<compile_context>
chip_gen: v7x
topology: tpu7x:2x2x1
jax: 0.10.0
libtpu: 0.0.40
codegen_flags: <defaults>
</compile_context>

<pallas_src>
import functools
import math

import jax
import jax.numpy as jnp
from jax.experimental import pallas as pl
from jax.experimental.pallas import tpu as pltpu


# ----------------------------------------------------------------------------
# Separable bilinear (align_corners=True) resize helpers.
# ----------------------------------------------------------------------------
def _resize_matrix_1d(out_size, in_size):
    """(out_size, in_size) 1-D bilinear resize operator, align_corners=True."""
    idx = jnp.arange(out_size, dtype=jnp.float32)
    if out_size > 1:
        src = idx * float(in_size - 1) / float(out_size - 1)
    else:
        src = jnp.zeros_like(idx)
    lo = jnp.clip(jnp.floor(src).astype(jnp.int32), 0, in_size - 1)
    hi = jnp.clip(lo + 1, 0, in_size - 1)
    frac = src - lo.astype(jnp.float32)
    rows = jnp.arange(out_size)
    R = jnp.zeros((out_size, in_size), jnp.float32)
    R = R.at[rows, lo].add(1.0 - frac)
    R = R.at[rows, hi].add(frac)
    return R


def _resize_taps(out_size, in_size):
    """Static per-output-row 2-tap (lo, hi, w_lo, w_hi), align_corners=True."""
    taps = []
    for i in range(out_size):
        src = (i * (in_size - 1) / (out_size - 1)) if out_size > 1 else 0.0
        lo = min(max(int(math.floor(src)), 0), in_size - 1)
        hi = min(lo + 1, in_size - 1)
        frac = float(src - lo)
        taps.append((lo, hi, 1.0 - frac, frac))
    return tuple(taps)


def _pick_tile(hw):
    """Largest dst-column tile <= 512 that divides HW."""
    if hw <= 512:
        return hw
    for t in (512, 448, 384, 320, 256, 192, 128):
        if hw % t == 0:
            return t
    for t in range(512, 0, -1):
        if hw % t == 0:
            return t
    return hw


# ----------------------------------------------------------------------------
# Deterministic parameter init (synthetic; mirrors the module's shapes).
# ----------------------------------------------------------------------------
def init_params(key, channel1):
    C = channel1
    ks = jax.random.split(key, 6)
    eps = 1e-5
    bn_scale = jnp.full((1, C), 1.0 / math.sqrt(1.0 + eps), jnp.float32)
    bn_shift = jnp.zeros((1, C), jnp.float32)
    return dict(
        # delta_gen1: 1x1 conv (2C->C, no bias), BN (folded), 3x3 conv (C->2)
        w1_1=jax.random.normal(ks[0], (2 * C, C), jnp.float32) * 0.1,
        bn1_scale=bn_scale, bn1_shift=bn_shift,
        w3_1=jax.random.normal(ks[1], (9, C, 2), jnp.float32) * 0.1,
        # delta_gen2
        w1_2=jax.random.normal(ks[2], (2 * C, C), jnp.float32) * 0.1,
        bn2_scale=bn_scale, bn2_shift=bn_shift,
        w3_2=jax.random.normal(ks[3], (9, C, 2), jnp.float32) * 0.1,
        # gamma (nn.Parameter(torch.ones(1)))
        gamma=jnp.ones((1, 1), jnp.float32),
        # out: 3x3 conv (C->1) with bias
        wout=jax.random.normal(ks[4], (9, C, 1), jnp.float32) * 0.1,
        bout=jax.random.normal(ks[5], (1, 1), jnp.float32) * 0.1,
    )


# ----------------------------------------------------------------------------
# The fused Pallas kernel (one batch element per grid step).
# ----------------------------------------------------------------------------
def _smm_kernel(H, W, C, w2, win, TILE, taps_hi, taps_in,
                low_ref, high_ref, inmap_ref, posc_ref, rwh_ref, rwi_ref,
                w1_ref, bsh_ref, w3_ref, wout_ref, gamma_ref, bout_ref,
                f_ref, out_ref,
                hiup_ref, gate_ref):
    f32 = jnp.float32
    HW = H * W

    low = low_ref[0]                       # (C, HW)
    high = high_ref[0]                     # (C, h2*w2)
    imap = inmap_ref[0]                    # (1, hin*win)
    gamma = gamma_ref[0, 0]                # SMEM scalar
    rwh = rwh_ref[...]                     # (w2, W)
    rwi = rwi_ref[...]                     # (win, W)

    # ---- separable bilinear resizes (align_corners=True): 2-tap height blend
    # ---- + tiny width matmul per output row; also builds the gating map.
    for y in range(H):
        lo, hi_, a0, a1 = taps_hi[y]
        src = a0 * high[:, lo * w2:(lo + 1) * w2]
        if a1 != 0.0:
            src = src + a1 * high[:, hi_ * w2:(hi_ + 1) * w2]
        hiup_ref[:, y * W:(y + 1) * W] = jnp.dot(
            src, rwh, preferred_element_type=f32)                 # (C, W)

        lo2, hi2, b0, b1 = taps_in[y]
        srci = b0 * imap[:, lo2 * win:(lo2 + 1) * win]
        if b1 != 0.0:
            srci = srci + b1 * imap[:, hi2 * win:(hi2 + 1) * win]
        up = jnp.dot(srci, rwi, preferred_element_type=f32)       # (1, W)
        # gate = 1 + gamma * sigmoid(up)   (f = hs * gate)
        gate_ref[:, y * W:(y + 1) * W] = 1.0 + gamma * jax.nn.sigmoid(up)

    hi_up = hiup_ref[...]                  # (C, HW)

    # ---- merged 1x1 convs (BN scale folded into weights in the wrapper) ----
    chcat = jnp.concatenate([low, hi_up], axis=0)                 # (2C, HW)
    t12 = jnp.dot(w1_ref[...], chcat, preferred_element_type=f32) + bsh_ref[...]

    # ---- 3x3 convs: 9 lane rolls + border masks fused into one im2col matmul.
    mxn = posc_ref[2:3, :]
    mxp = posc_ref[3:4, :]
    myn = posc_ref[4:5, :]
    myp = posc_ref[5:6, :]

    def tap_mask(dy, dx):
        m = None
        if dy == -1:
            m = myn
        elif dy == 1:
            m = myp
        if dx == -1:
            m = mxn if m is None else m * mxn
        elif dx == 1:
            m = mxp if m is None else m * mxp
        return m

    def im2col(x):
        cols = []
        for k in range(9):
            dy, dx = k // 3 - 1, k % 3 - 1
            s = dy * W + dx
            if s == 0:
                cols.append(x)                                    # center tap
            else:
                tap = pltpu.roll(x, (-s) % HW, 1)                 # [:,p]=x[:,p+s]
                cols.append(tap * tap_mask(dy, dx))               # zero OOB wrap
        return jnp.concatenate(cols, axis=0)                      # (9*rows, HW)

    # merged branch convs: block-diagonal (4, 18C) weight; rows 0,1 = delta1,
    # rows 2,3 = delta2.
    delta12 = jnp.dot(w3_ref[...], im2col(t12), preferred_element_type=f32)

    # ---- grid_sample (bilinear, padding_mode='zeros', align_corners=False),
    # ---- tiled over destination columns; bf16 operands, f32 accumulation.
    src_cat = jnp.concatenate([hi_up, low], axis=1).astype(jnp.bfloat16)  # (C, 2HW)
    inv_w = 1.0 / float(W)
    inv_h = 1.0 / float(H)
    q = jax.lax.broadcasted_iota(jnp.int32, (HW, TILE), 0)        # src linear idx

    for t in range(HW // TILE):
        ts = t * TILE
        gxb = posc_ref[0:1, ts:ts + TILE]                         # (1, TILE)
        gyb = posc_ref[1:2, ts:ts + TILE]

        def bilinear_wmat(dx_off, dy_off):
            gx = gxb + dx_off * inv_w
            gy = gyb + dy_off * inv_h
            ix = ((gx + 1.0) * float(W) - 1.0) * 0.5
            iy = ((gy + 1.0) * float(H) - 1.0) * 0.5
            x0f = jnp.floor(ix)
            y0f = jnp.floor(iy)
            wx = ix - x0f
            wy = iy - y0f
            x0 = x0f.astype(jnp.int32)
            y0 = y0f.astype(jnp.int32)
            x1 = x0 + 1
            y1 = y0 + 1

            def corner(xi, yi, wgt):
                valid = (xi >= 0) & (xi < W) & (yi >= 0) & (yi < H)
                lin = jnp.where(valid, yi * W + xi, -1)           # OOB -> -1
                return jnp.where(q == lin, wgt, 0.0)              # (HW, TILE)

            wm = corner(x0, y0, (1.0 - wx) * (1.0 - wy))
            wm = wm + corner(x1, y0, wx * (1.0 - wy))
            wm = wm + corner(x0, y1, (1.0 - wx) * wy)
            wm = wm + corner(x1, y1, wx * wy)
            return wm.astype(jnp.bfloat16)      # one bulk cast (v5e-friendly)

        w_hi = bilinear_wmat(delta12[0:1, ts:ts + TILE], delta12[1:2, ts:ts + TILE])
        w_lo = bilinear_wmat(delta12[2:3, ts:ts + TILE], delta12[3:4, ts:ts + TILE])
        wcat = jnp.concatenate([w_hi, w_lo], axis=0)              # (2HW, TILE)
        hs_t = jnp.dot(src_cat, wcat, preferred_element_type=f32)  # (C, TILE)
        # f = hs * (1 + gamma * input_map)
        f_ref[0, :, ts:ts + TILE] = hs_t * gate_ref[:, ts:ts + TILE]

    # ---- output 3x3 conv (1 channel, with bias) ----
    out_ref[0] = (jnp.dot(wout_ref[...], im2col(f_ref[0]),
                          preferred_element_type=f32) + bout_ref[0, 0])


# ----------------------------------------------------------------------------
# Wrapper: NCHW in/out, builds small constants, calls Pallas.
# ----------------------------------------------------------------------------
def saliency_mining_forward(low_stage, high_stage, in_map, params):
    N, C, H, W = low_stage.shape
    h2, w2 = int(high_stage.shape[2]), int(high_stage.shape[3])
    hin, win = int(in_map.shape[2]), int(in_map.shape[3])
    HW = H * W
    TILE = _pick_tile(HW)

    # NCHW -> (N, C, H*W): channels-first, reshape-only.
    low_flat = low_stage.reshape(N, C, HW).astype(jnp.float32)
    high_flat = high_stage.reshape(N, C, h2 * w2).astype(jnp.float32)
    inmap_flat = in_map.reshape(N, 1, hin * win).astype(jnp.float32)

    # separable resize pieces (KB-scale)
    rwh = _resize_matrix_1d(W, w2).T          # (w2, W)
    rwi = _resize_matrix_1d(W, win).T         # (win, W)
    taps_hi = _resize_taps(H, h2)
    taps_in = _resize_taps(H, hin)

    # packed lane-dense per-position constants:
    #   rows = [gx_base, gy_base, x>=1, x<=W-2, y>=1, y<=H-2]
    gx = jnp.tile(jnp.linspace(-1.0, 1.0, W, dtype=jnp.float32)[None, :],
                  (H, 1)).reshape(1, HW)
    gy = jnp.tile(jnp.linspace(-1.0, 1.0, H, dtype=jnp.float32)[:, None],
                  (1, W)).reshape(1, HW)
    xs = jnp.tile(jnp.arange(W, dtype=jnp.int32)[None, :], (H, 1)).reshape(1, HW)
    ys = jnp.tile(jnp.arange(H, dtype=jnp.int32)[:, None], (1, W)).reshape(1, HW)
    posc = jnp.concatenate(
        [gx, gy,
         (xs >= 1).astype(jnp.float32), (xs <= W - 2).astype(jnp.float32),
         (ys >= 1).astype(jnp.float32), (ys <= H - 2).astype(jnp.float32)],
        axis=0)                                # (6, HW)

    p = params
    s1 = p["bn1_scale"].reshape(C, 1)
    b1 = p["bn1_shift"].reshape(C, 1)
    s2 = p["bn2_scale"].reshape(C, 1)
    b2 = p["bn2_shift"].reshape(C, 1)
    # merged 1x1 conv weights (BN scale folded in; exact inference-mode fold)
    w1cat = jnp.concatenate([p["w1_1"].T * s1, p["w1_2"].T * s2], axis=0)   # (2C, 2C)
    bshift = jnp.concatenate([b1, b2], axis=0)                              # (2C, 1)
    # merged 3x3 conv weights in block-diagonal im2col layout: (4, 18C)
    zeros9 = jnp.zeros_like(p["w3_1"])
    w3cat = jnp.concatenate(
        [jnp.concatenate([p["w3_1"], zeros9], axis=1),
         jnp.concatenate([zeros9, p["w3_2"]], axis=1)], axis=2)             # (9, 2C, 4)
    w3cat = w3cat.reshape(9 * 2 * C, 4).T                                    # (4, 18C)
    wout = p["wout"].reshape(9 * C, 1).T                                     # (1, 9C)
    gamma = p["gamma"].reshape(1, 1).astype(jnp.float32)
    bout = p["bout"].reshape(1, 1).astype(jnp.float32)

    inputs = (low_flat, high_flat, inmap_flat, posc, rwh, rwi,
              w1cat, bshift, w3cat, wout, gamma, bout)

    def batch_spec(c, n_flat):
        return pl.BlockSpec((1, c, n_flat), lambda b: (b, 0, 0))

    def const_spec(a):
        # constants are now KB-scale, so default double-buffering is harmless
        return pl.BlockSpec(a.shape, lambda b: (0,) * a.ndim)

    smem_spec = pl.BlockSpec(memory_space=pltpu.MemorySpace.SMEM)

    in_specs = [
        batch_spec(C, HW),
        batch_spec(C, h2 * w2),
        batch_spec(1, hin * win),
        const_spec(posc), const_spec(rwh), const_spec(rwi),
        const_spec(w1cat), const_spec(bshift), const_spec(w3cat), const_spec(wout),
        smem_spec, smem_spec,
    ]
    out_specs = [batch_spec(C, HW), batch_spec(1, HW)]
    out_shape = (jax.ShapeDtypeStruct((N, C, HW), jnp.float32),
                 jax.ShapeDtypeStruct((N, 1, HW), jnp.float32))

    kernel = functools.partial(_smm_kernel, H, W, C, w2, win, TILE,
                               taps_hi, taps_in)

    # Scoped-VMEM budget sized to the tiled working set (+40% headroom),
    # clamped to [32 MiB, 64 MiB] so it is valid on v5e/v6e/v7x.
    est = (4 * HW * (8 * C + 2 * C + 16 + 2 * C + 36 * C + 9 * C + 4 * C)
           + HW * TILE * (2 * 4 + 2 * 2 + 4) + (4 << 20))
    vmem_limit = int(min(64 * 1024 * 1024, max(32 * 1024 * 1024, int(est * 1.4))))

    flops = N * (2 * C * (2 * HW) * HW          # grid_sample MXU
                 + 10 * HW * HW                 # corner one-hot build (VALU)
                 + 2 * (2 * C) * (2 * C) * HW   # merged 1x1
                 + 2 * 4 * (18 * C) * HW        # merged 3x3
                 + 2 * 9 * C * HW               # out conv
                 + 32 * C * HW)                 # resizes / elementwise
    bytes_accessed = int(4 * (low_flat.size + high_flat.size + inmap_flat.size
                              + N * C * HW + N * HW)
                         + 4 * (posc.size + w1cat.size + w3cat.size + wout.size))
    cost = pl.CostEstimate(flops=int(flops), transcendentals=int(N * HW),
                           bytes_accessed=bytes_accessed)

    f_flat, out_flat = pl.pallas_call(
        kernel,
        out_shape=out_shape,
        grid_spec=pltpu.PrefetchScalarGridSpec(
            num_scalar_prefetch=0,
            grid=(N,),
            in_specs=in_specs,
            out_specs=out_specs,
            scratch_shapes=[pltpu.VMEM((C, HW), jnp.float32),   # hi_up
                            pltpu.VMEM((1, HW), jnp.float32)],  # gate
        ),
        compiler_params=pltpu.CompilerParams(
            dimension_semantics=("parallel",),    # batch axis independent
            vmem_limit_bytes=vmem_limit),
        cost_estimate=cost,
    )(*inputs)

    f_feature = f_flat.reshape(N, C, H, W)
    out = out_flat.reshape(N, 1, H, W)
    return f_feature, out


if __name__ == "__main__":
    N, C, H, W = 2, 8, 16, 16   # channel1 == channel2 == C (required by forward)
    key = jax.random.PRNGKey(0)
    k1, k2, k3, k4 = jax.random.split(key, 4)
    low_stage = jax.random.normal(k1, (N, C, H, W), jnp.float32)
    high_stage = jax.random.normal(k2, (N, C, H // 2, W // 2), jnp.float32)
    in_map = jax.random.normal(k3, (N, 1, H // 2, W // 2), jnp.float32)

    params = init_params(k4, C)

    f_feature, out = saliency_mining_forward(low_stage, high_stage, in_map, params)
    jax.block_until_ready((f_feature, out))

    assert f_feature.shape == (N, C, H, W)
    assert out.shape == (N, 1, H, W)
    assert bool(jnp.all(jnp.isfinite(f_feature))) and bool(jnp.all(jnp.isfinite(out)))
    print("KERNEL_OK")
</pallas_src>

<mosaic_0001>
module attributes {stable_mosaic.version = 11 : i64} {
  func.func @_smm_kernel(%arg0: i32, %arg1: memref<1x8x256xf32, #tpu.memory_space<vmem>>, %arg2: memref<1x8x64xf32, #tpu.memory_space<vmem>>, %arg3: memref<1x1x64xf32, #tpu.memory_space<vmem>>, %arg4: memref<6x256xf32, #tpu.memory_space<vmem>>, %arg5: memref<8x16xf32, #tpu.memory_space<vmem>>, %arg6: memref<8x16xf32, #tpu.memory_space<vmem>>, %arg7: memref<16x16xf32, #tpu.memory_space<vmem>>, %arg8: memref<16x1xf32, #tpu.memory_space<vmem>>, %arg9: memref<4x144xf32, #tpu.memory_space<vmem>>, %arg10: memref<1x72xf32, #tpu.memory_space<vmem>>, %arg11: memref<1x1xf32, #tpu.memory_space<smem>>, %arg12: memref<1x1xf32, #tpu.memory_space<smem>>, %arg13: memref<1x8x256xf32, #tpu.memory_space<vmem>>, %arg14: memref<1x1x256xf32, #tpu.memory_space<vmem>>, %arg15: memref<8x256xf32, #tpu.memory_space<vmem>>, %arg16: memref<1x256xf32, #tpu.memory_space<vmem>>) attributes {dimension_semantics = [#tpu.dimension_semantics<parallel>], iteration_bounds = array<i64: 2>, scalar_prefetch = 0 : i64, scratch_operands = 2 : i64, tpu.core_type = #tpu.core_type<tc>, window_params = [{transform_indices = @transform_0, window_bounds = array<i64: 1, 8, 256>}, {transform_indices = @transform_1, window_bounds = array<i64: 1, 8, 64>}, {transform_indices = @transform_2, window_bounds = array<i64: 1, 1, 64>}, {pipeline_mode = #tpu.pipeline_mode<synchronous>, transform_indices = @transform_3, window_bounds = array<i64: 6, 256>}, {pipeline_mode = #tpu.pipeline_mode<synchronous>, transform_indices = @transform_4, window_bounds = array<i64: 8, 16>}, {pipeline_mode = #tpu.pipeline_mode<synchronous>, transform_indices = @transform_5, window_bounds = array<i64: 8, 16>}, {pipeline_mode = #tpu.pipeline_mode<synchronous>, transform_indices = @transform_6, window_bounds = array<i64: 16, 16>}, {pipeline_mode = #tpu.pipeline_mode<synchronous>, transform_indices = @transform_7, window_bounds = array<i64: 16, 1>}, {pipeline_mode = #tpu.pipeline_mode<synchronous>, transform_indices = @transform_8, window_bounds = array<i64: 4, 144>}, {pipeline_mode = #tpu.pipeline_mode<synchronous>, transform_indices = @transform_9, window_bounds = array<i64: 1, 72>}, {transform_indices = @transform_10, window_bounds = array<i64: 1, 1>}, {transform_indices = @transform_11, window_bounds = array<i64: 1, 1>}, {transform_indices = @transform_12, window_bounds = array<i64: 1, 8, 256>}, {transform_indices = @transform_13, window_bounds = array<i64: 1, 1, 256>}]} {
    %c0 = arith.constant 0 : index
    %c0_0 = arith.constant 0 : index
    %c0_1 = arith.constant 0 : index
    %0 = vector.load %arg1[%c0, %c0_0, %c0_1] : memref<1x8x256xf32, #tpu.memory_space<vmem>>, vector<1x8x256xf32>
    %1 = vector.shape_cast %0 : vector<1x8x256xf32> to vector<8x256xf32>
    %c0_2 = arith.constant 0 : index
    %c0_3 = arith.constant 0 : index
    %c0_4 = arith.constant 0 : index
    %2 = vector.load %arg2[%c0_2, %c0_3, %c0_4] : memref<1x8x64xf32, #tpu.memory_space<vmem>>, vector<1x8x64xf32>
    %3 = vector.shape_cast %2 : vector<1x8x64xf32> to vector<8x64xf32>
    %c0_5 = arith.constant 0 : index
    %c0_6 = arith.constant 0 : index
    %c0_7 = arith.constant 0 : index
    %4 = vector.load %arg3[%c0_5, %c0_6, %c0_7] : memref<1x1x64xf32, #tpu.memory_space<vmem>>, vector<1x1x64xf32>
    %5 = vector.shape_cast %4 : vector<1x1x64xf32> to vector<1x64xf32>
    %c0_8 = arith.constant 0 : index
    %c0_9 = arith.constant 0 : index
    %6 = memref.load %arg11[%c0_8, %c0_9] : memref<1x1xf32, #tpu.memory_space<smem>>
    %c0_10 = arith.constant 0 : index
    %c0_11 = arith.constant 0 : index
    %7 = vector.load %arg5[%c0_10, %c0_11] : memref<8x16xf32, #tpu.memory_space<vmem>>, vector<8x16xf32>
    %c0_12 = arith.constant 0 : index
    %c0_13 = arith.constant 0 : index
    %8 = vector.load %arg6[%c0_12, %c0_13] : memref<8x16xf32, #tpu.memory_space<vmem>>, vector<8x16xf32>
    %9 = vector.extract_strided_slice %3 {offsets = [0, 0], sizes = [8, 8], strides = [1, 1]} : vector<8x64xf32> to vector<8x8xf32>
    %cst = arith.constant 1.000000e+00 : f32
    %10 = vector.broadcast %cst : f32 to vector<8x8xf32>
    %11 = arith.mulf %10, %9 : vector<8x8xf32>
    %cst_14 = arith.constant dense<0.000000e+00> : vector<8x16xf32>
    %12 = tpu.matmul %11, %7, %cst_14 {dimension_numbers = #tpu.dot_dimension_numbers<[1], [0], [0], [1], [0, 0, 1, 1], [], []>} : vector<8x8xf32>, vector<8x16xf32>, vector<8x16xf32> -> vector<8x16xf32>
    %c0_15 = arith.constant 0 : index
    %c0_16 = arith.constant 0 : index
    %13 = vector.load %arg15[%c0_15, %c0_16] : memref<8x256xf32, #tpu.memory_space<vmem>>, vector<8x16xf32>
    tpu.vector_store %arg15[%c0_15, %c0_16], %12 {strides = array<i32>} : memref<8x256xf32, #tpu.memory_space<vmem>>, vector<8x16xf32>,
    %14 = vector.extract_strided_slice %5 {offsets = [0, 0], sizes = [1, 8], strides = [1, 1]} : vector<1x64xf32> to vector<1x8xf32>
    %cst_17 = arith.constant 1.000000e+00 : f32
    %15 = vector.broadcast %cst_17 : f32 to vector<1x8xf32>
    %16 = arith.mulf %15, %14 : vector<1x8xf32>
    %cst_18 = arith.constant dense<0.000000e+00> : vector<1x16xf32>
    %17 = tpu.matmul %16, %8, %cst_18 {dimension_numbers = #tpu.dot_dimension_numbers<[1], [0], [0], [1], [0, 0, 1, 1], [], []>} : vector<1x8xf32>, vector<8x16xf32>, vector<1x16xf32> -> vector<1x16xf32>
    %18 = arith.negf %17 : vector<1x16xf32>
    %19 = math.exp %18 : vector<1x16xf32>
    %cst_19 = arith.constant 1.000000e+00 : f32
    %20 = vector.broadcast %cst_19 : f32 to vector<1x16xf32>
    %21 = arith.addf %20, %19 : vector<1x16xf32>
    %22 = arith.divf %20, %21 : vector<1x16xf32>
    %23 = vector.broadcast %6 : f32 to vector<1x16xf32>
    %24 = arith.mulf %23, %22 : vector<1x16xf32>
    %cst_20 = arith.constant 1.000000e+00 : f32
    %25 = vector.broadcast %cst_20 : f32 to vector<1x16xf32>
    %26 = arith.addf %25, %24 : vector<1x16xf32>
    %c0_21 = arith.constant 0 : index
    %c0_22 = arith.constant 0 : index
    %27 = vector.load %arg16[%c0_21, %c0_22] : memref<1x256xf32, #tpu.memory_space<vmem>>, vector<1x16xf32>
    tpu.vector_store %arg16[%c0_21, %c0_22], %26 {strides = array<i32>} : memref<1x256xf32, #tpu.memory_space<vmem>>, vector<1x16xf32>,
    %28 = vector.extract_strided_slice %3 {offsets = [0, 0], sizes = [8, 8], strides = [1, 1]} : vector<8x64xf32> to vector<8x8xf32>
    %cst_23 = arith.constant 0.533333361 : f32
    %29 = vector.broadcast %cst_23 : f32 to vector<8x8xf32>
    %30 = arith.mulf %29, %28 : vector<8x8xf32>
    %31 = vector.extract_strided_slice %3 {offsets = [0, 8], sizes = [8, 8], strides = [1, 1]} : vector<8x64xf32> to vector<8x8xf32>
    %cst_24 = arith.constant 0.466666669 : f32
    %32 = vector.broadcast %cst_24 : f32 to vector<8x8xf32>
    %33 = arith.mulf %32, %31 : vector<8x8xf32>
    %34 = arith.addf %30, %33 : vector<8x8xf32>
    %cst_25 = arith.constant dense<0.000000e+00> : vector<8x16xf32>
    %35 = tpu.matmul %34, %7, %cst_25 {dimension_numbers = #tpu.dot_dimension_numbers<[1], [0], [0], [1], [0, 0, 1, 1], [], []>} : vector<8x8xf32>, vector<8x16xf32>, vector<8x16xf32> -> vector<8x16xf32>
    %c0_26 = arith.constant 0 : index
    %c16 = arith.constant 16 : index
    %36 = vector.load %arg15[%c0_26, %c16] : memref<8x256xf32, #tpu.memory_space<vmem>>, vector<8x16xf32>
    tpu.vector_store %arg15[%c0_26, %c16], %35 {strides = array<i32>} : memref<8x256xf32, #tpu.memory_space<vmem>>, vector<8x16xf32>,
    %37 = vector.extract_strided_slice %5 {offsets = [0, 0], sizes = [1, 8], strides = [1, 1]} : vector<1x64xf32> to vector<1x8xf32>
    %cst_27 = arith.constant 0.533333361 : f32
    %38 = vector.broadcast %cst_27 : f32 to vector<1x8xf32>
    %39 = arith.mulf %38, %37 : vector<1x8xf32>
    %40 = vector.extract_strided_slice %5 {offsets = [0, 8], sizes = [1, 8], strides = [1, 1]} : vector<1x64xf32> to vector<1x8xf32>
    %cst_28 = arith.constant 0.466666669 : f32
    %41 = vector.broadcast %cst_28 : f32 to vector<1x8xf32>
    %42 = arith.mulf %41, %40 : vector<1x8xf32>
    %43 = arith.addf %39, %42 : vector<1x8xf32>
    %cst_29 = arith.constant dense<0.000000e+00> : vector<1x16xf32>
    %44 = tpu.matmul %43, %8, %cst_29 {dimension_numbers = #tpu.dot_dimension_numbers<[1], [0], [0], [1], [0, 0, 1, 1], [], []>} : vector<1x8xf32>, vector<8x16xf32>, vector<1x16xf32> -> vector<1x16xf32>
    %45 = arith.negf %44 : vector<1x16xf32>
    %46 = math.exp %45 : vector<1x16xf32>
    %cst_30 = arith.constant 1.000000e+00 : f32
    %47 = vector.broadcast %cst_30 : f32 to vector<1x16xf32>
    %48 = arith.addf %47, %46 : vector<1x16xf32>
    %49 = arith.divf %47, %48 : vector<1x16xf32>
    %50 = vector.broadcast %6 : f32 to vector<1x16xf32>
    %51 = arith.mulf %50, %49 : vector<1x16xf32>
    %cst_31 = arith.constant 1.000000e+00 : f32
    %52 = vector.broadcast %cst_31 : f32 to vector<1x16xf32>
    %53 = arith.addf %52, %51 : vector<1x16xf32>
    %c0_32 = arith.constant 0 : index
    %c16_33 = arith.constant 16 : index
    %54 = vector.load %arg16[%c0_32, %c16_33] : memref<1x256xf32, #tpu.memory_space<vmem>>, vector<1x16xf32>
    tpu.vector_store %arg16[%c0_32, %c16_33], %53 {strides = array<i32>} : memref<1x256xf32, #tpu.memory_space<vmem>>, vector<1x16xf32>,
    %55 = vector.extract_strided_slice %3 {offsets = [0, 0], sizes = [8, 8], strides = [1, 1]} : vector<8x64xf32> to vector<8x8xf32>
    %cst_34 = arith.constant 0.0666666701 : f32
    %56 = vector.broadcast %cst_34 : f32 to vector<8x8xf32>
    %57 = arith.mulf %56, %55 : vector<8x8xf32>
    %58 = vector.extract_strided_slice %3 {offsets = [0, 8], sizes = [8, 8], strides = [1, 1]} : vector<8x64xf32> to vector<8x8xf32>
    %cst_35 = arith.constant 0.933333337 : f32
    %59 = vector.broadcast %cst_35 : f32 to vector<8x8xf32>
    %60 = arith.mulf %59, %58 : vector<8x8xf32>
    %61 = arith.addf %57, %60 : vector<8x8xf32>
    %cst_36 = arith.constant dense<0.000000e+00> : vector<8x16xf32>
    %62 = tpu.matmul %61, %7, %cst_36 {dimension_numbers = #tpu.dot_dimension_numbers<[1], [0], [0], [1], [0, 0, 1, 1], [], []>} : vector<8x8xf32>, vector<8x16xf32>, vector<8x16xf32> -> vector<8x16xf32>
    %c0_37 = arith.constant 0 : index
    %c32 = arith.constant 32 : index
    %63 = vector.load %arg15[%c0_37, %c32] : memref<8x256xf32, #tpu.memory_space<vmem>>, vector<8x16xf32>
    tpu.vector_store %arg15[%c0_37, %c32], %62 {strides = array<i32>} : memref<8x256xf32, #tpu.memory_space<vmem>>, vector<8x16xf32>,
    %64 = vector.extract_strided_slice %5 {offsets = [0, 0], sizes = [1, 8], strides = [1, 1]} : vector<1x64xf32> to vector<1x8xf32>
    %cst_38 = arith.constant 0.0666666701 : f32
    %65 = vector.broadcast %cst_38 : f32 to vector<1x8xf32>
    %66 = arith.mulf %65, %64 : vector<1x8xf32>
    %67 = vector.extract_strided_slice %5 {offsets = [0, 8], sizes = [1, 8], strides = [1, 1]} : vector<1x64xf32> to vector<1x8xf32>
    %cst_39 = arith.constant 0.933333337 : f32
    %68 = vector.broadcast %cst_39 : f32 to vector<1x8xf32>
    %69 = arith.mulf %68, %67 : vector<1x8xf32>
    %70 = arith.addf %66, %69 : vector<1x8xf32>
    %cst_40 = arith.constant dense<0.000000e+00> : vector<1x16xf32>
    %71 = tpu.matmul %70, %8, %cst_40 {dimension_numbers = #tpu.dot_dimension_numbers<[1], [0], [0], [1], [0, 0, 1, 1], [], []>} : vector<1x8xf32>, vector<8x16xf32>, vector<1x16xf32> -> vector<1x16xf32>
    %72 = arith.negf %71 : vector<1x16xf32>
    %73 = math.exp %72 : vector<1x16xf32>
    %cst_41 = arith.constant 1.000000e+00 : f32
    %74 = vector.broadcast %cst_41 : f32 to vector<1x16xf32>
    %75 = arith.addf %74, %73 : vector<1x16xf32>
    %76 = arith.divf %74, %75 : vector<1x16xf32>
    %77 = vector.broadcast %6 : f32 to vector<1x16xf32>
    %78 = arith.mulf %77, %76 : vector<1x16xf32>
    %cst_42 = arith.constant 1.000000e+00 : f32
    %79 = vector.broadcast %cst_42 : f32 to vector<1x16xf32>
    %80 = arith.addf %79, %78 : vector<1x16xf32>
    %c0_43 = arith.constant 0 : index
    %c32_44 = arith.constant 32 : index
    %81 = vector.load %arg16[%c0_43, %c32_44] : memref<1x256xf32, #tpu.memory_space<vmem>>, vector<1x16xf32>
    tpu.vector_store %arg16[%c0_43, %c32_44], %80 {strides = array<i32>} : memref<1x256xf32, #tpu.memory_space<vmem>>, vector<1x16xf32>,
    %82 = vector.extract_strided_slice %3 {offsets = [0, 8], sizes = [8, 8], strides = [1, 1]} : vector<8x64xf32> to vector<8x8xf32>
    %cst_45 = arith.constant 6.000000e-01 : f32
    %83 = vector.broadcast %cst_45 : f32 to vector<8x8xf32>
    %84 = arith.mulf %83, %82 : vector<8x8xf32>
    %85 = vector.extract_strided_slice %3 {offsets = [0, 16], sizes = [8, 8], strides = [1, 1]} : vector<8x64xf32> to vector<8x8xf32>
    %cst_46 = arith.constant 4.000000e-01 : f32
    %86 = vector.broadcast %cst_46 : f32 to vector<8x8xf32>
    %87 = arith.mulf %86, %85 : vector<8x8xf32>
    %88 = arith.addf %84, %87 : vector<8x8xf32>
    %cst_47 = arith.constant dense<0.000000e+00> : vector<8x16xf32>
    %89 = tpu.matmul %88, %7, %cst_47 {dimension_numbers = #tpu.dot_dimension_numbers<[1], [0], [0], [1], [0, 0, 1, 1], [], []>} : vector<8x8xf32>, vector<8x16xf32>, vector<8x16xf32> -> vector<8x16xf32>
    %c0_48 = arith.constant 0 : index
    %c48 = arith.constant 48 : index
    %90 = vector.load %arg15[%c0_48, %c48] : memref<8x256xf32, #tpu.memory_space<vmem>>, vector<8x16xf32>
    tpu.vector_store %arg15[%c0_48, %c48], %89 {strides = array<i32>} : memref<8x256xf32, #tpu.memory_space<vmem>>, vector<8x16xf32>,
    %91 = vector.extract_strided_slice %5 {offsets = [0, 8], sizes = [1, 8], strides = [1, 1]} : vector<1x64xf32> to vector<1x8xf32>
    %cst_49 = arith.constant 6.000000e-01 : f32
    %92 = vector.broadcast %cst_49 : f32 to vector<1x8xf32>
    %93 = arith.mulf %92, %91 : vector<1x8xf32>
    %94 = vector.extract_strided_slice %5 {offsets = [0, 16], sizes = [1, 8], strides = [1, 1]} : vector<1x64xf32> to vector<1x8xf32>
    %cst_50 = arith.constant 4.000000e-01 : f32
    %95 = vector.broadcast %cst_50 : f32 to vector<1x8xf32>
    %96 = arith.mulf %95, %94 : vector<1x8xf32>
    %97 = arith.addf %93, %96 : vector<1x8xf32>
    %cst_51 = arith.constant dense<0.000000e+00> : vector<1x16xf32>
    %98 = tpu.matmul %97, %8, %cst_51 {dimension_numbers = #tpu.dot_dimension_numbers<[1], [0], [0], [1], [0, 0, 1, 1], [], []>} : vector<1x8xf32>, vector<8x16xf32>, vector<1x16xf32> -> vector<1x16xf32>
    %99 = arith.negf %98 : vector<1x16xf32>
    %100 = math.exp %99 : vector<1x16xf32>
    %cst_52 = arith.constant 1.000000e+00 : f32
    %101 = vector.broadcast %cst_52 : f32 to vector<1x16xf32>
    %102 = arith.addf %101, %100 : vector<1x16xf32>
    %103 = arith.divf %101, %102 : vector<1x16xf32>
    %104 = vector.broadcast %6 : f32 to vector<1x16xf32>
    %105 = arith.mulf %104, %103 : vector<1x16xf32>
    %cst_53 = arith.constant 1.000000e+00 : f32
    %106 = vector.broadcast %cst_53 : f32 to vector<1x16xf32>
    %107 = arith.addf %106, %105 : vector<1x16xf32>
    %c0_54 = arith.constant 0 : index
    %c48_55 = arith.constant 48 : index
    %108 = vector.load %arg16[%c0_54, %c48_55] : memref<1x256xf32, #tpu.memory_space<vmem>>, vector<1x16xf32>
    tpu.vector_store %arg16[%c0_54, %c48_55], %107 {strides = array<i32>} : memref<1x256xf32, #tpu.memory_space<vmem>>, vector<1x16xf32>,
    %109 = vector.extract_strided_slice %3 {offsets = [0, 8], sizes = [8, 8], strides = [1, 1]} : vector<8x64xf32> to vector<8x8xf32>
    %cst_56 = arith.constant 0.13333334 : f32
    %110 = vector.broadcast %cst_56 : f32 to vector<8x8xf32>
    %111 = arith.mulf %110, %109 : vector<8x8xf32>
    %112 = vector.extract_strided_slice %3 {offsets = [0, 16], sizes = [8, 8], strides = [1, 1]} : vector<8x64xf32> to vector<8x8xf32>
    %cst_57 = arith.constant 0.866666674 : f32
    %113 = vector.broadcast %cst_57 : f32 to vector<8x8xf32>
    %114 = arith.mulf %113, %112 : vector<8x8xf32>
    %115 = arith.addf %111, %114 : vector<8x8xf32>
    %cst_58 = arith.constant dense<0.000000e+00> : vector<8x16xf32>
    %116 = tpu.matmul %115, %7, %cst_58 {dimension_numbers = #tpu.dot_dimension_numbers<[1], [0], [0], [1], [0, 0, 1, 1], [], []>} : vector<8x8xf32>, vector<8x16xf32>, vector<8x16xf32> -> vector<8x16xf32>
    %c0_59 = arith.constant 0 : index
    %c64 = arith.constant 64 : index
    %117 = vector.load %arg15[%c0_59, %c64] : memref<8x256xf32, #tpu.memory_space<vmem>>, vector<8x16xf32>
    tpu.vector_store %arg15[%c0_59, %c64], %116 {strides = array<i32>} : memref<8x256xf32, #tpu.memory_space<vmem>>, vector<8x16xf32>,
    %118 = vector.extract_strided_slice %5 {offsets = [0, 8], sizes = [1, 8], strides = [1, 1]} : vector<1x64xf32> to vector<1x8xf32>
    %cst_60 = arith.constant 0.13333334 : f32
    %119 = vector.broadcast %cst_60 : f32 to vector<1x8xf32>
    %120 = arith.mulf %119, %118 : vector<1x8xf32>
    %121 = vector.extract_strided_slice %5 {offsets = [0, 16], sizes = [1, 8], strides = [1, 1]} : vector<1x64xf32> to vector<1x8xf32>
    %cst_61 = arith.constant 0.866666674 : f32
    %122 = vector.broadcast %cst_61 : f32 to vector<1x8xf32>
    %123 = arith.mulf %122, %121 : vector<1x8xf32>
    %124 = arith.addf %120, %123 : vector<1x8xf32>
    %cst_62 = arith.constant dense<0.000000e+00> : vector<1x16xf32>
    %125 = tpu.matmul %124, %8, %cst_62 {dimension_numbers = #tpu.dot_dimension_numbers<[1], [0], [0], [1], [0, 0, 1, 1], [], []>} : vector<1x8xf32>, vector<8x16xf32>, vector<1x16xf32> -> vector<1x16xf32>
    %126 = arith.negf %125 : vector<1x16xf32>
    %127 = math.exp %126 : vector<1x16xf32>
    %cst_63 = arith.constant 1.000000e+00 : f32
    %128 = vector.broadcast %cst_63 : f32 to vector<1x16xf32>
    %129 = arith.addf %128, %127 : vector<1x16xf32>
    %130 = arith.divf %128, %129 : vector<1x16xf32>
    %131 = vector.broadcast %6 : f32 to vector<1x16xf32>
    %132 = arith.mulf %131, %130 : vector<1x16xf32>
    %cst_64 = arith.constant 1.000000e+00 : f32
    %133 = vector.broadcast %cst_64 : f32 to vector<1x16xf32>
    %134 = arith.addf %133, %132 : vector<1x16xf32>
    %c0_65 = arith.constant 0 : index
    %c64_66 = arith.constant 64 : index
    %135 = vector.load %arg16[%c0_65, %c64_66] : memref<1x256xf32, #tpu.memory_space<vmem>>, vector<1x16xf32>
    tpu.vector_store %arg16[%c0_65, %c64_66], %134 {strides = array<i32>} : memref<1x256xf32, #tpu.memory_space<vmem>>, vector<1x16xf32>,
    %136 = vector.extract_strided_slice %3 {offsets = [0, 16], sizes = [8, 8], strides = [1, 1]} : vector<8x64xf32> to vector<8x8xf32>
    %cst_67 = arith.constant 0.666666686 : f32
    %137 = vector.broadcast %cst_67 : f32 to vector<8x8xf32>
    %138 = arith.mulf %137, %136 : vector<8x8xf32>
    %139 = vector.extract_strided_slice %3 {offsets = [0, 24], sizes = [8, 8], strides = [1, 1]} : vector<8x64xf32> to vector<8x8xf32>
    %cst_68 = arith.constant 0.333333343 : f32
    %140 = vector.broadcast %cst_68 : f32 to vector<8x8xf32>
    %141 = arith.mulf %140, %139 : vector<8x8xf32>
    %142 = arith.addf %138, %141 : vector<8x8xf32>
    %cst_69 = arith.constant dense<0.000000e+00> : vector<8x16xf32>
    %143 = tpu.matmul %142, %7, %cst_69 {dimension_numbers = #tpu.dot_dimension_numbers<[1], [0], [0], [1], [0, 0, 1, 1], [], []>} : vector<8x8xf32>, vector<8x16xf32>, vector<8x16xf32> -> vector<8x16xf32>
    %c0_70 = arith.constant 0 : index
    %c80 = arith.constant 80 : index
    %144 = vector.load %arg15[%c0_70, %c80] : memref<8x256xf32, #tpu.memory_space<vmem>>, vector<8x16xf32>
    tpu.vector_store %arg15[%c0_70, %c80], %143 {strides = array<i32>} : memref<8x256xf32, #tpu.memory_space<vmem>>, vector<8x16xf32>,
    %145 = vector.extract_strided_slice %5 {offsets = [0, 16], sizes = [1, 8], strides = [1, 1]} : vector<1x64xf32> to vector<1x8xf32>
    %cst_71 = arith.constant 0.666666686 : f32
    %146 = vector.broadcast %cst_71 : f32 to vector<1x8xf32>
    %147 = arith.mulf %146, %145 : vector<1x8xf32>
    %148 = vector.extract_strided_slice %5 {offsets = [0, 24], sizes = [1, 8], strides = [1, 1]} : vector<1x64xf32> to vector<1x8xf32>
    %cst_72 = arith.constant 0.333333343 : f32
    %149 = vector.broadcast %cst_72 : f32 to vector<1x8xf32>
    %150 = arith.mulf %149, %148 : vector<1x8xf32>
    %151 = arith.addf %147, %150 : vector<1x8xf32>
    %cst_73 = arith.constant dense<0.000000e+00> : vector<1x16xf32>
    %152 = tpu.matmul %151, %8, %cst_73 {dimension_numbers = #tpu.dot_dimension_numbers<[1], [0], [0], [1], [0, 0, 1, 1], [], []>} : vector<1x8xf32>, vector<8x16xf32>, vector<1x16xf32> -> vector<1x16xf32>
    %153 = arith.negf %152 : vector<1x16xf32>
    %154 = math.exp %153 : vector<1x16xf32>
    %cst_74 = arith.constant 1.000000e+00 : f32
    %155 = vector.broadcast %cst_74 : f32 to vector<1x16xf32>
    %156 = arith.addf %155, %154 : vector<1x16xf32>
    %157 = arith.divf %155, %156 : vector<1x16xf32>
    %158 = vector.broadcast %6 : f32 to vector<1x16xf32>
    %159 = arith.mulf %158, %157 : vector<1x16xf32>
    %cst_75 = arith.constant 1.000000e+00 : f32
    %160 = vector.broadcast %cst_75 : f32 to vector<1x16xf32>
    %161 = arith.addf %160, %159 : vector<1x16xf32>
    %c0_76 = arith.constant 0 : index
    %c80_77 = arith.constant 80 : index
    %162 = vector.load %arg16[%c0_76, %c80_77] : memref<1x256xf32, #tpu.memory_space<vmem>>, vector<1x16xf32>
    tpu.vector_store %arg16[%c0_76, %c80_77], %161 {strides = array<i32>} : memref<1x256xf32, #tpu.memory_space<vmem>>, vector<1x16xf32>,
    %163 = vector.extract_strided_slice %3 {offsets = [0, 16], sizes = [8, 8], strides = [1, 1]} : vector<8x64xf32> to vector<8x8xf32>
    %cst_78 = arith.constant 2.000000e-01 : f32
    %164 = vector.broadcast %cst_78 : f32 to vector<8x8xf32>
    %165 = arith.mulf %164, %163 : vector<8x8xf32>
    %166 = vector.extract_strided_slice %3 {offsets = [0, 24], sizes = [8, 8], strides = [1, 1]} : vector<8x64xf32> to vector<8x8xf32>
    %cst_79 = arith.constant 8.000000e-01 : f32
    %167 = vector.broadcast %cst_79 : f32 to vector<8x8xf32>
    %168 = arith.mulf %167, %166 : vector<8x8xf32>
    %169 = arith.addf %165, %168 : vector<8x8xf32>
    %cst_80 = arith.constant dense<0.000000e+00> : vector<8x16xf32>
    %170 = tpu.matmul %169, %7, %cst_80 {dimension_numbers = #tpu.dot_dimension_numbers<[1], [0], [0], [1], [0, 0, 1, 1], [], []>} : vector<8x8xf32>, vector<8x16xf32>, vector<8x16xf32> -> vector<8x16xf32>
    %c0_81 = arith.constant 0 : index
    %c96 = arith.constant 96 : index
    %171 = vector.load %arg15[%c0_81, %c96] : memref<8x256xf32, #tpu.memory_space<vmem>>, vector<8x16xf32>
    tpu.vector_store %arg15[%c0_81, %c96], %170 {strides = array<i32>} : memref<8x256xf32, #tpu.memory_space<vmem>>, vector<8x16xf32>,
    %172 = vector.extract_strided_slice %5 {offsets = [0, 16], sizes = [1, 8], strides = [1, 1]} : vector<1x64xf32> to vector<1x8xf32>
    %cst_82 = arith.constant 2.000000e-01 : f32
    %173 = vector.broadcast %cst_82 : f32 to vector<1x8xf32>
    %174 = arith.mulf %173, %172 : vector<1x8xf32>
    %175 = vector.extract_strided_slice %5 {offsets = [0, 24], sizes = [1, 8], strides = [1, 1]} : vector<1x64xf32> to vector<1x8xf32>
    %cst_83 = arith.constant 8.000000e-01 : f32
    %176 = vector.broadcast %cst_83 : f32 to vector<1x8xf32>
    %177 = arith.mulf %176, %175 : vector<1x8xf32>
    %178 = arith.addf %174, %177 : vector<1x8xf32>
    %cst_84 = arith.constant dense<0.000000e+00> : vector<1x16xf32>
    %179 = tpu.matmul %178, %8, %cst_84 {dimension_numbers = #tpu.dot_dimension_numbers<[1], [0], [0], [1], [0, 0, 1, 1], [], []>} : vector<1x8xf32>, vector<8x16xf32>, vector<1x16xf32> -> vector<1x16xf32>
    %180 = arith.negf %179 : vector<1x16xf32>
    %181 = math.exp %180 : vector<1x16xf32>
    %cst_85 = arith.constant 1.000000e+00 : f32
    %182 = vector.broadcast %cst_85 : f32 to vector<1x16xf32>
    %183 = arith.addf %182, %181 : vector<1x16xf32>
    %184 = arith.divf %182, %183 : vector<1x16xf32>
    %185 = vector.broadcast %6 : f32 to vector<1x16xf32>
    %186 = arith.mulf %185, %184 : vector<1x16xf32>
    %cst_86 = arith.constant 1.000000e+00 : f32
    %187 = vector.broadcast %cst_86 : f32 to vector<1x16xf32>
    %188 = arith.addf %187, %186 : vector<1x16xf32>
    %c0_87 = arith.constant 0 : index
    %c96_88 = arith.constant 96 : index
    %189 = vector.load %arg16[%c0_87, %c96_88] : memref<1x256xf32, #tpu.memory_space<vmem>>, vector<1x16xf32>
    tpu.vector_store %arg16[%c0_87, %c96_88], %188 {strides = array<i32>} : memref<1x256xf32, #tpu.memory_space<vmem>>, vector<1x16xf32>,
    %190 = vector.extract_strided_slice %3 {offsets = [0, 24], sizes = [8, 8], strides = [1, 1]} : vector<8x64xf32> to vector<8x8xf32>
    %cst_89 = arith.constant 0.733333349 : f32
    %191 = vector.broadcast %cst_89 : f32 to vector<8x8xf32>
    %192 = arith.mulf %191, %190 : vector<8x8xf32>
    %193 = vector.extract_strided_slice %3 {offsets = [0, 32], sizes = [8, 8], strides = [1, 1]} : vector<8x64xf32> to vector<8x8xf32>
    %cst_90 = arith.constant 0.266666681 : f32
    %194 = vector.broadcast %cst_90 : f32 to vector<8x8xf32>
    %195 = arith.mulf %194, %193 : vector<8x8xf32>
    %196 = arith.addf %192, %195 : vector<8x8xf32>
    %cst_91 = arith.constant dense<0.000000e+00> : vector<8x16xf32>
    %197 = tpu.matmul %196, %7, %cst_91 {dimension_numbers = #tpu.dot_dimension_numbers<[1], [0], [0], [1], [0, 0, 1, 1], [], []>} : vector<8x8xf32>, vector<8x16xf32>, vector<8x16xf32> -> vector<8x16xf32>
    %c0_92 = arith.constant 0 : index
    %c112 = arith.constant 112 : index
    %198 = vector.load %arg15[%c0_92, %c112] : memref<8x256xf32, #tpu.memory_space<vmem>>, vector<8x16xf32>
    tpu.vector_store %arg15[%c0_92, %c112], %197 {strides = array<i32>} : memref<8x256xf32, #tpu.memory_space<vmem>>, vector<8x16xf32>,
    %199 = vector.extract_strided_slice %5 {offsets = [0, 24], sizes = [1, 8], strides = [1, 1]} : vector<1x64xf32> to vector<1x8xf32>
    %cst_93 = arith.constant 0.733333349 : f32
    %200 = vector.broadcast %cst_93 : f32 to vector<1x8xf32>
    %201 = arith.mulf %200, %199 : vector<1x8xf32>
    %202 = vector.extract_strided_slice %5 {offsets = [0, 32], sizes = [1, 8], strides = [1, 1]} : vector<1x64xf32> to vector<1x8xf32>
    %cst_94 = arith.constant 0.266666681 : f32
    %203 = vector.broadcast %cst_94 : f32 to vector<1x8xf32>
    %204 = arith.mulf %203, %202 : vector<1x8xf32>
    %205 = arith.addf %201, %204 : vector<1x8xf32>
    %cst_95 = arith.constant dense<0.000000e+00> : vector<1x16xf32>
    %206 = tpu.matmul %205, %8, %cst_95 {dimension_numbers = #tpu.dot_dimension_numbers<[1], [0], [0], [1], [0, 0, 1, 1], [], []>} : vector<1x8xf32>, vector<8x16xf32>, vector<1x16xf32> -> vector<1x16xf32>
    %207 = arith.negf %206 : vector<1x16xf32>
    %208 = math.exp %207 : vector<1x16xf32>
    %cst_96 = arith.constant 1.000000e+00 : f32
    %209 = vector.broadcast %cst_96 : f32 to vector<1x16xf32>
    %210 = arith.addf %209, %208 : vector<1x16xf32>
    %211 = arith.divf %209, %210 : vector<1x16xf32>
    %212 = vector.broadcast %6 : f32 to vector<1x16xf32>
    %213 = arith.mulf %212, %211 : vector<1x16xf32>
    %cst_97 = arith.constant 1.000000e+00 : f32
    %214 = vector.broadcast %cst_97 : f32 to vector<1x16xf32>
    %215 = arith.addf %214, %213 : vector<1x16xf32>
    %c0_98 = arith.constant 0 : index
    %c112_99 = arith.constant 112 : index
    %216 = vector.load %arg16[%c0_98, %c112_99] : memref<1x256xf32, #tpu.memory_space<vmem>>, vector<1x16xf32>
    tpu.vector_store %arg16[%c0_98, %c112_99], %215 {strides = array<i32>} : memref<1x256xf32, #tpu.memory_space<vmem>>, vector<1x16xf32>,
    %217 = vector.extract_strided_slice %3 {offsets = [0, 24], sizes = [8, 8], strides = [1, 1]} : vector<8x64xf32> to vector<8x8xf32>
    %cst_100 = arith.constant 0.266666681 : f32
    %218 = vector.broadcast %cst_100 : f32 to vector<8x8xf32>
    %219 = arith.mulf %218, %217 : vector<8x8xf32>
    %220 = vector.extract_strided_slice %3 {offsets = [0, 32], sizes = [8, 8], strides = [1, 1]} : vector<8x64xf32> to vector<8x8xf32>
    %cst_101 = arith.constant 0.733333349 : f32
    %221 = vector.broadcast %cst_101 : f32 to vector<8x8xf32>
    %222 = arith.mulf %221, %220 : vector<8x8xf32>
    %223 = arith.addf %219, %222 : vector<8x8xf32>
    %cst_102 = arith.constant dense<0.000000e+00> : vector<8x16xf32>
    %224 = tpu.matmul %223, %7, %cst_102 {dimension_numbers = #tpu.dot_dimension_numbers<[1], [0], [0], [1], [0, 0, 1, 1], [], []>} : vector<8x8xf32>, vector<8x16xf32>, vector<8x16xf32> -> vector<8x16xf32>
    %c0_103 = arith.constant 0 : index
    %c128 = arith.constant 128 : index
    %225 = vector.load %arg15[%c0_103, %c128] : memref<8x256xf32, #tpu.memory_space<vmem>>, vector<8x16xf32>
    tpu.vector_store %arg15[%c0_103, %c128], %224 {strides = array<i32>} : memref<8x256xf32, #tpu.memory_space<vmem>>, vector<8x16xf32>,
    %226 = vector.extract_strided_slice %5 {offsets = [0, 24], sizes = [1, 8], strides = [1, 1]} : vector<1x64xf32> to vector<1x8xf32>
    %cst_104 = arith.constant 0.266666681 : f32
    %227 = vector.broadcast %cst_104 : f32 to vector<1x8xf32>
    %228 = arith.mulf %227, %226 : vector<1x8xf32>
    %229 = vector.extract_strided_slice %5 {offsets = [0, 32], sizes = [1, 8], strides = [1, 1]} : vector<1x64xf32> to vector<1x8xf32>
    %cst_105 = arith.constant 0.733333349 : f32
    %230 = vector.broadcast %cst_105 : f32 to vector<1x8xf32>
    %231 = arith.mulf %230, %229 : vector<1x8xf32>
    %232 = arith.addf %228, %231 : vector<1x8xf32>
    %cst_106 = arith.constant dense<0.000000e+00> : vector<1x16xf32>
    %233 = tpu.matmul %232, %8, %cst_106 {dimension_numbers = #tpu.dot_dimension_numbers<[1], [0], [0], [1], [0, 0, 1, 1], [], []>} : vector<1x8xf32>, vector<8x16xf32>, vector<1x16xf32> -> vector<1x16xf32>
    %234 = arith.negf %233 : vector<1x16xf32>
    %235 = math.exp %234 : vector<1x16xf32>
    %cst_107 = arith.constant 1.000000e+00 : f32
    %236 = vector.broadcast %cst_107 : f32 to vector<1x16xf32>
    %237 = arith.addf %236, %235 : vector<1x16xf32>
    %238 = arith.divf %236, %237 : vector<1x16xf32>
    %239 = vector.broadcast %6 : f32 to vector<1x16xf32>
    %240 = arith.mulf %239, %238 : vector<1x16xf32>
    %cst_108 = arith.constant 1.000000e+00 : f32
    %241 = vector.broadcast %cst_108 : f32 to vector<1x16xf32>
    %242 = arith.addf %241, %240 : vector<1x16xf32>
    %c0_109 = arith.constant 0 : index
    %c128_110 = arith.constant 128 : index
    %243 = vector.load %arg16[%c0_109, %c128_110] : memref<1x256xf32, #tpu.memory_space<vmem>>, vector<1x16xf32>
    tpu.vector_store %arg16[%c0_109, %c128_110], %242 {strides = array<i32>} : memref<1x256xf32, #tpu.memory_space<vmem>>, vector<1x16xf32>,
    %244 = vector.extract_strided_slice %3 {offsets = [0, 32], sizes = [8, 8], strides = [1, 1]} : vector<8x64xf32> to vector<8x8xf32>
    %cst_111 = arith.constant 8.000000e-01 : f32
    %245 = vector.broadcast %cst_111 : f32 to vector<8x8xf32>
    %246 = arith.mulf %245, %244 : vector<8x8xf32>
    %247 = vector.extract_strided_slice %3 {offsets = [0, 40], sizes = [8, 8], strides = [1, 1]} : vector<8x64xf32> to vector<8x8xf32>
    %cst_112 = arith.constant 2.000000e-01 : f32
    %248 = vector.broadcast %cst_112 : f32 to vector<8x8xf32>
    %249 = arith.mulf %248, %247 : vector<8x8xf32>
    %250 = arith.addf %246, %249 : vector<8x8xf32>
    %cst_113 = arith.constant dense<0.000000e+00> : vector<8x16xf32>
    %251 = tpu.matmul %250, %7, %cst_113 {dimension_numbers = #tpu.dot_dimension_numbers<[1], [0], [0], [1], [0, 0, 1, 1], [], []>} : vector<8x8xf32>, vector<8x16xf32>, vector<8x16xf32> -> vector<8x16xf32>
    %c0_114 = arith.constant 0 : index
    %c144 = arith.constant 144 : index
    %252 = vector.load %arg15[%c0_114, %c144] : memref<8x256xf32, #tpu.memory_space<vmem>>, vector<8x16xf32>
    tpu.vector_store %arg15[%c0_114, %c144], %251 {strides = array<i32>} : memref<8x256xf32, #tpu.memory_space<vmem>>, vector<8x16xf32>,
    %253 = vector.extract_strided_slice %5 {offsets = [0, 32], sizes = [1, 8], strides = [1, 1]} : vector<1x64xf32> to vector<1x8xf32>
    %cst_115 = arith.constant 8.000000e-01 : f32
    %254 = vector.broadcast %cst_115 : f32 to vector<1x8xf32>
    %255 = arith.mulf %254, %253 : vector<1x8xf32>
    %256 = vector.extract_strided_slice %5 {offsets = [0, 40], sizes = [1, 8], strides = [1, 1]} : vector<1x64xf32> to vector<1x8xf32>
    %cst_116 = arith.constant 2.000000e-01 : f32
    %257 = vector.broadcast %cst_116 : f32 to vector<1x8xf32>
    %258 = arith.mulf %257, %256 : vector<1x8xf32>
    %259 = arith.addf %255, %258 : vector<1x8xf32>
    %cst_117 = arith.constant dense<0.000000e+00> : vector<1x16xf32>
    %260 = tpu.matmul %259, %8, %cst_117 {dimension_numbers = #tpu.dot_dimension_numbers<[1], [0], [0], [1], [0, 0, 1, 1], [], []>} : vector<1x8xf32>, vector<8x16xf32>, vector<1x16xf32> -> vector<1x16xf32>
    %261 = arith.negf %260 : vector<1x16xf32>
    %262 = math.exp %261 : vector<1x16xf32>
    %cst_118 = arith.constant 1.000000e+00 : f32
    %263 = vector.broadcast %cst_118 : f32 to vector<1x16xf32>
    %264 = arith.addf %263, %262 : vector<1x16xf32>
    %265 = arith.divf %263, %264 : vector<1x16xf32>
    %266 = vector.broadcast %6 : f32 to vector<1x16xf32>
    %267 = arith.mulf %266, %265 : vector<1x16xf32>
    %cst_119 = arith.constant 1.000000e+00 : f32
    %268 = vector.broadcast %cst_119 : f32 to vector<1x16xf32>
    %269 = arith.addf %268, %267 : vector<1x16xf32>
    %c0_120 = arith.constant 0 : index
    %c144_121 = arith.constant 144 : index
    %270 = vector.load %arg16[%c0_120, %c144_121] : memref<1x256xf32, #tpu.memory_space<vmem>>, vector<1x16xf32>
    tpu.vector_store %arg16[%c0_120, %c144_121], %269 {strides = array<i32>} : memref<1x256xf32, #tpu.memory_space<vmem>>, vector<1x16xf32>,
    %271 = vector.extract_strided_slice %3 {offsets = [0, 32], sizes = [8, 8], strides = [1, 1]} : vector<8x64xf32> to vector<8x8xf32>
    %cst_122 = arith.constant 0.333333343 : f32
    %272 = vector.broadcast %cst_122 : f32 to vector<8x8xf32>
    %273 = arith.mulf %272, %271 : vector<8x8xf32>
    %274 = vector.extract_strided_slice %3 {offsets = [0, 40], sizes = [8, 8], strides = [1, 1]} : vector<8x64xf32> to vector<8x8xf32>
    %cst_123 = arith.constant 0.666666686 : f32
    %275 = vector.broadcast %cst_123 : f32 to vector<8x8xf32>
    %276 = arith.mulf %275, %274 : vector<8x8xf32>
    %277 = arith.addf %273, %276 : vector<8x8xf32>
    %cst_124 = arith.constant dense<0.000000e+00> : vector<8x16xf32>
    %278 = tpu.matmul %277, %7, %cst_124 {dimension_numbers = #tpu.dot_dimension_numbers<[1], [0], [0], [1], [0, 0, 1, 1], [], []>} : vector<8x8xf32>, vector<8x16xf32>, vector<8x16xf32> -> vector<8x16xf32>
    %c0_125 = arith.constant 0 : index
    %c160 = arith.constant 160 : index
    %279 = vector.load %arg15[%c0_125, %c160] : memref<8x256xf32, #tpu.memory_space<vmem>>, vector<8x16xf32>
    tpu.vector_store %arg15[%c0_125, %c160], %278 {strides = array<i32>} : memref<8x256xf32, #tpu.memory_space<vmem>>, vector<8x16xf32>,
    %280 = vector.extract_strided_slice %5 {offsets = [0, 32], sizes = [1, 8], strides = [1, 1]} : vector<1x64xf32> to vector<1x8xf32>
    %cst_126 = arith.constant 0.333333343 : f32
    %281 = vector.broadcast %cst_126 : f32 to vector<1x8xf32>
    %282 = arith.mulf %281, %280 : vector<1x8xf32>
    %283 = vector.extract_strided_slice %5 {offsets = [0, 40], sizes = [1, 8], strides = [1, 1]} : vector<1x64xf32> to vector<1x8xf32>
    %cst_127 = arith.constant 0.666666686 : f32
    %284 = vector.broadcast %cst_127 : f32 to vector<1x8xf32>
    %285 = arith.mulf %284, %283 : vector<1x8xf32>
    %286 = arith.addf %282, %285 : vector<1x8xf32>
    %cst_128 = arith.constant dense<0.000000e+00> : vector<1x16xf32>
    %287 = tpu.matmul %286, %8, %cst_128 {dimension_numbers = #tpu.dot_dimension_numbers<[1], [0], [0], [1], [0, 0, 1, 1], [], []>} : vector<1x8xf32>, vector<8x16xf32>, vector<1x16xf32> -> vector<1x16xf32>
    %288 = arith.negf %287 : vector<1x16xf32>
    %289 = math.exp %288 : vector<1x16xf32>
    %cst_129 = arith.constant 1.000000e+00 : f32
    %290 = vector.broadcast %cst_129 : f32 to vector<1x16xf32>
    %291 = arith.addf %290, %289 : vector<1x16xf32>
    %292 = arith.divf %290, %291 : vector<1x16xf32>
    %293 = vector.broadcast %6 : f32 to vector<1x16xf32>
    %294 = arith.mulf %293, %292 : vector<1x16xf32>
    %cst_130 = arith.constant 1.000000e+00 : f32
    %295 = vector.broadcast %cst_130 : f32 to vector<1x16xf32>
    %296 = arith.addf %295, %294 : vector<1x16xf32>
    %c0_131 = arith.constant 0 : index
    %c160_132 = arith.constant 160 : index
    %297 = vector.load %arg16[%c0_131, %c160_132] : memref<1x256xf32, #tpu.memory_space<vmem>>, vector<1x16xf32>
    tpu.vector_store %arg16[%c0_131, %c160_132], %296 {strides = array<i32>} : memref<1x256xf32, #tpu.memory_space<vmem>>, vector<1x16xf32>,
    %298 = vector.extract_strided_slice %3 {offsets = [0, 40], sizes = [8, 8], strides = [1, 1]} : vector<8x64xf32> to vector<8x8xf32>
    %cst_133 = arith.constant 0.866666674 : f32
    %299 = vector.broadcast %cst_133 : f32 to vector<8x8xf32>
    %300 = arith.mulf %299, %298 : vector<8x8xf32>
    %301 = vector.extract_strided_slice %3 {offsets = [0, 48], sizes = [8, 8], strides = [1, 1]} : vector<8x64xf32> to vector<8x8xf32>
    %cst_134 = arith.constant 0.13333334 : f32
    %302 = vector.broadcast %cst_134 : f32 to vector<8x8xf32>
    %303 = arith.mulf %302, %301 : vector<8x8xf32>
    %304 = arith.addf %300, %303 : vector<8x8xf32>
    %cst_135 = arith.constant dense<0.000000e+00> : vector<8x16xf32>
    %305 = tpu.matmul %304, %7, %cst_135 {dimension_numbers = #tpu.dot_dimension_numbers<[1], [0], [0], [1], [0, 0, 1, 1], [], []>} : vector<8x8xf32>, vector<8x16xf32>, vector<8x16xf32> -> vector<8x16xf32>
    %c0_136 = arith.constant 0 : index
    %c176 = arith.constant 176 : index
    %306 = vector.load %arg15[%c0_136, %c176] : memref<8x256xf32, #tpu.memory_space<vmem>>, vector<8x16xf32>
    tpu.vector_store %arg15[%c0_136, %c176], %305 {strides = array<i32>} : memref<8x256xf32, #tpu.memory_space<vmem>>, vector<8x16xf32>,
    %307 = vector.extract_strided_slice %5 {offsets = [0, 40], sizes = [1, 8], strides = [1, 1]} : vector<1x64xf32> to vector<1x8xf32>
    %cst_137 = arith.constant 0.866666674 : f32
    %308 = vector.broadcast %cst_137 : f32 to vector<1x8xf32>
    %309 = arith.mulf %308, %307 : vector<1x8xf32>
    %310 = vector.extract_strided_slice %5 {offsets = [0, 48], sizes = [1, 8], strides = [1, 1]} : vector<1x64xf32> to vector<1x8xf32>
    %cst_138 = arith.constant 0.13333334 : f32
    %311 = vector.broadcast %cst_138 : f32 to vector<1x8xf32>
    %312 = arith.mulf %311, %310 : vector<1x8xf32>
    %313 = arith.addf %309, %312 : vector<1x8xf32>
    %cst_139 = arith.constant dense<0.000000e+00> : vector<1x16xf32>
    %314 = tpu.matmul %313, %8, %cst_139 {dimension_numbers = #tpu.dot_dimension_numbers<[1], [0], [0], [1], [0, 0, 1, 1], [], []>} : vector<1x8xf32>, vector<8x16xf32>, vector<1x16xf32> -> vector<1x16xf32>
    %315 = arith.negf %314 : vector<1x16xf32>
    %316 = math.exp %315 : vector<1x16xf32>
    %cst_140 = arith.constant 1.000000e+00 : f32
    %317 = vector.broadcast %cst_140 : f32 to vector<1x16xf32>
    %318 = arith.addf %317, %316 : vector<1x16xf32>
    %319 = arith.divf %317, %318 : vector<1x16xf32>
    %320 = vector.broadcast %6 : f32 to vector<1x16xf32>
    %321 = arith.mulf %320, %319 : vector<1x16xf32>
    %cst_141 = arith.constant 1.000000e+00 : f32
    %322 = vector.broadcast %cst_141 : f32 to vector<1x16xf32>
    %323 = arith.addf %322, %321 : vector<1x16xf32>
    %c0_142 = arith.constant 0 : index
    %c176_143 = arith.constant 176 : index
    %324 = vector.load %arg16[%c0_142, %c176_143] : memref<1x256xf32, #tpu.memory_space<vmem>>, vector<1x16xf32>
    tpu.vector_store %arg16[%c0_142, %c176_143], %323 {strides = array<i32>} : memref<1x256xf32, #tpu.memory_space<vmem>>, vector<1x16xf32>,
    %325 = vector.extract_strided_slice %3 {offsets = [0, 40], sizes = [8, 8], strides = [1, 1]} : vector<8x64xf32> to vector<8x8xf32>
    %cst_144 = arith.constant 4.000000e-01 : f32
    %326 = vector.broadcast %cst_144 : f32 to vector<8x8xf32>
    %327 = arith.mulf %326, %325 : vector<8x8xf32>
    %328 = vector.extract_strided_slice %3 {offsets = [0, 48], sizes = [8, 8], strides = [1, 1]} : vector<8x64xf32> to vector<8x8xf32>
    %cst_145 = arith.constant 6.000000e-01 : f32
    %329 = vector.broadcast %cst_145 : f32 to vector<8x8xf32>
    %330 = arith.mulf %329, %328 : vector<8x8xf32>
    %331 = arith.addf %327, %330 : vector<8x8xf32>
    %cst_146 = arith.constant dense<0.000000e+00> : vector<8x16xf32>
    %332 = tpu.matmul %331, %7, %cst_146 {dimension_numbers = #tpu.dot_dimension_numbers<[1], [0], [0], [1], [0, 0, 1, 1], [], []>} : vector<8x8xf32>, vector<8x16xf32>, vector<8x16xf32> -> vector<8x16xf32>
    %c0_147 = arith.constant 0 : index
    %c192 = arith.constant 192 : index
    %333 = vector.load %arg15[%c0_147, %c192] : memref<8x256xf32, #tpu.memory_space<vmem>>, vector<8x16xf32>
    tpu.vector_store %arg15[%c0_147, %c192], %332 {strides = array<i32>} : memref<8x256xf32, #tpu.memory_space<vmem>>, vector<8x16xf32>,
    %334 = vector.extract_strided_slice %5 {offsets = [0, 40], sizes = [1, 8], strides = [1, 1]} : vector<1x64xf32> to vector<1x8xf32>
    %cst_148 = arith.constant 4.000000e-01 : f32
    %335 = vector.broadcast %cst_148 : f32 to vector<1x8xf32>
    %336 = arith.mulf %335, %334 : vector<1x8xf32>
    %337 = vector.extract_strided_slice %5 {offsets = [0, 48], sizes = [1, 8], strides = [1, 1]} : vector<1x64xf32> to vector<1x8xf32>
    %cst_149 = arith.constant 6.000000e-01 : f32
    %338 = vector.broadcast %cst_149 : f32 to vector<1x8xf32>
    %339 = arith.mulf %338, %337 : vector<1x8xf32>
    %340 = arith.addf %336, %339 : vector<1x8xf32>
    %cst_150 = arith.constant dense<0.000000e+00> : vector<1x16xf32>
    %341 = tpu.matmul %340, %8, %cst_150 {dimension_numbers = #tpu.dot_dimension_numbers<[1], [0], [0], [1], [0, 0, 1, 1], [], []>} : vector<1x8xf32>, vector<8x16xf32>, vector<1x16xf32> -> vector<1x16xf32>
    %342 = arith.negf %341 : vector<1x16xf32>
    %343 = math.exp %342 : vector<1x16xf32>
    %cst_151 = arith.constant 1.000000e+00 : f32
    %344 = vector.broadcast %cst_151 : f32 to vector<1x16xf32>
    %345 = arith.addf %344, %343 : vector<1x16xf32>
    %346 = arith.divf %344, %345 : vector<1x16xf32>
    %347 = vector.broadcast %6 : f32 to vector<1x16xf32>
    %348 = arith.mulf %347, %346 : vector<1x16xf32>
    %cst_152 = arith.constant 1.000000e+00 : f32
    %349 = vector.broadcast %cst_152 : f32 to vector<1x16xf32>
    %350 = arith.addf %349, %348 : vector<1x16xf32>
    %c0_153 = arith.constant 0 : index
    %c192_154 = arith.constant 192 : index
    %351 = vector.load %arg16[%c0_153, %c192_154] : memref<1x256xf32, #tpu.memory_space<vmem>>, vector<1x16xf32>
    tpu.vector_store %arg16[%c0_153, %c192_154], %350 {strides = array<i32>} : memref<1x256xf32, #tpu.memory_space<vmem>>, vector<1x16xf32>,
    %352 = vector.extract_strided_slice %3 {offsets = [0, 48], sizes = [8, 8], strides = [1, 1]} : vector<8x64xf32> to vector<8x8xf32>
    %cst_155 = arith.constant 0.933333337 : f32
    %353 = vector.broadcast %cst_155 : f32 to vector<8x8xf32>
    %354 = arith.mulf %353, %352 : vector<8x8xf32>
    %355 = vector.extract_strided_slice %3 {offsets = [0, 56], sizes = [8, 8], strides = [1, 1]} : vector<8x64xf32> to vector<8x8xf32>
    %cst_156 = arith.constant 0.0666666701 : f32
    %356 = vector.broadcast %cst_156 : f32 to vector<8x8xf32>
    %357 = arith.mulf %356, %355 : vector<8x8xf32>
    %358 = arith.addf %354, %357 : vector<8x8xf32>
    %cst_157 = arith.constant dense<0.000000e+00> : vector<8x16xf32>
    %359 = tpu.matmul %358, %7, %cst_157 {dimension_numbers = #tpu.dot_dimension_numbers<[1], [0], [0], [1], [0, 0, 1, 1], [], []>} : vector<8x8xf32>, vector<8x16xf32>, vector<8x16xf32> -> vector<8x16xf32>
    %c0_158 = arith.constant 0 : index
    %c208 = arith.constant 208 : index
    %360 = vector.load %arg15[%c0_158, %c208] : memref<8x256xf32, #tpu.memory_space<vmem>>, vector<8x16xf32>
    tpu.vector_store %arg15[%c0_158, %c208], %359 {strides = array<i32>} : memref<8x256xf32, #tpu.memory_space<vmem>>, vector<8x16xf32>,
    %361 = vector.extract_strided_slice %5 {offsets = [0, 48], sizes = [1, 8], strides = [1, 1]} : vector<1x64xf32> to vector<1x8xf32>
    %cst_159 = arith.constant 0.933333337 : f32
    %362 = vector.broadcast %cst_159 : f32 to vector<1x8xf32>
    %363 = arith.mulf %362, %361 : vector<1x8xf32>
    %364 = vector.extract_strided_slice %5 {offsets = [0, 56], sizes = [1, 8], strides = [1, 1]} : vector<1x64xf32> to vector<1x8xf32>
    %cst_160 = arith.constant 0.0666666701 : f32
    %365 = vector.broadcast %cst_160 : f32 to vector<1x8xf32>
    %366 = arith.mulf %365, %364 : vector<1x8xf32>
    %367 = arith.addf %363, %366 : vector<1x8xf32>
    %cst_161 = arith.constant dense<0.000000e+00> : vector<1x16xf32>
    %368 = tpu.matmul %367, %8, %cst_161 {dimension_numbers = #tpu.dot_dimension_numbers<[1], [0], [0], [1], [0, 0, 1, 1], [], []>} : vector<1x8xf32>, vector<8x16xf32>, vector<1x16xf32> -> vector<1x16xf32>
    %369 = arith.negf %368 : vector<1x16xf32>
    %370 = math.exp %369 : vector<1x16xf32>
    %cst_162 = arith.constant 1.000000e+00 : f32
    %371 = vector.broadcast %cst_162 : f32 to vector<1x16xf32>
    %372 = arith.addf %371, %370 : vector<1x16xf32>
    %373 = arith.divf %371, %372 : vector<1x16xf32>
    %374 = vector.broadcast %6 : f32 to vector<1x16xf32>
    %375 = arith.mulf %374, %373 : vector<1x16xf32>
    %cst_163 = arith.constant 1.000000e+00 : f32
    %376 = vector.broadcast %cst_163 : f32 to vector<1x16xf32>
    %377 = arith.addf %376, %375 : vector<1x16xf32>
    %c0_164 = arith.constant 0 : index
    %c208_165 = arith.constant 208 : index
    %378 = vector.load %arg16[%c0_164, %c208_165] : memref<1x256xf32, #tpu.memory_space<vmem>>, vector<1x16xf32>
    tpu.vector_store %arg16[%c0_164, %c208_165], %377 {strides = array<i32>} : memref<1x256xf32, #tpu.memory_space<vmem>>, vector<1x16xf32>,
    %379 = vector.extract_strided_slice %3 {offsets = [0, 48], sizes = [8, 8], strides = [1, 1]} : vector<8x64xf32> to vector<8x8xf32>
    %cst_166 = arith.constant 0.466666669 : f32
    %380 = vector.broadcast %cst_166 : f32 to vector<8x8xf32>
    %381 = arith.mulf %380, %379 : vector<8x8xf32>
    %382 = vector.extract_strided_slice %3 {offsets = [0, 56], sizes = [8, 8], strides = [1, 1]} : vector<8x64xf32> to vector<8x8xf32>
    %cst_167 = arith.constant 0.533333361 : f32
    %383 = vector.broadcast %cst_167 : f32 to vector<8x8xf32>
    %384 = arith.mulf %383, %382 : vector<8x8xf32>
    %385 = arith.addf %381, %384 : vector<8x8xf32>
    %cst_168 = arith.constant dense<0.000000e+00> : vector<8x16xf32>
    %386 = tpu.matmul %385, %7, %cst_168 {dimension_numbers = #tpu.dot_dimension_numbers<[1], [0], [0], [1], [0, 0, 1, 1], [], []>} : vector<8x8xf32>, vector<8x16xf32>, vector<8x16xf32> -> vector<8x16xf32>
    %c0_169 = arith.constant 0 : index
    %c224 = arith.constant 224 : index
    %387 = vector.load %arg15[%c0_169, %c224] : memref<8x256xf32, #tpu.memory_space<vmem>>, vector<8x16xf32>
    tpu.vector_store %arg15[%c0_169, %c224], %386 {strides = array<i32>} : memref<8x256xf32, #tpu.memory_space<vmem>>, vector<8x16xf32>,
    %388 = vector.extract_strided_slice %5 {offsets = [0, 48], sizes = [1, 8], strides = [1, 1]} : vector<1x64xf32> to vector<1x8xf32>
    %cst_170 = arith.constant 0.466666669 : f32
    %389 = vector.broadcast %cst_170 : f32 to vector<1x8xf32>
    %390 = arith.mulf %389, %388 : vector<1x8xf32>
    %391 = vector.extract_strided_slice %5 {offsets = [0, 56], sizes = [1, 8], strides = [1, 1]} : vector<1x64xf32> to vector<1x8xf32>
    %cst_171 = arith.constant 0.533333361 : f32
    %392 = vector.broadcast %cst_171 : f32 to vector<1x8xf32>
    %393 = arith.mulf %392, %391 : vector<1x8xf32>
    %394 = arith.addf %390, %393 : vector<1x8xf32>
    %cst_172 = arith.constant dense<0.000000e+00> : vector<1x16xf32>
    %395 = tpu.matmul %394, %8, %cst_172 {dimension_numbers = #tpu.dot_dimension_numbers<[1], [0], [0], [1], [0, 0, 1, 1], [], []>} : vector<1x8xf32>, vector<8x16xf32>, vector<1x16xf32> -> vector<1x16xf32>
    %396 = arith.negf %395 : vector<1x16xf32>
    %397 = math.exp %396 : vector<1x16xf32>
    %cst_173 = arith.constant 1.000000e+00 : f32
    %398 = vector.broadcast %cst_173 : f32 to vector<1x16xf32>
    %399 = arith.addf %398, %397 : vector<1x16xf32>
    %400 = arith.divf %398, %399 : vector<1x16xf32>
    %401 = vector.broadcast %6 : f32 to vector<1x16xf32>
    %402 = arith.mulf %401, %400 : vector<1x16xf32>
    %cst_174 = arith.constant 1.000000e+00 : f32
    %403 = vector.broadcast %cst_174 : f32 to vector<1x16xf32>
    %404 = arith.addf %403, %402 : vector<1x16xf32>
    %c0_175 = arith.constant 0 : index
    %c224_176 = arith.constant 224 : index
    %405 = vector.load %arg16[%c0_175, %c224_176] : memref<1x256xf32, #tpu.memory_space<vmem>>, vector<1x16xf32>
    tpu.vector_store %arg16[%c0_175, %c224_176], %404 {strides = array<i32>} : memref<1x256xf32, #tpu.memory_space<vmem>>, vector<1x16xf32>,
    %406 = vector.extract_strided_slice %3 {offsets = [0, 56], sizes = [8, 8], strides = [1, 1]} : vector<8x64xf32> to vector<8x8xf32>
    %cst_177 = arith.constant 1.000000e+00 : f32
    %407 = vector.broadcast %cst_177 : f32 to vector<8x8xf32>
    %408 = arith.mulf %407, %406 : vector<8x8xf32>
    %cst_178 = arith.constant dense<0.000000e+00> : vector<8x16xf32>
    %409 = tpu.matmul %408, %7, %cst_178 {dimension_numbers = #tpu.dot_dimension_numbers<[1], [0], [0], [1], [0, 0, 1, 1], [], []>} : vector<8x8xf32>, vector<8x16xf32>, vector<8x16xf32> -> vector<8x16xf32>
    %c0_179 = arith.constant 0 : index
    %c240 = arith.constant 240 : index
    %410 = vector.load %arg15[%c0_179, %c240] : memref<8x256xf32, #tpu.memory_space<vmem>>, vector<8x16xf32>
    tpu.vector_store %arg15[%c0_179, %c240], %409 {strides = array<i32>} : memref<8x256xf32, #tpu.memory_space<vmem>>, vector<8x16xf32>,
    %411 = vector.extract_strided_slice %5 {offsets = [0, 56], sizes = [1, 8], strides = [1, 1]} : vector<1x64xf32> to vector<1x8xf32>
    %cst_180 = arith.constant 1.000000e+00 : f32
    %412 = vector.broadcast %cst_180 : f32 to vector<1x8xf32>
    %413 = arith.mulf %412, %411 : vector<1x8xf32>
    %cst_181 = arith.constant dense<0.000000e+00> : vector<1x16xf32>
    %414 = tpu.matmul %413, %8, %cst_181 {dimension_numbers = #tpu.dot_dimension_numbers<[1], [0], [0], [1], [0, 0, 1, 1], [], []>} : vector<1x8xf32>, vector<8x16xf32>, vector<1x16xf32> -> vector<1x16xf32>
    %415 = arith.negf %414 : vector<1x16xf32>
    %416 = math.exp %415 : vector<1x16xf32>
    %cst_182 = arith.constant 1.000000e+00 : f32
    %417 = vector.broadcast %cst_182 : f32 to vector<1x16xf32>
    %418 = arith.addf %417, %416 : vector<1x16xf32>
    %419 = arith.divf %417, %418 : vector<1x16xf32>
    %420 = vector.broadcast %6 : f32 to vector<1x16xf32>
    %421 = arith.mulf %420, %419 : vector<1x16xf32>
    %cst_183 = arith.constant 1.000000e+00 : f32
    %422 = vector.broadcast %cst_183 : f32 to vector<1x16xf32>
    %423 = arith.addf %422, %421 : vector<1x16xf32>
    %c0_184 = arith.constant 0 : index
    %c240_185 = arith.constant 240 : index
    %424 = vector.load %arg16[%c0_184, %c240_185] : memref<1x256xf32, #tpu.memory_space<vmem>>, vector<1x16xf32>
    tpu.vector_store %arg16[%c0_184, %c240_185], %423 {strides = array<i32>} : memref<1x256xf32, #tpu.memory_space<vmem>>, vector<1x16xf32>,
    %c0_186 = arith.constant 0 : index
    %c0_187 = arith.constant 0 : index
    %425 = vector.load %arg15[%c0_186, %c0_187] : memref<8x256xf32, #tpu.memory_space<vmem>>, vector<8x256xf32>
    %426 = tpu.concatenate %1, %425 in 0 : vector<8x256xf32>, vector<8x256xf32> -> vector<16x256xf32>
    %c0_188 = arith.constant 0 : index
    %c0_189 = arith.constant 0 : index
    %427 = vector.load %arg7[%c0_188, %c0_189] : memref<16x16xf32, #tpu.memory_space<vmem>>, vector<16x16xf32>
    %cst_190 = arith.constant dense<0.000000e+00> : vector<16x256xf32>
    %428 = tpu.matmul %427, %426, %cst_190 {dimension_numbers = #tpu.dot_dimension_numbers<[1], [0], [0], [1], [0, 0, 1, 1], [], []>} : vector<16x16xf32>, vector<16x256xf32>, vector<16x256xf32> -> vector<16x256xf32>
    %c0_191 = arith.constant 0 : index
    %c0_192 = arith.constant 0 : index
    %429 = vector.load %arg8[%c0_191, %c0_192] : memref<16x1xf32, #tpu.memory_space<vmem>>, vector<16x1xf32>
    %430 = vector.broadcast %429 : vector<16x1xf32> to vector<16x256xf32>
    %431 = arith.addf %428, %430 : vector<16x256xf32>
    %c2 = arith.constant 2 : index
    %c0_193 = arith.constant 0 : index
    %432 = vector.load %arg4[%c2, %c0_193] : memref<6x256xf32, #tpu.memory_space<vmem>>, vector<1x256xf32>
    %c3 = arith.constant 3 : index
    %c0_194 = arith.constant 0 : index
    %433 = vector.load %arg4[%c3, %c0_194] : memref<6x256xf32, #tpu.memory_space<vmem>>, vector<1x256xf32>
    %c4 = arith.constant 4 : index
    %c0_195 = arith.constant 0 : index
    %434 = vector.load %arg4[%c4, %c0_195] : memref<6x256xf32, #tpu.memory_space<vmem>>, vector<1x256xf32>
    %c5 = arith.constant 5 : index
    %c0_196 = arith.constant 0 : index
    %435 = vector.load %arg4[%c5, %c0_196] : memref<6x256xf32, #tpu.memory_space<vmem>>, vector<1x256xf32>
    %c0_197 = arith.constant 0 : index
    %c0_198 = arith.constant 0 : index
    %436 = vector.load %arg9[%c0_197, %c0_198] : memref<4x144xf32, #tpu.memory_space<vmem>>, vector<4x144xf32>
    %c17_i32 = arith.constant 17 : i32
    %437 = tpu.dynamic_rotate %431 by %c17_i32 dim 1 : vector<16x256xf32>, i32 -> vector<16x256xf32>
    %438 = arith.mulf %434, %432 : vector<1x256xf32>
    %439 = vector.broadcast %438 : vector<1x256xf32> to vector<16x256xf32>
    %440 = arith.mulf %437, %439 : vector<16x256xf32>
    %c16_i32 = arith.constant 16 : i32
    %441 = tpu.dynamic_rotate %431 by %c16_i32 dim 1 : vector<16x256xf32>, i32 -> vector<16x256xf32>
    %442 = vector.broadcast %434 : vector<1x256xf32> to vector<16x256xf32>
    %443 = arith.mulf %441, %442 : vector<16x256xf32>
    %c15_i32 = arith.constant 15 : i32
    %444 = tpu.dynamic_rotate %431 by %c15_i32 dim 1 : vector<16x256xf32>, i32 -> vector<16x256xf32>
    %445 = arith.mulf %434, %433 : vector<1x256xf32>
    %446 = vector.broadcast %445 : vector<1x256xf32> to vector<16x256xf32>
    %447 = arith.mulf %444, %446 : vector<16x256xf32>
    %c1_i32 = arith.constant 1 : i32
    %448 = tpu.dynamic_rotate %431 by %c1_i32 dim 1 : vector<16x256xf32>, i32 -> vector<16x256xf32>
    %449 = vector.broadcast %432 : vector<1x256xf32> to vector<16x256xf32>
    %450 = arith.mulf %448, %449 : vector<16x256xf32>
    %c255_i32 = arith.constant 255 : i32
    %451 = tpu.dynamic_rotate %431 by %c255_i32 dim 1 : vector<16x256xf32>, i32 -> vector<16x256xf32>
    %452 = vector.broadcast %433 : vector<1x256xf32> to vector<16x256xf32>
    %453 = arith.mulf %451, %452 : vector<16x256xf32>
    %c241_i32 = arith.constant 241 : i32
    %454 = tpu.dynamic_rotate %431 by %c241_i32 dim 1 : vector<16x256xf32>, i32 -> vector<16x256xf32>
    %455 = arith.mulf %435, %432 : vector<1x256xf32>
    %456 = vector.broadcast %455 : vector<1x256xf32> to vector<16x256xf32>
    %457 = arith.mulf %454, %456 : vector<16x256xf32>
    %c240_i32 = arith.constant 240 : i32
    %458 = tpu.dynamic_rotate %431 by %c240_i32 dim 1 : vector<16x256xf32>, i32 -> vector<16x256xf32>
    %459 = vector.broadcast %435 : vector<1x256xf32> to vector<16x256xf32>
    %460 = arith.mulf %458, %459 : vector<16x256xf32>
    %c239_i32 = arith.constant 239 : i32
    %461 = tpu.dynamic_rotate %431 by %c239_i32 dim 1 : vector<16x256xf32>, i32 -> vector<16x256xf32>
    %462 = arith.mulf %435, %433 : vector<1x256xf32>
    %463 = vector.broadcast %462 : vector<1x256xf32> to vector<16x256xf32>
    %464 = arith.mulf %461, %463 : vector<16x256xf32>
    %465 = tpu.concatenate %440, %443, %447, %450, %431, %453, %457, %460, %464 in 0 : vector<16x256xf32>, vector<16x256xf32>, vector<16x256xf32>, vector<16x256xf32>, vector<16x256xf32>, vector<16x256xf32>, vector<16x256xf32>, vector<16x256xf32>, vector<16x256xf32> -> vector<144x256xf32>
    %cst_199 = arith.constant dense<0.000000e+00> : vector<4x256xf32>
    %466 = tpu.matmul %436, %465, %cst_199 {dimension_numbers = #tpu.dot_dimension_numbers<[1], [0], [0], [1], [0, 0, 1, 1], [], []>} : vector<4x144xf32>, vector<144x256xf32>, vector<4x256xf32> -> vector<4x256xf32>
    %467 = tpu.concatenate %425, %1 in 1 : vector<8x256xf32>, vector<8x256xf32> -> vector<8x512xf32>
    %468 = arith.truncf %467 : vector<8x512xf32> to vector<8x512xbf16>
    %469 = tpu.iota {dimensions = array<i32: 0>} : vector<256x256xi32>
    %c0_200 = arith.constant 0 : index
    %c0_201 = arith.constant 0 : index
    %470 = vector.load %arg4[%c0_200, %c0_201] : memref<6x256xf32, #tpu.memory_space<vmem>>, vector<1x256xf32>
    %c1 = arith.constant 1 : index
    %c0_202 = arith.constant 0 : index
    %471 = vector.load %arg4[%c1, %c0_202] : memref<6x256xf32, #tpu.memory_space<vmem>>, vector<1x256xf32>
    %472 = vector.extract_strided_slice %466 {offsets = [0, 0], sizes = [1, 256], strides = [1, 1]} : vector<4x256xf32> to vector<1x256xf32>
    %473 = vector.extract_strided_slice %466 {offsets = [1, 0], sizes = [1, 256], strides = [1, 1]} : vector<4x256xf32> to vector<1x256xf32>
    %cst_203 = arith.constant 6.250000e-02 : f32
    %474 = vector.broadcast %cst_203 : f32 to vector<1x256xf32>
    %475 = arith.mulf %472, %474 : vector<1x256xf32>
    %476 = arith.addf %470, %475 : vector<1x256xf32>
    %cst_204 = arith.constant 6.250000e-02 : f32
    %477 = vector.broadcast %cst_204 : f32 to vector<1x256xf32>
    %478 = arith.mulf %473, %477 : vector<1x256xf32>
    %479 = arith.addf %471, %478 : vector<1x256xf32>
    %cst_205 = arith.constant 1.000000e+00 : f32
    %480 = vector.broadcast %cst_205 : f32 to vector<1x256xf32>
    %481 = arith.addf %476, %480 : vector<1x256xf32>
    %cst_206 = arith.constant 1.600000e+01 : f32
    %482 = vector.broadcast %cst_206 : f32 to vector<1x256xf32>
    %483 = arith.mulf %481, %482 : vector<1x256xf32>
    %cst_207 = arith.constant 1.000000e+00 : f32
    %484 = vector.broadcast %cst_207 : f32 to vector<1x256xf32>
    %485 = arith.subf %483, %484 : vector<1x256xf32>
    %cst_208 = arith.constant 5.000000e-01 : f32
    %486 = vector.broadcast %cst_208 : f32 to vector<1x256xf32>
    %487 = arith.mulf %485, %486 : vector<1x256xf32>
    %cst_209 = arith.constant 1.000000e+00 : f32
    %488 = vector.broadcast %cst_209 : f32 to vector<1x256xf32>
    %489 = arith.addf %479, %488 : vector<1x256xf32>
    %cst_210 = arith.constant 1.600000e+01 : f32
    %490 = vector.broadcast %cst_210 : f32 to vector<1x256xf32>
    %491 = arith.mulf %489, %490 : vector<1x256xf32>
    %cst_211 = arith.constant 1.000000e+00 : f32
    %492 = vector.broadcast %cst_211 : f32 to vector<1x256xf32>
    %493 = arith.subf %491, %492 : vector<1x256xf32>
    %cst_212 = arith.constant 5.000000e-01 : f32
    %494 = vector.broadcast %cst_212 : f32 to vector<1x256xf32>
    %495 = arith.mulf %493, %494 : vector<1x256xf32>
    %496 = math.floor %487 : vector<1x256xf32>
    %497 = math.floor %495 : vector<1x256xf32>
    %498 = arith.subf %487, %496 : vector<1x256xf32>
    %499 = arith.subf %495, %497 : vector<1x256xf32>
    %500 = arith.fptosi %496 : vector<1x256xf32> to vector<1x256xi32>
    %501 = arith.fptosi %497 : vector<1x256xf32> to vector<1x256xi32>
    %c1_i32_213 = arith.constant 1 : i32
    %502 = vector.broadcast %c1_i32_213 : i32 to vector<1x256xi32>
    %503 = arith.addi %500, %502 : vector<1x256xi32>
    %c1_i32_214 = arith.constant 1 : i32
    %504 = vector.broadcast %c1_i32_214 : i32 to vector<1x256xi32>
    %505 = arith.addi %501, %504 : vector<1x256xi32>
    %cst_215 = arith.constant 1.000000e+00 : f32
    %506 = vector.broadcast %cst_215 : f32 to vector<1x256xf32>
    %507 = arith.subf %506, %498 : vector<1x256xf32>
    %cst_216 = arith.constant 1.000000e+00 : f32
    %508 = vector.broadcast %cst_216 : f32 to vector<1x256xf32>
    %509 = arith.subf %508, %499 : vector<1x256xf32>
    %510 = arith.mulf %507, %509 : vector<1x256xf32>
    %c0_i32 = arith.constant 0 : i32
    %511 = vector.broadcast %c0_i32 : i32 to vector<1x256xi32>
    %512 = arith.cmpi sge, %500, %511 : vector<1x256xi32>
    %c16_i32_217 = arith.constant 16 : i32
    %513 = vector.broadcast %c16_i32_217 : i32 to vector<1x256xi32>
    %514 = arith.cmpi slt, %500, %513 : vector<1x256xi32>
    %515 = arith.andi %512, %514 : vector<1x256xi1>
    %c0_i32_218 = arith.constant 0 : i32
    %516 = vector.broadcast %c0_i32_218 : i32 to vector<1x256xi32>
    %517 = arith.cmpi sge, %501, %516 : vector<1x256xi32>
    %518 = arith.andi %515, %517 : vector<1x256xi1>
    %c16_i32_219 = arith.constant 16 : i32
    %519 = vector.broadcast %c16_i32_219 : i32 to vector<1x256xi32>
    %520 = arith.cmpi slt, %501, %519 : vector<1x256xi32>
    %521 = arith.andi %518, %520 : vector<1x256xi1>
    %c16_i32_220 = arith.constant 16 : i32
    %522 = vector.broadcast %c16_i32_220 : i32 to vector<1x256xi32>
    %523 = arith.muli %501, %522 : vector<1x256xi32>
    %524 = arith.addi %523, %500 : vector<1x256xi32>
    %c-1_i32 = arith.constant -1 : i32
    %525 = vector.broadcast %c-1_i32 : i32 to vector<1x256xi32>
    %526 = arith.select %521, %524, %525 : vector<1x256xi1>, vector<1x256xi32>
    %527 = vector.broadcast %526 : vector<1x256xi32> to vector<256x256xi32>
    %528 = arith.cmpi eq, %469, %527 : vector<256x256xi32>
    %cst_221 = arith.constant 0.000000e+00 : f32
    %529 = vector.shape_cast %510 : vector<1x256xf32> to vector<1x256xf32>
    %530 = vector.broadcast %529 : vector<1x256xf32> to vector<256x256xf32>
    %531 = vector.broadcast %cst_221 : f32 to vector<256x256xf32>
    %532 = arith.select %528, %530, %531 : vector<256x256xi1>, vector<256x256xf32>
    %cst_222 = arith.constant 1.000000e+00 : f32
    %533 = vector.broadcast %cst_222 : f32 to vector<1x256xf32>
    %534 = arith.subf %533, %499 : vector<1x256xf32>
    %535 = arith.mulf %498, %534 : vector<1x256xf32>
    %c0_i32_223 = arith.constant 0 : i32
    %536 = vector.broadcast %c0_i32_223 : i32 to vector<1x256xi32>
    %537 = arith.cmpi sge, %503, %536 : vector<1x256xi32>
    %c16_i32_224 = arith.constant 16 : i32
    %538 = vector.broadcast %c16_i32_224 : i32 to vector<1x256xi32>
    %539 = arith.cmpi slt, %503, %538 : vector<1x256xi32>
    %540 = arith.andi %537, %539 : vector<1x256xi1>
    %c0_i32_225 = arith.constant 0 : i32
    %541 = vector.broadcast %c0_i32_225 : i32 to vector<1x256xi32>
    %542 = arith.cmpi sge, %501, %541 : vector<1x256xi32>
    %543 = arith.andi %540, %542 : vector<1x256xi1>
    %c16_i32_226 = arith.constant 16 : i32
    %544 = vector.broadcast %c16_i32_226 : i32 to vector<1x256xi32>
    %545 = arith.cmpi slt, %501, %544 : vector<1x256xi32>
    %546 = arith.andi %543, %545 : vector<1x256xi1>
    %c16_i32_227 = arith.constant 16 : i32
    %547 = vector.broadcast %c16_i32_227 : i32 to vector<1x256xi32>
    %548 = arith.muli %501, %547 : vector<1x256xi32>
    %549 = arith.addi %548, %503 : vector<1x256xi32>
    %c-1_i32_228 = arith.constant -1 : i32
    %550 = vector.broadcast %c-1_i32_228 : i32 to vector<1x256xi32>
    %551 = arith.select %546, %549, %550 : vector<1x256xi1>, vector<1x256xi32>
    %552 = vector.broadcast %551 : vector<1x256xi32> to vector<256x256xi32>
    %553 = arith.cmpi eq, %469, %552 : vector<256x256xi32>
    %cst_229 = arith.constant 0.000000e+00 : f32
    %554 = vector.shape_cast %535 : vector<1x256xf32> to vector<1x256xf32>
    %555 = vector.broadcast %554 : vector<1x256xf32> to vector<256x256xf32>
    %556 = vector.broadcast %cst_229 : f32 to vector<256x256xf32>
    %557 = arith.select %553, %555, %556 : vector<256x256xi1>, vector<256x256xf32>
    %558 = arith.addf %532, %557 : vector<256x256xf32>
    %cst_230 = arith.constant 1.000000e+00 : f32
    %559 = vector.broadcast %cst_230 : f32 to vector<1x256xf32>
    %560 = arith.subf %559, %498 : vector<1x256xf32>
    %561 = arith.mulf %560, %499 : vector<1x256xf32>
    %c0_i32_231 = arith.constant 0 : i32
    %562 = vector.broadcast %c0_i32_231 : i32 to vector<1x256xi32>
    %563 = arith.cmpi sge, %500, %562 : vector<1x256xi32>
    %c16_i32_232 = arith.constant 16 : i32
    %564 = vector.broadcast %c16_i32_232 : i32 to vector<1x256xi32>
    %565 = arith.cmpi slt, %500, %564 : vector<1x256xi32>
    %566 = arith.andi %563, %565 : vector<1x256xi1>
    %c0_i32_233 = arith.constant 0 : i32
    %567 = vector.broadcast %c0_i32_233 : i32 to vector<1x256xi32>
    %568 = arith.cmpi sge, %505, %567 : vector<1x256xi32>
    %569 = arith.andi %566, %568 : vector<1x256xi1>
    %c16_i32_234 = arith.constant 16 : i32
    %570 = vector.broadcast %c16_i32_234 : i32 to vector<1x256xi32>
    %571 = arith.cmpi slt, %505, %570 : vector<1x256xi32>
    %572 = arith.andi %569, %571 : vector<1x256xi1>
    %c16_i32_235 = arith.constant 16 : i32
    %573 = vector.broadcast %c16_i32_235 : i32 to vector<1x256xi32>
    %574 = arith.muli %505, %573 : vector<1x256xi32>
    %575 = arith.addi %574, %500 : vector<1x256xi32>
    %c-1_i32_236 = arith.constant -1 : i32
    %576 = vector.broadcast %c-1_i32_236 : i32 to vector<1x256xi32>
    %577 = arith.select %572, %575, %576 : vector<1x256xi1>, vector<1x256xi32>
    %578 = vector.broadcast %577 : vector<1x256xi32> to vector<256x256xi32>
    %579 = arith.cmpi eq, %469, %578 : vector<256x256xi32>
    %cst_237 = arith.constant 0.000000e+00 : f32
    %580 = vector.shape_cast %561 : vector<1x256xf32> to vector<1x256xf32>
    %581 = vector.broadcast %580 : vector<1x256xf32> to vector<256x256xf32>
    %582 = vector.broadcast %cst_237 : f32 to vector<256x256xf32>
    %583 = arith.select %579, %581, %582 : vector<256x256xi1>, vector<256x256xf32>
    %584 = arith.addf %558, %583 : vector<256x256xf32>
    %585 = arith.mulf %498, %499 : vector<1x256xf32>
    %c0_i32_238 = arith.constant 0 : i32
    %586 = vector.broadcast %c0_i32_238 : i32 to vector<1x256xi32>
    %587 = arith.cmpi sge, %503, %586 : vector<1x256xi32>
    %c16_i32_239 = arith.constant 16 : i32
    %588 = vector.broadcast %c16_i32_239 : i32 to vector<1x256xi32>
    %589 = arith.cmpi slt, %503, %588 : vector<1x256xi32>
    %590 = arith.andi %587, %589 : vector<1x256xi1>
    %c0_i32_240 = arith.constant 0 : i32
    %591 = vector.broadcast %c0_i32_240 : i32 to vector<1x256xi32>
    %592 = arith.cmpi sge, %505, %591 : vector<1x256xi32>
    %593 = arith.andi %590, %592 : vector<1x256xi1>
    %c16_i32_241 = arith.constant 16 : i32
    %594 = vector.broadcast %c16_i32_241 : i32 to vector<1x256xi32>
    %595 = arith.cmpi slt, %505, %594 : vector<1x256xi32>
    %596 = arith.andi %593, %595 : vector<1x256xi1>
    %c16_i32_242 = arith.constant 16 : i32
    %597 = vector.broadcast %c16_i32_242 : i32 to vector<1x256xi32>
    %598 = arith.muli %505, %597 : vector<1x256xi32>
    %599 = arith.addi %598, %503 : vector<1x256xi32>
    %c-1_i32_243 = arith.constant -1 : i32
    %600 = vector.broadcast %c-1_i32_243 : i32 to vector<1x256xi32>
    %601 = arith.select %596, %599, %600 : vector<1x256xi1>, vector<1x256xi32>
    %602 = vector.broadcast %601 : vector<1x256xi32> to vector<256x256xi32>
    %603 = arith.cmpi eq, %469, %602 : vector<256x256xi32>
    %cst_244 = arith.constant 0.000000e+00 : f32
    %604 = vector.shape_cast %585 : vector<1x256xf32> to vector<1x256xf32>
    %605 = vector.broadcast %604 : vector<1x256xf32> to vector<256x256xf32>
    %606 = vector.broadcast %cst_244 : f32 to vector<256x256xf32>
    %607 = arith.select %603, %605, %606 : vector<256x256xi1>, vector<256x256xf32>
    %608 = arith.addf %584, %607 : vector<256x256xf32>
    %609 = arith.truncf %608 : vector<256x256xf32> to vector<256x256xbf16>
    %610 = vector.extract_strided_slice %466 {offsets = [2, 0], sizes = [1, 256], strides = [1, 1]} : vector<4x256xf32> to vector<1x256xf32>
    %611 = vector.extract_strided_slice %466 {offsets = [3, 0], sizes = [1, 256], strides = [1, 1]} : vector<4x256xf32> to vector<1x256xf32>
    %cst_245 = arith.constant 6.250000e-02 : f32
    %612 = vector.broadcast %cst_245 : f32 to vector<1x256xf32>
    %613 = arith.mulf %610, %612 : vector<1x256xf32>
    %614 = arith.addf %470, %613 : vector<1x256xf32>
    %cst_246 = arith.constant 6.250000e-02 : f32
    %615 = vector.broadcast %cst_246 : f32 to vector<1x256xf32>
    %616 = arith.mulf %611, %615 : vector<1x256xf32>
    %617 = arith.addf %471, %616 : vector<1x256xf32>
    %cst_247 = arith.constant 1.000000e+00 : f32
    %618 = vector.broadcast %cst_247 : f32 to vector<1x256xf32>
    %619 = arith.addf %614, %618 : vector<1x256xf32>
    %cst_248 = arith.constant 1.600000e+01 : f32
    %620 = vector.broadcast %cst_248 : f32 to vector<1x256xf32>
    %621 = arith.mulf %619, %620 : vector<1x256xf32>
    %cst_249 = arith.constant 1.000000e+00 : f32
    %622 = vector.broadcast %cst_249 : f32 to vector<1x256xf32>
    %623 = arith.subf %621, %622 : vector<1x256xf32>
    %cst_250 = arith.constant 5.000000e-01 : f32
    %624 = vector.broadcast %cst_250 : f32 to vector<1x256xf32>
    %625 = arith.mulf %623, %624 : vector<1x256xf32>
    %cst_251 = arith.constant 1.000000e+00 : f32
    %626 = vector.broadcast %cst_251 : f32 to vector<1x256xf32>
    %627 = arith.addf %617, %626 : vector<1x256xf32>
    %cst_252 = arith.constant 1.600000e+01 : f32
    %628 = vector.broadcast %cst_252 : f32 to vector<1x256xf32>
    %629 = arith.mulf %627, %628 : vector<1x256xf32>
    %cst_253 = arith.constant 1.000000e+00 : f32
    %630 = vector.broadcast %cst_253 : f32 to vector<1x256xf32>
    %631 = arith.subf %629, %630 : vector<1x256xf32>
    %cst_254 = arith.constant 5.000000e-01 : f32
    %632 = vector.broadcast %cst_254 : f32 to vector<1x256xf32>
    %633 = arith.mulf %631, %632 : vector<1x256xf32>
    %634 = math.floor %625 : vector<1x256xf32>
    %635 = math.floor %633 : vector<1x256xf32>
    %636 = arith.subf %625, %634 : vector<1x256xf32>
    %637 = arith.subf %633, %635 : vector<1x256xf32>
    %638 = arith.fptosi %634 : vector<1x256xf32> to vector<1x256xi32>
    %639 = arith.fptosi %635 : vector<1x256xf32> to vector<1x256xi32>
    %c1_i32_255 = arith.constant 1 : i32
    %640 = vector.broadcast %c1_i32_255 : i32 to vector<1x256xi32>
    %641 = arith.addi %638, %640 : vector<1x256xi32>
    %c1_i32_256 = arith.constant 1 : i32
    %642 = vector.broadcast %c1_i32_256 : i32 to vector<1x256xi32>
    %643 = arith.addi %639, %642 : vector<1x256xi32>
    %cst_257 = arith.constant 1.000000e+00 : f32
    %644 = vector.broadcast %cst_257 : f32 to vector<1x256xf32>
    %645 = arith.subf %644, %636 : vector<1x256xf32>
    %cst_258 = arith.constant 1.000000e+00 : f32
    %646 = vector.broadcast %cst_258 : f32 to vector<1x256xf32>
    %647 = arith.subf %646, %637 : vector<1x256xf32>
    %648 = arith.mulf %645, %647 : vector<1x256xf32>
    %c0_i32_259 = arith.constant 0 : i32
    %649 = vector.broadcast %c0_i32_259 : i32 to vector<1x256xi32>
    %650 = arith.cmpi sge, %638, %649 : vector<1x256xi32>
    %c16_i32_260 = arith.constant 16 : i32
    %651 = vector.broadcast %c16_i32_260 : i32 to vector<1x256xi32>
    %652 = arith.cmpi slt, %638, %651 : vector<1x256xi32>
    %653 = arith.andi %650, %652 : vector<1x256xi1>
    %c0_i32_261 = arith.constant 0 : i32
    %654 = vector.broadcast %c0_i32_261 : i32 to vector<1x256xi32>
    %655 = arith.cmpi sge, %639, %654 : vector<1x256xi32>
    %656 = arith.andi %653, %655 : vector<1x256xi1>
    %c16_i32_262 = arith.constant 16 : i32
    %657 = vector.broadcast %c16_i32_262 : i32 to vector<1x256xi32>
    %658 = arith.cmpi slt, %639, %657 : vector<1x256xi32>
    %659 = arith.andi %656, %658 : vector<1x256xi1>
    %c16_i32_263 = arith.constant 16 : i32
    %660 = vector.broadcast %c16_i32_263 : i32 to vector<1x256xi32>
    %661 = arith.muli %639, %660 : vector<1x256xi32>
    %662 = arith.addi %661, %638 : vector<1x256xi32>
    %c-1_i32_264 = arith.constant -1 : i32
    %663 = vector.broadcast %c-1_i32_264 : i32 to vector<1x256xi32>
    %664 = arith.select %659, %662, %663 : vector<1x256xi1>, vector<1x256xi32>
    %665 = vector.broadcast %664 : vector<1x256xi32> to vector<256x256xi32>
    %666 = arith.cmpi eq, %469, %665 : vector<256x256xi32>
    %cst_265 = arith.constant 0.000000e+00 : f32
    %667 = vector.shape_cast %648 : vector<1x256xf32> to vector<1x256xf32>
    %668 = vector.broadcast %667 : vector<1x256xf32> to vector<256x256xf32>
    %669 = vector.broadcast %cst_265 : f32 to vector<256x256xf32>
    %670 = arith.select %666, %668, %669 : vector<256x256xi1>, vector<256x256xf32>
    %cst_266 = arith.constant 1.000000e+00 : f32
    %671 = vector.broadcast %cst_266 : f32 to vector<1x256xf32>
    %672 = arith.subf %671, %637 : vector<1x256xf32>
    %673 = arith.mulf %636, %672 : vector<1x256xf32>
    %c0_i32_267 = arith.constant 0 : i32
    %674 = vector.broadcast %c0_i32_267 : i32 to vector<1x256xi32>
    %675 = arith.cmpi sge, %641, %674 : vector<1x256xi32>
    %c16_i32_268 = arith.constant 16 : i32
    %676 = vector.broadcast %c16_i32_268 : i32 to vector<1x256xi32>
    %677 = arith.cmpi slt, %641, %676 : vector<1x256xi32>
    %678 = arith.andi %675, %677 : vector<1x256xi1>
    %c0_i32_269 = arith.constant 0 : i32
    %679 = vector.broadcast %c0_i32_269 : i32 to vector<1x256xi32>
    %680 = arith.cmpi sge, %639, %679 : vector<1x256xi32>
    %681 = arith.andi %678, %680 : vector<1x256xi1>
    %c16_i32_270 = arith.constant 16 : i32
    %682 = vector.broadcast %c16_i32_270 : i32 to vector<1x256xi32>
    %683 = arith.cmpi slt, %639, %682 : vector<1x256xi32>
    %684 = arith.andi %681, %683 : vector<1x256xi1>
    %c16_i32_271 = arith.constant 16 : i32
    %685 = vector.broadcast %c16_i32_271 : i32 to vector<1x256xi32>
    %686 = arith.muli %639, %685 : vector<1x256xi32>
    %687 = arith.addi %686, %641 : vector<1x256xi32>
    %c-1_i32_272 = arith.constant -1 : i32
    %688 = vector.broadcast %c-1_i32_272 : i32 to vector<1x256xi32>
    %689 = arith.select %684, %687, %688 : vector<1x256xi1>, vector<1x256xi32>
    %690 = vector.broadcast %689 : vector<1x256xi32> to vector<256x256xi32>
    %691 = arith.cmpi eq, %469, %690 : vector<256x256xi32>
    %cst_273 = arith.constant 0.000000e+00 : f32
    %692 = vector.shape_cast %673 : vector<1x256xf32> to vector<1x256xf32>
    %693 = vector.broadcast %692 : vector<1x256xf32> to vector<256x256xf32>
    %694 = vector.broadcast %cst_273 : f32 to vector<256x256xf32>
    %695 = arith.select %691, %693, %694 : vector<256x256xi1>, vector<256x256xf32>
    %696 = arith.addf %670, %695 : vector<256x256xf32>
    %cst_274 = arith.constant 1.000000e+00 : f32
    %697 = vector.broadcast %cst_274 : f32 to vector<1x256xf32>
    %698 = arith.subf %697, %636 : vector<1x256xf32>
    %699 = arith.mulf %698, %637 : vector<1x256xf32>
    %c0_i32_275 = arith.constant 0 : i32
    %700 = vector.broadcast %c0_i32_275 : i32 to vector<1x256xi32>
    %701 = arith.cmpi sge, %638, %700 : vector<1x256xi32>
    %c16_i32_276 = arith.constant 16 : i32
    %702 = vector.broadcast %c16_i32_276 : i32 to vector<1x256xi32>
    %703 = arith.cmpi slt, %638, %702 : vector<1x256xi32>
    %704 = arith.andi %701, %703 : vector<1x256xi1>
    %c0_i32_277 = arith.constant 0 : i32
    %705 = vector.broadcast %c0_i32_277 : i32 to vector<1x256xi32>
    %706 = arith.cmpi sge, %643, %705 : vector<1x256xi32>
    %707 = arith.andi %704, %706 : vector<1x256xi1>
    %c16_i32_278 = arith.constant 16 : i32
    %708 = vector.broadcast %c16_i32_278 : i32 to vector<1x256xi32>
    %709 = arith.cmpi slt, %643, %708 : vector<1x256xi32>
    %710 = arith.andi %707, %709 : vector<1x256xi1>
    %c16_i32_279 = arith.constant 16 : i32
    %711 = vector.broadcast %c16_i32_279 : i32 to vector<1x256xi32>
    %712 = arith.muli %643, %711 : vector<1x256xi32>
    %713 = arith.addi %712, %638 : vector<1x256xi32>
    %c-1_i32_280 = arith.constant -1 : i32
    %714 = vector.broadcast %c-1_i32_280 : i32 to vector<1x256xi32>
    %715 = arith.select %710, %713, %714 : vector<1x256xi1>, vector<1x256xi32>
    %716 = vector.broadcast %715 : vector<1x256xi32> to vector<256x256xi32>
    %717 = arith.cmpi eq, %469, %716 : vector<256x256xi32>
    %cst_281 = arith.constant 0.000000e+00 : f32
    %718 = vector.shape_cast %699 : vector<1x256xf32> to vector<1x256xf32>
    %719 = vector.broadcast %718 : vector<1x256xf32> to vector<256x256xf32>
    %720 = vector.broadcast %cst_281 : f32 to vector<256x256xf32>
    %721 = arith.select %717, %719, %720 : vector<256x256xi1>, vector<256x256xf32>
    %722 = arith.addf %696, %721 : vector<256x256xf32>
    %723 = arith.mulf %636, %637 : vector<1x256xf32>
    %c0_i32_282 = arith.constant 0 : i32
    %724 = vector.broadcast %c0_i32_282 : i32 to vector<1x256xi32>
    %725 = arith.cmpi sge, %641, %724 : vector<1x256xi32>
    %c16_i32_283 = arith.constant 16 : i32
    %726 = vector.broadcast %c16_i32_283 : i32 to vector<1x256xi32>
    %727 = arith.cmpi slt, %641, %726 : vector<1x256xi32>
    %728 = arith.andi %725, %727 : vector<1x256xi1>
    %c0_i32_284 = arith.constant 0 : i32
    %729 = vector.broadcast %c0_i32_284 : i32 to vector<1x256xi32>
    %730 = arith.cmpi sge, %643, %729 : vector<1x256xi32>
    %731 = arith.andi %728, %730 : vector<1x256xi1>
    %c16_i32_285 = arith.constant 16 : i32
    %732 = vector.broadcast %c16_i32_285 : i32 to vector<1x256xi32>
    %733 = arith.cmpi slt, %643, %732 : vector<1x256xi32>
    %734 = arith.andi %731, %733 : vector<1x256xi1>
    %c16_i32_286 = arith.constant 16 : i32
    %735 = vector.broadcast %c16_i32_286 : i32 to vector<1x256xi32>
    %736 = arith.muli %643, %735 : vector<1x256xi32>
    %737 = arith.addi %736, %641 : vector<1x256xi32>
    %c-1_i32_287 = arith.constant -1 : i32
    %738 = vector.broadcast %c-1_i32_287 : i32 to vector<1x256xi32>
    %739 = arith.select %734, %737, %738 : vector<1x256xi1>, vector<1x256xi32>
    %740 = vector.broadcast %739 : vector<1x256xi32> to vector<256x256xi32>
    %741 = arith.cmpi eq, %469, %740 : vector<256x256xi32>
    %cst_288 = arith.constant 0.000000e+00 : f32
    %742 = vector.shape_cast %723 : vector<1x256xf32> to vector<1x256xf32>
    %743 = vector.broadcast %742 : vector<1x256xf32> to vector<256x256xf32>
    %744 = vector.broadcast %cst_288 : f32 to vector<256x256xf32>
    %745 = arith.select %741, %743, %744 : vector<256x256xi1>, vector<256x256xf32>
    %746 = arith.addf %722, %745 : vector<256x256xf32>
    %747 = arith.truncf %746 : vector<256x256xf32> to vector<256x256xbf16>
    %748 = tpu.concatenate %609, %747 in 0 : vector<256x256xbf16>, vector<256x256xbf16> -> vector<512x256xbf16>
    %cst_289 = arith.constant dense<0.000000e+00> : vector<8x256xf32>
    %749 = tpu.matmul %468, %748, %cst_289 {dimension_numbers = #tpu.dot_dimension_numbers<[1], [0], [0], [1], [0, 0, 1, 1], [], []>} : vector<8x512xbf16>, vector<512x256xbf16>, vector<8x256xf32> -> vector<8x256xf32>
    %c0_290 = arith.constant 0 : index
    %c0_291 = arith.constant 0 : index
    %750 = vector.load %arg16[%c0_290, %c0_291] : memref<1x256xf32, #tpu.memory_space<vmem>>, vector<1x256xf32>
    %751 = vector.broadcast %750 : vector<1x256xf32> to vector<8x256xf32>
    %752 = arith.mulf %749, %751 : vector<8x256xf32>
    %c0_292 = arith.constant 0 : index
    %c0_293 = arith.constant 0 : index
    %c0_294 = arith.constant 0 : index
    %753 = vector.load %arg13[%c0_292, %c0_293, %c0_294] : memref<1x8x256xf32, #tpu.memory_space<vmem>>, vector<1x8x256xf32>
    %754 = vector.shape_cast %753 : vector<1x8x256xf32> to vector<8x256xf32>
    %755 = vector.shape_cast %752 : vector<8x256xf32> to vector<1x8x256xf32>
    tpu.vector_store %arg13[%c0_292, %c0_293, %c0_294], %755 {strides = array<i32>} : memref<1x8x256xf32, #tpu.memory_space<vmem>>, vector<1x8x256xf32>,
    %c0_295 = arith.constant 0 : index
    %c0_296 = arith.constant 0 : index
    %756 = vector.load %arg10[%c0_295, %c0_296] : memref<1x72xf32, #tpu.memory_space<vmem>>, vector<1x72xf32>
    %c0_297 = arith.constant 0 : index
    %c0_298 = arith.constant 0 : index
    %c0_299 = arith.constant 0 : index
    %757 = vector.load %arg13[%c0_297, %c0_298, %c0_299] : memref<1x8x256xf32, #tpu.memory_space<vmem>>, vector<1x8x256xf32>
    %758 = vector.shape_cast %757 : vector<1x8x256xf32> to vector<8x256xf32>
    %c17_i32_300 = arith.constant 17 : i32
    %759 = tpu.dynamic_rotate %758 by %c17_i32_300 dim 1 : vector<8x256xf32>, i32 -> vector<8x256xf32>
    %760 = arith.mulf %434, %432 : vector<1x256xf32>
    %761 = vector.broadcast %760 : vector<1x256xf32> to vector<8x256xf32>
    %762 = arith.mulf %759, %761 : vector<8x256xf32>
    %c16_i32_301 = arith.constant 16 : i32
    %763 = tpu.dynamic_rotate %758 by %c16_i32_301 dim 1 : vector<8x256xf32>, i32 -> vector<8x256xf32>
    %764 = vector.broadcast %434 : vector<1x256xf32> to vector<8x256xf32>
    %765 = arith.mulf %763, %764 : vector<8x256xf32>
    %c15_i32_302 = arith.constant 15 : i32
    %766 = tpu.dynamic_rotate %758 by %c15_i32_302 dim 1 : vector<8x256xf32>, i32 -> vector<8x256xf32>
    %767 = arith.mulf %434, %433 : vector<1x256xf32>
    %768 = vector.broadcast %767 : vector<1x256xf32> to vector<8x256xf32>
    %769 = arith.mulf %766, %768 : vector<8x256xf32>
    %c1_i32_303 = arith.constant 1 : i32
    %770 = tpu.dynamic_rotate %758 by %c1_i32_303 dim 1 : vector<8x256xf32>, i32 -> vector<8x256xf32>
    %771 = vector.broadcast %432 : vector<1x256xf32> to vector<8x256xf32>
    %772 = arith.mulf %770, %771 : vector<8x256xf32>
    %c255_i32_304 = arith.constant 255 : i32
    %773 = tpu.dynamic_rotate %758 by %c255_i32_304 dim 1 : vector<8x256xf32>, i32 -> vector<8x256xf32>
    %774 = vector.broadcast %433 : vector<1x256xf32> to vector<8x256xf32>
    %775 = arith.mulf %773, %774 : vector<8x256xf32>
    %c241_i32_305 = arith.constant 241 : i32
    %776 = tpu.dynamic_rotate %758 by %c241_i32_305 dim 1 : vector<8x256xf32>, i32 -> vector<8x256xf32>
    %777 = arith.mulf %435, %432 : vector<1x256xf32>
    %778 = vector.broadcast %777 : vector<1x256xf32> to vector<8x256xf32>
    %779 = arith.mulf %776, %778 : vector<8x256xf32>
    %c240_i32_306 = arith.constant 240 : i32
    %780 = tpu.dynamic_rotate %758 by %c240_i32_306 dim 1 : vector<8x256xf32>, i32 -> vector<8x256xf32>
    %781 = vector.broadcast %435 : vector<1x256xf32> to vector<8x256xf32>
    %782 = arith.mulf %780, %781 : vector<8x256xf32>
    %c239_i32_307 = arith.constant 239 : i32
    %783 = tpu.dynamic_rotate %758 by %c239_i32_307 dim 1 : vector<8x256xf32>, i32 -> vector<8x256xf32>
    %784 = arith.mulf %435, %433 : vector<1x256xf32>
    %785 = vector.broadcast %784 : vector<1x256xf32> to vector<8x256xf32>
    %786 = arith.mulf %783, %785 : vector<8x256xf32>
    %787 = tpu.concatenate %762, %765, %769, %772, %758, %775, %779, %782, %786 in 0 : vector<8x256xf32>, vector<8x256xf32>, vector<8x256xf32>, vector<8x256xf32>, vector<8x256xf32>, vector<8x256xf32>, vector<8x256xf32>, vector<8x256xf32>, vector<8x256xf32> -> vector<72x256xf32>
    %cst_308 = arith.constant dense<0.000000e+00> : vector<1x256xf32>
    %788 = tpu.matmul %756, %787, %cst_308 {dimension_numbers = #tpu.dot_dimension_numbers<[1], [0], [0], [1], [0, 0, 1, 1], [], []>} : vector<1x72xf32>, vector<72x256xf32>, vector<1x256xf32> -> vector<1x256xf32>
    %c0_309 = arith.constant 0 : index
    %c0_310 = arith.constant 0 : index
    %789 = memref.load %arg12[%c0_309, %c0_310] : memref<1x1xf32, #tpu.memory_space<smem>>
    %790 = vector.broadcast %789 : f32 to vector<1x256xf32>
    %791 = arith.addf %788, %790 : vector<1x256xf32>
    %c0_311 = arith.constant 0 : index
    %c0_312 = arith.constant 0 : index
    %c0_313 = arith.constant 0 : index
    %792 = vector.load %arg14[%c0_311, %c0_312, %c0_313] : memref<1x1x256xf32, #tpu.memory_space<vmem>>, vector<1x1x256xf32>
    %793 = vector.shape_cast %792 : vector<1x1x256xf32> to vector<1x256xf32>
    %794 = vector.shape_cast %791 : vector<1x256xf32> to vector<1x1x256xf32>
    tpu.vector_store %arg14[%c0_311, %c0_312, %c0_313], %794 {strides = array<i32>} : memref<1x1x256xf32, #tpu.memory_space<vmem>>, vector<1x1x256xf32>,
    return
  }
  func.func @transform_0(%arg0: i32) -> (i32, i32, i32) {
    %c0_i32 = arith.constant 0 : i32
    %c0_i32_0 = arith.constant 0 : i32
    %c0_i32_1 = arith.constant 0 : i32
    return %arg0, %c0_i32, %c0_i32_0 : i32, i32, i32
  }
  func.func @transform_1(%arg0: i32) -> (i32, i32, i32) {
    %c0_i32 = arith.constant 0 : i32
    %c0_i32_0 = arith.constant 0 : i32
    %c0_i32_1 = arith.constant 0 : i32
    return %arg0, %c0_i32, %c0_i32_0 : i32, i32, i32
  }
  func.func @transform_2(%arg0: i32) -> (i32, i32, i32) {
    %c0_i32 = arith.constant 0 : i32
    %c0_i32_0 = arith.constant 0 : i32
    %c0_i32_1 = arith.constant 0 : i32
    return %arg0, %c0_i32, %c0_i32_0 : i32, i32, i32
  }
  func.func @transform_3(%arg0: i32) -> (i32, i32) {
    %c0_i32 = arith.constant 0 : i32
    %c0_i32_0 = arith.constant 0 : i32
    %c0_i32_1 = arith.constant 0 : i32
    return %c0_i32, %c0_i32_0 : i32, i32
  }
  func.func @transform_4(%arg0: i32) -> (i32, i32) {
    %c0_i32 = arith.constant 0 : i32
    %c0_i32_0 = arith.constant 0 : i32
    %c0_i32_1 = arith.constant 0 : i32
    return %c0_i32, %c0_i32_0 : i32, i32
  }
  func.func @transform_5(%arg0: i32) -> (i32, i32) {
    %c0_i32 = arith.constant 0 : i32
    %c0_i32_0 = arith.constant 0 : i32
    %c0_i32_1 = arith.constant 0 : i32
    return %c0_i32, %c0_i32_0 : i32, i32
  }
  func.func @transform_6(%arg0: i32) -> (i32, i32) {
    %c0_i32 = arith.constant 0 : i32
    %c0_i32_0 = arith.constant 0 : i32
    %c0_i32_1 = arith.constant 0 : i32
    return %c0_i32, %c0_i32_0 : i32, i32
  }
  func.func @transform_7(%arg0: i32) -> (i32, i32) {
    %c0_i32 = arith.constant 0 : i32
    %c0_i32_0 = arith.constant 0 : i32
    %c0_i32_1 = arith.constant 0 : i32
    return %c0_i32, %c0_i32_0 : i32, i32
  }
  func.func @transform_8(%arg0: i32) -> (i32, i32) {
    %c0_i32 = arith.constant 0 : i32
    %c0_i32_0 = arith.constant 0 : i32
    %c0_i32_1 = arith.constant 0 : i32
    return %c0_i32, %c0_i32_0 : i32, i32
  }
  func.func @transform_9(%arg0: i32) -> (i32, i32) {
    %c0_i32 = arith.constant 0 : i32
    %c0_i32_0 = arith.constant 0 : i32
    %c0_i32_1 = arith.constant 0 : i32
    return %c0_i32, %c0_i32_0 : i32, i32
  }
  func.func @transform_10(%arg0: i32) -> (i32, i32) {
    %c0_i32 = arith.constant 0 : i32
    %c0_i32_0 = arith.constant 0 : i32
    %c0_i32_1 = arith.constant 0 : i32
    return %c0_i32, %c0_i32_0 : i32, i32
  }
  func.func @transform_11(%arg0: i32) -> (i32, i32) {
    %c0_i32 = arith.constant 0 : i32
    %c0_i32_0 = arith.constant 0 : i32
    %c0_i32_1 = arith.constant 0 : i32
    return %c0_i32, %c0_i32_0 : i32, i32
  }
  func.func @transform_12(%arg0: i32) -> (i32, i32, i32) {
    %c0_i32 = arith.constant 0 : i32
    %c0_i32_0 = arith.constant 0 : i32
    %c0_i32_1 = arith.constant 0 : i32
    return %arg0, %c0_i32, %c0_i32_0 : i32, i32, i32
  }
  func.func @transform_13(%arg0: i32) -> (i32, i32, i32) {
    %c0_i32 = arith.constant 0 : i32
    %c0_i32_0 = arith.constant 0 : i32
    %c0_i32_1 = arith.constant 0 : i32
    return %arg0, %c0_i32, %c0_i32_0 : i32, i32, i32
  }
}

</mosaic_0001>

<bundles_post_ra>
// kernel: tpu_custom_call.1
= control target key start
LH: loop header
LB: loop body
LE: loop exit
PB: predicated region body
PF: predicated region fallthrough
CT: control target
= control target key end

     0   :  { %s10256_s0 = inlined_call_operand.hbm [shape: f32[2,8,256], index: 0, kind: input, shape index: {}]   ;;  %s10257_s1 = inlined_call_operand.vmem [shape: f32[2,8,64], index: 1, kind: input, shape index: {}]   ;;  %s10258_s2 = inlined_call_operand.hbm [shape: f32[2,1,64], index: 2, kind: input, shape index: {}]   ;;  %s10259_s3 = inlined_call_operand.vmem [shape: f32[6,256], index: 3, kind: input, shape index: {}]   ;;  %s10260_s4 = inlined_call_operand.hbm [shape: f32[8,16], index: 4, kind: input, shape index: {}]   ;;  %s10261_s5 = inlined_call_operand.vmem [shape: f32[8,16], index: 5, kind: input, shape index: {}]   ;;  %s10262_s6 = inlined_call_operand.hbm [shape: f32[16,16], index: 6, kind: input, shape index: {}]   ;;  %s10263_s7 = inlined_call_operand.vmem [shape: f32[16,1], index: 7, kind: input, shape index: {}]   ;;  %s10264_s8 = inlined_call_operand.vmem [shape: f32[4,144], index: 8, kind: input, shape index: {}]   ;;  %s10265_s9 = inlined_call_operand.vmem [shape: f32[1,72], index: 9, kind: input, shape index: {}]   ;;  %s10266_s10 = inlined_call_operand.<no memory space> [shape: f32[1,1], index: 10, kind: input, shape index: {}]   ;;  %s10267_s11 = inlined_call_operand.<no memory space> [shape: f32[1,1], index: 11, kind: input, shape index: {}]   ;;  %s10268_s12 = inlined_call_operand.hbm [shape: f32[2,8,256], index: 12, kind: output, shape index: {0}]   ;;  %s10269_s13 = inlined_call_operand.hbm [shape: f32[2,1,256], index: 13, kind: output, shape index: {1}]  }
   0x1   :  { %10306 = sst [smem:[#allocation40_spill]] %s10256_s0 }
   0x2   :  { %10307 = sst [smem:[#allocation41_spill]] %s10260_s4 }
   0x3   :  { %10308 = sst [smem:[#allocation42_spill]] %s10262_s6 }
   0x4   :  { %19 = sst [smem:[#allocation4]] %s10266_s10 }
   0x5   :  { %20 = sst [smem:[#allocation5]] %s10267_s11 }
   0x6   :  { %21 = vsyncpa [#allocation7], 0 }
   0x7   :  { %23 = vsyncpa [#allocation7 + $0x1], 0 }
   0x8   :  { %24 = vsyncpa [#allocation10], 0 }
   0x9   :  { %26 = vsyncpa [#allocation10 + $0x1], 0 }
   0xa   :  { %27 = vsyncpa [#allocation13], 0 }
   0xb   :  { %28 = vsyncpa [#allocation8], 0 }
   0xc   :  { %30 = vsyncpa [#allocation8 + $0x1], 0 }
   0xd   :  { %31 = vsyncpa [#allocation16], 0 }
   0xe   :  { %33 = vsyncpa [#allocation16 + $0x1], 0  ;;  %s7210_s29 = smov 0   ;;  %s7212_s30 = smov 0  }
   0xf   :  { %s7214_s14 = smov 0   ;;  %s7216_s10 = smov 0  }
  0x10 LB: > { %10309 = sst [smem:[#allocation23_spill]] %s7099_s14  ;;  %s7231_s11 = sadd.s32 4294967295, %s7103_s10   ;;  %s7103_s10 = sphi %s7216_s10, %s10395_s10   ;;  %s7099_s14 = sphi %s7214_s14, %s10392_s14   ;;  %s7095_s30 = sphi %s7212_s30, %s10394_s30   ;;  %s7091_s29 = sphi %s7210_s29, %s10393_s29  }
  0x11   : > { %s6328_s15 = sadd.s32 4294967294, %s7103_s10   ;;  %p59_p0 = scmp.ne.s32.totalorder %s7095_s30, %s7091_s29 }
  0x12   : > { %p10270_p1 = scmp.eq.s32.totalorder %s7231_s11, 0  ;;  %p330_p3 = scmp.eq.s32.totalorder %s6328_s15, 1 }
  0x13   : > { %p6329_p5 = scmp.ge.s32.totalorder %s7103_s10, 1  ;;  %p363_p7 = scmp.lt.s32.totalorder %s7103_s10, 3 }
  0x14   : > { %p7240_p4 = por %p10270_p1, %p59_p0  ;;  %p7245_p6 = por %p330_p3, %p59_p0 }
  0x15   : > { %p7250_p8 = pnand %p6329_p5, %p363_p7  ;;  %s7105_s19 = smov [#allocation11]  }
  0x16   : > { %s10310_s16 = scalar_select %p7240_p4, 1, 0 }
  0x17   : > { %s10311_s17 = scalar_select %p7245_p6, 1, 0 }
  0x18   : > { %s10313_s18 = scalar_select %p7250_p8, 1, 0 }
  0x19   : > { %10312 = sst [smem:[#allocation24_spill]] %s10311_s17  ;;  %s379_s20 = sshll.u32 %s7105_s19, 4  ;;  %s380_s20 = int_to_ptr.vmem [resolvable:$true] %s379_s20 }
  0x1a   : > { %p6722_p10 = pneg %p7250_p8  ;;  %s7106_s21 = smov [#allocation12]  }
  0x1b   : > { %s392_s22 = sshll.u32 %s7106_s21, 4  ;;  %s10315_s4 = sld [smem:[#allocation41_spill]]  ;;  %s7263_s22 = int_to_ptr.vmem [resolvable:$true] %s392_s22 }
  0x1c   : > { %p7259_p11 = pnand %p6722_p10, %p10270_p1 }
  0x1e   : > { %p6879_p13 = pneg %p7259_p11 }
  0x21   : > { %s6877_s26 = scalar_lea.hbm %s10315_s4, 128 }
  0x22   : > { %p6878_p12 = scmp.ne.s32.totalorder %s10315_s4, %s6877_s26  ;;  %p6884_p5 = scmp.lt.u32.totalorder %s6877_s26, %s10315_s4 }
  0x24   : > { %p6880_p0 = pnand %p6879_p13, %p6878_p12 }
  0x26   : > { %p6881_p3 = pneg %p6880_p0 }
  0x28   : > { %p6886_p7 = pnand %p6884_p5, %p6881_p3 }
  0x2a   : > { %6889 = shalt.err (!%p6886_p7)
}
  0x2b   : > { %s6890_s21 = scalar_lea.vmem %s380_s20, 128  ;;  %p6898_p2 = scmp.lt.s32.totalorder %s380_s20, %s380_s20 }
  0x2c   : > { %p6891_p10 = scmp.ne.s32.totalorder %s380_s20, %s6890_s21  ;;  %p6899_p6 = scmp.lt.s32.totalorder %s6890_s21, %s6890_s21 }
  0x2e   : > { %p6893_p9 = pnand %p6891_p10, %p6879_p13  ;;  %p6900_p4 = por %p6899_p6, %p6898_p2 }
  0x30   : > { %p6894_p1 = pneg %p6893_p9 }
  0x32   : > { %p6901_p8 = pnand %p6900_p4, %p6894_p1 }
  0x34   : > { %6904 = shalt.err (!%p6901_p8)
}
  0x35   : > { %6725 = dma.hbm_to_vmem [thread:$0]  (!%p7259_p11), %s10315_s4, 128, %s380_s20, [#allocation10]  }
  0x36   : > { %s10316_s6 = sld [smem:[#allocation42_spill]] }
  0x3c   : > { %s6905_s28 = scalar_lea.hbm %s10316_s6, 256 }
  0x3d   : > { %p6906_p9 = scmp.ne.s32.totalorder %s10316_s6, %s6905_s28  ;;  %p6912_p4 = scmp.lt.u32.totalorder %s6905_s28, %s10316_s6 }
  0x3f   : > { %p6908_p2 = pnand %p6906_p9, %p6879_p13 }
  0x41   : > { %p6909_p1 = pneg %p6908_p2 }
  0x43   : > { %p6914_p6 = pnand %p6912_p4, %p6909_p1 }
  0x45   : > { %6917 = shalt.err (!%p6914_p6)
}
  0x46   : > { %s6918_s20 = scalar_lea.vmem %s7263_s22, 256  ;;  %p6926_p3 = scmp.lt.s32.totalorder %s7263_s22, %s7263_s22 }
  0x47   : > { %p6919_p8 = scmp.ne.s32.totalorder %s7263_s22, %s6918_s20  ;;  %p6927_p5 = scmp.lt.s32.totalorder %s6918_s20, %s6918_s20 }
  0x49   : > { %p6921_p12 = pnand %p6919_p8, %p6879_p13  ;;  %p6928_p7 = por %p6927_p5, %p6926_p3 }
  0x4b   : > { %p6922_p0 = pneg %p6921_p12 }
  0x4d   : > { %p6929_p10 = pnand %p6928_p7, %p6922_p0 }
  0x4f   : > { %6932 = shalt.err (!%p6929_p10)
}
  0x50   : > { %s7107_s17 = smov 128   ;;  %s7108_s24 = smov 8  }
  0x51   : > { %6728 = dma.hbm_to_vmem [thread:$0]  (!%p7259_p11), %s10316_s6, 256, %s7263_s22, [#allocation13], %s7107_s17, %s7107_s17, %s7108_s24  }
  0x52   : > { %s7313_s27 = sadd.s32 1, %s7103_s10   ;;  %s46_s28 = sadd.s32 1, %s7099_s14 }
  0x53   : > { %s43_s15 = ssub.s32 %s7103_s10, %s7313_s27  ;;  %p53_p13 = scmp.ne.s32.totalorder %s7099_s14, %s7095_s30 }
  0x54   : > { %p44_p9 = scmp.eq.s32.totalorder %s43_s15, 0  ;;  %p54_p2 = scmp.eq.s32.totalorder %s7103_s10, 0 }
  0x55   : > { %p10317_p1 = scmp.eq.s32.totalorder %s7231_s11, 1  ;;  %p6745_p6 = scmp.lt.s32.totalorder %s7103_s10, 2 }
  0x56   : > { %s7329_s23 = scalar_select %p44_p9, %s7099_s14, %s46_s28  }
  0x57   : > { %p7323_p4 = por %p10317_p1, %p53_p13  ;;  %p55_p8 = por %p54_p2, %p53_p13 }
  0x58   : > { %10319 = sst [smem:[#allocation25_spill]] %s7329_s23  ;;  %s7332_s21 = sand.u32 1, %s7099_s14  }
  0x59   : > { %s10318_s19 = scalar_select %p7323_p4, 1, 0 }
  0x5a   : > { %s6333_s22 = sshll.u32 %s7332_s21, 4  ;;  %s6413_s20 = sshll.u32 %s7103_s10, 8 }
  0x5b   : > { %s10320_s0 = sld [smem:[#allocation40_spill]]  ;;  %s425_s26 = scalar_lea.vmem [#allocation6], %s6333_s22 }
  0x5c   : > { %s433_s15 = sshll.u32 %s425_s26, 4  ;;  %p7343_p11 = pnand %p6745_p6, %p55_p8  ;;  %s7341_s15 = int_to_ptr.vmem [resolvable:$true] %s433_s15 }
  0x5d   : > { %s422_s6 = scalar_lea.sflag [#allocation7], %s7332_s21 }
  0x5e   : > { %p6935_p0 = pneg %p7343_p11 }
  0x61   : > { %s7339_s25 = scalar_lea.hbm %s10320_s0, %s6413_s20  ;;  %s6938_s17 = scalar_lea.hbm %s10320_s0, 512 }
  0x62   : > { %s6933_s23 = scalar_lea.hbm %s7339_s25, 256  ;;  %p6939_p7 = scmp.lt.u32.totalorder %s7339_s25, %s10320_s0 }
  0x63   : > { %p6934_p12 = scmp.ne.s32.totalorder %s7339_s25, %s6933_s23  ;;  %p6940_p10 = scmp.lt.u32.totalorder %s6938_s17, %s6933_s23 }
  0x64   : > { %p6942_p9 = scmp.lt.u32.totalorder %s6933_s23, %s7339_s25 }
  0x65   : > { %p6936_p3 = pnand %p6935_p0, %p6934_p12  ;;  %p6941_p13 = por %p6940_p10, %p6939_p7 }
  0x67   : > { %p6937_p5 = pneg %p6936_p3  ;;  %p6943_p2 = por %p6942_p9, %p6941_p13 }
  0x69   : > { %p6944_p1 = pnand %p6943_p2, %p6937_p5 }
  0x6b   : > { %6947 = shalt.err (!%p6944_p1)
}
  0x6c   : > { %s6948_s4 = scalar_lea.vmem %s7341_s15, 256  ;;  %s7109_s22 = smov [#allocation6]  }
  0x6d   : > { %p6949_p6 = scmp.ne.s32.totalorder %s7341_s15, %s6948_s4  ;;  %s6953_s20 = sshll.u32 %s7109_s22, 4  ;;  %s6954_s20 = int_to_ptr.vmem [resolvable:$false] %s6953_s20 }
  0x6e   : > { %s6955_s24 = scalar_lea.vmem %s6954_s20, 512  ;;  %p6956_p3 = scmp.lt.s32.totalorder %s7341_s15, %s6954_s20 }
  0x6f   : > { %p6951_p8 = pnand %p6949_p6, %p6935_p0  ;;  %p6957_p7 = scmp.lt.s32.totalorder %s6955_s24, %s6948_s4 }
  0x71   : > { %p6952_p12 = pneg %p6951_p8  ;;  %p6958_p10 = por %p6957_p7, %p6956_p3 }
  0x73   : > { %p6959_p13 = pnand %p6958_p10, %p6952_p12 }
  0x75   : > { %6962 = shalt.err (!%p6959_p13)
}
  0x76   : > { %6732 = dma.hbm_to_vmem [thread:$0]  (!%p7343_p11), %s7339_s25, 256, %s7341_s15, %s422_s6  }
  0x77   : > { %s6336_s23 = sshll.u32 %s7103_s10, 4  ;;  %s450_s17 = scalar_lea.vmem [#allocation9], %s7332_s21 }
  0x78   : > { %s457_s26 = sshll.u32 %s450_s17, 4  ;;  %s7379_s20 = scalar_lea.hbm %s10258_s2, %s6336_s23  ;;  %s458_s26 = int_to_ptr.vmem [resolvable:$true] %s457_s26 }
  0x79   : > { %s10322_s4 = sand.u32 1, %s7103_s10   ;;  %s6963_s14 = scalar_lea.hbm %s7379_s20, 16 }
  0x7a   : > { %s448_s24 = scalar_lea.sflag [#allocation10], %s10322_s4  ;;  %p6964_p5 = scmp.ne.s32.totalorder %s7379_s20, %s6963_s14 }
  0x7b   : > { %s6968_s25 = scalar_lea.hbm %s10258_s2, 32  ;;  %p6969_p1 = scmp.lt.u32.totalorder %s7379_s20, %s10258_s2 }
  0x7c   : > { %p6966_p9 = pnand %p6964_p5, %p6935_p0  ;;  %p6970_p6 = scmp.lt.u32.totalorder %s6968_s25, %s6963_s14 }
  0x7d   : > { %p6972_p12 = scmp.lt.u32.totalorder %s6963_s14, %s7379_s20 }
  0x7e   : > { %p6967_p2 = pneg %p6966_p9  ;;  %p6971_p8 = por %p6970_p6, %p6969_p1 }
  0x80   : > { %p6973_p3 = por %p6972_p12, %p6971_p8 }
  0x82   : > { %p6974_p7 = pnand %p6973_p3, %p6967_p2 }
  0x84   : > { %6977 = shalt.err (!%p6974_p7)
}
  0x85   : > { %s6978_s23 = scalar_lea.vmem %s458_s26, 16  ;;  %s7110_s17 = smov [#allocation9]  }
  0x86   : > { %p6979_p10 = scmp.ne.s32.totalorder %s458_s26, %s6978_s23  ;;  %s6983_s22 = sshll.u32 %s7110_s17, 4  ;;  %s6984_s22 = int_to_ptr.vmem [resolvable:$false] %s6983_s22 }
  0x87   : > { %s6985_s4 = scalar_lea.vmem %s6984_s22, 32  ;;  %p6986_p9 = scmp.lt.s32.totalorder %s458_s26, %s6984_s22 }
  0x88   : > { %p6981_p13 = pnand %p6979_p10, %p6935_p0  ;;  %p6987_p4 = scmp.lt.s32.totalorder %s6985_s4, %s6978_s23 }
  0x8a   : > { %p6982_p5 = pneg %p6981_p13  ;;  %p6988_p1 = por %p6987_p4, %p6986_p9 }
  0x8c   : > { %p6989_p6 = pnand %p6988_p1, %p6982_p5 }
  0x8e   : > { %6992 = shalt.err (!%p6989_p6)
}
  0x8f   : > { %6735 = dma.hbm_to_vmem [thread:$0]  (!%p7343_p11), %s7379_s20, 16, %s458_s26, %s448_s24  }
  0x90   : > { %p10323_p2 = scmp.ne.s32.totalorder %s10313_s18, 0 }
  0x92   : > { %466 = sbr.rel (%p10323_p2) target bundleno = 2437 (0x985), region = 68 }
  0x99   : > { %s7405_s14 = sand.u32 1, %s7095_s30   ;;  %p10324_p4 = scmp.ne.s32.totalorder %s10310_s16, 0 }
  0x9a   : > { %s10276_s6 = sshll.u32 %s7405_s14, 4  ;;  %s469_s21 = scalar_lea.sflag [#allocation7], %s7405_s14 }
  0x9b   : > { %s7411_s25 = scalar_lea.vmem [#allocation6], %s10276_s6 }
  0x9c   : > { %7066 = dma.done.wait (%p10324_p4), %s469_s21, 256  }
  0x9d   : > { %7068 = vsyncadd (%p10324_p4), %s469_s21, 4294967040  ;;  %s477_s18 = sand.u32 1, %s7231_s11   ;;  %s480_s26 = scalar_lea.vmem [#allocation9], %s7405_s14 }
  0x9e   : > { %s478_s28 = scalar_lea.sflag [#allocation10], %s477_s18 }
  0x9f   : > { %7070 = dma.done.wait (%p10324_p4), %s478_s28, 16  }
  0xa0   : > { %7072 = vsyncadd (%p10324_p4), %s478_s28, 4294967280  ;;  %p10325_p11 = scmp.eq.s32.totalorder %s7231_s11, 0 }
  0xa2   : > { %7074 = dma.done.wait (%p10325_p11), [#allocation10], 128   ;;  %p10326_p0 = pmov %p10325_p11 }
  0xa4   : > { %7076 = vsyncadd (%p10326_p0), [#allocation10], 4294967168  ;;  %p10327_p8 = pmov %p10326_p0 }
  0xa5   : > { %p10328_p12 = pmov %p10326_p0 }
  0xa6   : > { %7078 = dma.done.wait (%p10327_p8), [#allocation13], 256  }
  0xa7   : > { %7080 = vsyncadd (%p10328_p12), [#allocation13], 4294967040  ;;  %p544_p3 = scmp.lt.s32.totalorder %s7231_s11, 1  ;;  %s7111_s23 = smov 120   ;;  %v7468_v11 = vld [vmem:[#allocation11] sm:$0xff]  ;;  %v10290_v12 = vmov 0.0  }
  0xa8   : > { %6480 = vmatprep.subr.mxu0 %v10290_v12  ;;  %vm7113_vm0 = vmmov 0   ;;  %vm555_vm1 = vcmask 64512   ;;  %v7477_v13 = vld [vmem:[%s10261_s5] sm:$0xff]  ;;  %6505 = vmatprep.subr.mxu1 %v10290_v12  ;;  %s7114_s4 = smov 112   ;;  %s7115_s21 = smov 104   ;;  %vm629_vm2 = vcmask 130048  }
  0xa9   : > { %s545_s20 = scalar_select %p544_p3, %s7231_s11, 1  ;;  %6482 = vmatprep.mubr.msk.f32.mxu0 %vm7113_vm0, %v10290_v12  ;;  %6481 = vmatpush3.msra.mxu0 %v7468_v11  ;;  %v7490_v16 = vld [vmem:[%s480_s26] sm:$0x1]  ;;  %vm802_vm4 = vcmask 261248   ;;  %vm998_vm5 = vcmask 392448   ;;  %vm1196_vm6 = vcmask 523648  }
  0xaa   : > { %6485 = vmatprep.subr.mxu0 %v10290_v12  ;;  %6506 = vmatpush3.msra.mxu1 %v7477_v13  ;;  %v7506_v18 = vmul.f32 0.46666667, %v7490_v16  ;;  %s7116_s18 = smov 96   ;;  %s7117_s28 = smov 88   ;;  %v7538_v45 = vmul.f32 0.53333336, %v7490_v16 }
  0xab   : > { %s6343_s24 = sshll.u32 %s545_s20, 3  ;;  %6507 = vmatprep.mubr.msk.f32.mxu1 %vm7113_vm0, %v10290_v12  ;;  %6515 = vmatprep.subr.mxu1 %v10290_v12  ;;  %s7118_s26 = smov 80   ;;  %vm1400_vm7 = vcmask 654848   ;;  %vm1604_vm8 = vcmask 786048   ;;  %vm1808_vm9 = vcmask 917248   ;;  %vm2012_vm10 = vcmask 1048448  }
  0xac   : > { %s547_s15 = scalar_lea.vmem %s10257_s1, %s6343_s24  ;;  %s7119_s20 = smov 72  }
  0xad   : > { %v7436_v0 = vld [vmem:[%s547_s15] sm:$0xff]  ;;  %s552_s24 = sld [smem:[#allocation4]]  ;;  %s7120_s0 = smov 16  }
  0xae   : > { %v7439_v1 = vmul.f32 0.4, %v7436_v0  ;;  %v7442_v2 = vmul.f32 0.33333334, %v7436_v0  ;;  %v7447_v3 = vmul.f32 0.8666667, %v7436_v0  ;;  %6483 = vmatmul.mubr.msk.f32.vlgmr.msra.gmra.mrb[0].mxu0 %vm555_vm1, %v7436_v0 }
  0xaf   : > { %v7452_v4 = vmul.f32 0.8, %v7436_v0  ;;  %v1927_v5 = vmul.f32 0.26666668, %v7436_v0  ;;  %v1926_v6 = vmul.f32 0.73333335, %v7436_v0  ;;  %6486 = vmatpush3.msra.mxu0 %v7477_v13  ;;  %6487 = vmatprep.mubr.msk.f32.mxu0 %vm7113_vm0, %v10290_v12 }
  0xb0   : > { %1113 = vrot.lane.b32.xlu0 %v7439_v1, %s7111_s23  ;;  %1521 = vrot.lane.b32.xlu1 %v7442_v2, %s7111_s23  ;;  %v1722_v7 = vmul.f32 0.2, %v7436_v0  ;;  %v1518_v8 = vmul.f32 0.6666667, %v7436_v0  ;;  %v1314_v9 = vmul.f32 0.13333334, %v7436_v0 }
  0xb1   : > { %v1110_v10 = vmul.f32 0.6, %v7436_v0  ;;  %v7483_v14 = vmul.f32 0.06666667, %v7436_v0  ;;  %v7486_v15 = vmul.f32 0.53333336, %v7436_v0  ;;  %6490 = vmatprep.subr.mxu0 %v10290_v12 }
  0xb2   : > { %v719_v17 = vmul.f32 0.46666667, %v7436_v0  ;;  %6488 = vmatmul.mubr.msk.f32.vlgmr.msra.gmra.mrb[2].mxu0 %vm555_vm1, %v7490_v16  ;;  %v915_v19 = vmul.f32 0.93333334, %v7436_v0  ;;  %s7121_s16 = smov 32   ;;  %s7122_s15 = smov 48  }
  0xb3   : > { %6491 = vmatpush3.msra.mxu0 %v7468_v11  ;;  %6492 = vmatprep.mubr.msk.f32.mxu0 %vm7113_vm0, %v10290_v12  ;;  %s10277_s17 = smov 64   ;;  %s7125_s6 = smov 17  }
  0xb4   : > { %1317 = vrot.lane.b32.xlu0 %v7447_v3, %s7111_s23  ;;  %1725 = vrot.lane.b32.xlu1 %v7452_v4, %s7111_s23  ;;  %s10364_s22 = smov 1   ;;  %p10385_p10 = scmp.ne.s32.totalorder %s10318_s19, 0 }
  0xb5   : > { %6495 = vmatprep.subr.mxu0 %v10290_v12 }
  0xb8   : > { %1929 = vrot.lane.b32.xlu0 %v1927_v5, %s7111_s23  ;;  %2131 = vrot.lane.b32.xlu1 %v1926_v6, %s7111_s23 }
  0xbc   : > { %2305 = vrot.lane.b32.xlu0 %v1722_v7, %s7111_s23  ;;  %2501 = vrot.lane.b32.xlu1 %v1518_v8, %s7111_s23 }
  0xc0   : > { %2697 = vrot.lane.b32.xlu0 %v1314_v9, %s7111_s23  ;;  %2893 = vrot.lane.b32.xlu1 %v1110_v10, %s7111_s23 }
  0xc4   : > { %3089 = vrot.lane.b32.xlu0 %v7483_v14, %s7111_s23  ;;  %3285 = vrot.lane.b32.xlu1 %v7486_v15, %s7111_s23 }
  0xc8   : > { %721 = vrot.lane.b32.xlu0 %v719_v17, %s7111_s23  ;;  %807 = vrot.lane.b32.xlu1 %v7506_v18, %s7111_s23 }
  0xcc   : > { %917 = vrot.lane.b32.xlu0 %v915_v19, %s7111_s23 }
 0x122   : > { %v1114_v20 = vpop.permute.xlu0 %1113  ;;  %v1522_v21 = vpop.permute.xlu1 %1521 }
 0x123   : > { %v1116_v22 = vadd.f32 %v1114_v20, %v1110_v10  ;;  %v1524_v23 = vadd.f32 %v1522_v21, %v1518_v8  ;;  %v7623_v8 = vstv %s552_s24  ;;  %v10289_v10 = vlaneseq  ;;  %s10365_s24 = smov 127  }
 0x125   : > { %1118 = vrot.lane.b32.xlu1 %v1116_v22, %s7111_s23  ;;  %vm7627_vm3 = vcmp.lt.s32.totalorder %v10289_v10, 16 }
 0x126   : > { %v1318_v24 = vpop.permute.xlu0 %1317  ;;  %v1726_v25 = vpop.permute.xlu1 %1725 }
 0x127   : > { %v1320_v26 = vadd.f32 %v1318_v24, %v1314_v9  ;;  %v1728_v27 = vadd.f32 %v1726_v25, %v1722_v7 }
 0x129   : > { %1322 = vrot.lane.b32.xlu0 %v1320_v26, %s7111_s23  ;;  %1526 = vrot.lane.b32.xlu1 %v1524_v23, %s7114_s4 }
 0x12a   : > { %v1930_v28 = vpop.permute.xlu0 %1929  ;;  %v2132_v29 = vpop.permute.xlu1 %2131 }
 0x12b   : > { %v1932_v30 = vadd.f32 %v1930_v28, %v1926_v6  ;;  %v2134_v31 = vadd.f32 %v2132_v29, %v1927_v5 }
 0x12d   : > { %1730 = vrot.lane.b32.xlu0 %v1728_v27, %s7114_s4  ;;  %1934 = vrot.lane.b32.xlu1 %v1932_v30, %s7115_s21 }
 0x12e   : > { %v2306_v32 = vpop.permute.xlu0 %2305  ;;  %v2502_v33 = vpop.permute.xlu1 %2501 }
 0x12f   : > { %v2308_v34 = vadd.f32 %v2306_v32, %v7452_v4  ;;  %v2504_v35 = vadd.f32 %v2502_v33, %v7442_v2 }
 0x131   : > { %2136 = vrot.lane.b32.xlu0 %v2134_v31, %s7115_s21  ;;  %2310 = vrot.lane.b32.xlu1 %v2308_v34, %s7116_s18 }
 0x132   : > { %v2698_v36 = vpop.permute.xlu0 %2697  ;;  %v2894_v37 = vpop.permute.xlu1 %2893 }
 0x133   : > { %v2700_v38 = vadd.f32 %v2698_v36, %v7447_v3  ;;  %v2896_v39 = vadd.f32 %v2894_v37, %v7439_v1 }
 0x135   : > { %2506 = vrot.lane.b32.xlu0 %v2504_v35, %s7116_s18  ;;  %2702 = vrot.lane.b32.xlu1 %v2700_v38, %s7117_s28 }
 0x136   : > { %v3090_v40 = vpop.permute.xlu0 %3089  ;;  %v3286_v41 = vpop.permute.xlu1 %3285 }
 0x137   : > { %v3092_v42 = vadd.f32 %v3090_v40, %v915_v19  ;;  %v3288_v43 = vadd.f32 %v3286_v41, %v719_v17 }
 0x139   : > { %2898 = vrot.lane.b32.xlu0 %v2896_v39, %s7117_s28  ;;  %3094 = vrot.lane.b32.xlu1 %v3092_v42, %s7118_s26 }
 0x13a   : > { %v722_v44 = vpop.permute.xlu0 %721  ;;  %v808_v47 = vpop.permute.xlu1 %807 }
 0x13b   : > { %v724_v46 = vadd.f32 %v722_v44, %v7486_v15  ;;  %v810_v48 = vadd.f32 %v808_v47, %v7538_v45 }
 0x13d   : > { %3290 = vrot.lane.b32.xlu0 %v3288_v43, %s7118_s26  ;;  %3480 = vrot.lane.b32.xlu1 %v7436_v0, %s7119_s20 }
 0x13e   : > { %6493 = vmatmul.mubr.msk.f32.vlgmr.msra.gmra.mrb[4].mxu0 %vm555_vm1, %v724_v46  ;;  %v918_v49 = vpop.permute.xlu0 %917 }
 0x13f   : > { %6496 = vmatpush3.msra.mxu0 %v7477_v13  ;;  %6497 = vmatprep.mubr.msk.f32.mxu0 %vm7113_vm0, %v10290_v12  ;;  %v920_v50 = vadd.f32 %v918_v49, %v7483_v14 }
 0x140   : > { %6500 = vmatprep.subr.mxu0 %v10290_v12 }
 0x142   : > { %6498 = vmatmul.mubr.msk.f32.vlgmr.msra.gmra.mrb[6].mxu0 %vm555_vm1, %v810_v48 }
 0x143   : > { %6501 = vmatpush3.msra.mxu0 %v7468_v11  ;;  %6502 = vmatprep.mubr.msk.f32.mxu0 %vm7113_vm0, %v10290_v12 }
 0x144   : > { %6510 = vmatprep.subr.mxu0 %v10290_v12 }
 0x146   : > { %6503 = vmatmul.mubr.msk.f32.vlgmr.msra.gmra.mrb[8].mxu0 %vm555_vm1, %v920_v50 }
 0x147   : > { %6511 = vmatpush3.msra.mxu0 %v7468_v11  ;;  %6512 = vmatprep.mubr.msk.f32.mxu0 %vm7113_vm0, %v10290_v12 }
 0x148   : > { %6520 = vmatprep.subr.mxu0 %v10290_v12 }
 0x181   : > { %v625_v51 = vpop.f32.mrb[0].mxu0 }
 0x182   : > { %630 = vst.msk [vmem:[#allocation2] sm:$0xff] %vm629_vm2, %v625_v51  ;;  %v6484_v52 = vpop.f32.mrb[1].mxu0 }
 0x183   : > { %v7653_v52 = vmul.f32 0.4, %v7490_v16 }
 0x185   : > { %v700_v54 = vpop.f32.mrb[2].mxu0 }
 0x186   : > { %v6489_v55 = vpop.f32.mrb[3].mxu0  ;;  %v6346_v4 = vmul.f32 -1.442695, %v700_v54  ;;  %v7663_v54 = vmul.f32 0.8, %v7490_v16 }
 0x187   : > { %v7666_v55 = vmul.f32 0.33333334, %v7490_v16 }
 0x188   : > { %6809 = vpow2.f32 %v6346_v4 }
 0x192   : > { %v6810_v5 = vpop.eup %6809 }
 0x193   : > { %v707_v6 = vadd.f32 1.0, %v6810_v5 }
 0x195   : > { %6811 = vrcp.f32 %v707_v6 }
 0x197   : > { %v1119_v53 = vpop.permute.xlu1 %1118 }
 0x198   : > { %6513 = vmatmul.mubr.msk.f32.vlgmr.msra.gmra.mrb[10].mxu0 %vm555_vm1, %v1119_v53  ;;  %v7656_v53 = vmul.f32 0.8666667, %v7490_v16 }
 0x199   : > { %6521 = vmatpush3.msra.mxu0 %v7468_v11  ;;  %6522 = vmatprep.mubr.msk.f32.mxu0 %vm7113_vm0, %v10290_v12 }
 0x19a   : > { %6530 = vmatprep.subr.mxu0 %v10290_v12 }
 0x19b   : > { %v1323_v56 = vpop.permute.xlu0 %1322  ;;  %v1527_v57 = vpop.permute.xlu1 %1526 }
 0x19c   : > { %6523 = vmatmul.mubr.msk.f32.vlgmr.msra.gmra.mrb[12].mxu0 %vm555_vm1, %v1323_v56  ;;  %v7124_v56 = vmov 0  }
 0x19d   : > { %6531 = vmatpush3.msra.mxu0 %v7468_v11  ;;  %6532 = vmatprep.mubr.msk.f32.mxu0 %vm7113_vm0, %v10290_v12 }
 0x19e   : > { %6540 = vmatprep.subr.mxu0 %v10290_v12  ;;  %6807 = vset.pattern.permute.xlu1 %v7124_v56 }
 0x19f   : > { %v1731_v58 = vpop.permute.xlu0 %1730  ;;  %v1935_v59 = vpop.permute.xlu1 %1934  ;;  %6806 = vset.pattern.permute.xlu0 %v7124_v56 }
 0x1a0   : > { %6533 = vmatmul.mubr.msk.f32.vlgmr.msra.gmra.mrb[14].mxu0 %vm555_vm1, %v1527_v57  ;;  %v6812_v7 = vpop.eup %6811  ;;  %v7673_v57 = vmul.f32 0.73333335, %v7490_v16 }
 0x1a1   : > { %6541 = vmatpush3.msra.mxu0 %v7468_v11  ;;  %6542 = vmatprep.mubr.msk.f32.mxu0 %vm7113_vm0, %v10290_v12  ;;  %v711_v9 = vmul.f32 %v6812_v7, %v7623_v8 }
 0x1a2   : > { %6550 = vmatprep.subr.mxu0 %v10290_v12 }
 0x1a3   : > { %v2137_v60 = vpop.permute.xlu0 %2136  ;;  %v2311_v61 = vpop.permute.xlu1 %2310 }
 0x1a4   : > { %6543 = vmatmul.mubr.msk.f32.vlgmr.msra.gmra.mrb[16].mxu0 %vm555_vm1, %v1731_v58  ;;  %v7676_v58 = vmul.f32 0.26666668, %v7490_v16 }
 0x1a5   : > { %6551 = vmatpush3.msra.mxu0 %v7468_v11  ;;  %6552 = vmatprep.mubr.msk.f32.mxu0 %vm7113_vm0, %v10290_v12 }
 0x1a6   : > { %6560 = vmatprep.subr.mxu0 %v10290_v12 }
 0x1a7   : > { %v2507_v62 = vpop.permute.xlu0 %2506  ;;  %v2703_v63 = vpop.permute.xlu1 %2702 }
 0x1a8   : > { %6553 = vmatmul.mubr.msk.f32.vlgmr.msra.gmra.mrb[18].mxu0 %vm555_vm1, %v1935_v59  ;;  %v7681_v59 = vmul.f32 0.6666667, %v7490_v16 }
 0x1a9   : > { %6561 = vmatpush3.msra.mxu0 %v7468_v11  ;;  %6562 = vmatprep.mubr.msk.f32.mxu0 %vm7113_vm0, %v10290_v12 }
 0x1aa   : > { %6570 = vmatprep.subr.mxu0 %v10290_v12 }
 0x1ab   : > { %v2899_v0 = vpop.permute.xlu0 %2898  ;;  %v3095_v1 = vpop.permute.xlu1 %3094 }
 0x1ac   : > { %6563 = vmatmul.mubr.msk.f32.vlgmr.msra.gmra.mrb[20].mxu0 %vm555_vm1, %v2137_v60  ;;  %v7686_v60 = vmul.f32 0.2, %v7490_v16 }
 0x1ad   : > { %6571 = vmatpush3.msra.mxu0 %v7468_v11  ;;  %6572 = vmatprep.mubr.msk.f32.mxu0 %vm7113_vm0, %v10290_v12 }
 0x1ae   : > { %6580 = vmatprep.subr.mxu0 %v10290_v12 }
 0x1af   : > { %v3291_v2 = vpop.permute.xlu0 %3290  ;;  %v3481_v3 = vpop.permute.xlu1 %3480 }
 0x1b0   : > { %6573 = vmatmul.mubr.msk.f32.vlgmr.msra.gmra.mrb[22].mxu0 %vm555_vm1, %v2311_v61  ;;  %v1198_v61 = vmul.f32 0.6, %v7490_v16 }
 0x1b1   : > { %6581 = vmatpush3.msra.mxu0 %v7468_v11  ;;  %6582 = vmatprep.mubr.msk.f32.mxu0 %vm7113_vm0, %v10290_v12 }
 0x1b2   : > { %6590 = vmatprep.subr.mxu0 %v10290_v12 }
 0x1b4   : > { %6583 = vmatmul.mubr.msk.f32.vlgmr.msra.gmra.mrb[24].mxu0 %vm555_vm1, %v2507_v62  ;;  %v1402_v62 = vmul.f32 0.13333334, %v7490_v16 }
 0x1b5   : > { %6591 = vmatpush3.msra.mxu0 %v7468_v11  ;;  %6592 = vmatprep.mubr.msk.f32.mxu0 %vm7113_vm0, %v10290_v12 }
 0x1b6   : > { %6600 = vmatprep.subr.mxu0 %v10290_v12 }
 0x1b8   : > { %6593 = vmatmul.mubr.msk.f32.vlgmr.msra.gmra.mrb[26].mxu0 %vm555_vm1, %v2703_v63  ;;  %v3669_v63 = vld [vmem:[%s10263_s7 + $0x8] sm:$0xff] }
 0x1b9   : > { %6601 = vmatpush3.msra.mxu0 %v7468_v11  ;;  %6602 = vmatprep.mubr.msk.f32.mxu0 %vm7113_vm0, %v10290_v12 }
 0x1ba   : > { %6610 = vmatprep.subr.mxu0 %v10290_v12 }
 0x1bc   : > { %6603 = vmatmul.mubr.msk.f32.vlgmr.msra.gmra.mrb[28].mxu0 %vm555_vm1, %v2899_v0  ;;  %v3668_v0 = vld [vmem:[%s10263_s7] sm:$0xff] }
 0x1bd   : > { %6611 = vmatpush3.msra.mxu0 %v7468_v11  ;;  %6612 = vmatprep.mubr.msk.f32.mxu0 %vm7113_vm0, %v10290_v12 }
 0x1be   : > { %6620 = vmatprep.subr.mxu0 %v10290_v12 }
 0x1c0   : > { %6613 = vmatmul.mubr.msk.f32.vlgmr.msra.gmra.mrb[30].mxu0 %vm555_vm1, %v3095_v1  ;;  %v7703_v1 = vmul.f32 0.06666667, %v7490_v16 }
 0x1c1   : > { %6621 = vmatpush3.msra.mxu0 %v7468_v11  ;;  %6622 = vmatprep.mubr.msk.f32.mxu0 %vm7113_vm0, %v10290_v12 }
 0x1c2   : > { %6630 = vmatprep.subr.mxu0 %v10290_v12 }
 0x1c4   : > { %6623 = vmatmul.mubr.msk.f32.vlgmr.msra.gmra.mrb[32].mxu0 %vm555_vm1, %v3291_v2  ;;  %v7710_v2 = vmul.f32 0.93333334, %v7490_v16 }
 0x1c5   : > { %6631 = vmatpush3.msra.mxu0 %v7468_v11  ;;  %6632 = vmatprep.mubr.msk.f32.mxu0 %vm7113_vm0, %v10290_v12  ;;  %v712_v11 = vadd.f32 1.0, %v711_v9 }
 0x1c7   : > { %717 = vst.msk [vmem:[#allocation3] sm:$0x1] %vm7627_vm3, %v712_v11 }
 0x1c8   : > { %6633 = vmatmul.mubr.msk.f32.vlgmr.msra.gmra.mrb[34].mxu0 %vm555_vm1, %v3481_v3 }
 0x1c9   : > { %3750 = vmatprep.mubr.f32.mxu0 %v10290_v12 }
 0x211   : > { %v794_v15 = vpop.f32.mrb[4].mxu0 }
 0x212   : > { %v6494_v17 = vpop.f32.mrb[5].mxu0  ;;  %799 = vrot.lane.b32.xlu1 %v794_v15, %s7120_s0 }
 0x215   : > { %v7634_v19 = vpop.f32.mrb[6].mxu0 }
 0x216   : > { %v6499_v20 = vpop.f32.mrb[7].mxu0 }
 0x219   : > { %v990_v21 = vpop.f32.mrb[8].mxu0 }
 0x21a   : > { %v6504_v22 = vpop.f32.mrb[9].mxu0  ;;  %995 = vrot.lane.b32.xlu1 %v990_v21, %s7121_s16 }
 0x21b   : > { %v7727_v22 = vshrl.u32 %v10289_v10, 7 }
 0x26b   : > { %v1188_v23 = vpop.f32.mrb[10].mxu0 }
 0x26c   : > { %1193 = vrot.lane.b32.xlu1 %v1188_v23, %s7122_s15  ;;  %v6514_v24 = vpop.f32.mrb[11].mxu0  ;;  %v549_v23 = vld [vmem:[%s7411_s25 + $0x8] sm:$0xff] }
 0x26d   : > { %v7731_v24 = vsub.s32 0, %v7727_v22 }
 0x26f   : > { %v1392_v25 = vpop.f32.mrb[12].mxu0 }
 0x270   : > { %1397 = vrot.lane.b32.xlu1 %v1392_v25, %s10277_s17  ;;  %v6524_v26 = vpop.f32.mrb[13].mxu0  ;;  %v548_v25 = vld [vmem:[%s7411_s25] sm:$0xff] }
 0x273   : > { %v1596_v27 = vpop.f32.mrb[14].mxu0 }
 0x274   : > { %1601 = vrot.lane.b32.xlu1 %v1596_v27, %s7118_s26  ;;  %v6534_v28 = vpop.f32.mrb[15].mxu0 }
 0x277   : > { %v1800_v29 = vpop.f32.mrb[16].mxu0 }
 0x278   : > { %1805 = vrot.lane.b32.xlu1 %v1800_v29, %s7116_s18  ;;  %v6544_v30 = vpop.f32.mrb[17].mxu0 }
 0x27b   : > { %v2004_v31 = vpop.f32.mrb[18].mxu0 }
 0x27c   : > { %2009 = vrot.lane.b32.xlu1 %v2004_v31, %s7114_s4  ;;  %v6554_v32 = vpop.f32.mrb[19].mxu0 }
 0x27f   : > { %v2206_v33 = vpop.f32.mrb[20].mxu0 }
 0x280   : > { %2210 = vst.msk [vmem:[#allocation2 + $0x8] sm:$0xff] %vm629_vm2, %v2206_v33  ;;  %v6564_v34 = vpop.f32.mrb[21].mxu0  ;;  %1405 = vrot.lane.b32.xlu1 %v7656_v53, %s7111_s23 }
 0x283   : > { %v2380_v35 = vpop.f32.mrb[22].mxu0 }
 0x284   : > { %2385 = vrot.lane.b32.xlu0 %v2380_v35, %s7120_s0  ;;  %v6574_v36 = vpop.f32.mrb[23].mxu0  ;;  %v800_v37 = vpop.permute.xlu1 %799  ;;  %1813 = vrot.lane.b32.xlu1 %v7663_v54, %s7111_s23 }
 0x285   : > { %803 = vst.msk [vmem:[#allocation2] sm:$0xff] %vm802_vm4, %v800_v37 }
 0x287   : > { %v2576_v38 = vpop.f32.mrb[24].mxu0 }
 0x288   : > { %2581 = vrot.lane.b32.xlu0 %v2576_v38, %s7121_s16  ;;  %v6584_v39 = vpop.f32.mrb[25].mxu0  ;;  %2212 = vrot.lane.b32.xlu1 %v7673_v57, %s7111_s23  ;;  %v3666_v38 = vld [vmem:[#allocation12] sm:$0xff] }
 0x28b   : > { %v2772_v40 = vpop.f32.mrb[26].mxu0 }
 0x28c   : > { %2777 = vrot.lane.b32.xlu0 %v2772_v40, %s7122_s15  ;;  %v6594_v41 = vpop.f32.mrb[27].mxu0  ;;  %v996_v42 = vpop.permute.xlu1 %995  ;;  %2586 = vrot.lane.b32.xlu1 %v7681_v59, %s7111_s23 }
 0x28d   : > { %999 = vst.msk [vmem:[#allocation2] sm:$0xff] %vm998_vm5, %v996_v42 }
 0x28f   : > { %v2968_v43 = vpop.f32.mrb[28].mxu0 }
 0x290   : > { %2973 = vrot.lane.b32.xlu0 %v2968_v43, %s10277_s17  ;;  %v6604_v44 = vpop.f32.mrb[29].mxu0  ;;  %2978 = vrot.lane.b32.xlu1 %v1198_v61, %s7111_s23  ;;  %s10279_s17 = smov 111  }
 0x293   : > { %v3164_v46 = vpop.f32.mrb[30].mxu0 }
 0x294   : > { %3169 = vrot.lane.b32.xlu0 %v3164_v46, %s7118_s26  ;;  %v6614_v47 = vpop.f32.mrb[31].mxu0  ;;  %3677 = vperm.xlu1 %6807, %v3669_v63   ;;  %v3667_v46 = vld [vmem:[#allocation12 + $0x8] sm:$0xff] }
 0x297   : > { %v3360_v48 = vpop.f32.mrb[32].mxu0 }
 0x298   : > { %3365 = vrot.lane.b32.xlu0 %v3360_v48, %s7116_s18  ;;  %v6624_v49 = vpop.f32.mrb[33].mxu0  ;;  %3174 = vrot.lane.b32.xlu1 %v7703_v1, %s7111_s23 }
 0x29b   : > { %v3550_v50 = vpop.f32.mrb[34].mxu0 }
 0x29c   : > { %3555 = vrot.lane.b32.xlu0 %v3550_v50, %s7114_s4  ;;  %v6634_v51 = vpop.f32.mrb[35].mxu0  ;;  %1003 = vrot.lane.b32.xlu1 %v7710_v2, %s7111_s23 }
 0x2a0   : > { %1201 = vrot.lane.b32.xlu0 %v7653_v52, %s7111_s23 }
 0x2a4   : > { %1609 = vrot.lane.b32.xlu0 %v7666_v55, %s7111_s23 }
 0x2a8   : > { %2017 = vrot.lane.b32.xlu0 %v7676_v58, %s7111_s23 }
 0x2ac   : > { %2390 = vrot.lane.b32.xlu0 %v7686_v60, %s7111_s23 }
 0x2b0   : > { %2782 = vrot.lane.b32.xlu0 %v1402_v62, %s7111_s23 }
 0x2b4   : > { %3672 = vperm.xlu0 %6806, %v3668_v0  }
 0x2b8   : > { %3370 = vrot.lane.b32.xlu0 %v7538_v45, %s7111_s23 }
 0x2de   : > { %v1194_v3 = vpop.permute.xlu1 %1193 }
 0x2df   : > { %1197 = vst.msk [vmem:[#allocation2] sm:$0xff] %vm1196_vm6, %v1194_v3 }
 0x2e2   : > { %v1398_v4 = vpop.permute.xlu1 %1397 }
 0x2e3   : > { %1401 = vst.msk [vmem:[#allocation2] sm:$0xff] %vm1400_vm7, %v1398_v4 }
 0x2e6   : > { %v1602_v5 = vpop.permute.xlu1 %1601 }
 0x2e7   : > { %1605 = vst.msk [vmem:[#allocation2] sm:$0xff] %vm1604_vm8, %v1602_v5 }
 0x2ea   : > { %v1806_v45 = vpop.permute.xlu1 %1805 }
 0x2eb   : > { %1809 = vst.msk [vmem:[#allocation2] sm:$0xff] %vm1808_vm9, %v1806_v45 }
 0x2ee   : > { %v2010_v6 = vpop.permute.xlu1 %2009 }
 0x2ef   : > { %2013 = vst.msk [vmem:[#allocation2] sm:$0xff] %vm2012_vm10, %v2010_v6 }
 0x2f2   : > { %v1406_v28 = vpop.permute.xlu1 %1405 }
 0x2f3   : > { %v1408_v31 = vadd.f32 %v1406_v28, %v1402_v62 }
 0x2f5   : > { %v1413_v35 = vrot.slane %v1408_v31, %v7731_v24 }
 0x2f6   : > { %v2386_v7 = vpop.permute.xlu0 %2385  ;;  %v3664_v26 = vld [vmem:[#allocation2] sm:$0xff]  ;;  %v1814_v37 = vpop.permute.xlu1 %1813 }
 0x2f7   : > { %2388 = vst.msk [vmem:[#allocation2 + $0x8] sm:$0xff] %vm802_vm4, %v2386_v7  ;;  %v6642_v33 = vpack.c.bf16 %v3664_v26, %v548_v25  ;;  %v1816_v40 = vadd.f32 %v1814_v37, %v7686_v60  ;;  %1414 = vrot.lane.b32.xlu1 %v1413_v35, %s7111_s23  ;;  %vm8206_vm4 = vcmp.ge.s32.totalorder %v10289_v10, 16 }
 0x2f9   : > { %v1821_v42 = vrot.slane %v1816_v40, %v7731_v24 }
 0x2fa   : > { %v2582_v9 = vpop.permute.xlu0 %2581  ;;  %v2213_v44 = vpop.permute.xlu1 %2212 }
 0x2fb   : > { %2584 = vst.msk [vmem:[#allocation2 + $0x8] sm:$0xff] %vm998_vm5, %v2582_v9  ;;  %v2215_v48 = vadd.f32 %v2213_v44, %v7676_v58  ;;  %1822 = vrot.lane.b32.xlu1 %v1821_v42, %s7114_s4  ;;  %v3562_v9 = vrot.slane %v7490_v16, %v7731_v24  ;;  %vm8211_vm5 = vcmp.lt.s32.totalorder %v10289_v10, 32 }
 0x2fd   : > { %v2220_v50 = vrot.slane %v2215_v48, %v7731_v24 }
 0x2fe   : > { %v2778_v11 = vpop.permute.xlu0 %2777  ;;  %v2587_v56 = vpop.permute.xlu1 %2586 }
 0x2ff   : > { %2780 = vst.msk [vmem:[#allocation2 + $0x8] sm:$0xff] %vm1196_vm6, %v2778_v11  ;;  %v2589_v60 = vadd.f32 %v2587_v56, %v7666_v55  ;;  %2221 = vrot.lane.b32.xlu1 %v2220_v50, %s7115_s21  ;;  %vm912_vm6 = vmand %vm8206_vm4, %vm8211_vm5  ;;  %vm1515_vm4 = vcmp.lt.s32.totalorder %v10289_v10, 80  ;;  %vm8280_vm5 = vcmp.ge.s32.totalorder %v10289_v10, 80 }
 0x301   : > { %v2594_v58 = vrot.slane %v2589_v60, %v7731_v24 }
 0x302   : > { %v2974_v15 = vpop.permute.xlu0 %2973 }
 0x303   : > { %2976 = vst.msk [vmem:[#allocation2 + $0x8] sm:$0xff] %vm1400_vm7, %v2974_v15  ;;  %2595 = vrot.lane.b32.xlu1 %v2594_v58, %s7116_s18  ;;  %vm1106_vm7 = vcmp.ge.s32.totalorder %v10289_v10, 32 }
 0x306   : > { %v3170_v17 = vpop.permute.xlu0 %3169 }
 0x307   : > { %3172 = vst.msk [vmem:[#allocation2 + $0x8] sm:$0xff] %vm1604_vm8, %v3170_v17  ;;  %vm1107_vm8 = vcmp.lt.s32.totalorder %v10289_v10, 48 }
 0x30a   : > { %v3366_v20 = vpop.permute.xlu0 %3365 }
 0x30b   : > { %3368 = vst.msk [vmem:[#allocation2 + $0x8] sm:$0xff] %vm1808_vm9, %v3366_v20  ;;  %vm1108_vm9 = vmand %vm1106_vm7, %vm1107_vm8  ;;  %vm1922_vm8 = vcmp.ge.s32.totalorder %v10289_v10, 96 }
 0x30e   : > { %v3556_v21 = vpop.permute.xlu0 %3555 }
 0x30f   : > { %3558 = vst.msk [vmem:[#allocation2 + $0x8] sm:$0xff] %vm2012_vm10, %v3556_v21  ;;  %vm1310_vm10 = vcmp.ge.s32.totalorder %v10289_v10, 48 }
 0x312   : > { %v1202_v27 = vpop.permute.xlu0 %1201 }
 0x313   : > { %v1204_v30 = vadd.f32 %v1202_v27, %v1198_v61  ;;  %v2979_v61 = vpop.permute.xlu1 %2978 }
 0x314   : > { %v2981_v63 = vadd.f32 %v2979_v61, %v7653_v52 }
 0x315   : > { %v1209_v34 = vrot.slane %v1204_v30, %v7731_v24 }
 0x316   : > { %v3665_v29 = vld [vmem:[#allocation2 + $0x8] sm:$0xff]  ;;  %v1610_v36 = vpop.permute.xlu0 %1609 }
 0x317   : > { %v6640_v32 = vpack.c.bf16 %v3665_v29, %v549_v23  ;;  %1210 = vrot.lane.b32.xlu0 %v1209_v34, %s7111_s23  ;;  %v1612_v39 = vadd.f32 %v1610_v36, %v7681_v59  ;;  %v7765_v3 = vpop.permute.xlu1 %3677  ;;  %s7126_s23 = smov 15  }
 0x319   : > { %6641 = vmatprep.subr.bf16.mxu0 %v6640_v32  ;;  %v1617_v41 = vrot.slane %v1612_v39, %v7731_v24  ;;  %v6349_v39 = vmul.f32 -1.442695, %v7634_v19 }
 0x31a   : > { %6643 = vmatpush1.bf16.msra.mxu0 %v6642_v33  ;;  %v2018_v43 = vpop.permute.xlu0 %2017 }
 0x31b   : > { %1618 = vrot.lane.b32.xlu0 %v1617_v41, %s7114_s4  ;;  %v2020_v47 = vadd.f32 %v2018_v43, %v7673_v57  ;;  %v3175_v5 = vpop.permute.xlu1 %3174  ;;  %6813 = vpow2.f32 %v6349_v39  ;;  %v7131_v41 = vmov 1966171168  }
 0x31c   : > { %v3177_v52 = vadd.f32 %v3175_v5, %v7710_v2  ;;  %v894_v42 = vunpack.c.l.s4 %v7131_v41 }
 0x31d   : > { %6392 = vmatmul.mubr.msk.f32.vlgmr.msra.gmra.mrb[36].mxu0 %vm629_vm2, %v3666_v38  ;;  %v2025_v49 = vrot.slane %v2020_v47, %v7731_v24  ;;  %v7921_v47 = vld [vmem:[%s10264_s8] sm:$0xff] }
 0x31e   : > { %3756 = vmatprep.mubr.f32.mxu0 %v10290_v12  ;;  %v2391_v51 = vpop.permute.xlu0 %2390  ;;  %v3182_v6 = vrot.slane %v3177_v52, %v7731_v24  ;;  %v4003_v48 = vcombine.high %v7921_v47, %v7921_v47 }
 0x31f   : > { %2026 = vrot.lane.b32.xlu0 %v2025_v49, %s7115_s21  ;;  %v2393_v59 = vadd.f32 %v2391_v51, %v7663_v54  ;;  %v2986_v54 = vrot.slane %v2981_v63, %v7731_v24  ;;  %v1004_v11 = vpop.permute.xlu1 %1003  ;;  %s10285_s21 = smov 1  }
 0x320   : > { %v1006_v15 = vadd.f32 %v1004_v11, %v7703_v1 }
 0x321   : > { %6393 = vmatmul.mubr.msk.f32.gmra.mrb[38].mxu0 %vm629_vm2, %v3667_v46  ;;  %v2398_v57 = vrot.slane %v2393_v59, %v7731_v24  ;;  %2987 = vrot.lane.b32.xlu1 %v2986_v54, %s7117_s28  ;;  %v895_v46 = vunpack.c.0.s8 %v894_v42 }
 0x322   : > { %v2783_v62 = vpop.permute.xlu0 %2782  ;;  %6508 = vmatmul.mubr.msk.f32.vlgmr.msra.gmra.mrb[0].mxu1 %vm555_vm1, %v1006_v15 }
 0x323   : > { %2399 = vrot.lane.b32.xlu0 %v2398_v57, %s7116_s18  ;;  %v2785_v0 = vadd.f32 %v2783_v62, %v7656_v53  ;;  %6516 = vmatpush3.msra.mxu1 %v7477_v13  ;;  %v7926_v50 = vsub.s32 %v895_v46, %v7727_v22 }
 0x324   : > { %6517 = vmatprep.mubr.msk.f32.mxu1 %vm7113_vm0, %v10290_v12  ;;  %6525 = vmatprep.subr.mxu1 %v10290_v12 }
 0x325   : > { %v2790_v55 = vrot.slane %v2785_v0, %v7731_v24  ;;  %v6814_v19 = vpop.eup %6813  ;;  %10331 = vst [vmem:[#allocation26_spill] sm:$0xff] %v7926_v50 }
 0x326   : > { %v887_v40 = vadd.f32 1.0, %v6814_v19 }
 0x327   : > { %2791 = vrot.lane.b32.xlu0 %v2790_v55, %s7117_s28  ;;  %s10283_s28 = smov 127  }
 0x328   : > { %6815 = vrcp.f32 %v887_v40 }
 0x32b   : > { %3183 = vrot.lane.b32.xlu0 %v3182_v6, %s7118_s26 }
 0x32f   : > { %3563 = vrot.lane.b32.xlu0 %v3562_v9, %s7119_s20  ;;  %s10281_s20 = smov 113  }
 0x332   : > { %v6816_v43 = vpop.eup %6815 }
 0x333   : > { %v7767_v4 = vpop.permute.xlu0 %3672  ;;  %v890_v44 = vmul.f32 %v6816_v43, %v7623_v8 }
 0x335   : > { %v891_v49 = vadd.f32 1.0, %v890_v44 }
 0x337   : > { %v3371_v45 = vpop.permute.xlu0 %3370  ;;  %v899_v51 = vrot.slane %v891_v49, %v7926_v50 }
 0x338   : > { %v3373_v53 = vadd.f32 %v3371_v45, %v7506_v18 }
 0x339   : > { %v906_v56 = vrot.slane %v899_v51, %v7926_v50 }
 0x33a   : > { %v3378_v7 = vrot.slane %v3373_v53, %v7731_v24 }
 0x33c   : > { %3379 = vrot.lane.b32.xlu1 %v3378_v7, %s7118_s26 }
 0x369   : > { %v1415_v16 = vpop.permute.xlu1 %1414 }
 0x36d   : > { %v1823_v2 = vpop.permute.xlu1 %1822 }
 0x371   : > { %v2222_v20 = vpop.permute.xlu1 %2221 }
 0x375   : > { %v2596_v23 = vpop.permute.xlu1 %2595 }
 0x389   : > { %v1211_v18 = vpop.permute.xlu0 %1210 }
 0x38a   : > { %6518 = vmatmul.mubr.msk.f32.vlgmr.msra.gmra.mrb[2].mxu1 %vm555_vm1, %v1211_v18 }
 0x38b   : > { %6526 = vmatpush3.msra.mxu1 %v7477_v13  ;;  %6527 = vmatprep.mubr.msk.f32.mxu1 %vm7113_vm0, %v10290_v12 }
 0x38c   : > { %6535 = vmatprep.subr.mxu1 %v10290_v12 }
 0x38d   : > { %v1619_v1 = vpop.permute.xlu0 %1618 }
 0x38e   : > { %6528 = vmatmul.mubr.msk.f32.vlgmr.msra.gmra.mrb[4].mxu1 %vm555_vm1, %v1415_v16 }
 0x38f   : > { %6536 = vmatpush3.msra.mxu1 %v7477_v13  ;;  %6537 = vmatprep.mubr.msk.f32.mxu1 %vm7113_vm0, %v10290_v12 }
 0x390   : > { %6545 = vmatprep.subr.mxu1 %v10290_v12 }
 0x391   : > { %v2027_v17 = vpop.permute.xlu0 %2026 }
 0x392   : > { %6538 = vmatmul.mubr.msk.f32.vlgmr.msra.gmra.mrb[6].mxu1 %vm555_vm1, %v1619_v1 }
 0x393   : > { %6546 = vmatpush3.msra.mxu1 %v7477_v13  ;;  %6547 = vmatprep.mubr.msk.f32.mxu1 %vm7113_vm0, %v10290_v12  ;;  %v2988_v26 = vpop.permute.xlu1 %2987 }
 0x394   : > { %6555 = vmatprep.subr.mxu1 %v10290_v12 }
 0x395   : > { %v2400_v21 = vpop.permute.xlu0 %2399 }
 0x396   : > { %6548 = vmatmul.mubr.msk.f32.vlgmr.msra.gmra.mrb[8].mxu1 %vm555_vm1, %v1823_v2  ;;  %v7955_v2 = vld [vmem:[%s10259_s3 + $0x2] ss:$8 sm:$0x3] }
 0x397   : > { %6556 = vmatpush3.msra.mxu1 %v7477_v13  ;;  %6557 = vmatprep.mubr.msk.f32.mxu1 %vm7113_vm0, %v10290_v12 }
 0x398   : > { %6565 = vmatprep.subr.mxu1 %v10290_v12 }
 0x399   : > { %v2792_v25 = vpop.permute.xlu0 %2791 }
 0x39a   : > { %6558 = vmatmul.mubr.msk.f32.vlgmr.msra.gmra.mrb[10].mxu1 %vm555_vm1, %v2027_v17 }
 0x39b   : > { %6566 = vmatpush3.msra.mxu1 %v7477_v13  ;;  %6567 = vmatprep.mubr.msk.f32.mxu1 %vm7113_vm0, %v10290_v12 }
 0x39c   : > { %6575 = vmatprep.subr.mxu1 %v10290_v12 }
 0x39d   : > { %v3184_v27 = vpop.permute.xlu0 %3183 }
 0x39e   : > { %6568 = vmatmul.mubr.msk.f32.vlgmr.msra.gmra.mrb[12].mxu1 %vm555_vm1, %v2222_v20 }
 0x39f   : > { %6576 = vmatpush3.msra.mxu1 %v7477_v13  ;;  %6577 = vmatprep.mubr.msk.f32.mxu1 %vm7113_vm0, %v10290_v12 }
 0x3a0   : > { %6585 = vmatprep.subr.mxu1 %v10290_v12 }
 0x3a1   : > { %v3564_v29 = vpop.permute.xlu0 %3563 }
 0x3a2   : > { %6578 = vmatmul.mubr.msk.f32.vlgmr.msra.gmra.mrb[14].mxu1 %vm555_vm1, %v2400_v21 }
 0x3a3   : > { %6586 = vmatpush3.msra.mxu1 %v7477_v13  ;;  %6587 = vmatprep.mubr.msk.f32.mxu1 %vm7113_vm0, %v10290_v12 }
 0x3a4   : > { %6595 = vmatprep.subr.mxu1 %v10290_v12 }
 0x3a6   : > { %6588 = vmatmul.mubr.msk.f32.vlgmr.msra.gmra.mrb[16].mxu1 %vm555_vm1, %v2596_v23 }
 0x3a7   : > { %6596 = vmatpush3.msra.mxu1 %v7477_v13  ;;  %6597 = vmatprep.mubr.msk.f32.mxu1 %vm7113_vm0, %v10290_v12 }
 0x3a8   : > { %6605 = vmatprep.subr.mxu1 %v10290_v12 }
 0x3aa   : > { %6598 = vmatmul.mubr.msk.f32.vlgmr.msra.gmra.mrb[18].mxu1 %vm555_vm1, %v2792_v25 }
 0x3ab   : > { %6606 = vmatpush3.msra.mxu1 %v7477_v13  ;;  %6607 = vmatprep.mubr.msk.f32.mxu1 %vm7113_vm0, %v10290_v12 }
 0x3ac   : > { %6615 = vmatprep.subr.mxu1 %v10290_v12 }
 0x3ae   : > { %6608 = vmatmul.mubr.msk.f32.vlgmr.msra.gmra.mrb[20].mxu1 %vm555_vm1, %v2988_v26  ;;  %v3380_v28 = vpop.permute.xlu1 %3379  ;;  %v6396_v26 = vld [vmem:[%s10259_s3 + $0x4] ss:$8 sm:$0x3] }
 0x3af   : > { %6616 = vmatpush3.msra.mxu1 %v7477_v13  ;;  %6617 = vmatprep.mubr.msk.f32.mxu1 %vm7113_vm0, %v10290_v12  ;;  %v7981_v43 = vrot.slane %v6396_v26, %v7731_v24 }
 0x3b0   : > { %6625 = vmatprep.subr.mxu1 %v10290_v12 }
 0x3b2   : > { %6618 = vmatmul.mubr.msk.f32.vlgmr.msra.gmra.mrb[22].mxu1 %vm555_vm1, %v3184_v27  ;;  %v7965_v27 = vld [vmem:[%s10259_s3 + $0x3] ss:$8 sm:$0x3] }
 0x3b3   : > { %6626 = vmatpush3.msra.mxu1 %v7477_v13  ;;  %6627 = vmatprep.mubr.msk.f32.mxu1 %vm7113_vm0, %v10290_v12  ;;  %v3844_v40 = vmul.f32 %v6396_v26, %v7965_v27 }
 0x3b4   : > { %6635 = vmatprep.subr.mxu1 %v10290_v12 }
 0x3b6   : > { %6628 = vmatmul.mubr.msk.f32.vlgmr.msra.gmra.mrb[24].mxu1 %vm555_vm1, %v3380_v28  ;;  %v7968_v28 = vand.u32 127, %v10289_v10 }
 0x3b7   : > { %6636 = vmatpush3.msra.mxu1 %v7477_v13  ;;  %6637 = vmatprep.mubr.msk.f32.mxu1 %vm7113_vm0, %v10290_v12 }
 0x3b8   : > { %vm3782_vm11 = vcmp.lt.s32.totalorder %v7968_v28, 17  ;;  %vm3811_vm12 = vcmp.lt.s32.totalorder %v7968_v28, 16  ;;  %vm3839_vm13 = vcmp.lt.s32.totalorder %v7968_v28, 15  ;;  %vm3868_vm14 = vcmp.lt.s32.totalorder %v7968_v28, 1 }
 0x3b9   : > { %vm3896_vm15 = vcmp.lt.s32.totalorder %v7968_v28, 127  ;;  %vm3924_vm0 = vcmp.lt.s32.totalorder %v7968_v28, 113 }
 0x3ba   : > { %6638 = vmatmul.mubr.msk.f32.vlgmr.msra.gmra.mrb[26].mxu1 %vm555_vm1, %v3564_v29  ;;  %v3787_v29 = vmul.f32 %v6396_v26, %v7955_v2  ;;  %vm10288_vm1 = vcmp.lt.s32.totalorder %v7968_v28, 112 }
 0x3bb   : > { %6398 = vmatprep.mubr.msk.f32.mxu1 %vm629_vm2, %v4003_v48  ;;  %vm10287_vm2 = vcmp.lt.s32.totalorder %v7968_v28, 111 }
 0x3bc   : > { %v7985_v46 = vrot.slane %v3787_v29, %v7731_v24 }
 0x3f0   : > { %v3752_v30 = vpop.f32.mrb[36].mxu0 }
 0x3f1   : > { %v7845_v31 = vadd.f32 %v3752_v30, %v7767_v4  ;;  %v3754_v32 = vpop.f32.mrb[37].mxu0 }
 0x3f2   : > { %v7852_v13 = vadd.f32 %v3754_v32, %v7767_v4 }
 0x3f3   : > { %3803 = vrot.lane.b32.xlu0 %v7845_v31, %s7120_s0  ;;  %3772 = vrot.lane.b32.xlu1 %v7845_v31, %s7125_s6 }
 0x3f4   : > { %v3758_v33 = vpop.f32.mrb[38].mxu0 }
 0x3f5   : > { %v7855_v34 = vadd.f32 %v3758_v33, %v7765_v3  ;;  %v3760_v35 = vpop.f32.mrb[39].mxu0  ;;  %v1076_v59 = vpop.f32.mrb[0].mxu1  ;;  %v7972_v33 = vsub.s32 1, %v7727_v22 }
 0x3f6   : > { %v7858_v36 = vadd.f32 %v3760_v35, %v7765_v3  ;;  %v6352_v60 = vmul.f32 -1.442695, %v1076_v59  ;;  %v6509_v57 = vpop.f32.mrb[1].mxu1 }
 0x3f7   : > { %3807 = vrot.lane.b32.xlu0 %v7852_v13, %s7120_s0  ;;  %3831 = vrot.lane.b32.xlu1 %v7845_v31, %s7126_s23  ;;  %v6662_v37 = vpack.c.bf16 %v7855_v34, %v7845_v31  ;;  %v7988_v48 = vrot.slane %v3787_v29, %v7972_v33 }
 0x3f8   : > { %v6660_v38 = vpack.c.bf16 %v7858_v36, %v7852_v13  ;;  %6817 = vpow2.f32 %v6352_v60 }
 0x3fb   : > { %3774 = vrot.lane.b32.xlu0 %v7855_v34, %s7125_s6  ;;  %3860 = vrot.lane.b32.xlu1 %v7845_v31, %s10285_s21 }
 0x3ff   : > { %3833 = vrot.lane.b32.xlu0 %v7855_v34, %s7126_s23  ;;  %3888 = vrot.lane.b32.xlu1 %v7845_v31, %s10283_s28 }
 0x402   : > { %v6818_v53 = vpop.eup %6817 }
 0x403   : > { %3862 = vrot.lane.b32.xlu0 %v7855_v34, %s10285_s21  ;;  %3776 = vrot.lane.b32.xlu1 %v7852_v13, %s7125_s6  ;;  %v1083_v6 = vadd.f32 1.0, %v6818_v53 }
 0x407   : > { %3890 = vrot.lane.b32.xlu0 %v7855_v34, %s10283_s28  ;;  %3835 = vrot.lane.b32.xlu1 %v7852_v13, %s7126_s23 }
 0x40b   : > { %3778 = vrot.lane.b32.xlu0 %v7858_v36, %s7125_s6  ;;  %3864 = vrot.lane.b32.xlu1 %v7852_v13, %s10285_s21 }
 0x40f   : > { %3918 = vrot.lane.b32.xlu0 %v7855_v34, %s10281_s20  ;;  %3805 = vrot.lane.b32.xlu1 %v7855_v34, %s7120_s0 }
 0x413   : > { %3947 = vrot.lane.b32.xlu0 %v7855_v34, %s7114_s4  ;;  %3809 = vrot.lane.b32.xlu1 %v7858_v36, %s7120_s0 }
 0x417   : > { %3837 = vrot.lane.b32.xlu0 %v7858_v36, %s7126_s23  ;;  %3892 = vrot.lane.b32.xlu1 %v7852_v13, %s10283_s28 }
 0x41b   : > { %3866 = vrot.lane.b32.xlu0 %v7858_v36, %s10285_s21  ;;  %3916 = vrot.lane.b32.xlu1 %v7845_v31, %s10281_s20  ;;  %s6414_s21 = sshll.u32 %s7231_s11, 8 }
 0x41f   : > { %3975 = vrot.lane.b32.xlu0 %v7855_v34, %s10279_s17  ;;  %3920 = vrot.lane.b32.xlu1 %v7852_v13, %s10281_s20 }
 0x423   : > { %3894 = vrot.lane.b32.xlu0 %v7858_v36, %s10283_s28  ;;  %3945 = vrot.lane.b32.xlu1 %v7845_v31, %s7114_s4 }
 0x427   : > { %3922 = vrot.lane.b32.xlu0 %v7858_v36, %s10281_s20  ;;  %3949 = vrot.lane.b32.xlu1 %v7852_v13, %s7114_s4  ;;  %s10342_s20 = smov 64  }
 0x42b   : > { %3951 = vrot.lane.b32.xlu0 %v7858_v36, %s7114_s4  ;;  %3973 = vrot.lane.b32.xlu1 %v7845_v31, %s10279_s17 }
 0x42f   : > { %3979 = vrot.lane.b32.xlu0 %v7858_v36, %s10279_s17  ;;  %3977 = vrot.lane.b32.xlu1 %v7852_v13, %s10279_s17 }
 0x433   : > { %907 = vrot.lane.b32.xlu1 %v906_v56, %s7120_s0  ;;  %v7993_v56 = vrot.slane %v6396_v26, %v7972_v33 }
 0x435   : > { %10332 = vst [vmem:[#allocation27_spill] sm:$0xff] %v7993_v56 }
 0x45d   : > { %v1280_v62 = vpop.f32.mrb[2].mxu1 }
 0x45e   : > { %v6355_v63 = vmul.f32 -1.442695, %v1280_v62  ;;  %v6519_v0 = vpop.f32.mrb[3].mxu1 }
 0x45f   : > { %v8005_v0 = vrot.slane %v3844_v40, %v7972_v33 }
 0x460   : > { %6819 = vpow2.f32 %v6355_v63  ;;  %v8002_v63 = vrot.slane %v3844_v40, %v7731_v24 }
 0x461   : > { %v1484_v3 = vpop.f32.mrb[4].mxu1  ;;  %10334 = vst [vmem:[#allocation29_spill] sm:$0xff] %v8005_v0 }
 0x462   : > { %v6358_v4 = vmul.f32 -1.442695, %v1484_v3  ;;  %v6529_v5 = vpop.f32.mrb[5].mxu1  ;;  %10333 = vst [vmem:[#allocation28_spill] sm:$0xff] %v8002_v63 }
 0x463   : > { %v8012_v5 = vld [vmem:[%s10259_s3 + $0x5] ss:$8 sm:$0x3] }
 0x464   : > { %6821 = vpow2.f32 %v6358_v4 }
 0x465   : > { %v7940_v58 = vpop.permute.xlu0 %3803  ;;  %v3773_v61 = vpop.permute.xlu1 %3772  ;;  %6823 = vrcp.f32 %v1083_v6 }
 0x466   : > { %v1688_v7 = vpop.f32.mrb[6].mxu1 }
 0x467   : > { %v6361_v9 = vmul.f32 -1.442695, %v1688_v7  ;;  %v6539_v11 = vpop.f32.mrb[7].mxu1  ;;  %v8021_v7 = vrot.slane %v7955_v2, %v7731_v24 }
 0x469   : > { %v7942_v54 = vpop.permute.xlu0 %3807  ;;  %v7944_v55 = vpop.permute.xlu1 %3831  ;;  %6825 = vpow2.f32 %v6361_v9  ;;  %10335 = vst [vmem:[#allocation30_spill] sm:$0xff] %v8021_v7 }
 0x46a   : > { %v1892_v16 = vpop.f32.mrb[8].mxu1  ;;  %v6820_v1 = vpop.eup %6819 }
 0x46b   : > { %v6364_v17 = vmul.f32 -1.442695, %v1892_v16  ;;  %v6549_v20 = vpop.f32.mrb[9].mxu1  ;;  %v1287_v25 = vadd.f32 1.0, %v6820_v1 }
 0x46d   : > { %v3775_v45 = vpop.permute.xlu0 %3774  ;;  %v7946_v52 = vpop.permute.xlu1 %3860  ;;  %6827 = vpow2.f32 %v6364_v17 }
 0x46e   : > { %6829 = vrcp.f32 %v1287_v25  ;;  %v2096_v30 = vpop.f32.mrb[10].mxu1  ;;  %v6822_v32 = vpop.eup %6821 }
 0x46f   : > { %v6367_v35 = vmul.f32 -1.442695, %v2096_v30  ;;  %v6559_v39 = vpop.f32.mrb[11].mxu1  ;;  %v1491_v42 = vadd.f32 1.0, %v6822_v32  ;;  %v6824_v44 = vpop.eup %6823  ;;  %v3812_v30 = vsel %vm3811_vm12, %v7940_v58, %v7942_v54 }
 0x470   : > { %v1086_v62 = vmul.f32 %v6824_v44, %v7623_v8  ;;  %v3814_v44 = vsel %vm3811_vm12, %v7942_v54, %v7940_v58 }
 0x471   : > { %v7948_v15 = vpop.permute.xlu0 %3833  ;;  %v7950_v18 = vpop.permute.xlu1 %3888  ;;  %6831 = vpow2.f32 %v6367_v35 }
 0x472   : > { %6833 = vrcp.f32 %v1491_v42  ;;  %v7990_v49 = vpop.f32.mrb[12].mxu1  ;;  %v1087_v26 = vadd.f32 1.0, %v1086_v62  ;;  %v8051_v62 = vrot.slane %v7965_v27, %v7972_v33 }
 0x473   : > { %v6826_v51 = vpop.eup %6825  ;;  %v6569_v57 = vpop.f32.mrb[13].mxu1 }
 0x474   : > { %v8047_v57 = vrot.slane %v7965_v27, %v7731_v24  ;;  %10338 = vst [vmem:[#allocation33_spill] sm:$0xff] %v8051_v62 }
 0x475   : > { %v7957_v21 = vpop.permute.xlu0 %3862  ;;  %v3777_v23 = vpop.permute.xlu1 %3776 }
 0x476   : > { %v3783_v59 = vsel %vm3782_vm11, %v3773_v61, %v3777_v23  ;;  %v3785_v60 = vsel %vm3782_vm11, %v3777_v23, %v3773_v61  ;;  %v1695_v61 = vadd.f32 1.0, %v6826_v51  ;;  %v2469_v17 = vpop.f32.mrb[14].mxu1  ;;  %v3929_v23 = vmul.f32 %v8012_v5, %v7955_v2  ;;  %10337 = vst [vmem:[#allocation32_spill] sm:$0xff] %v8047_v57 }
 0x477   : > { %v3799_v9 = vmul.f32 %v7985_v46, %v3785_v60  ;;  %v3800_v11 = vmul.f32 %v7988_v48, %v3783_v59  ;;  %v6828_v20 = vpop.eup %6827  ;;  %v6579_v25 = vpop.f32.mrb[15].mxu1  ;;  %v1095_v51 = vrot.slane %v1087_v26, %v7926_v50  ;;  %v8043_v60 = vrot.slane %v7955_v2, %v7972_v33 }
 0x478   : > { %6835 = vrcp.f32 %v1695_v61  ;;  %v6830_v29 = vpop.eup %6829  ;;  %v1899_v42 = vadd.f32 1.0, %v6828_v20 }
 0x479   : > { %v7975_v19 = vpop.permute.xlu0 %3890  ;;  %v7978_v41 = vpop.permute.xlu1 %3835  ;;  %v1290_v59 = vmul.f32 %v6830_v29, %v7623_v8  ;;  %10336 = vst [vmem:[#allocation31_spill] sm:$0xff] %v8043_v60  ;;  %v1102_v2 = vrot.slane %v1095_v51, %v7926_v50 }
 0x47a   : > { %v2665_v58 = vpop.f32.mrb[16].mxu1 }
 0x47b   : > { %v6832_v54 = vpop.eup %6831  ;;  %v6376_v61 = vmul.f32 -1.442695, %v2665_v58  ;;  %1103 = vrot.lane.b32.xlu1 %v1102_v2, %s7121_s16 }
 0x47d   : > { %v3779_v3 = vpop.permute.xlu0 %3778  ;;  %v8007_v4 = vpop.permute.xlu1 %3864 }
 0x47e   : > { %v3784_v53 = vsel %vm3782_vm11, %v3775_v45, %v3779_v3  ;;  %v3786_v6 = vsel %vm3782_vm11, %v3779_v3, %v3775_v45  ;;  %v6373_v45 = vmul.f32 -1.442695, %v2469_v17  ;;  %v8054_v3 = vrot.slane %v3929_v23, %v7731_v24 }
 0x47f   : > { %v3801_v16 = vmul.f32 %v7985_v46, %v3786_v6  ;;  %v3802_v1 = vmul.f32 %v7988_v48, %v3784_v53  ;;  %v6589_v53 = vpop.f32.mrb[17].mxu1  ;;  %v1291_v6 = vadd.f32 1.0, %v1290_v59 }
 0x480   : > { %6837 = vpow2.f32 %v6373_v45  ;;  %10339 = vst [vmem:[#allocation34_spill] sm:$0xff] %v8054_v3  ;;  %v2103_v45 = vadd.f32 1.0, %v6832_v54  ;;  %v3871_v54 = vsel %vm3868_vm14, %v8007_v4, %v7946_v52 }
 0x481   : > { %v6646_v32 = vpack.c.bf16 %v3801_v16, %v3799_v9  ;;  %v8033_v35 = vpop.permute.xlu0 %3918  ;;  %v3806_v39 = vpop.permute.xlu1 %3805  ;;  %v6644_v40 = vpack.c.bf16 %v3802_v1, %v3800_v11  ;;  %6839 = vrcp.f32 %v1899_v42  ;;  %v3827_v11 = vmul.f32 %v7981_v43, %v3814_v44 }
 0x482   : > { %v6834_v9 = vpop.eup %6833  ;;  %v3828_v16 = vmul.f32 %v7993_v56, %v3812_v30  ;;  %v3842_v1 = vsel %vm3839_vm13, %v7978_v41, %v7944_v55  ;;  %6841 = vpow2.f32 %v6376_v61  ;;  %v1299_v29 = vrot.slane %v1291_v6, %v7926_v50 }
 0x483   : > { %6645 = vmatprep.subr.bf16.mxu1 %v6644_v40  ;;  %6843 = vrcp.f32 %v2103_v45  ;;  %v2861_v40 = vpop.f32.mrb[18].mxu1  ;;  %v1494_v42 = vmul.f32 %v6834_v9, %v7623_v8  ;;  %v8080_v44 = vrot.slane %v3929_v23, %v7972_v33 }
 0x484   : > { %6647 = vmatpush1.bf16.msra.mxu1 %v6646_v32  ;;  %v6379_v51 = vmul.f32 -1.442695, %v2861_v40  ;;  %v6599_v59 = vpop.f32.mrb[19].mxu1  ;;  %v1306_v58 = vrot.slane %v1299_v29, %v7926_v50  ;;  %v3884_v29 = vmul.f32 %v8021_v7, %v3871_v54 }
 0x485   : > { %v8063_v17 = vpop.permute.xlu0 %3947  ;;  %v3810_v20 = vpop.permute.xlu1 %3809  ;;  %10340 = vst [vmem:[#allocation35_spill] sm:$0xff] %v8080_v44  ;;  %v1495_v9 = vadd.f32 1.0, %v1494_v42 }
 0x486   : > { %v3813_v25 = vsel %vm3811_vm12, %v3806_v39, %v3810_v20  ;;  %v3815_v26 = vsel %vm3811_vm12, %v3810_v20, %v3806_v39  ;;  %v3840_v39 = vsel %vm3839_vm13, %v7944_v55, %v7978_v41  ;;  %v6836_v20 = vpop.eup %6835  ;;  %v3856_v55 = vmul.f32 %v8002_v63, %v3842_v1  ;;  %1307 = vrot.lane.b32.xlu1 %v1306_v58, %s7122_s15 }
 0x487   : > { %v3829_v30 = vmul.f32 %v7981_v43, %v3815_v26  ;;  %v3830_v32 = vmul.f32 %v7993_v56, %v3813_v25  ;;  %v3869_v1 = vsel %vm3868_vm14, %v7946_v52, %v8007_v4  ;;  %6845 = vpow2.f32 %v6379_v51 }
 0x488   : > { %v1698_v58 = vmul.f32 %v6836_v20, %v7623_v8 }
 0x489   : > { %v6650_v61 = vpack.c.bf16 %v3829_v30, %v3827_v11  ;;  %v3838_v53 = vpop.permute.xlu0 %3837  ;;  %v3893_v2 = vpop.permute.xlu1 %3892  ;;  %v6648_v6 = vpack.c.bf16 %v3830_v32, %v3828_v16  ;;  %v3986_v11 = vmul.f32 %v8012_v5, %v7965_v27  ;;  %v3857_v16 = vmul.f32 %v8005_v0, %v3840_v39 }
 0x48a   : > { %v3841_v41 = vsel %vm3839_vm13, %v7948_v15, %v3838_v53  ;;  %v3843_v23 = vsel %vm3839_vm13, %v3838_v53, %v7948_v15  ;;  %v3057_v15 = vpop.f32.mrb[20].mxu1  ;;  %v6838_v26 = vpop.eup %6837  ;;  %v1503_v32 = vrot.slane %v1495_v9, %v7926_v50  ;;  %v3885_v53 = vmul.f32 %v8043_v60, %v3869_v1 }
 0x48b   : > { %v3858_v45 = vmul.f32 %v8002_v63, %v3843_v23  ;;  %v3859_v25 = vmul.f32 %v8005_v0, %v3841_v41  ;;  %6649 = vmatprep.subr.bf16.mxu1 %v6648_v6  ;;  %v6382_v27 = vmul.f32 -1.442695, %v3057_v15  ;;  %v6609_v30 = vpop.f32.mrb[21].mxu1  ;;  %v6840_v40 = vpop.eup %6839  ;;  %v2476_v4 = vadd.f32 1.0, %v6838_v26 }
 0x48c   : > { %6651 = vmatpush1.bf16.msra.mxu1 %v6650_v61  ;;  %v1510_v61 = vrot.slane %v1503_v32, %v7926_v50  ;;  %v1699_v20 = vadd.f32 1.0, %v1698_v58  ;;  %v6842_v41 = vpop.eup %6841  ;;  %v8122_v23 = vrot.slane %v8012_v5, %v7731_v24 }
 0x48d   : > { %v6654_v42 = vpack.c.bf16 %v3858_v45, %v3856_v55  ;;  %v3867_v39 = vpop.permute.xlu0 %3866  ;;  %v8107_v59 = vpop.permute.xlu1 %3916  ;;  %v6652_v52 = vpack.c.bf16 %v3859_v25, %v3857_v16  ;;  %6847 = vrcp.f32 %v2476_v4  ;;  %v2672_v32 = vadd.f32 1.0, %v6842_v41 }
 0x48e   : > { %v3870_v54 = vsel %vm3868_vm14, %v7957_v21, %v3867_v39  ;;  %v3872_v51 = vsel %vm3868_vm14, %v3867_v39, %v7957_v21  ;;  %v3253_v55 = vpop.f32.mrb[22].mxu1  ;;  %10341 = vst [vmem:[#allocation36_spill] sm:$0xff] %v8122_v23  ;;  %6849 = vpow2.f32 %v6382_v27  ;;  %1511 = vrot.lane.b32.xlu1 %v1510_v61, %s10342_s20  ;;  %v1902_v21 = vmul.f32 %v6840_v40, %v7623_v8  ;;  %v6844_v45 = vpop.eup %6843 }
 0x48f   : > { %v3886_v6 = vmul.f32 %v8021_v7, %v3872_v51  ;;  %v3887_v9 = vmul.f32 %v8043_v60, %v3870_v54  ;;  %6653 = vmatprep.subr.bf16.mxu1 %v6652_v52  ;;  %v6385_v16 = vmul.f32 -1.442695, %v3253_v55  ;;  %v6619_v1 = vpop.f32.mrb[23].mxu1  ;;  %v3897_v39 = vsel %vm3896_vm15, %v7950_v18, %v3893_v2 }
 0x490   : > { %6655 = vmatpush1.bf16.msra.mxu1 %v6654_v42  ;;  %v1707_v42 = vrot.slane %v1699_v20, %v7926_v50  ;;  %v3899_v27 = vsel %vm3896_vm15, %v3893_v2, %v7950_v18  ;;  %v1903_v52 = vadd.f32 1.0, %v1902_v21  ;;  %v8140_v40 = vrot.slane %v3986_v11, %v7731_v24  ;;  %v3449_v4 = vpop.f32.mrb[24].mxu1 }
 0x491   : > { %v6658_v25 = vpack.c.bf16 %v3886_v6, %v3884_v29  ;;  %v8126_v15 = vpop.permute.xlu0 %3975  ;;  %v3921_v26 = vpop.permute.xlu1 %3920  ;;  %v6656_v30 = vpack.c.bf16 %v3887_v9, %v3885_v53  ;;  %6851 = vpow2.f32 %v6385_v16  ;;  %v8137_v29 = vrot.slane %v8012_v5, %v7972_v33 }
 0x492   : > { %10344 = vst [vmem:[#allocation38_spill] sm:$0xff] %v8140_v40  ;;  %6853 = vrcp.f32 %v2672_v32  ;;  %v1714_v58 = vrot.slane %v1707_v42, %v7926_v50  ;;  %v8144_v53 = vrot.slane %v3986_v11, %v7972_v33  ;;  %v6388_v54 = vmul.f32 -1.442695, %v3449_v4  ;;  %v6629_v18 = vpop.f32.mrb[25].mxu1  ;;  %v6846_v55 = vpop.eup %6845 }
 0x493   : > { %6657 = vmatprep.subr.bf16.mxu1 %v6656_v30  ;;  %10343 = vst [vmem:[#allocation37_spill] sm:$0xff] %v8137_v29  ;;  %v1911_v2 = vrot.slane %v1903_v52, %v7926_v50  ;;  %v2106_v51 = vmul.f32 %v6844_v45, %v7623_v8  ;;  %v3912_v5 = vmul.f32 %v8047_v57, %v3897_v39  ;;  %v3633_v1 = vpop.f32.mrb[26].mxu1 }
 0x494   : > { %6659 = vmatpush1.bf16.msra.mxu1 %v6658_v25  ;;  %10345 = vst [vmem:[#allocation39_spill] sm:$0xff] %v8144_v53  ;;  %v3913_v61 = vmul.f32 %v8051_v62, %v3899_v27  ;;  %v3925_v6 = vsel %vm3924_vm0, %v8107_v59, %v3921_v26  ;;  %1715 = vrot.lane.b32.xlu1 %v1714_v58, %s7118_s26  ;;  %6855 = vpow2.f32 %v6388_v54  ;;  %v6391_v30 = vmul.f32 -1.442695, %v3633_v1  ;;  %v6639_v32 = vpop.f32.mrb[27].mxu1 }
 0x495   : > { %v3895_v9 = vpop.permute.xlu0 %3894  ;;  %6661 = vmatprep.subr.bf16.mxu1 %v6660_v38  ;;  %v3946_v11 = vpop.permute.xlu1 %3945  ;;  %v1918_v16 = vrot.slane %v1911_v2, %v7926_v50  ;;  %v2868_v38 = vadd.f32 1.0, %v6846_v55  ;;  %v2107_v21 = vadd.f32 1.0, %v2106_v51  ;;  %v3927_v45 = vsel %vm3924_vm0, %v3921_v26, %v8107_v59 }
 0x496   : > { %v3898_v20 = vsel %vm3896_vm15, %v7975_v19, %v3895_v9  ;;  %v3900_v41 = vsel %vm3896_vm15, %v3895_v9, %v7975_v19  ;;  %v3941_v25 = vmul.f32 %v8054_v3, %v3925_v6  ;;  %v6370_v19 = vmul.f32 -1.442695, %v7990_v49 }
 0x497   : > { %v3914_v13 = vmul.f32 %v8047_v57, %v3898_v20  ;;  %v3915_v36 = vmul.f32 %v8051_v62, %v3900_v41  ;;  %v6848_v42 = vpop.eup %6847  ;;  %6857 = vrcp.f32 %v2868_v38  ;;  %v2115_v59 = vrot.slane %v2107_v21, %v7926_v50 }
 0x498   : > { %6663 = vmatpush1.bf16.msra.mxu1 %v6662_v37  ;;  %1919 = vrot.lane.b32.xlu1 %v1918_v16, %s7116_s18  ;;  %v6850_v26 = vpop.eup %6849  ;;  %v3942_v58 = vmul.f32 %v8080_v44, %v3927_v45  ;;  %6859 = vpow2.f32 %v6391_v30 }
 0x499   : > { %v6666_v39 = vpack.c.bf16 %v3914_v13, %v3912_v5  ;;  %v3923_v27 = vpop.permute.xlu0 %3922  ;;  %v3950_v52 = vpop.permute.xlu1 %3949  ;;  %v6664_v4 = vpack.c.bf16 %v3915_v36, %v3913_v61  ;;  %v3064_v5 = vadd.f32 1.0, %v6850_v26  ;;  %v2122_v61 = vrot.slane %v2115_v59, %v7926_v50 }
 0x49a   : > { %v3926_v31 = vsel %vm3924_vm0, %v8033_v35, %v3923_v27  ;;  %v3928_v34 = vsel %vm3924_vm0, %v3923_v27, %v8033_v35  ;;  %v3954_v37 = vsel %vm10288_vm1, %v3946_v11, %v3950_v52  ;;  %v3956_v49 = vsel %vm10288_vm1, %v3950_v52, %v3946_v11 }
 0x49b   : > { %v3943_v54 = vmul.f32 %v8054_v3, %v3926_v31  ;;  %v3944_v18 = vmul.f32 %v8080_v44, %v3928_v34  ;;  %v3969_v2 = vmul.f32 %v8122_v23, %v3954_v37  ;;  %6665 = vmatprep.subr.bf16.mxu1 %v6664_v4  ;;  %v6852_v51 = vpop.eup %6851  ;;  %v2479_v35 = vmul.f32 %v6848_v42, %v7623_v8 }
 0x49c   : > { %6667 = vmatpush1.bf16.msra.mxu1 %v6666_v39  ;;  %v6854_v6 = vpop.eup %6853  ;;  %v3970_v11 = vmul.f32 %v8137_v29, %v3956_v49  ;;  %v3260_v16 = vadd.f32 1.0, %v6852_v51  ;;  %6861 = vrcp.f32 %v3064_v5  ;;  %2123 = vrot.lane.b32.xlu1 %v2122_v61, %s7114_s4 }
 0x49d   : > { %v6670_v9 = vpack.c.bf16 %v3943_v54, %v3941_v25  ;;  %v3952_v55 = vpop.permute.xlu0 %3951  ;;  %v3974_v20 = vpop.permute.xlu1 %3973  ;;  %v6668_v41 = vpack.c.bf16 %v3944_v18, %v3942_v58  ;;  %v2480_v38 = vadd.f32 1.0, %v2479_v35  ;;  %v2675_v45 = vmul.f32 %v6854_v6, %v7623_v8 }
 0x49e   : > { %v3955_v13 = vsel %vm10288_vm1, %v8063_v17, %v3952_v55  ;;  %v3957_v36 = vsel %vm10288_vm1, %v3952_v55, %v8063_v17  ;;  %6863 = vrcp.f32 %v3260_v16  ;;  %v6856_v25 = vpop.eup %6855  ;;  %vm1514_vm1 = vcmp.ge.s32.totalorder %v10289_v10, 64 }
 0x49f   : > { %v3971_v1 = vmul.f32 %v8122_v23, %v3955_v13  ;;  %v3972_v21 = vmul.f32 %v8137_v29, %v3957_v36  ;;  %6669 = vmatprep.subr.bf16.mxu1 %v6668_v41  ;;  %6865 = vpow2.f32 %v6370_v19  ;;  %v2488_v32 = vrot.slane %v2480_v38, %v7926_v50  ;;  %v6873_v38 = vld [vmem:[#allocation2 + $0x8] sm:$0xff]  ;;  %vm1516_vm7 = vmand %vm1514_vm1, %vm1515_vm4 }
 0x4a0   : > { %6671 = vmatpush1.bf16.msra.mxu1 %v6670_v9  ;;  %v3456_v4 = vadd.f32 1.0, %v6856_v25  ;;  %v2676_v59 = vadd.f32 1.0, %v2675_v45  ;;  %vm2126_vm1 = vcmp.ge.s32.totalorder %v10289_v10, 112 }
 0x4a1   : > { %v6674_v42 = vpack.c.bf16 %v3971_v1, %v3969_v2  ;;  %v3980_v39 = vpop.permute.xlu0 %3979  ;;  %v3978_v27 = vpop.permute.xlu1 %3977  ;;  %v6672_v52 = vpack.c.bf16 %v3972_v21, %v3970_v11  ;;  %v4078_v1 = vpack.c.bf16 %v6873_v38, %v6873_v38 }
 0x4a2   : > { %v3983_v26 = vsel %vm10287_vm2, %v8126_v15, %v3980_v39  ;;  %v3985_v31 = vsel %vm10287_vm2, %v3980_v39, %v8126_v15  ;;  %v3982_v34 = vsel %vm10287_vm2, %v3974_v20, %v3978_v27  ;;  %v3984_v19 = vsel %vm10287_vm2, %v3978_v27, %v3974_v20  ;;  %v6858_v37 = vpop.eup %6857 }
 0x4a3   : > { %v4000_v49 = vmul.f32 %v8140_v40, %v3983_v26  ;;  %v4001_v58 = vmul.f32 %v8144_v53, %v3985_v31  ;;  %v3998_v54 = vmul.f32 %v8140_v40, %v3982_v34  ;;  %v3999_v18 = vmul.f32 %v8144_v53, %v3984_v19  ;;  %6673 = vmatprep.subr.bf16.mxu1 %v6672_v52  ;;  %v6860_v6 = vpop.eup %6859 }
 0x4a4   : > { %6675 = vmatpush1.bf16.msra.mxu1 %v6674_v42  ;;  %6867 = vrcp.f32 %v3456_v4  ;;  %v2495_v15 = vrot.slane %v2488_v32, %v7926_v50  ;;  %v2684_v2 = vrot.slane %v2676_v59, %v7926_v50  ;;  %v2871_v51 = vmul.f32 %v6858_v37, %v7623_v8 }
 0x4a5   : > { %v6678_v5 = vpack.c.bf16 %v4000_v49, %v3998_v54  ;;  %v908_v35 = vpop.permute.xlu1 %907  ;;  %v6676_v61 = vpack.c.bf16 %v4001_v58, %v3999_v18  ;;  %v3640_v55 = vadd.f32 1.0, %v6860_v6 }
 0x4a6   : > { %913 = vst.msk [vmem:[#allocation3] sm:$0x1] %vm912_vm6, %v908_v35  ;;  %2496 = vrot.lane.b32.xlu0 %v2495_v15, %s7120_s0  ;;  %v2691_v9 = vrot.slane %v2684_v2, %v7926_v50  ;;  %v2872_v11 = vadd.f32 1.0, %v2871_v51  ;;  %v6862_v20 = vpop.eup %6861 }
 0x4a7   : > { %6677 = vmatprep.subr.bf16.mxu1 %v6676_v61  ;;  %6869 = vrcp.f32 %v3640_v55  ;;  %v3067_v13 = vmul.f32 %v6862_v20, %v7623_v8 }
 0x4a8   : > { %6679 = vmatpush1.bf16.msra.mxu1 %v6678_v5  ;;  %v2880_v41 = vrot.slane %v2872_v11, %v7926_v50  ;;  %v6864_v16 = vpop.eup %6863 }
 0x4a9   : > { %v6866_v36 = vpop.eup %6865  ;;  %v3263_v45 = vmul.f32 %v6864_v16, %v7623_v8  ;;  %v3068_v25 = vadd.f32 1.0, %v3067_v13 }
 0x4aa   : > { %2692 = vrot.lane.b32.xlu0 %v2691_v9, %s7121_s16  ;;  %v2887_v21 = vrot.slane %v2880_v41, %v7926_v50  ;;  %v2298_v27 = vadd.f32 1.0, %v6866_v36  ;;  %s6142_s16 = scalar_lea.sflag [#allocation8], %s7405_s14 }
 0x4ab   : > { %4071 = vmatmul.mubr.f32.vlgmr.msra.gmra.mrb[28].mxu1 %v7921_v47  ;;  %v3264_v32 = vadd.f32 1.0, %v3263_v45  ;;  %v3076_v42 = vrot.slane %v3068_v25, %v7926_v50  ;;  %v4114_v25 = vld [vmem:[%s10259_s3] ss:$8 sm:$0x3] }
 0x4ac   : > { %5910 = vmatprep.mubr.bf16.mxu1 %v4078_v1  ;;  %6871 = vrcp.f32 %v2298_v27 }
 0x4ad   : > { %v3272_v52 = vrot.slane %v3264_v32, %v7926_v50  ;;  %v3083_v4 = vrot.slane %v3076_v42, %v7926_v50 }
 0x4ae   : > { %v6868_v39 = vpop.eup %6867  ;;  %2888 = vrot.lane.b32.xlu0 %v2887_v21, %s7122_s15 }
 0x4af   : > { %v3459_v59 = vmul.f32 %v6868_v39, %v7623_v8  ;;  %v3279_v47 = vrot.slane %v3272_v52, %v7926_v50  ;;  %v6399_v39 = vld [vmem:[%s10259_s3 + $0x1] ss:$8 sm:$0x3] }
 0x4b1   : > { %v3460_v26 = vadd.f32 1.0, %v3459_v59  ;;  %v6870_v31 = vpop.eup %6869 }
 0x4b2   : > { %3084 = vrot.lane.b32.xlu0 %v3083_v4, %s10342_s20  ;;  %v3643_v19 = vmul.f32 %v6870_v31, %v7623_v8 }
 0x4b3   : > { %v3468_v34 = vrot.slane %v3460_v26, %v7926_v50 }
 0x4b4   : > { %v3644_v49 = vadd.f32 1.0, %v3643_v19 }
 0x4b5   : > { %v3475_v37 = vrot.slane %v3468_v34, %v7926_v50 }
 0x4b6   : > { %3280 = vrot.lane.b32.xlu0 %v3279_v47, %s7118_s26  ;;  %v3652_v58 = vrot.slane %v3644_v49, %v7926_v50  ;;  %v6872_v18 = vpop.eup %6871 }
 0x4b7   : > { %v2301_v15 = vmul.f32 %v6872_v18, %v7623_v8 }
 0x4b8   : > { %v3659_v54 = vrot.slane %v3652_v58, %v7926_v50 }
 0x4b9   : > { %v2302_v2 = vadd.f32 1.0, %v2301_v15 }
 0x4ba   : > { %3476 = vrot.lane.b32.xlu0 %v3475_v37, %s7116_s18  ;;  %s10183_s18 = scalar_lea.hbm %s10268_s12, %s6414_s21 }
 0x4bb   : > { %2303 = vst.msk [vmem:[#allocation3 + $0x1] sm:$0x1] %vm7627_vm3, %v2302_v2  ;;  %vm1311_vm3 = vcmp.lt.s32.totalorder %v10289_v10, 64 }
 0x4bc   : > { %vm1312_vm2 = vmand %vm1310_vm10, %vm1311_vm3 }
 0x4be   : > { %3660 = vrot.lane.b32.xlu0 %v3659_v54, %s7114_s4 }
 0x4ed   : > { %v1104_v5 = vpop.permute.xlu1 %1103 }
 0x4ee   : > { %1109 = vst.msk [vmem:[#allocation3] sm:$0x1] %vm1108_vm9, %v1104_v5 }
 0x4f8   : > { %v1308_v61 = vpop.permute.xlu1 %1307 }
 0x4f9   : > { %1313 = vst.msk [vmem:[#allocation3] sm:$0x1] %vm1312_vm2, %v1308_v61  ;;  %v8307_v61 = vadd.s32 8, %v7727_v22 }
 0x500   : > { %v1512_v9 = vpop.permute.xlu1 %1511 }
 0x501   : > { %1517 = vst.msk [vmem:[#allocation3] sm:$0x1] %vm1516_vm7, %v1512_v9  ;;  %v8313_v9 = vadd.s32 24, %v7727_v22 }
 0x506   : > { %v1716_v17 = vpop.permute.xlu1 %1715 }
 0x50a   : > { %v1920_v55 = vpop.permute.xlu1 %1919 }
 0x50e   : > { %v2124_v16 = vpop.permute.xlu1 %2123 }
 0x518   : > { %v2497_v51 = vpop.permute.xlu0 %2496 }
 0x519   : > { %2499 = vst.msk [vmem:[#allocation3 + $0x1] sm:$0x1] %vm912_vm6, %v2497_v51  ;;  %vm8285_vm6 = vcmp.lt.s32.totalorder %v10289_v10, 96 }
 0x51a   : > { %vm1720_vm10 = vmand %vm8280_vm5, %vm8285_vm6 }
 0x51b   : > { %1721 = vst.msk [vmem:[#allocation3] sm:$0x1] %vm1720_vm10, %v1716_v17 }
 0x51c   : > { %v2693_v35 = vpop.permute.xlu0 %2692 }
 0x51d   : > { %2695 = vst.msk [vmem:[#allocation3 + $0x1] sm:$0x1] %vm1108_vm9, %v2693_v35  ;;  %vm1923_vm9 = vcmp.lt.s32.totalorder %v10289_v10, 112 }
 0x51e   : > { %vm1924_vm3 = vmand %vm1922_vm8, %vm1923_vm9 }
 0x51f   : > { %1925 = vst.msk [vmem:[#allocation3] sm:$0x1] %vm1924_vm3, %v1920_v55  ;;  %v8319_v55 = vadd.s32 40, %v7727_v22 }
 0x520   : > { %v2889_v6 = vpop.permute.xlu0 %2888 }
 0x521   : > { %2891 = vst.msk [vmem:[#allocation3 + $0x1] sm:$0x1] %vm1312_vm2, %v2889_v6  ;;  %vm2127_vm2 = vcmp.lt.s32.totalorder %v10289_v10, 128  ;;  %v8310_v6 = vadd.s32 16, %v7727_v22 }
 0x522   : > { %vm2128_vm4 = vmand %vm2126_vm1, %vm2127_vm2 }
 0x523   : > { %2129 = vst.msk [vmem:[#allocation3] sm:$0x1] %vm2128_vm4, %v2124_v16 }
 0x524   : > { %v3085_v30 = vpop.permute.xlu0 %3084 }
 0x525   : > { %3087 = vst.msk [vmem:[#allocation3 + $0x1] sm:$0x1] %vm1516_vm7, %v3085_v30 }
 0x528   : > { %v3281_v11 = vpop.permute.xlu0 %3280 }
 0x529   : > { %3283 = vst.msk [vmem:[#allocation3 + $0x1] sm:$0x1] %vm1720_vm10, %v3281_v11  ;;  %v8316_v11 = vadd.s32 32, %v7727_v22 }
 0x52c   : > { %v3477_v20 = vpop.permute.xlu0 %3476 }
 0x52d   : > { %3479 = vst.msk [vmem:[#allocation3 + $0x1] sm:$0x1] %vm1924_vm3, %v3477_v20  ;;  %v8322_v20 = vadd.s32 48, %v7727_v22 }
 0x530   : > { %v3661_v41 = vpop.permute.xlu0 %3660 }
 0x531   : > { %3663 = vst.msk [vmem:[#allocation3 + $0x1] sm:$0x1] %vm2128_vm4, %v3661_v41  ;;  %v8325_v41 = vadd.s32 56, %v7727_v22 }
 0x57e   : > { %v4072_v13 = vpop.f32.mrb[28].mxu1 }
 0x57f   : > { %v4117_v36 = vmul.f32 0.0625, %v4072_v13  ;;  %v4074_v38 = vpop.f32.mrb[29].mxu1 }
 0x580   : > { %v4118_v1 = vmul.f32 0.0625, %v4074_v38 }
 0x582   : > { %v4121_v21 = vcombine.low %v4117_v36, %v4118_v1 }
 0x584   : > { %v4128_v45 = vrot.slane %v4121_v21, %v7926_v50  ;;  %v8328_v21 = vadd.s32 64, %v7727_v22 }
 0x586   : > { %v4135_v32 = vrot.slane %v4128_v45, %v7926_v50  ;;  %v4138_v42 = vcombine.high %v4128_v45, %v4128_v45  ;;  %v8331_v45 = vadd.s32 72, %v7727_v22 }
 0x588   : > { %v4137_v27 = vadd.f32 %v4135_v32, %v4114_v25  ;;  %v4145_v52 = vrot.slane %v4138_v42, %v7926_v50  ;;  %v5010_v4 = vcombine.high %v4135_v32, %v4135_v32 }
 0x58a   : > { %v4147_v59 = vadd.f32 %v6399_v39, %v4145_v52  ;;  %v4148_v26 = vadd.f32 1.0, %v4137_v27  ;;  %v5012_v47 = vadd.f32 %v5010_v4, %v4114_v25  ;;  %v5013_v31 = vcombine.high %v4145_v52, %v4145_v52 }
 0x58b   : > { %v8334_v25 = vadd.s32 80, %v7727_v22 }
 0x58c   : > { %v4149_v34 = vmul.f32 16.0, %v4148_v26  ;;  %v4152_v19 = vadd.f32 1.0, %v4147_v59  ;;  %v5015_v37 = vadd.f32 %v6399_v39, %v5013_v31  ;;  %v5016_v49 = vadd.f32 1.0, %v5012_v47 }
 0x58d   : > { %v8339_v26 = vadd.s32 88, %v7727_v22 }
 0x58e   : > { %v6400_v58 = vadd.f32 -1.0, %v4149_v34  ;;  %v4153_v54 = vmul.f32 16.0, %v4152_v19  ;;  %v5017_v18 = vmul.f32 16.0, %v5016_v49  ;;  %v5020_v15 = vadd.f32 1.0, %v5015_v37 }
 0x590   : > { %v4151_v2 = vmul.f32 0.5, %v6400_v58  ;;  %v6401_v51 = vadd.f32 -1.0, %v4153_v54  ;;  %v6402_v5 = vadd.f32 -1.0, %v5017_v18  ;;  %v5021_v35 = vmul.f32 16.0, %v5020_v15 }
 0x592   : > { %v4155_v8 = vmul.f32 0.5, %v6401_v51  ;;  %v4156_v14 = vfloor.f32 %v4151_v2  ;;  %v5019_v30 = vmul.f32 0.5, %v6402_v5  ;;  %v6403_v17 = vadd.f32 -1.0, %v5021_v35 }
 0x594   : > { %v4157_v16 = vfloor.f32 %v4155_v8  ;;  %v4158_v13 = vsub.f32 %v4151_v2, %v4156_v14  ;;  %v6698_v36 = vtrunc.f32 %v4156_v14  ;;  %v5023_v38 = vmul.f32 0.5, %v6403_v17 }
 0x595   : > { %v5024_v1 = vfloor.f32 %v5019_v30 }
 0x596   : > { %v4159_v32 = vsub.f32 %v4155_v8, %v4157_v16  ;;  %v6699_v42 = vcvt.f32.s32 %v6698_v36  ;;  %v6700_v39 = vtrunc.f32 %v4157_v16  ;;  %v4164_v27 = vsub.f32 1.0, %v4158_v13 }
 0x597   : > { %v5025_v52 = vfloor.f32 %v5023_v38  ;;  %v8336_v4 = vsub.f32 %v5019_v30, %v5024_v1  ;;  %v6702_v59 = vtrunc.f32 %v5024_v1 }
 0x598   : > { %v6701_v47 = vcvt.f32.s32 %v6700_v39  ;;  %v4162_v31 = vadd.s32 1, %v6699_v42  ;;  %v4165_v34 = vsub.f32 1.0, %v4159_v32  ;;  %vm4167_vm5 = vcmp.ge.s32.totalorder %v6699_v42, 0 }
 0x599   : > { %vm4168_vm6 = vcmp.lt.s32.totalorder %v6699_v42, 16  ;;  %v4543_v19 = vmul.f32 %v4164_v27, %v4159_v32  ;;  %v4762_v37 = vmul.f32 %v4159_v32, %v4158_v13  ;;  %v8341_v49 = vsub.f32 %v5023_v38, %v5025_v52 }
 0x59a   : > { %v4163_v58 = vadd.s32 1, %v6701_v47  ;;  %v4166_v54 = vmul.f32 %v4165_v34, %v4164_v27  ;;  %vm8343_vm7 = vmand %vm4167_vm5, %vm4168_vm6  ;;  %vm4170_vm8 = vcmp.ge.s32.totalorder %v6701_v47, 0  ;;  %vm4172_vm9 = vcmp.lt.s32.totalorder %v6701_v47, 16 }
 0x59b   : > { %vm4171_vm10 = vmand %vm8343_vm7, %vm4170_vm8  ;;  %v4174_v15 = vmul.u32 16, %v6701_v47  ;;  %v4324_v2 = vmul.f32 %v4165_v34, %v4158_v13  ;;  %vm4325_vm3 = vcmp.ge.s32.totalorder %v4162_v31, 0  ;;  %vm4326_vm1 = vcmp.lt.s32.totalorder %v4162_v31, 16 }
 0x59c   : > { %vm4173_vm2 = vmand %vm4171_vm10, %vm4172_vm9  ;;  %v8352_v51 = vrot.slane %v4166_v54, %v7731_v24  ;;  %v8355_v5 = vrot.slane %v4166_v54, %v7972_v33  ;;  %vm4544_vm4 = vcmp.ge.s32.totalorder %v4163_v58, 0  ;;  %vm4546_vm5 = vcmp.lt.s32.totalorder %v4163_v58, 16 }
 0x59d   : > { %v4175_v35 = vadd.s32 %v6699_v42, %v4174_v15  ;;  %vm8357_vm6 = vmand %vm4325_vm3, %vm4326_vm1  ;;  %v4330_v14 = vadd.s32 %v4174_v15, %v4162_v31  ;;  %v8362_v30 = vrot.slane %v4324_v2, %v7731_v24  ;;  %v8365_v17 = vrot.slane %v4324_v2, %v7972_v33 }
 0x59e   : > { %vm4328_vm10 = vmand %vm8357_vm6, %vm4170_vm8  ;;  %v4548_v16 = vmul.u32 16, %v4163_v58  ;;  %v8371_v13 = vrot.slane %v4543_v19, %v7731_v24  ;;  %v8374_v36 = vrot.slane %v4543_v19, %v7972_v33  ;;  %v8377_v38 = vrot.slane %v4762_v37, %v7731_v24 }
 0x59f   : > { %v4176_v1 = vsel %vm4173_vm2, %v4175_v35, 4294967295  ;;  %vm4329_vm3 = vmand %vm4328_vm10, %vm4172_vm9  ;;  %v8381_v32 = vrot.slane %v4762_v37, %v7972_v33  ;;  %v6703_v39 = vcvt.f32.s32 %v6702_v59  ;;  %v6704_v27 = vtrunc.f32 %v5025_v52 }
 0x5a0   : > { %v8384_v34 = vrot.slane %v4176_v1, %v7731_v24  ;;  %v8387_v54 = vrot.slane %v4176_v1, %v7972_v33  ;;  %v4331_v15 = vsel %vm4329_vm3, %v4330_v14, 4294967295  ;;  %vm4545_vm8 = vmand %vm8343_vm7, %vm4544_vm4  ;;  %v4549_v19 = vadd.s32 %v6699_v42, %v4548_v16 }
 0x5a1   : > { %v8393_v47 = vrot.slane %v4331_v15, %v7731_v24  ;;  %v8396_v37 = vrot.slane %v4331_v15, %v7972_v33  ;;  %vm4547_vm9 = vmand %vm4545_vm8, %vm4546_vm5  ;;  %v4765_v52 = vadd.s32 %v4548_v16, %v4162_v31  ;;  %v6705_v59 = vcvt.f32.s32 %v6704_v27 }
 0x5a2   : > { %v4550_v2 = vsel %vm4547_vm9, %v4549_v19, 4294967295  ;;  %vm4763_vm1 = vmand %vm8357_vm6, %vm4544_vm4  ;;  %v5030_v35 = vadd.s32 1, %v6703_v39  ;;  %v5032_v18 = vsub.f32 1.0, %v8336_v4  ;;  %v5033_v42 = vsub.f32 1.0, %v8341_v49 }
 0x5a3   : > { %v8405_v14 = vrot.slane %v4550_v2, %v7731_v24  ;;  %v8408_v1 = vrot.slane %v4550_v2, %v7972_v33  ;;  %vm4764_vm7 = vmand %vm4763_vm1, %vm4546_vm5  ;;  %v5031_v31 = vadd.s32 1, %v6705_v59  ;;  %vm5035_vm2 = vcmp.ge.s32.totalorder %v6703_v39, 0 }
 0x5a4   : > { %v4766_v16 = vsel %vm4764_vm7, %v4765_v52, 4294967295  ;;  %v5034_v27 = vmul.f32 %v5033_v42, %v5032_v18  ;;  %vm5036_vm10 = vcmp.lt.s32.totalorder %v6703_v39, 16  ;;  %vm5038_vm3 = vcmp.ge.s32.totalorder %v6705_v59, 0 }
 0x5a5   : > { %v8412_v8 = vrot.slane %v4766_v16, %v7731_v24  ;;  %v8415_v15 = vrot.slane %v4766_v16, %v7972_v33  ;;  %vm8417_vm4 = vmand %vm5035_vm2, %vm5036_vm10  ;;  %vm5040_vm6 = vcmp.lt.s32.totalorder %v6705_v59, 16  ;;  %v5042_v2 = vmul.u32 16, %v6705_v59 }
 0x5a6   : > { %vm5039_vm5 = vmand %vm8417_vm4, %vm5038_vm3  ;;  %v8425_v58 = vrot.slane %v5034_v27, %v7731_v24  ;;  %v8428_v52 = vrot.slane %v5034_v27, %v7972_v33  ;;  %v5192_v10 = vmul.f32 %v5033_v42, %v8336_v4  ;;  %vm5193_vm8 = vcmp.ge.s32.totalorder %v5030_v35, 0 }
 0x5a7   : > { %vm5041_vm9 = vmand %vm5039_vm5, %vm5040_vm6  ;;  %v5043_v16 = vadd.s32 %v6703_v39, %v5042_v2  ;;  %vm5194_vm1 = vcmp.lt.s32.totalorder %v5030_v35, 16  ;;  %v5198_v12 = vadd.s32 %v5042_v2, %v5030_v35  ;;  %v5411_v50 = vmul.f32 %v5032_v18, %v8341_v49 }
 0x5a8   : > { %vm8433_vm7 = vmand %vm5193_vm8, %vm5194_vm1  ;;  %v8438_v53 = vrot.slane %v5192_v10, %v7731_v24  ;;  %v8441_v27 = vrot.slane %v5192_v10, %v7972_v33  ;;  %vm5412_vm2 = vcmp.ge.s32.totalorder %v5031_v31, 0  ;;  %vm5414_vm10 = vcmp.lt.s32.totalorder %v5031_v31, 16 }
 0x5a9   : > { %v5044_v42 = vsel %vm5041_vm9, %v5043_v16, 4294967295  ;;  %vm5196_vm5 = vmand %vm8433_vm7, %vm5038_vm3  ;;  %v5416_v2 = vmul.u32 16, %v5031_v31  ;;  %v8447_v18 = vrot.slane %v5411_v50, %v7731_v24  ;;  %v8450_v29 = vrot.slane %v5411_v50, %v7972_v33 }
 0x5aa   : > { %v8453_v23 = vrot.slane %v5044_v42, %v7731_v24  ;;  %v8456_v10 = vrot.slane %v5044_v42, %v7972_v33  ;;  %vm5197_vm8 = vmand %vm5196_vm5, %vm5040_vm6  ;;  %v5630_v16 = vmul.f32 %v8341_v49, %v8336_v4  ;;  %vm4186_vm3 = vcmp.eq.s32.totalorder %v7727_v22, %v8387_v54 }
 0x5ab   : > { %v5199_v44 = vsel %vm5197_vm8, %v5198_v12, 4294967295  ;;  %vm5413_vm9 = vmand %vm8417_vm4, %vm5412_vm2  ;;  %v5417_v50 = vadd.s32 %v6703_v39, %v5416_v2  ;;  %v5633_v3 = vadd.s32 %v5416_v2, %v5030_v35  ;;  %vm4188_vm1 = vcmp.eq.s32.totalorder %v8307_v61, %v8387_v54 }
 0x5ac   : > { %v8469_v42 = vrot.slane %v5199_v44, %v7731_v24  ;;  %v8472_v59 = vrot.slane %v5199_v44, %v7972_v33  ;;  %vm5415_vm6 = vmand %vm5413_vm9, %vm5414_vm10  ;;  %v8476_v4 = vrot.slane %v5630_v16, %v7731_v24  ;;  %v8479_v12 = vrot.slane %v5630_v16, %v7972_v33 }
 0x5ad   : > { %v5418_v49 = vsel %vm5415_vm6, %v5417_v50, 4294967295  ;;  %vm5631_vm4 = vmand %vm8433_vm7, %vm5412_vm2  ;;  %v4261_v39 = vsel %vm4186_vm3, %v8355_v5, 0.0  ;;  %v4263_v35 = vsel %vm4188_vm1, %v8355_v5, 0.0  ;;  %vm4341_vm5 = vcmp.eq.s32.totalorder %v7727_v22, %v8396_v37 }
 0x5ae   : > { %v8489_v44 = vrot.slane %v5418_v49, %v7731_v24  ;;  %v8492_v19 = vrot.slane %v5418_v49, %v7972_v33  ;;  %vm5632_vm8 = vmand %vm5631_vm4, %vm5414_vm10  ;;  %vm4343_vm9 = vcmp.eq.s32.totalorder %v8307_v61, %v8396_v37  ;;  %v4416_v40 = vsel %vm4341_vm5, %v8365_v17, 0.0 }
 0x5af   : > { %v5634_v2 = vsel %vm5632_vm8, %v5633_v3, 4294967295  ;;  %v4418_v16 = vsel %vm4343_vm9, %v8365_v17, 0.0  ;;  %v4480_v50 = vadd.f32 %v4416_v40, %v4261_v39  ;;  %vm4560_vm7 = vcmp.eq.s32.totalorder %v7727_v22, %v8408_v1 }
 0x5b0   : > { %v8502_v62 = vrot.slane %v5634_v2, %v7731_v24  ;;  %v8505_v49 = vrot.slane %v5634_v2, %v7972_v33  ;;  %v4482_v31 = vadd.f32 %v4418_v16, %v4263_v35  ;;  %vm4562_vm2 = vcmp.eq.s32.totalorder %v8307_v61, %v8408_v1 }
 0x5b1   : > { %v4635_v57 = vsel %vm4560_vm7, %v8374_v36, 0.0  ;;  %v4637_v3 = vsel %vm4562_vm2, %v8374_v36, 0.0  ;;  %vm4776_vm10 = vcmp.eq.s32.totalorder %v7727_v22, %v8415_v15  ;;  %vm4778_vm3 = vcmp.eq.s32.totalorder %v8307_v61, %v8415_v15 }
 0x5b2   : > { %v4699_v39 = vadd.f32 %v4635_v57, %v4480_v50  ;;  %v4701_v40 = vadd.f32 %v4637_v3, %v4482_v31  ;;  %v4851_v60 = vsel %vm4776_vm10, %v8381_v32, 0.0  ;;  %v4853_v2 = vsel %vm4778_vm3, %v8381_v32, 0.0 }
 0x5b3   : > { %vm4185_vm1 = vcmp.eq.s32.totalorder %v7727_v22, %v8384_v34  ;;  %vm4187_vm6 = vcmp.eq.s32.totalorder %v8307_v61, %v8384_v34  ;;  %vm4340_vm4 = vcmp.eq.s32.totalorder %v7727_v22, %v8393_v47  ;;  %vm4342_vm5 = vcmp.eq.s32.totalorder %v8307_v61, %v8393_v47 }
 0x5b4   : > { %v4915_v35 = vadd.f32 %v4851_v60, %v4699_v39  ;;  %v4917_v16 = vadd.f32 %v4853_v2, %v4701_v40  ;;  %v4260_v57 = vsel %vm4185_vm1, %v8352_v51, 0.0  ;;  %v4262_v50 = vsel %vm4187_vm6, %v8352_v51, 0.0 }
 0x5b5   : > { %v4415_v31 = vsel %vm4340_vm4, %v8362_v30, 0.0  ;;  %v4417_v3 = vsel %vm4342_vm5, %v8362_v30, 0.0  ;;  %vm4559_vm8 = vcmp.eq.s32.totalorder %v7727_v22, %v8405_v14  ;;  %vm4561_vm9 = vcmp.eq.s32.totalorder %v8307_v61, %v8405_v14 }
 0x5b6   : > { %v4979_v7 = vpack.c.bf16 %v4917_v16, %v4915_v35  ;;  %v4479_v0 = vadd.f32 %v4415_v31, %v4260_v57  ;;  %v4481_v63 = vadd.f32 %v4417_v3, %v4262_v50  ;;  %v4634_v60 = vsel %vm4559_vm8, %v8371_v13, 0.0 }
 0x5b7   : > { %v4636_v39 = vsel %vm4561_vm9, %v8371_v13, 0.0  ;;  %vm4775_vm7 = vcmp.eq.s32.totalorder %v7727_v22, %v8412_v8  ;;  %vm4777_vm2 = vcmp.eq.s32.totalorder %v8307_v61, %v8412_v8  ;;  %vm4190_vm10 = vcmp.eq.s32.totalorder %v8310_v6, %v8387_v54 }
 0x5b8   : > { %5878 = vmatprep.subr.bf16.mxu1 %v4979_v7  ;;  %v4698_v40 = vadd.f32 %v4634_v60, %v4479_v0  ;;  %v4700_v2 = vadd.f32 %v4636_v39, %v4481_v63  ;;  %v4850_v35 = vsel %vm4775_vm7, %v8377_v38, 0.0  ;;  %v4852_v16 = vsel %vm4777_vm2, %v8377_v38, 0.0 }
 0x5b9   : > { %vm4192_vm3 = vcmp.eq.s32.totalorder %v8313_v9, %v8387_v54  ;;  %v4265_v57 = vsel %vm4190_vm10, %v8355_v5, 0.0  ;;  %vm4345_vm1 = vcmp.eq.s32.totalorder %v8310_v6, %v8396_v37  ;;  %vm4347_vm6 = vcmp.eq.s32.totalorder %v8313_v9, %v8396_v37 }
 0x5ba   : > { %v4914_v50 = vadd.f32 %v4850_v35, %v4698_v40  ;;  %v4916_v31 = vadd.f32 %v4852_v16, %v4700_v2  ;;  %v4267_v0 = vsel %vm4192_vm3, %v8355_v5, 0.0  ;;  %v4420_v63 = vsel %vm4345_vm1, %v8365_v17, 0.0 }
 0x5bb   : > { %v4422_v7 = vsel %vm4347_vm6, %v8365_v17, 0.0  ;;  %v4484_v3 = vadd.f32 %v4420_v63, %v4265_v57  ;;  %vm4564_vm4 = vcmp.eq.s32.totalorder %v8310_v6, %v8408_v1  ;;  %vm4566_vm5 = vcmp.eq.s32.totalorder %v8313_v9, %v8408_v1 }
 0x5bc   : > { %v4978_v60 = vpack.c.bf16 %v4916_v31, %v4914_v50  ;;  %v4486_v39 = vadd.f32 %v4422_v7, %v4267_v0  ;;  %v4639_v56 = vsel %vm4564_vm4, %v8374_v36, 0.0  ;;  %v4641_v40 = vsel %vm4566_vm5, %v8374_v36, 0.0 }
 0x5bd   : > { %v4703_v2 = vadd.f32 %v4639_v56, %v4484_v3  ;;  %vm4780_vm8 = vcmp.eq.s32.totalorder %v8310_v6, %v8415_v15  ;;  %vm4782_vm9 = vcmp.eq.s32.totalorder %v8313_v9, %v8415_v15  ;;  %vm5054_vm7 = vcmp.eq.s32.totalorder %v7727_v22, %v8456_v10 }
 0x5be   : > { %5879 = vmatpush1.bf16.msra.mxu1 %v4978_v60  ;;  %v4705_v35 = vadd.f32 %v4641_v40, %v4486_v39  ;;  %v4855_v16 = vsel %vm4780_vm8, %v8381_v32, 0.0  ;;  %v4857_v57 = vsel %vm4782_vm9, %v8381_v32, 0.0  ;;  %vm5056_vm2 = vcmp.eq.s32.totalorder %v8307_v61, %v8456_v10 }
 0x5bf   : > { %v4919_v50 = vadd.f32 %v4855_v16, %v4703_v2  ;;  %v5129_v56 = vsel %vm5054_vm7, %v8428_v52, 0.0  ;;  %v5131_v31 = vsel %vm5056_vm2, %v8428_v52, 0.0  ;;  %vm5209_vm10 = vcmp.eq.s32.totalorder %v7727_v22, %v8472_v59 }
 0x5c0   : > { %v4921_v0 = vadd.f32 %v4857_v57, %v4705_v35  ;;  %vm5211_vm3 = vcmp.eq.s32.totalorder %v8307_v61, %v8472_v59  ;;  %v5284_v63 = vsel %vm5209_vm10, %v8441_v27, 0.0  ;;  %vm5428_vm1 = vcmp.eq.s32.totalorder %v7727_v22, %v8492_v19 }
 0x5c1   : > { %v5286_v7 = vsel %vm5211_vm3, %v8441_v27, 0.0  ;;  %v5348_v3 = vadd.f32 %v5284_v63, %v5129_v56  ;;  %vm5430_vm6 = vcmp.eq.s32.totalorder %v8307_v61, %v8492_v19  ;;  %v5503_v60 = vsel %vm5428_vm1, %v8450_v29, 0.0 }
 0x5c2   : > { %v4981_v39 = vpack.c.bf16 %v4921_v0, %v4919_v50  ;;  %v5350_v40 = vadd.f32 %v5286_v7, %v5131_v31  ;;  %v5505_v2 = vsel %vm5430_vm6, %v8450_v29, 0.0  ;;  %vm5644_vm4 = vcmp.eq.s32.totalorder %v7727_v22, %v8505_v49 }
 0x5c3   : > { %v5567_v35 = vadd.f32 %v5503_v60, %v5348_v3  ;;  %vm5646_vm5 = vcmp.eq.s32.totalorder %v8307_v61, %v8505_v49  ;;  %v5719_v16 = vsel %vm5644_vm4, %v8479_v12, 0.0  ;;  %vm5053_vm8 = vcmp.eq.s32.totalorder %v7727_v22, %v8453_v23 }
 0x5c4   : > { %5880 = vmatprep.subr.bf16.mxu1 %v4981_v39  ;;  %v5569_v57 = vadd.f32 %v5505_v2, %v5350_v40  ;;  %v5721_v56 = vsel %vm5646_vm5, %v8479_v12, 0.0  ;;  %vm5055_vm9 = vcmp.eq.s32.totalorder %v8307_v61, %v8453_v23  ;;  %v5128_v50 = vsel %vm5053_vm8, %v8425_v58, 0.0 }
 0x5c5   : > { %v5783_v31 = vadd.f32 %v5719_v16, %v5567_v35  ;;  %v5130_v0 = vsel %vm5055_vm9, %v8425_v58, 0.0  ;;  %vm5208_vm7 = vcmp.eq.s32.totalorder %v7727_v22, %v8469_v42  ;;  %vm5210_vm2 = vcmp.eq.s32.totalorder %v8307_v61, %v8469_v42 }
 0x5c6   : > { %v5785_v63 = vadd.f32 %v5721_v56, %v5569_v57  ;;  %v5283_v7 = vsel %vm5208_vm7, %v8438_v53, 0.0  ;;  %v5285_v3 = vsel %vm5210_vm2, %v8438_v53, 0.0  ;;  %vm5427_vm10 = vcmp.eq.s32.totalorder %v7727_v22, %v8489_v44 }
 0x5c7   : > { %v5347_v60 = vadd.f32 %v5283_v7, %v5128_v50  ;;  %v5349_v39 = vadd.f32 %v5285_v3, %v5130_v0  ;;  %vm5429_vm3 = vcmp.eq.s32.totalorder %v8307_v61, %v8489_v44  ;;  %v5502_v40 = vsel %vm5427_vm10, %v8447_v18, 0.0 }
 0x5c8   : > { %v5847_v2 = vpack.c.bf16 %v5785_v63, %v5783_v31  ;;  %v5504_v35 = vsel %vm5429_vm3, %v8447_v18, 0.0  ;;  %vm5643_vm1 = vcmp.eq.s32.totalorder %v7727_v22, %v8502_v62  ;;  %vm5645_vm6 = vcmp.eq.s32.totalorder %v8307_v61, %v8502_v62 }
 0x5c9   : > { %v5566_v16 = vadd.f32 %v5502_v40, %v5347_v60  ;;  %v5568_v57 = vadd.f32 %v5504_v35, %v5349_v39  ;;  %v5718_v56 = vsel %vm5643_vm1, %v8476_v4, 0.0  ;;  %v5720_v50 = vsel %vm5645_vm6, %v8476_v4, 0.0 }
 0x5ca   : > { %5919 = vmatprep.subr.bf16.mxu0 %v5847_v2  ;;  %vm5058_vm4 = vcmp.eq.s32.totalorder %v8310_v6, %v8456_v10  ;;  %vm5060_vm5 = vcmp.eq.s32.totalorder %v8313_v9, %v8456_v10  ;;  %vm5213_vm8 = vcmp.eq.s32.totalorder %v8310_v6, %v8472_v59  ;;  %vm5215_vm9 = vcmp.eq.s32.totalorder %v8313_v9, %v8472_v59 }
 0x5cb   : > { %v5782_v61 = vadd.f32 %v5718_v56, %v5566_v16  ;;  %v5784_v31 = vadd.f32 %v5720_v50, %v5568_v57  ;;  %v5133_v0 = vsel %vm5058_vm4, %v8428_v52, 0.0  ;;  %v5135_v63 = vsel %vm5060_vm5, %v8428_v52, 0.0 }
 0x5cc   : > { %v5288_v7 = vsel %vm5213_vm8, %v8441_v27, 0.0  ;;  %v5290_v3 = vsel %vm5215_vm9, %v8441_v27, 0.0  ;;  %vm5432_vm7 = vcmp.eq.s32.totalorder %v8310_v6, %v8492_v19  ;;  %vm5434_vm2 = vcmp.eq.s32.totalorder %v8313_v9, %v8492_v19 }
 0x5cd   : > { %v5846_v60 = vpack.c.bf16 %v5784_v31, %v5782_v61  ;;  %v5352_v39 = vadd.f32 %v5288_v7, %v5133_v0  ;;  %v5354_v40 = vadd.f32 %v5290_v3, %v5135_v63  ;;  %v5507_v2 = vsel %vm5432_vm7, %v8450_v29, 0.0 }
 0x5ce   : > { %v5509_v35 = vsel %vm5434_vm2, %v8450_v29, 0.0  ;;  %vm5648_vm10 = vcmp.eq.s32.totalorder %v8310_v6, %v8505_v49  ;;  %vm5650_vm3 = vcmp.eq.s32.totalorder %v8313_v9, %v8505_v49  ;;  %vm4189_vm1 = vcmp.eq.s32.totalorder %v8310_v6, %v8384_v34 }
 0x5cf   : > { %5920 = vmatpush1.bf16.msra.mxu0 %v5846_v60  ;;  %v5571_v16 = vadd.f32 %v5507_v2, %v5352_v39  ;;  %v5573_v57 = vadd.f32 %v5509_v35, %v5354_v40  ;;  %v5723_v56 = vsel %vm5648_vm10, %v8479_v12, 0.0  ;;  %v5725_v50 = vsel %vm5650_vm3, %v8479_v12, 0.0 }
 0x5d0   : > { %vm4191_vm6 = vcmp.eq.s32.totalorder %v8313_v9, %v8384_v34  ;;  %v4264_v61 = vsel %vm4189_vm1, %v8352_v51, 0.0  ;;  %vm4344_vm4 = vcmp.eq.s32.totalorder %v8310_v6, %v8393_v47  ;;  %vm4346_vm5 = vcmp.eq.s32.totalorder %v8313_v9, %v8393_v47 }
 0x5d1   : > { %v5787_v31 = vadd.f32 %v5723_v56, %v5571_v16  ;;  %v5789_v0 = vadd.f32 %v5725_v50, %v5573_v57  ;;  %v4266_v63 = vsel %vm4191_vm6, %v8352_v51, 0.0  ;;  %v4419_v7 = vsel %vm4344_vm4, %v8362_v30, 0.0 }
 0x5d2   : > { %v4421_v3 = vsel %vm4346_vm5, %v8362_v30, 0.0  ;;  %v4483_v60 = vadd.f32 %v4419_v7, %v4264_v61  ;;  %vm4563_vm8 = vcmp.eq.s32.totalorder %v8310_v6, %v8405_v14  ;;  %vm4565_vm9 = vcmp.eq.s32.totalorder %v8313_v9, %v8405_v14 }
 0x5d3   : > { %v5849_v39 = vpack.c.bf16 %v5789_v0, %v5787_v31  ;;  %v4485_v40 = vadd.f32 %v4421_v3, %v4266_v63  ;;  %v4638_v2 = vsel %vm4563_vm8, %v8371_v13, 0.0  ;;  %v4640_v35 = vsel %vm4565_vm9, %v8371_v13, 0.0 }
 0x5d4   : > { %v4702_v16 = vadd.f32 %v4638_v2, %v4483_v60  ;;  %vm4779_vm7 = vcmp.eq.s32.totalorder %v8310_v6, %v8412_v8  ;;  %vm4781_vm2 = vcmp.eq.s32.totalorder %v8313_v9, %v8412_v8  ;;  %vm4194_vm10 = vcmp.eq.s32.totalorder %v8316_v11, %v8387_v54 }
 0x5d5   : > { %5921 = vmatprep.subr.bf16.mxu0 %v5849_v39  ;;  %v4704_v57 = vadd.f32 %v4640_v35, %v4485_v40  ;;  %v4854_v56 = vsel %vm4779_vm7, %v8377_v38, 0.0  ;;  %v4856_v50 = vsel %vm4781_vm2, %v8377_v38, 0.0  ;;  %vm4196_vm3 = vcmp.eq.s32.totalorder %v8319_v55, %v8387_v54 }
 0x5d6   : > { %v4918_v61 = vadd.f32 %v4854_v56, %v4702_v16  ;;  %v4269_v31 = vsel %vm4194_vm10, %v8355_v5, 0.0  ;;  %v4271_v0 = vsel %vm4196_vm3, %v8355_v5, 0.0  ;;  %vm4349_vm1 = vcmp.eq.s32.totalorder %v8316_v11, %v8396_v37 }
 0x5d7   : > { %v4920_v63 = vadd.f32 %v4856_v50, %v4704_v57  ;;  %vm4351_vm6 = vcmp.eq.s32.totalorder %v8319_v55, %v8396_v37  ;;  %v4424_v7 = vsel %vm4349_vm1, %v8365_v17, 0.0  ;;  %vm4568_vm4 = vcmp.eq.s32.totalorder %v8316_v11, %v8408_v1 }
 0x5d8   : > { %v4426_v3 = vsel %vm4351_vm6, %v8365_v17, 0.0  ;;  %v4488_v60 = vadd.f32 %v4424_v7, %v4269_v31  ;;  %vm4570_vm5 = vcmp.eq.s32.totalorder %v8319_v55, %v8408_v1  ;;  %v4643_v39 = vsel %vm4568_vm4, %v8374_v36, 0.0 }
 0x5d9   : > { %v4980_v40 = vpack.c.bf16 %v4920_v63, %v4918_v61  ;;  %v4490_v2 = vadd.f32 %v4426_v3, %v4271_v0  ;;  %v4645_v35 = vsel %vm4570_vm5, %v8374_v36, 0.0  ;;  %vm4784_vm8 = vcmp.eq.s32.totalorder %v8316_v11, %v8415_v15 }
 0x5da   : > { %v4707_v16 = vadd.f32 %v4643_v39, %v4488_v60  ;;  %vm4786_vm9 = vcmp.eq.s32.totalorder %v8319_v55, %v8415_v15  ;;  %v4859_v57 = vsel %vm4784_vm8, %v8381_v32, 0.0  ;;  %vm5057_vm7 = vcmp.eq.s32.totalorder %v8310_v6, %v8453_v23 }
 0x5db   : > { %5881 = vmatpush1.bf16.msra.mxu1 %v4980_v40  ;;  %v4709_v56 = vadd.f32 %v4645_v35, %v4490_v2  ;;  %v4861_v50 = vsel %vm4786_vm9, %v8381_v32, 0.0  ;;  %vm5059_vm2 = vcmp.eq.s32.totalorder %v8313_v9, %v8453_v23  ;;  %v5132_v61 = vsel %vm5057_vm7, %v8425_v58, 0.0 }
 0x5dc   : > { %v4923_v31 = vadd.f32 %v4859_v57, %v4707_v16  ;;  %v5134_v0 = vsel %vm5059_vm2, %v8425_v58, 0.0  ;;  %vm5212_vm10 = vcmp.eq.s32.totalorder %v8310_v6, %v8469_v42  ;;  %vm5214_vm3 = vcmp.eq.s32.totalorder %v8313_v9, %v8469_v42 }
 0x5dd   : > { %v4925_v63 = vadd.f32 %v4861_v50, %v4709_v56  ;;  %v5287_v7 = vsel %vm5212_vm10, %v8438_v53, 0.0  ;;  %v5289_v3 = vsel %vm5214_vm3, %v8438_v53, 0.0  ;;  %vm5431_vm1 = vcmp.eq.s32.totalorder %v8310_v6, %v8489_v44 }
 0x5de   : > { %v5351_v60 = vadd.f32 %v5287_v7, %v5132_v61  ;;  %v5353_v39 = vadd.f32 %v5289_v3, %v5134_v0  ;;  %vm5433_vm6 = vcmp.eq.s32.totalorder %v8313_v9, %v8489_v44  ;;  %v5506_v40 = vsel %vm5431_vm1, %v8447_v18, 0.0 }
 0x5df   : > { %v4983_v2 = vpack.c.bf16 %v4925_v63, %v4923_v31  ;;  %v5508_v35 = vsel %vm5433_vm6, %v8447_v18, 0.0  ;;  %vm5647_vm4 = vcmp.eq.s32.totalorder %v8310_v6, %v8502_v62  ;;  %vm5649_vm5 = vcmp.eq.s32.totalorder %v8313_v9, %v8502_v62 }
 0x5e0   : > { %v5570_v16 = vadd.f32 %v5506_v40, %v5351_v60  ;;  %v5572_v57 = vadd.f32 %v5508_v35, %v5353_v39  ;;  %v5722_v56 = vsel %vm5647_vm4, %v8476_v4, 0.0  ;;  %v5724_v50 = vsel %vm5649_vm5, %v8476_v4, 0.0 }
 0x5e1   : > { %5882 = vmatprep.subr.bf16.mxu1 %v4983_v2  ;;  %vm5062_vm8 = vcmp.eq.s32.totalorder %v8316_v11, %v8456_v10  ;;  %vm5064_vm9 = vcmp.eq.s32.totalorder %v8319_v55, %v8456_v10  ;;  %vm5217_vm7 = vcmp.eq.s32.totalorder %v8316_v11, %v8472_v59  ;;  %vm5219_vm2 = vcmp.eq.s32.totalorder %v8319_v55, %v8472_v59 }
 0x5e2   : > { %v5786_v6 = vadd.f32 %v5722_v56, %v5570_v16  ;;  %v5788_v9 = vadd.f32 %v5724_v50, %v5572_v57  ;;  %v5137_v61 = vsel %vm5062_vm8, %v8428_v52, 0.0  ;;  %v5139_v31 = vsel %vm5064_vm9, %v8428_v52, 0.0 }
 0x5e3   : > { %v5292_v0 = vsel %vm5217_vm7, %v8441_v27, 0.0  ;;  %v5294_v63 = vsel %vm5219_vm2, %v8441_v27, 0.0  ;;  %vm5436_vm10 = vcmp.eq.s32.totalorder %v8316_v11, %v8492_v19  ;;  %vm5438_vm3 = vcmp.eq.s32.totalorder %v8319_v55, %v8492_v19 }
 0x5e4   : > { %v5848_v7 = vpack.c.bf16 %v5788_v9, %v5786_v6  ;;  %v5356_v3 = vadd.f32 %v5292_v0, %v5137_v61  ;;  %v5358_v60 = vadd.f32 %v5294_v63, %v5139_v31  ;;  %v5511_v39 = vsel %vm5436_vm10, %v8450_v29, 0.0 }
 0x5e5   : > { %v5513_v40 = vsel %vm5438_vm3, %v8450_v29, 0.0  ;;  %vm5652_vm1 = vcmp.eq.s32.totalorder %v8316_v11, %v8505_v49  ;;  %vm5654_vm6 = vcmp.eq.s32.totalorder %v8319_v55, %v8505_v49  ;;  %vm4193_vm4 = vcmp.eq.s32.totalorder %v8316_v11, %v8384_v34 }
 0x5e6   : > { %5922 = vmatpush1.bf16.msra.mxu0 %v5848_v7  ;;  %v5575_v2 = vadd.f32 %v5511_v39, %v5356_v3  ;;  %v5577_v35 = vadd.f32 %v5513_v40, %v5358_v60  ;;  %v5727_v16 = vsel %vm5652_vm1, %v8479_v12, 0.0  ;;  %v5729_v57 = vsel %vm5654_vm6, %v8479_v12, 0.0 }
 0x5e7   : > { %vm4195_vm5 = vcmp.eq.s32.totalorder %v8319_v55, %v8384_v34  ;;  %v4268_v56 = vsel %vm4193_vm4, %v8352_v51, 0.0  ;;  %vm4348_vm8 = vcmp.eq.s32.totalorder %v8316_v11, %v8393_v47  ;;  %vm4350_vm9 = vcmp.eq.s32.totalorder %v8319_v55, %v8393_v47 }
 0x5e8   : > { %v5791_v50 = vadd.f32 %v5727_v16, %v5575_v2  ;;  %v5793_v6 = vadd.f32 %v5729_v57, %v5577_v35  ;;  %v4270_v9 = vsel %vm4195_vm5, %v8352_v51, 0.0  ;;  %v4423_v61 = vsel %vm4348_vm8, %v8362_v30, 0.0 }
 0x5e9   : > { %v4425_v31 = vsel %vm4350_vm9, %v8362_v30, 0.0  ;;  %v4487_v0 = vadd.f32 %v4423_v61, %v4268_v56  ;;  %vm4567_vm7 = vcmp.eq.s32.totalorder %v8316_v11, %v8405_v14  ;;  %vm4569_vm2 = vcmp.eq.s32.totalorder %v8319_v55, %v8405_v14 }
 0x5ea   : > { %v5851_v63 = vpack.c.bf16 %v5793_v6, %v5791_v50  ;;  %v4489_v7 = vadd.f32 %v4425_v31, %v4270_v9  ;;  %v4642_v3 = vsel %vm4567_vm7, %v8371_v13, 0.0  ;;  %v4644_v60 = vsel %vm4569_vm2, %v8371_v13, 0.0 }
 0x5eb   : > { %v4706_v39 = vadd.f32 %v4642_v3, %v4487_v0  ;;  %vm4783_vm10 = vcmp.eq.s32.totalorder %v8316_v11, %v8412_v8  ;;  %vm4785_vm3 = vcmp.eq.s32.totalorder %v8319_v55, %v8412_v8  ;;  %vm4198_vm1 = vcmp.eq.s32.totalorder %v8322_v20, %v8387_v54 }
 0x5ec   : > { %5923 = vmatprep.subr.bf16.mxu0 %v5851_v63  ;;  %v4708_v40 = vadd.f32 %v4644_v60, %v4489_v7  ;;  %v4858_v2 = vsel %vm4783_vm10, %v8377_v38, 0.0  ;;  %v4860_v35 = vsel %vm4785_vm3, %v8377_v38, 0.0  ;;  %vm4200_vm6 = vcmp.eq.s32.totalorder %v8325_v41, %v8387_v54 }
 0x5ed   : > { %v4922_v16 = vadd.f32 %v4858_v2, %v4706_v39  ;;  %v4273_v57 = vsel %vm4198_vm1, %v8355_v5, 0.0  ;;  %v4275_v56 = vsel %vm4200_vm6, %v8355_v5, 0.0  ;;  %vm4353_vm4 = vcmp.eq.s32.totalorder %v8322_v20, %v8396_v37 }
 0x5ee   : > { %v4924_v50 = vadd.f32 %v4860_v35, %v4708_v40  ;;  %vm4355_vm5 = vcmp.eq.s32.totalorder %v8325_v41, %v8396_v37  ;;  %v4428_v6 = vsel %vm4353_vm4, %v8365_v17, 0.0  ;;  %vm4572_vm8 = vcmp.eq.s32.totalorder %v8322_v20, %v8408_v1 }
 0x5ef   : > { %v4430_v9 = vsel %vm4355_vm5, %v8365_v17, 0.0  ;;  %v4492_v61 = vadd.f32 %v4428_v6, %v4273_v57  ;;  %vm4574_vm9 = vcmp.eq.s32.totalorder %v8325_v41, %v8408_v1  ;;  %v4647_v31 = vsel %vm4572_vm8, %v8374_v36, 0.0 }
 0x5f0   : > { %v4982_v0 = vpack.c.bf16 %v4924_v50, %v4922_v16  ;;  %v4494_v63 = vadd.f32 %v4430_v9, %v4275_v56  ;;  %v4649_v7 = vsel %vm4574_vm9, %v8374_v36, 0.0  ;;  %vm4788_vm7 = vcmp.eq.s32.totalorder %v8322_v20, %v8415_v15 }
 0x5f1   : > { %v4711_v3 = vadd.f32 %v4647_v31, %v4492_v61  ;;  %vm4790_vm2 = vcmp.eq.s32.totalorder %v8325_v41, %v8415_v15  ;;  %v4863_v60 = vsel %vm4788_vm7, %v8381_v32, 0.0  ;;  %vm5061_vm10 = vcmp.eq.s32.totalorder %v8316_v11, %v8453_v23 }
 0x5f2   : > { %5883 = vmatpush1.bf16.msra.mxu1 %v4982_v0  ;;  %v4713_v39 = vadd.f32 %v4649_v7, %v4494_v63  ;;  %v4865_v40 = vsel %vm4790_vm2, %v8381_v32, 0.0  ;;  %vm5063_vm3 = vcmp.eq.s32.totalorder %v8319_v55, %v8453_v23  ;;  %v5136_v2 = vsel %vm5061_vm10, %v8425_v58, 0.0 }
 0x5f3   : > { %v4927_v35 = vadd.f32 %v4863_v60, %v4711_v3  ;;  %v5138_v16 = vsel %vm5063_vm3, %v8425_v58, 0.0  ;;  %vm5216_vm1 = vcmp.eq.s32.totalorder %v8316_v11, %v8469_v42  ;;  %vm5218_vm6 = vcmp.eq.s32.totalorder %v8319_v55, %v8469_v42 }
 0x5f4   : > { %v4929_v57 = vadd.f32 %v4865_v40, %v4713_v39  ;;  %v5291_v56 = vsel %vm5216_vm1, %v8438_v53, 0.0  ;;  %v5293_v50 = vsel %vm5218_vm6, %v8438_v53, 0.0  ;;  %vm5435_vm4 = vcmp.eq.s32.totalorder %v8316_v11, %v8489_v44 }
 0x5f5   : > { %v5355_v6 = vadd.f32 %v5291_v56, %v5136_v2  ;;  %v5357_v9 = vadd.f32 %v5293_v50, %v5138_v16  ;;  %vm5437_vm5 = vcmp.eq.s32.totalorder %v8319_v55, %v8489_v44  ;;  %v5510_v61 = vsel %vm5435_vm4, %v8447_v18, 0.0 }
 0x5f6   : > { %v4985_v31 = vpack.c.bf16 %v4929_v57, %v4927_v35  ;;  %v5512_v0 = vsel %vm5437_vm5, %v8447_v18, 0.0  ;;  %vm5651_vm8 = vcmp.eq.s32.totalorder %v8316_v11, %v8502_v62  ;;  %vm5653_vm9 = vcmp.eq.s32.totalorder %v8319_v55, %v8502_v62 }
 0x5f7   : > { %v5574_v63 = vadd.f32 %v5510_v61, %v5355_v6  ;;  %v5576_v7 = vadd.f32 %v5512_v0, %v5357_v9  ;;  %v5726_v3 = vsel %vm5651_vm8, %v8476_v4, 0.0  ;;  %v5728_v60 = vsel %vm5653_vm9, %v8476_v4, 0.0 }
 0x5f8   : > { %5884 = vmatprep.subr.bf16.mxu1 %v4985_v31  ;;  %vm5066_vm7 = vcmp.eq.s32.totalorder %v8322_v20, %v8456_v10  ;;  %vm5068_vm2 = vcmp.eq.s32.totalorder %v8325_v41, %v8456_v10  ;;  %vm5221_vm10 = vcmp.eq.s32.totalorder %v8322_v20, %v8472_v59  ;;  %vm5223_vm3 = vcmp.eq.s32.totalorder %v8325_v41, %v8472_v59 }
 0x5f9   : > { %v5790_v11 = vadd.f32 %v5726_v3, %v5574_v63  ;;  %v5792_v55 = vadd.f32 %v5728_v60, %v5576_v7  ;;  %v5141_v39 = vsel %vm5066_vm7, %v8428_v52, 0.0  ;;  %v5143_v40 = vsel %vm5068_vm2, %v8428_v52, 0.0 }
 0x5fa   : > { %v5296_v2 = vsel %vm5221_vm10, %v8441_v27, 0.0  ;;  %v5298_v35 = vsel %vm5223_vm3, %v8441_v27, 0.0  ;;  %vm5440_vm1 = vcmp.eq.s32.totalorder %v8322_v20, %v8492_v19  ;;  %vm5442_vm6 = vcmp.eq.s32.totalorder %v8325_v41, %v8492_v19 }
 0x5fb   : > { %v5850_v16 = vpack.c.bf16 %v5792_v55, %v5790_v11  ;;  %v5360_v57 = vadd.f32 %v5296_v2, %v5141_v39  ;;  %v5362_v56 = vadd.f32 %v5298_v35, %v5143_v40  ;;  %v5515_v50 = vsel %vm5440_vm1, %v8450_v29, 0.0 }
 0x5fc   : > { %v5517_v6 = vsel %vm5442_vm6, %v8450_v29, 0.0  ;;  %vm5656_vm4 = vcmp.eq.s32.totalorder %v8322_v20, %v8505_v49  ;;  %vm5658_vm5 = vcmp.eq.s32.totalorder %v8325_v41, %v8505_v49  ;;  %vm4197_vm8 = vcmp.eq.s32.totalorder %v8322_v20, %v8384_v34 }
 0x5fd   : > { %5924 = vmatpush1.bf16.msra.mxu0 %v5850_v16  ;;  %v5579_v9 = vadd.f32 %v5515_v50, %v5360_v57  ;;  %v5581_v61 = vadd.f32 %v5517_v6, %v5362_v56  ;;  %v5731_v31 = vsel %vm5656_vm4, %v8479_v12, 0.0  ;;  %v5733_v0 = vsel %vm5658_vm5, %v8479_v12, 0.0 }
 0x5fe   : > { %vm4199_vm9 = vcmp.eq.s32.totalorder %v8325_v41, %v8384_v34  ;;  %v4272_v63 = vsel %vm4197_vm8, %v8352_v51, 0.0  ;;  %vm4352_vm7 = vcmp.eq.s32.totalorder %v8322_v20, %v8393_v47  ;;  %vm4354_vm2 = vcmp.eq.s32.totalorder %v8325_v41, %v8393_v47 }
 0x5ff   : > { %v5795_v7 = vadd.f32 %v5731_v31, %v5579_v9  ;;  %v5797_v3 = vadd.f32 %v5733_v0, %v5581_v61  ;;  %v4274_v60 = vsel %vm4199_vm9, %v8352_v51, 0.0  ;;  %v4427_v11 = vsel %vm4352_vm7, %v8362_v30, 0.0 }
 0x600   : > { %v4429_v55 = vsel %vm4354_vm2, %v8362_v30, 0.0  ;;  %v4491_v39 = vadd.f32 %v4427_v11, %v4272_v63  ;;  %vm4571_vm10 = vcmp.eq.s32.totalorder %v8322_v20, %v8405_v14  ;;  %vm4573_vm3 = vcmp.eq.s32.totalorder %v8325_v41, %v8405_v14 }
 0x601   : > { %v5853_v40 = vpack.c.bf16 %v5797_v3, %v5795_v7  ;;  %v4493_v2 = vadd.f32 %v4429_v55, %v4274_v60  ;;  %v4646_v35 = vsel %vm4571_vm10, %v8371_v13, 0.0  ;;  %v4648_v16 = vsel %vm4573_vm3, %v8371_v13, 0.0 }
 0x602   : > { %v4710_v57 = vadd.f32 %v4646_v35, %v4491_v39  ;;  %vm4787_vm1 = vcmp.eq.s32.totalorder %v8322_v20, %v8412_v8  ;;  %vm4789_vm6 = vcmp.eq.s32.totalorder %v8325_v41, %v8412_v8  ;;  %vm4202_vm4 = vcmp.eq.s32.totalorder %v8328_v21, %v8387_v54 }
 0x603   : > { %5925 = vmatprep.subr.bf16.mxu0 %v5853_v40  ;;  %v4712_v56 = vadd.f32 %v4648_v16, %v4493_v2  ;;  %v4862_v50 = vsel %vm4787_vm1, %v8377_v38, 0.0  ;;  %v4864_v6 = vsel %vm4789_vm6, %v8377_v38, 0.0  ;;  %vm4204_vm5 = vcmp.eq.s32.totalorder %v8331_v45, %v8387_v54 }
 0x604   : > { %v4926_v9 = vadd.f32 %v4862_v50, %v4710_v57  ;;  %v4277_v61 = vsel %vm4202_vm4, %v8355_v5, 0.0  ;;  %v4279_v31 = vsel %vm4204_vm5, %v8355_v5, 0.0  ;;  %vm4357_vm8 = vcmp.eq.s32.totalorder %v8328_v21, %v8396_v37 }
 0x605   : > { %v4928_v0 = vadd.f32 %v4864_v6, %v4712_v56  ;;  %vm4359_vm9 = vcmp.eq.s32.totalorder %v8331_v45, %v8396_v37  ;;  %v4432_v63 = vsel %vm4357_vm8, %v8365_v17, 0.0  ;;  %vm4576_vm7 = vcmp.eq.s32.totalorder %v8328_v21, %v8408_v1 }
 0x606   : > { %v4434_v7 = vsel %vm4359_vm9, %v8365_v17, 0.0  ;;  %v4496_v3 = vadd.f32 %v4432_v63, %v4277_v61  ;;  %vm4578_vm2 = vcmp.eq.s32.totalorder %v8331_v45, %v8408_v1  ;;  %v4651_v60 = vsel %vm4576_vm7, %v8374_v36, 0.0 }
 0x607   : > { %v4984_v11 = vpack.c.bf16 %v4928_v0, %v4926_v9  ;;  %v4498_v55 = vadd.f32 %v4434_v7, %v4279_v31  ;;  %v4653_v39 = vsel %vm4578_vm2, %v8374_v36, 0.0  ;;  %vm4792_vm10 = vcmp.eq.s32.totalorder %v8328_v21, %v8415_v15 }
 0x608   : > { %v4715_v40 = vadd.f32 %v4651_v60, %v4496_v3  ;;  %vm4794_vm3 = vcmp.eq.s32.totalorder %v8331_v45, %v8415_v15  ;;  %v4867_v2 = vsel %vm4792_vm10, %v8381_v32, 0.0  ;;  %vm5065_vm1 = vcmp.eq.s32.totalorder %v8322_v20, %v8453_v23 }
 0x609   : > { %5885 = vmatpush1.bf16.msra.mxu1 %v4984_v11  ;;  %v4717_v35 = vadd.f32 %v4653_v39, %v4498_v55  ;;  %v4869_v16 = vsel %vm4794_vm3, %v8381_v32, 0.0  ;;  %vm5067_vm6 = vcmp.eq.s32.totalorder %v8325_v41, %v8453_v23  ;;  %v5140_v57 = vsel %vm5065_vm1, %v8425_v58, 0.0 }
 0x60a   : > { %v4931_v56 = vadd.f32 %v4867_v2, %v4715_v40  ;;  %v5142_v50 = vsel %vm5067_vm6, %v8425_v58, 0.0  ;;  %vm5220_vm4 = vcmp.eq.s32.totalorder %v8322_v20, %v8469_v42  ;;  %vm5222_vm5 = vcmp.eq.s32.totalorder %v8325_v41, %v8469_v42 }
 0x60b   : > { %v4933_v6 = vadd.f32 %v4869_v16, %v4717_v35  ;;  %v5295_v9 = vsel %vm5220_vm4, %v8438_v53, 0.0  ;;  %v5297_v61 = vsel %vm5222_vm5, %v8438_v53, 0.0  ;;  %vm5439_vm8 = vcmp.eq.s32.totalorder %v8322_v20, %v8489_v44 }
 0x60c   : > { %v5359_v31 = vadd.f32 %v5295_v9, %v5140_v57  ;;  %v5361_v0 = vadd.f32 %v5297_v61, %v5142_v50  ;;  %vm5441_vm9 = vcmp.eq.s32.totalorder %v8325_v41, %v8489_v44  ;;  %v5514_v63 = vsel %vm5439_vm8, %v8447_v18, 0.0 }
 0x60d   : > { %v4987_v7 = vpack.c.bf16 %v4933_v6, %v4931_v56  ;;  %v5516_v3 = vsel %vm5441_vm9, %v8447_v18, 0.0  ;;  %vm5655_vm7 = vcmp.eq.s32.totalorder %v8322_v20, %v8502_v62  ;;  %vm5657_vm2 = vcmp.eq.s32.totalorder %v8325_v41, %v8502_v62 }
 0x60e   : > { %v5578_v60 = vadd.f32 %v5514_v63, %v5359_v31  ;;  %v5580_v11 = vadd.f32 %v5516_v3, %v5361_v0  ;;  %v5730_v55 = vsel %vm5655_vm7, %v8476_v4, 0.0  ;;  %v5732_v39 = vsel %vm5657_vm2, %v8476_v4, 0.0 }
 0x60f   : > { %5886 = vmatprep.subr.bf16.mxu1 %v4987_v7  ;;  %vm5070_vm10 = vcmp.eq.s32.totalorder %v8328_v21, %v8456_v10  ;;  %vm5072_vm3 = vcmp.eq.s32.totalorder %v8331_v45, %v8456_v10  ;;  %vm5225_vm1 = vcmp.eq.s32.totalorder %v8328_v21, %v8472_v59  ;;  %vm5227_vm6 = vcmp.eq.s32.totalorder %v8331_v45, %v8472_v59 }
 0x610   : > { %v5794_v20 = vadd.f32 %v5730_v55, %v5578_v60  ;;  %v5796_v41 = vadd.f32 %v5732_v39, %v5580_v11  ;;  %v5145_v40 = vsel %vm5070_vm10, %v8428_v52, 0.0  ;;  %v5147_v2 = vsel %vm5072_vm3, %v8428_v52, 0.0 }
 0x611   : > { %v5300_v35 = vsel %vm5225_vm1, %v8441_v27, 0.0  ;;  %v5302_v16 = vsel %vm5227_vm6, %v8441_v27, 0.0  ;;  %vm5444_vm4 = vcmp.eq.s32.totalorder %v8328_v21, %v8492_v19  ;;  %vm5446_vm5 = vcmp.eq.s32.totalorder %v8331_v45, %v8492_v19 }
 0x612   : > { %v5852_v57 = vpack.c.bf16 %v5796_v41, %v5794_v20  ;;  %v5364_v56 = vadd.f32 %v5300_v35, %v5145_v40  ;;  %v5366_v50 = vadd.f32 %v5302_v16, %v5147_v2  ;;  %v5519_v6 = vsel %vm5444_vm4, %v8450_v29, 0.0 }
 0x613   : > { %v5521_v9 = vsel %vm5446_vm5, %v8450_v29, 0.0  ;;  %vm5660_vm8 = vcmp.eq.s32.totalorder %v8328_v21, %v8505_v49  ;;  %vm5662_vm9 = vcmp.eq.s32.totalorder %v8331_v45, %v8505_v49  ;;  %vm4201_vm7 = vcmp.eq.s32.totalorder %v8328_v21, %v8384_v34 }
 0x614   : > { %5926 = vmatpush1.bf16.msra.mxu0 %v5852_v57  ;;  %v5583_v61 = vadd.f32 %v5519_v6, %v5364_v56  ;;  %v5585_v31 = vadd.f32 %v5521_v9, %v5366_v50  ;;  %v5735_v0 = vsel %vm5660_vm8, %v8479_v12, 0.0  ;;  %v5737_v63 = vsel %vm5662_vm9, %v8479_v12, 0.0 }
 0x615   : > { %vm4203_vm2 = vcmp.eq.s32.totalorder %v8331_v45, %v8384_v34  ;;  %v4276_v7 = vsel %vm4201_vm7, %v8352_v51, 0.0  ;;  %vm4356_vm10 = vcmp.eq.s32.totalorder %v8328_v21, %v8393_v47  ;;  %vm4358_vm3 = vcmp.eq.s32.totalorder %v8331_v45, %v8393_v47 }
 0x616   : > { %v5799_v3 = vadd.f32 %v5735_v0, %v5583_v61  ;;  %v5801_v60 = vadd.f32 %v5737_v63, %v5585_v31  ;;  %v4278_v11 = vsel %vm4203_vm2, %v8352_v51, 0.0  ;;  %v4431_v55 = vsel %vm4356_vm10, %v8362_v30, 0.0 }
 0x617   : > { %v4433_v39 = vsel %vm4358_vm3, %v8362_v30, 0.0  ;;  %v4495_v20 = vadd.f32 %v4431_v55, %v4276_v7  ;;  %vm4575_vm1 = vcmp.eq.s32.totalorder %v8328_v21, %v8405_v14  ;;  %vm4577_vm6 = vcmp.eq.s32.totalorder %v8331_v45, %v8405_v14 }
 0x618   : > { %v5855_v41 = vpack.c.bf16 %v5801_v60, %v5799_v3  ;;  %v4497_v40 = vadd.f32 %v4433_v39, %v4278_v11  ;;  %v4650_v2 = vsel %vm4575_vm1, %v8371_v13, 0.0  ;;  %v4652_v35 = vsel %vm4577_vm6, %v8371_v13, 0.0 }
 0x619   : > { %v4714_v16 = vadd.f32 %v4650_v2, %v4495_v20  ;;  %vm4791_vm4 = vcmp.eq.s32.totalorder %v8328_v21, %v8412_v8  ;;  %vm4793_vm5 = vcmp.eq.s32.totalorder %v8331_v45, %v8412_v8  ;;  %vm4206_vm8 = vcmp.eq.s32.totalorder %v8334_v25, %v8387_v54 }
 0x61a   : > { %5927 = vmatprep.subr.bf16.mxu0 %v5855_v41  ;;  %v4716_v57 = vadd.f32 %v4652_v35, %v4497_v40  ;;  %v4866_v56 = vsel %vm4791_vm4, %v8377_v38, 0.0  ;;  %v4868_v50 = vsel %vm4793_vm5, %v8377_v38, 0.0  ;;  %vm4208_vm9 = vcmp.eq.s32.totalorder %v8339_v26, %v8387_v54 }
 0x61b   : > { %v4930_v6 = vadd.f32 %v4866_v56, %v4714_v16  ;;  %v4281_v9 = vsel %vm4206_vm8, %v8355_v5, 0.0  ;;  %v4283_v61 = vsel %vm4208_vm9, %v8355_v5, 0.0  ;;  %vm4361_vm7 = vcmp.eq.s32.totalorder %v8334_v25, %v8396_v37 }
 0x61c   : > { %v4932_v31 = vadd.f32 %v4868_v50, %v4716_v57  ;;  %vm4363_vm2 = vcmp.eq.s32.totalorder %v8339_v26, %v8396_v37  ;;  %v4436_v0 = vsel %vm4361_vm7, %v8365_v17, 0.0  ;;  %vm4580_vm10 = vcmp.eq.s32.totalorder %v8334_v25, %v8408_v1 }
 0x61d   : > { %v4438_v63 = vsel %vm4363_vm2, %v8365_v17, 0.0  ;;  %v4500_v7 = vadd.f32 %v4436_v0, %v4281_v9  ;;  %vm4582_vm3 = vcmp.eq.s32.totalorder %v8339_v26, %v8408_v1  ;;  %v4655_v3 = vsel %vm4580_vm10, %v8374_v36, 0.0 }
 0x61e   : > { %v4986_v60 = vpack.c.bf16 %v4932_v31, %v4930_v6  ;;  %v4502_v11 = vadd.f32 %v4438_v63, %v4283_v61  ;;  %v4657_v55 = vsel %vm4582_vm3, %v8374_v36, 0.0  ;;  %vm4796_vm1 = vcmp.eq.s32.totalorder %v8334_v25, %v8415_v15 }
 0x61f   : > { %v4719_v39 = vadd.f32 %v4655_v3, %v4500_v7  ;;  %vm4798_vm6 = vcmp.eq.s32.totalorder %v8339_v26, %v8415_v15  ;;  %v4871_v20 = vsel %vm4796_vm1, %v8381_v32, 0.0  ;;  %vm5069_vm4 = vcmp.eq.s32.totalorder %v8328_v21, %v8453_v23 }
 0x620   : > { %5887 = vmatpush1.bf16.msra.mxu1 %v4986_v60  ;;  %v4721_v41 = vadd.f32 %v4657_v55, %v4502_v11  ;;  %v4873_v40 = vsel %vm4798_vm6, %v8381_v32, 0.0  ;;  %vm5071_vm5 = vcmp.eq.s32.totalorder %v8331_v45, %v8453_v23  ;;  %v5144_v2 = vsel %vm5069_vm4, %v8425_v58, 0.0 }
 0x621   : > { %v4935_v35 = vadd.f32 %v4871_v20, %v4719_v39  ;;  %v5146_v16 = vsel %vm5071_vm5, %v8425_v58, 0.0  ;;  %vm5224_vm8 = vcmp.eq.s32.totalorder %v8328_v21, %v8469_v42  ;;  %vm5226_vm9 = vcmp.eq.s32.totalorder %v8331_v45, %v8469_v42 }
 0x622   : > { %v4937_v57 = vadd.f32 %v4873_v40, %v4721_v41  ;;  %v5299_v56 = vsel %vm5224_vm8, %v8438_v53, 0.0  ;;  %v5301_v50 = vsel %vm5226_vm9, %v8438_v53, 0.0  ;;  %vm5443_vm7 = vcmp.eq.s32.totalorder %v8328_v21, %v8489_v44 }
 0x623   : > { %v5363_v6 = vadd.f32 %v5299_v56, %v5144_v2  ;;  %v5365_v9 = vadd.f32 %v5301_v50, %v5146_v16  ;;  %vm5445_vm2 = vcmp.eq.s32.totalorder %v8331_v45, %v8489_v44  ;;  %v5518_v61 = vsel %vm5443_vm7, %v8447_v18, 0.0 }
 0x624   : > { %v4989_v31 = vpack.c.bf16 %v4937_v57, %v4935_v35  ;;  %v5520_v0 = vsel %vm5445_vm2, %v8447_v18, 0.0  ;;  %vm5659_vm10 = vcmp.eq.s32.totalorder %v8328_v21, %v8502_v62  ;;  %vm5661_vm3 = vcmp.eq.s32.totalorder %v8331_v45, %v8502_v62 }
 0x625   : > { %v5582_v63 = vadd.f32 %v5518_v61, %v5363_v6  ;;  %v5584_v7 = vadd.f32 %v5520_v0, %v5365_v9  ;;  %v5734_v3 = vsel %vm5659_vm10, %v8476_v4, 0.0  ;;  %v5736_v60 = vsel %vm5661_vm3, %v8476_v4, 0.0 }
 0x626   : > { %5888 = vmatprep.subr.bf16.mxu1 %v4989_v31  ;;  %vm5074_vm1 = vcmp.eq.s32.totalorder %v8334_v25, %v8456_v10  ;;  %vm5076_vm6 = vcmp.eq.s32.totalorder %v8339_v26, %v8456_v10  ;;  %vm5229_vm4 = vcmp.eq.s32.totalorder %v8334_v25, %v8472_v59  ;;  %vm5231_vm5 = vcmp.eq.s32.totalorder %v8339_v26, %v8472_v59 }
 0x627   : > { %v5798_v21 = vadd.f32 %v5734_v3, %v5582_v63  ;;  %v5800_v45 = vadd.f32 %v5736_v60, %v5584_v7  ;;  %v5149_v11 = vsel %vm5074_vm1, %v8428_v52, 0.0  ;;  %v5151_v55 = vsel %vm5076_vm6, %v8428_v52, 0.0 }
 0x628   : > { %v5304_v39 = vsel %vm5229_vm4, %v8441_v27, 0.0  ;;  %v5306_v20 = vsel %vm5231_vm5, %v8441_v27, 0.0  ;;  %vm5448_vm8 = vcmp.eq.s32.totalorder %v8334_v25, %v8492_v19  ;;  %vm5450_vm9 = vcmp.eq.s32.totalorder %v8339_v26, %v8492_v19 }
 0x629   : > { %v5854_v41 = vpack.c.bf16 %v5800_v45, %v5798_v21  ;;  %v5368_v40 = vadd.f32 %v5304_v39, %v5149_v11  ;;  %v5370_v2 = vadd.f32 %v5306_v20, %v5151_v55  ;;  %v5523_v35 = vsel %vm5448_vm8, %v8450_v29, 0.0 }
 0x62a   : > { %v5525_v16 = vsel %vm5450_vm9, %v8450_v29, 0.0  ;;  %vm5664_vm7 = vcmp.eq.s32.totalorder %v8334_v25, %v8505_v49  ;;  %vm5666_vm2 = vcmp.eq.s32.totalorder %v8339_v26, %v8505_v49  ;;  %vm4205_vm10 = vcmp.eq.s32.totalorder %v8334_v25, %v8384_v34 }
 0x62b   : > { %5928 = vmatpush1.bf16.msra.mxu0 %v5854_v41  ;;  %v5587_v57 = vadd.f32 %v5523_v35, %v5368_v40  ;;  %v5589_v56 = vadd.f32 %v5525_v16, %v5370_v2  ;;  %v5739_v50 = vsel %vm5664_vm7, %v8479_v12, 0.0  ;;  %v5741_v6 = vsel %vm5666_vm2, %v8479_v12, 0.0 }
 0x62c   : > { %vm4207_vm3 = vcmp.eq.s32.totalorder %v8339_v26, %v8384_v34  ;;  %v4280_v9 = vsel %vm4205_vm10, %v8352_v51, 0.0  ;;  %vm4360_vm1 = vcmp.eq.s32.totalorder %v8334_v25, %v8393_v47  ;;  %vm4362_vm6 = vcmp.eq.s32.totalorder %v8339_v26, %v8393_v47 }
 0x62d   : > { %v5803_v61 = vadd.f32 %v5739_v50, %v5587_v57  ;;  %v5805_v31 = vadd.f32 %v5741_v6, %v5589_v56  ;;  %v4282_v0 = vsel %vm4207_vm3, %v8352_v51, 0.0  ;;  %v4435_v63 = vsel %vm4360_vm1, %v8362_v30, 0.0 }
 0x62e   : > { %v4437_v7 = vsel %vm4362_vm6, %v8362_v30, 0.0  ;;  %v4499_v3 = vadd.f32 %v4435_v63, %v4280_v9  ;;  %vm4579_vm4 = vcmp.eq.s32.totalorder %v8334_v25, %v8405_v14  ;;  %vm4581_vm5 = vcmp.eq.s32.totalorder %v8339_v26, %v8405_v14 }
 0x62f   : > { %v5857_v60 = vpack.c.bf16 %v5805_v31, %v5803_v61  ;;  %v4501_v21 = vadd.f32 %v4437_v7, %v4282_v0  ;;  %v4654_v45 = vsel %vm4579_vm4, %v8371_v13, 0.0  ;;  %v4656_v11 = vsel %vm4581_vm5, %v8371_v13, 0.0 }
 0x630   : > { %v4718_v55 = vadd.f32 %v4654_v45, %v4499_v3  ;;  %vm4795_vm8 = vcmp.eq.s32.totalorder %v8334_v25, %v8412_v8  ;;  %vm4797_vm9 = vcmp.eq.s32.totalorder %v8339_v26, %v8412_v8  ;;  %v9044_v39 = vadd.s32 96, %v7727_v22 }
 0x631   : > { %5929 = vmatprep.subr.bf16.mxu0 %v5857_v60  ;;  %v4720_v20 = vadd.f32 %v4656_v11, %v4501_v21  ;;  %v4870_v41 = vsel %vm4795_vm8, %v8377_v38, 0.0  ;;  %v4872_v40 = vsel %vm4797_vm9, %v8377_v38, 0.0  ;;  %v9049_v2 = vadd.s32 104, %v7727_v22 }
 0x632   : > { %v4934_v35 = vadd.f32 %v4870_v41, %v4718_v55  ;;  %vm4210_vm7 = vcmp.eq.s32.totalorder %v9044_v39, %v8387_v54  ;;  %vm4365_vm2 = vcmp.eq.s32.totalorder %v9044_v39, %v8396_v37  ;;  %vm4584_vm10 = vcmp.eq.s32.totalorder %v9044_v39, %v8408_v1 }
 0x633   : > { %v4936_v16 = vadd.f32 %v4872_v40, %v4720_v20  ;;  %vm4212_vm3 = vcmp.eq.s32.totalorder %v9049_v2, %v8387_v54  ;;  %v4285_v57 = vsel %vm4210_vm7, %v8355_v5, 0.0  ;;  %vm4367_vm1 = vcmp.eq.s32.totalorder %v9049_v2, %v8396_v37 }
 0x634   : > { %v4287_v56 = vsel %vm4212_vm3, %v8355_v5, 0.0  ;;  %v4440_v50 = vsel %vm4365_vm2, %v8365_v17, 0.0  ;;  %v4442_v6 = vsel %vm4367_vm1, %v8365_v17, 0.0  ;;  %vm4586_vm6 = vcmp.eq.s32.totalorder %v9049_v2, %v8408_v1 }
 0x635   : > { %v4988_v9 = vpack.c.bf16 %v4936_v16, %v4934_v35  ;;  %v4504_v61 = vadd.f32 %v4440_v50, %v4285_v57  ;;  %v4506_v31 = vadd.f32 %v4442_v6, %v4287_v56  ;;  %v4659_v0 = vsel %vm4584_vm10, %v8374_v36, 0.0 }
 0x636   : > { %v4661_v63 = vsel %vm4586_vm6, %v8374_v36, 0.0  ;;  %vm4800_vm4 = vcmp.eq.s32.totalorder %v9044_v39, %v8415_v15  ;;  %vm4802_vm5 = vcmp.eq.s32.totalorder %v9049_v2, %v8415_v15  ;;  %vm5073_vm8 = vcmp.eq.s32.totalorder %v8334_v25, %v8453_v23 }
 0x637   : > { %5889 = vmatpush1.bf16.msra.mxu1 %v4988_v9  ;;  %v4723_v7 = vadd.f32 %v4659_v0, %v4504_v61  ;;  %v4725_v3 = vadd.f32 %v4661_v63, %v4506_v31  ;;  %v4875_v60 = vsel %vm4800_vm4, %v8381_v32, 0.0  ;;  %v4877_v21 = vsel %vm4802_vm5, %v8381_v32, 0.0 }
 0x638   : > { %vm5075_vm9 = vcmp.eq.s32.totalorder %v8339_v26, %v8453_v23  ;;  %v5148_v45 = vsel %vm5073_vm8, %v8425_v58, 0.0  ;;  %vm5228_vm7 = vcmp.eq.s32.totalorder %v8334_v25, %v8469_v42  ;;  %vm5230_vm2 = vcmp.eq.s32.totalorder %v8339_v26, %v8469_v42 }
 0x639   : > { %v4939_v11 = vadd.f32 %v4875_v60, %v4723_v7  ;;  %v4941_v55 = vadd.f32 %v4877_v21, %v4725_v3  ;;  %v5150_v20 = vsel %vm5075_vm9, %v8425_v58, 0.0  ;;  %v5303_v41 = vsel %vm5228_vm7, %v8438_v53, 0.0 }
 0x63a   : > { %v5305_v40 = vsel %vm5230_vm2, %v8438_v53, 0.0  ;;  %v5367_v35 = vadd.f32 %v5303_v41, %v5148_v45  ;;  %vm5447_vm10 = vcmp.eq.s32.totalorder %v8334_v25, %v8489_v44  ;;  %vm5449_vm3 = vcmp.eq.s32.totalorder %v8339_v26, %v8489_v44 }
 0x63b   : > { %v4991_v16 = vpack.c.bf16 %v4941_v55, %v4939_v11  ;;  %v5369_v57 = vadd.f32 %v5305_v40, %v5150_v20  ;;  %v5522_v56 = vsel %vm5447_vm10, %v8447_v18, 0.0  ;;  %v5524_v50 = vsel %vm5449_vm3, %v8447_v18, 0.0 }
 0x63c   : > { %v5586_v6 = vadd.f32 %v5522_v56, %v5367_v35  ;;  %vm5663_vm1 = vcmp.eq.s32.totalorder %v8334_v25, %v8502_v62  ;;  %vm5665_vm6 = vcmp.eq.s32.totalorder %v8339_v26, %v8502_v62  ;;  %vm5078_vm4 = vcmp.eq.s32.totalorder %v9044_v39, %v8456_v10 }
 0x63d   : > { %5890 = vmatprep.subr.bf16.mxu1 %v4991_v16  ;;  %v5588_v9 = vadd.f32 %v5524_v50, %v5369_v57  ;;  %v5738_v61 = vsel %vm5663_vm1, %v8476_v4, 0.0  ;;  %v5740_v31 = vsel %vm5665_vm6, %v8476_v4, 0.0  ;;  %vm5080_vm5 = vcmp.eq.s32.totalorder %v9049_v2, %v8456_v10 }
 0x63e   : > { %v5802_v0 = vadd.f32 %v5738_v61, %v5586_v6  ;;  %v5153_v63 = vsel %vm5078_vm4, %v8428_v52, 0.0  ;;  %v5155_v25 = vsel %vm5080_vm5, %v8428_v52, 0.0  ;;  %vm5233_vm8 = vcmp.eq.s32.totalorder %v9044_v39, %v8472_v59 }
 0x63f   : > { %v5804_v26 = vadd.f32 %v5740_v31, %v5588_v9  ;;  %vm5235_vm9 = vcmp.eq.s32.totalorder %v9049_v2, %v8472_v59  ;;  %v5308_v7 = vsel %vm5233_vm8, %v8441_v27, 0.0  ;;  %vm5452_vm7 = vcmp.eq.s32.totalorder %v9044_v39, %v8492_v19 }
 0x640   : > { %v5310_v3 = vsel %vm5235_vm9, %v8441_v27, 0.0  ;;  %v5372_v60 = vadd.f32 %v5308_v7, %v5153_v63  ;;  %vm5454_vm2 = vcmp.eq.s32.totalorder %v9049_v2, %v8492_v19  ;;  %v5527_v21 = vsel %vm5452_vm7, %v8450_v29, 0.0 }
 0x641   : > { %v5856_v45 = vpack.c.bf16 %v5804_v26, %v5802_v0  ;;  %v5374_v11 = vadd.f32 %v5310_v3, %v5155_v25  ;;  %v5529_v55 = vsel %vm5454_vm2, %v8450_v29, 0.0  ;;  %vm5668_vm10 = vcmp.eq.s32.totalorder %v9044_v39, %v8505_v49 }
 0x642   : > { %v5591_v20 = vadd.f32 %v5527_v21, %v5372_v60  ;;  %vm5670_vm3 = vcmp.eq.s32.totalorder %v9049_v2, %v8505_v49  ;;  %v5743_v41 = vsel %vm5668_vm10, %v8479_v12, 0.0  ;;  %vm4209_vm1 = vcmp.eq.s32.totalorder %v9044_v39, %v8384_v34 }
 0x643   : > { %5930 = vmatpush1.bf16.msra.mxu0 %v5856_v45  ;;  %v5593_v40 = vadd.f32 %v5529_v55, %v5374_v11  ;;  %v5745_v35 = vsel %vm5670_vm3, %v8479_v12, 0.0  ;;  %vm4211_vm6 = vcmp.eq.s32.totalorder %v9049_v2, %v8384_v34  ;;  %v4284_v16 = vsel %vm4209_vm1, %v8352_v51, 0.0 }
 0x644   : > { %v5807_v57 = vadd.f32 %v5743_v41, %v5591_v20  ;;  %v4286_v56 = vsel %vm4211_vm6, %v8352_v51, 0.0  ;;  %vm4364_vm4 = vcmp.eq.s32.totalorder %v9044_v39, %v8393_v47  ;;  %vm4366_vm5 = vcmp.eq.s32.totalorder %v9049_v2, %v8393_v47 }
 0x645   : > { %v5809_v50 = vadd.f32 %v5745_v35, %v5593_v40  ;;  %v4439_v6 = vsel %vm4364_vm4, %v8362_v30, 0.0  ;;  %v4441_v9 = vsel %vm4366_vm5, %v8362_v30, 0.0  ;;  %vm4583_vm8 = vcmp.eq.s32.totalorder %v9044_v39, %v8405_v14 }
 0x646   : > { %v4503_v61 = vadd.f32 %v4439_v6, %v4284_v16  ;;  %v4505_v31 = vadd.f32 %v4441_v9, %v4286_v56  ;;  %vm4585_vm9 = vcmp.eq.s32.totalorder %v9049_v2, %v8405_v14  ;;  %v4658_v0 = vsel %vm4583_vm8, %v8371_v13, 0.0 }
 0x647   : > { %v5859_v63 = vpack.c.bf16 %v5809_v50, %v5807_v57  ;;  %v4660_v25 = vsel %vm4585_vm9, %v8371_v13, 0.0  ;;  %vm4799_vm7 = vcmp.eq.s32.totalorder %v9044_v39, %v8412_v8  ;;  %vm4801_vm2 = vcmp.eq.s32.totalorder %v9049_v2, %v8412_v8 }
 0x648   : > { %v4722_v26 = vadd.f32 %v4658_v0, %v4503_v61  ;;  %v4724_v7 = vadd.f32 %v4660_v25, %v4505_v31  ;;  %v4874_v3 = vsel %vm4799_vm7, %v8377_v38, 0.0  ;;  %v4876_v60 = vsel %vm4801_vm2, %v8377_v38, 0.0 }
 0x649   : > { %5931 = vmatprep.subr.bf16.mxu0 %v5859_v63  ;;  %v9148_v21 = vadd.s32 112, %v7727_v22  ;;  %v9151_v45 = vadd.s32 120, %v7727_v22  ;;  %vm5077_vm10 = vcmp.eq.s32.totalorder %v9044_v39, %v8453_v23  ;;  %vm5079_vm3 = vcmp.eq.s32.totalorder %v9049_v2, %v8453_v23 }
 0x64a   : > { %v4938_v11 = vadd.f32 %v4874_v3, %v4722_v26  ;;  %v4940_v55 = vadd.f32 %v4876_v60, %v4724_v7  ;;  %v5152_v20 = vsel %vm5077_vm10, %v8425_v58, 0.0  ;;  %v5154_v41 = vsel %vm5079_vm3, %v8425_v58, 0.0 }
 0x64b   : > { %vm4214_vm1 = vcmp.eq.s32.totalorder %v9148_v21, %v8387_v54  ;;  %vm4216_vm6 = vcmp.eq.s32.totalorder %v9151_v45, %v8387_v54  ;;  %vm4369_vm4 = vcmp.eq.s32.totalorder %v9148_v21, %v8396_v37  ;;  %vm4371_vm5 = vcmp.eq.s32.totalorder %v9151_v45, %v8396_v37 }
 0x64c   : > { %v4990_v40 = vpack.c.bf16 %v4940_v55, %v4938_v11  ;;  %v4289_v35 = vsel %vm4214_vm1, %v8355_v5, 0.0  ;;  %v4291_v16 = vsel %vm4216_vm6, %v8355_v5, 0.0  ;;  %v4444_v57 = vsel %vm4369_vm4, %v8365_v17, 0.0 }
 0x64d   : > { %v4446_v56 = vsel %vm4371_vm5, %v8365_v17, 0.0  ;;  %v4508_v50 = vadd.f32 %v4444_v57, %v4289_v35  ;;  %vm4588_vm8 = vcmp.eq.s32.totalorder %v9148_v21, %v8408_v1  ;;  %vm4590_vm9 = vcmp.eq.s32.totalorder %v9151_v45, %v8408_v1 }
 0x64e   : > { %5891 = vmatpush1.bf16.msra.mxu1 %v4990_v40  ;;  %v4510_v6 = vadd.f32 %v4446_v56, %v4291_v16  ;;  %v4663_v9 = vsel %vm4588_vm8, %v8374_v36, 0.0  ;;  %v4665_v61 = vsel %vm4590_vm9, %v8374_v36, 0.0  ;;  %vm4804_vm7 = vcmp.eq.s32.totalorder %v9148_v21, %v8415_v15 }
 0x64f   : > { %v4727_v31 = vadd.f32 %v4663_v9, %v4508_v50  ;;  %vm4806_vm2 = vcmp.eq.s32.totalorder %v9151_v45, %v8415_v15  ;;  %v4879_v0 = vsel %vm4804_vm7, %v8381_v32, 0.0  ;;  %vm5232_vm10 = vcmp.eq.s32.totalorder %v9044_v39, %v8469_v42 }
 0x650   : > { %v4729_v63 = vadd.f32 %v4665_v61, %v4510_v6  ;;  %v4881_v25 = vsel %vm4806_vm2, %v8381_v32, 0.0  ;;  %vm5234_vm3 = vcmp.eq.s32.totalorder %v9049_v2, %v8469_v42  ;;  %v5307_v26 = vsel %vm5232_vm10, %v8438_v53, 0.0 }
 0x651   : > { %v4943_v7 = vadd.f32 %v4879_v0, %v4727_v31  ;;  %v5309_v3 = vsel %vm5234_vm3, %v8438_v53, 0.0  ;;  %v5371_v60 = vadd.f32 %v5307_v26, %v5152_v20  ;;  %vm5451_vm1 = vcmp.eq.s32.totalorder %v9044_v39, %v8489_v44 }
 0x652   : > { %v4945_v11 = vadd.f32 %v4881_v25, %v4729_v63  ;;  %v5373_v55 = vadd.f32 %v5309_v3, %v5154_v41  ;;  %vm5453_vm6 = vcmp.eq.s32.totalorder %v9049_v2, %v8489_v44  ;;  %v5526_v40 = vsel %vm5451_vm1, %v8447_v18, 0.0 }
 0x653   : > { %v5528_v35 = vsel %vm5453_vm6, %v8447_v18, 0.0  ;;  %v5590_v16 = vadd.f32 %v5526_v40, %v5371_v60  ;;  %vm5667_vm4 = vcmp.eq.s32.totalorder %v9044_v39, %v8502_v62  ;;  %vm5669_vm5 = vcmp.eq.s32.totalorder %v9049_v2, %v8502_v62 }
 0x654   : > { %v4993_v20 = vpack.c.bf16 %v4945_v11, %v4943_v7  ;;  %v5592_v57 = vadd.f32 %v5528_v35, %v5373_v55  ;;  %v5742_v56 = vsel %vm5667_vm4, %v8476_v4, 0.0  ;;  %v5744_v41 = vsel %vm5669_vm5, %v8476_v4, 0.0 }
 0x655   : > { %v5806_v50 = vadd.f32 %v5742_v56, %v5590_v16  ;;  %vm5082_vm8 = vcmp.eq.s32.totalorder %v9148_v21, %v8456_v10  ;;  %vm5084_vm9 = vcmp.eq.s32.totalorder %v9151_v45, %v8456_v10  ;;  %vm5237_vm7 = vcmp.eq.s32.totalorder %v9148_v21, %v8472_v59 }
 0x656   : > { %5892 = vmatprep.subr.bf16.mxu1 %v4993_v20  ;;  %v5808_v39 = vadd.f32 %v5744_v41, %v5592_v57  ;;  %v5157_v2 = vsel %vm5082_vm8, %v8428_v52, 0.0  ;;  %v5159_v6 = vsel %vm5084_vm9, %v8428_v52, 0.0  ;;  %vm5239_vm2 = vcmp.eq.s32.totalorder %v9151_v45, %v8472_v59 }
 0x657   : > { %v5312_v9 = vsel %vm5237_vm7, %v8441_v27, 0.0  ;;  %v5314_v61 = vsel %vm5239_vm2, %v8441_v27, 0.0  ;;  %vm5456_vm10 = vcmp.eq.s32.totalorder %v9148_v21, %v8492_v19  ;;  %vm5458_vm3 = vcmp.eq.s32.totalorder %v9151_v45, %v8492_v19 }
 0x658   : > { %v5858_v31 = vpack.c.bf16 %v5808_v39, %v5806_v50  ;;  %v5376_v0 = vadd.f32 %v5312_v9, %v5157_v2  ;;  %v5378_v63 = vadd.f32 %v5314_v61, %v5159_v6  ;;  %v5531_v25 = vsel %vm5456_vm10, %v8450_v29, 0.0 }
 0x659   : > { %v5533_v26 = vsel %vm5458_vm3, %v8450_v29, 0.0  ;;  %vm5672_vm1 = vcmp.eq.s32.totalorder %v9148_v21, %v8505_v49  ;;  %vm5674_vm6 = vcmp.eq.s32.totalorder %v9151_v45, %v8505_v49  ;;  %vm4213_vm4 = vcmp.eq.s32.totalorder %v9148_v21, %v8384_v34 }
 0x65a   : > { %5932 = vmatpush1.bf16.msra.mxu0 %v5858_v31  ;;  %v5595_v7 = vadd.f32 %v5531_v25, %v5376_v0  ;;  %v5597_v3 = vadd.f32 %v5533_v26, %v5378_v63  ;;  %v5747_v60 = vsel %vm5672_vm1, %v8479_v12, 0.0  ;;  %v5749_v11 = vsel %vm5674_vm6, %v8479_v12, 0.0 }
 0x65b   : > { %vm4215_vm5 = vcmp.eq.s32.totalorder %v9151_v45, %v8384_v34  ;;  %v4288_v55 = vsel %vm4213_vm4, %v8352_v51, 0.0  ;;  %vm4368_vm8 = vcmp.eq.s32.totalorder %v9148_v21, %v8393_v47  ;;  %vm4370_vm9 = vcmp.eq.s32.totalorder %v9151_v45, %v8393_v47 }
 0x65c   : > { %v5811_v40 = vadd.f32 %v5747_v60, %v5595_v7  ;;  %v5813_v35 = vadd.f32 %v5749_v11, %v5597_v3  ;;  %v4290_v16 = vsel %vm4215_vm5, %v8352_v51, 0.0  ;;  %v4443_v20 = vsel %vm4368_vm8, %v8362_v30, 0.0 }
 0x65d   : > { %v4445_v57 = vsel %vm4370_vm9, %v8362_v30, 0.0  ;;  %v4507_v56 = vadd.f32 %v4443_v20, %v4288_v55  ;;  %vm4587_vm7 = vcmp.eq.s32.totalorder %v9148_v21, %v8405_v14  ;;  %vm4589_vm2 = vcmp.eq.s32.totalorder %v9151_v45, %v8405_v14 }
 0x65e   : > { %v5861_v41 = vpack.c.bf16 %v5813_v35, %v5811_v40  ;;  %v4509_v50 = vadd.f32 %v4445_v57, %v4290_v16  ;;  %v4662_v39 = vsel %vm4587_vm7, %v8371_v13, 0.0  ;;  %v4664_v2 = vsel %vm4589_vm2, %v8371_v13, 0.0 }
 0x65f   : > { %v4726_v6 = vadd.f32 %v4662_v39, %v4507_v56  ;;  %vm4803_vm10 = vcmp.eq.s32.totalorder %v9148_v21, %v8412_v8  ;;  %vm4805_vm3 = vcmp.eq.s32.totalorder %v9151_v45, %v8412_v8  ;;  %v9248_v9 = vadd.s32 128, %v7727_v22 }
 0x660   : > { %5933 = vmatprep.subr.bf16.mxu0 %v5861_v41  ;;  %v4728_v61 = vadd.f32 %v4664_v2, %v4509_v50  ;;  %v4878_v31 = vsel %vm4803_vm10, %v8377_v38, 0.0  ;;  %v4880_v0 = vsel %vm4805_vm3, %v8377_v38, 0.0  ;;  %v9253_v63 = vadd.s32 136, %v7727_v22 }
 0x661   : > { %v4942_v25 = vadd.f32 %v4878_v31, %v4726_v6  ;;  %vm4218_vm1 = vcmp.eq.s32.totalorder %v9248_v9, %v8387_v54  ;;  %vm4373_vm6 = vcmp.eq.s32.totalorder %v9248_v9, %v8396_v37  ;;  %vm4592_vm4 = vcmp.eq.s32.totalorder %v9248_v9, %v8408_v1 }
 0x662   : > { %v4944_v26 = vadd.f32 %v4880_v0, %v4728_v61  ;;  %vm4220_vm5 = vcmp.eq.s32.totalorder %v9253_v63, %v8387_v54  ;;  %v4293_v7 = vsel %vm4218_vm1, %v8355_v5, 0.0  ;;  %vm4375_vm8 = vcmp.eq.s32.totalorder %v9253_v63, %v8396_v37 }
 0x663   : > { %v4295_v3 = vsel %vm4220_vm5, %v8355_v5, 0.0  ;;  %v4448_v60 = vsel %vm4373_vm6, %v8365_v17, 0.0  ;;  %v4450_v11 = vsel %vm4375_vm8, %v8365_v17, 0.0  ;;  %vm4594_vm9 = vcmp.eq.s32.totalorder %v9253_v63, %v8408_v1 }
 0x664   : > { %v4992_v55 = vpack.c.bf16 %v4944_v26, %v4942_v25  ;;  %v4512_v40 = vadd.f32 %v4448_v60, %v4293_v7  ;;  %v4514_v35 = vadd.f32 %v4450_v11, %v4295_v3  ;;  %v4667_v16 = vsel %vm4592_vm4, %v8374_v36, 0.0 }
 0x665   : > { %v4669_v20 = vsel %vm4594_vm9, %v8374_v36, 0.0  ;;  %vm4808_vm7 = vcmp.eq.s32.totalorder %v9248_v9, %v8415_v15  ;;  %vm4810_vm2 = vcmp.eq.s32.totalorder %v9253_v63, %v8415_v15  ;;  %vm5081_vm10 = vcmp.eq.s32.totalorder %v9148_v21, %v8453_v23 }
 0x666   : > { %5893 = vmatpush1.bf16.msra.mxu1 %v4992_v55  ;;  %v4731_v57 = vadd.f32 %v4667_v16, %v4512_v40  ;;  %v4733_v56 = vadd.f32 %v4669_v20, %v4514_v35  ;;  %v4883_v41 = vsel %vm4808_vm7, %v8381_v32, 0.0  ;;  %v4885_v50 = vsel %vm4810_vm2, %v8381_v32, 0.0 }
 0x667   : > { %vm5083_vm3 = vcmp.eq.s32.totalorder %v9151_v45, %v8453_v23  ;;  %v5156_v39 = vsel %vm5081_vm10, %v8425_v58, 0.0  ;;  %vm5236_vm1 = vcmp.eq.s32.totalorder %v9148_v21, %v8469_v42  ;;  %vm5238_vm6 = vcmp.eq.s32.totalorder %v9151_v45, %v8469_v42 }
 0x668   : > { %v4947_v2 = vadd.f32 %v4883_v41, %v4731_v57  ;;  %v4949_v6 = vadd.f32 %v4885_v50, %v4733_v56  ;;  %v5158_v61 = vsel %vm5083_vm3, %v8425_v58, 0.0  ;;  %v5311_v31 = vsel %vm5236_vm1, %v8438_v53, 0.0 }
 0x669   : > { %v5313_v0 = vsel %vm5238_vm6, %v8438_v53, 0.0  ;;  %v5375_v25 = vadd.f32 %v5311_v31, %v5156_v39  ;;  %vm5455_vm4 = vcmp.eq.s32.totalorder %v9148_v21, %v8489_v44  ;;  %vm5457_vm5 = vcmp.eq.s32.totalorder %v9151_v45, %v8489_v44 }
 0x66a   : > { %v4995_v26 = vpack.c.bf16 %v4949_v6, %v4947_v2  ;;  %v5377_v7 = vadd.f32 %v5313_v0, %v5158_v61  ;;  %v5530_v3 = vsel %vm5455_vm4, %v8447_v18, 0.0  ;;  %v5532_v60 = vsel %vm5457_vm5, %v8447_v18, 0.0 }
 0x66b   : > { %v5594_v11 = vadd.f32 %v5530_v3, %v5375_v25  ;;  %vm5671_vm8 = vcmp.eq.s32.totalorder %v9148_v21, %v8502_v62  ;;  %vm5673_vm9 = vcmp.eq.s32.totalorder %v9151_v45, %v8502_v62  ;;  %vm5086_vm7 = vcmp.eq.s32.totalorder %v9248_v9, %v8456_v10 }
 0x66c   : > { %5894 = vmatprep.subr.bf16.mxu1 %v4995_v26  ;;  %v5596_v55 = vadd.f32 %v5532_v60, %v5377_v7  ;;  %v5746_v40 = vsel %vm5671_vm8, %v8476_v4, 0.0  ;;  %v5748_v35 = vsel %vm5673_vm9, %v8476_v4, 0.0  ;;  %vm5088_vm2 = vcmp.eq.s32.totalorder %v9253_v63, %v8456_v10 }
 0x66d   : > { %v5810_v16 = vadd.f32 %v5746_v40, %v5594_v11  ;;  %v5161_v20 = vsel %vm5086_vm7, %v8428_v52, 0.0  ;;  %v5163_v21 = vsel %vm5088_vm2, %v8428_v52, 0.0  ;;  %vm5241_vm10 = vcmp.eq.s32.totalorder %v9248_v9, %v8472_v59 }
 0x66e   : > { %v5812_v45 = vadd.f32 %v5748_v35, %v5596_v55  ;;  %vm5243_vm3 = vcmp.eq.s32.totalorder %v9253_v63, %v8472_v59  ;;  %v5316_v57 = vsel %vm5241_vm10, %v8441_v27, 0.0  ;;  %vm5460_vm1 = vcmp.eq.s32.totalorder %v9248_v9, %v8492_v19 }
 0x66f   : > { %v5318_v56 = vsel %vm5243_vm3, %v8441_v27, 0.0  ;;  %v5380_v41 = vadd.f32 %v5316_v57, %v5161_v20  ;;  %vm5462_vm6 = vcmp.eq.s32.totalorder %v9253_v63, %v8492_v19  ;;  %v5535_v50 = vsel %vm5460_vm1, %v8450_v29, 0.0 }
 0x670   : > { %v5860_v39 = vpack.c.bf16 %v5812_v45, %v5810_v16  ;;  %v5382_v2 = vadd.f32 %v5318_v56, %v5163_v21  ;;  %v5537_v6 = vsel %vm5462_vm6, %v8450_v29, 0.0  ;;  %vm5676_vm4 = vcmp.eq.s32.totalorder %v9248_v9, %v8505_v49 }
 0x671   : > { %v5599_v61 = vadd.f32 %v5535_v50, %v5380_v41  ;;  %vm5678_vm5 = vcmp.eq.s32.totalorder %v9253_v63, %v8505_v49  ;;  %v5751_v31 = vsel %vm5676_vm4, %v8479_v12, 0.0  ;;  %vm4217_vm8 = vcmp.eq.s32.totalorder %v9248_v9, %v8384_v34 }
 0x672   : > { %5934 = vmatpush1.bf16.msra.mxu0 %v5860_v39  ;;  %v5601_v0 = vadd.f32 %v5537_v6, %v5382_v2  ;;  %v5753_v25 = vsel %vm5678_vm5, %v8479_v12, 0.0  ;;  %vm4219_vm9 = vcmp.eq.s32.totalorder %v9253_v63, %v8384_v34  ;;  %v4292_v26 = vsel %vm4217_vm8, %v8352_v51, 0.0 }
 0x673   : > { %v5815_v7 = vadd.f32 %v5751_v31, %v5599_v61  ;;  %v4294_v3 = vsel %vm4219_vm9, %v8352_v51, 0.0  ;;  %vm4372_vm7 = vcmp.eq.s32.totalorder %v9248_v9, %v8393_v47  ;;  %vm4374_vm2 = vcmp.eq.s32.totalorder %v9253_v63, %v8393_v47 }
 0x674   : > { %v5817_v60 = vadd.f32 %v5753_v25, %v5601_v0  ;;  %v4447_v11 = vsel %vm4372_vm7, %v8362_v30, 0.0  ;;  %v4449_v55 = vsel %vm4374_vm2, %v8362_v30, 0.0  ;;  %vm4591_vm10 = vcmp.eq.s32.totalorder %v9248_v9, %v8405_v14 }
 0x675   : > { %v4511_v40 = vadd.f32 %v4447_v11, %v4292_v26  ;;  %v4513_v35 = vadd.f32 %v4449_v55, %v4294_v3  ;;  %vm4593_vm3 = vcmp.eq.s32.totalorder %v9253_v63, %v8405_v14  ;;  %v4666_v16 = vsel %vm4591_vm10, %v8371_v13, 0.0 }
 0x676   : > { %v5863_v20 = vpack.c.bf16 %v5817_v60, %v5815_v7  ;;  %v4668_v21 = vsel %vm4593_vm3, %v8371_v13, 0.0  ;;  %vm4807_vm1 = vcmp.eq.s32.totalorder %v9248_v9, %v8412_v8  ;;  %vm4809_vm6 = vcmp.eq.s32.totalorder %v9253_v63, %v8412_v8 }
 0x677   : > { %v4730_v45 = vadd.f32 %v4666_v16, %v4511_v40  ;;  %v4732_v57 = vadd.f32 %v4668_v21, %v4513_v35  ;;  %v4882_v56 = vsel %vm4807_vm1, %v8377_v38, 0.0  ;;  %v4884_v41 = vsel %vm4809_vm6, %v8377_v38, 0.0 }
 0x678   : > { %5935 = vmatprep.subr.bf16.mxu0 %v5863_v20  ;;  %v9352_v50 = vadd.s32 144, %v7727_v22  ;;  %v9355_v39 = vadd.s32 152, %v7727_v22  ;;  %vm5085_vm4 = vcmp.eq.s32.totalorder %v9248_v9, %v8453_v23  ;;  %vm5087_vm5 = vcmp.eq.s32.totalorder %v9253_v63, %v8453_v23 }
 0x679   : > { %v4946_v2 = vadd.f32 %v4882_v56, %v4730_v45  ;;  %v4948_v6 = vadd.f32 %v4884_v41, %v4732_v57  ;;  %v5160_v61 = vsel %vm5085_vm4, %v8425_v58, 0.0  ;;  %v5162_v31 = vsel %vm5087_vm5, %v8425_v58, 0.0 }
 0x67a   : > { %vm4222_vm8 = vcmp.eq.s32.totalorder %v9352_v50, %v8387_v54  ;;  %vm4224_vm9 = vcmp.eq.s32.totalorder %v9355_v39, %v8387_v54  ;;  %vm4377_vm7 = vcmp.eq.s32.totalorder %v9352_v50, %v8396_v37  ;;  %vm4379_vm2 = vcmp.eq.s32.totalorder %v9355_v39, %v8396_v37 }
 0x67b   : > { %v4994_v0 = vpack.c.bf16 %v4948_v6, %v4946_v2  ;;  %v4297_v25 = vsel %vm4222_vm8, %v8355_v5, 0.0  ;;  %v4299_v26 = vsel %vm4224_vm9, %v8355_v5, 0.0  ;;  %v4452_v7 = vsel %vm4377_vm7, %v8365_v17, 0.0 }
 0x67c   : > { %v4454_v3 = vsel %vm4379_vm2, %v8365_v17, 0.0  ;;  %v4516_v60 = vadd.f32 %v4452_v7, %v4297_v25  ;;  %vm4596_vm10 = vcmp.eq.s32.totalorder %v9352_v50, %v8408_v1  ;;  %vm4598_vm3 = vcmp.eq.s32.totalorder %v9355_v39, %v8408_v1 }
 0x67d   : > { %5895 = vmatpush1.bf16.msra.mxu1 %v4994_v0  ;;  %v4518_v11 = vadd.f32 %v4454_v3, %v4299_v26  ;;  %v4671_v55 = vsel %vm4596_vm10, %v8374_v36, 0.0  ;;  %v4673_v40 = vsel %vm4598_vm3, %v8374_v36, 0.0  ;;  %vm4812_vm1 = vcmp.eq.s32.totalorder %v9352_v50, %v8415_v15 }
 0x67e   : > { %v4735_v35 = vadd.f32 %v4671_v55, %v4516_v60  ;;  %vm4814_vm6 = vcmp.eq.s32.totalorder %v9355_v39, %v8415_v15  ;;  %v4887_v16 = vsel %vm4812_vm1, %v8381_v32, 0.0  ;;  %vm5240_vm4 = vcmp.eq.s32.totalorder %v9248_v9, %v8469_v42 }
 0x67f   : > { %v4737_v20 = vadd.f32 %v4673_v40, %v4518_v11  ;;  %v4889_v21 = vsel %vm4814_vm6, %v8381_v32, 0.0  ;;  %vm5242_vm5 = vcmp.eq.s32.totalorder %v9253_v63, %v8469_v42  ;;  %v5315_v45 = vsel %vm5240_vm4, %v8438_v53, 0.0 }
 0x680   : > { %v4951_v57 = vadd.f32 %v4887_v16, %v4735_v35  ;;  %v5317_v56 = vsel %vm5242_vm5, %v8438_v53, 0.0  ;;  %v5379_v41 = vadd.f32 %v5315_v45, %v5160_v61  ;;  %vm5459_vm8 = vcmp.eq.s32.totalorder %v9248_v9, %v8489_v44 }
 0x681   : > { %v4953_v2 = vadd.f32 %v4889_v21, %v4737_v20  ;;  %v5381_v6 = vadd.f32 %v5317_v56, %v5162_v31  ;;  %vm5461_vm9 = vcmp.eq.s32.totalorder %v9253_v63, %v8489_v44  ;;  %v5534_v0 = vsel %vm5459_vm8, %v8447_v18, 0.0 }
 0x682   : > { %v5536_v25 = vsel %vm5461_vm9, %v8447_v18, 0.0  ;;  %v5598_v26 = vadd.f32 %v5534_v0, %v5379_v41  ;;  %vm5675_vm7 = vcmp.eq.s32.totalorder %v9248_v9, %v8502_v62  ;;  %vm5677_vm2 = vcmp.eq.s32.totalorder %v9253_v63, %v8502_v62 }
 0x683   : > { %v4997_v61 = vpack.c.bf16 %v4953_v2, %v4951_v57  ;;  %v5600_v7 = vadd.f32 %v5536_v25, %v5381_v6  ;;  %v5750_v3 = vsel %vm5675_vm7, %v8476_v4, 0.0  ;;  %v5752_v31 = vsel %vm5677_vm2, %v8476_v4, 0.0 }
 0x684   : > { %v5814_v60 = vadd.f32 %v5750_v3, %v5598_v26  ;;  %vm5090_vm10 = vcmp.eq.s32.totalorder %v9352_v50, %v8456_v10  ;;  %vm5092_vm3 = vcmp.eq.s32.totalorder %v9355_v39, %v8456_v10  ;;  %vm5245_vm1 = vcmp.eq.s32.totalorder %v9352_v50, %v8472_v59 }
 0x685   : > { %5896 = vmatprep.subr.bf16.mxu1 %v4997_v61  ;;  %v5816_v9 = vadd.f32 %v5752_v31, %v5600_v7  ;;  %v5165_v63 = vsel %vm5090_vm10, %v8428_v52, 0.0  ;;  %v5167_v11 = vsel %vm5092_vm3, %v8428_v52, 0.0  ;;  %vm5247_vm6 = vcmp.eq.s32.totalorder %v9355_v39, %v8472_v59 }
 0x686   : > { %v5320_v55 = vsel %vm5245_vm1, %v8441_v27, 0.0  ;;  %v5322_v40 = vsel %vm5247_vm6, %v8441_v27, 0.0  ;;  %vm5464_vm4 = vcmp.eq.s32.totalorder %v9352_v50, %v8492_v19  ;;  %vm5466_vm5 = vcmp.eq.s32.totalorder %v9355_v39, %v8492_v19 }
 0x687   : > { %v5862_v35 = vpack.c.bf16 %v5816_v9, %v5814_v60  ;;  %v5384_v16 = vadd.f32 %v5320_v55, %v5165_v63  ;;  %v5386_v20 = vadd.f32 %v5322_v40, %v5167_v11  ;;  %v5539_v21 = vsel %vm5464_vm4, %v8450_v29, 0.0 }
 0x688   : > { %v5541_v45 = vsel %vm5466_vm5, %v8450_v29, 0.0  ;;  %vm5680_vm8 = vcmp.eq.s32.totalorder %v9352_v50, %v8505_v49  ;;  %vm5682_vm9 = vcmp.eq.s32.totalorder %v9355_v39, %v8505_v49  ;;  %vm4221_vm7 = vcmp.eq.s32.totalorder %v9352_v50, %v8384_v34 }
 0x689   : > { %5936 = vmatpush1.bf16.msra.mxu0 %v5862_v35  ;;  %v5603_v57 = vadd.f32 %v5539_v21, %v5384_v16  ;;  %v5605_v56 = vadd.f32 %v5541_v45, %v5386_v20  ;;  %v5755_v41 = vsel %vm5680_vm8, %v8479_v12, 0.0  ;;  %v5757_v2 = vsel %vm5682_vm9, %v8479_v12, 0.0 }
 0x68a   : > { %vm4223_vm2 = vcmp.eq.s32.totalorder %v9355_v39, %v8384_v34  ;;  %v4296_v6 = vsel %vm4221_vm7, %v8352_v51, 0.0  ;;  %vm4376_vm10 = vcmp.eq.s32.totalorder %v9352_v50, %v8393_v47  ;;  %vm4378_vm3 = vcmp.eq.s32.totalorder %v9355_v39, %v8393_v47 }
 0x68b   : > { %v5819_v0 = vadd.f32 %v5755_v41, %v5603_v57  ;;  %v5821_v25 = vadd.f32 %v5757_v2, %v5605_v56  ;;  %v4298_v26 = vsel %vm4223_vm2, %v8352_v51, 0.0  ;;  %v4451_v61 = vsel %vm4376_vm10, %v8362_v30, 0.0 }
 0x68c   : > { %v4453_v7 = vsel %vm4378_vm3, %v8362_v30, 0.0  ;;  %v4515_v3 = vadd.f32 %v4451_v61, %v4296_v6  ;;  %vm4595_vm1 = vcmp.eq.s32.totalorder %v9352_v50, %v8405_v14  ;;  %vm4597_vm6 = vcmp.eq.s32.totalorder %v9355_v39, %v8405_v14 }
 0x68d   : > { %v5865_v31 = vpack.c.bf16 %v5821_v25, %v5819_v0  ;;  %v4517_v60 = vadd.f32 %v4453_v7, %v4298_v26  ;;  %v4670_v9 = vsel %vm4595_vm1, %v8371_v13, 0.0  ;;  %v4672_v63 = vsel %vm4597_vm6, %v8371_v13, 0.0 }
 0x68e   : > { %v4734_v11 = vadd.f32 %v4670_v9, %v4515_v3  ;;  %vm4811_vm4 = vcmp.eq.s32.totalorder %v9352_v50, %v8412_v8  ;;  %vm4813_vm5 = vcmp.eq.s32.totalorder %v9355_v39, %v8412_v8  ;;  %v9452_v55 = vadd.s32 160, %v7727_v22 }
 0x68f   : > { %5937 = vmatprep.subr.bf16.mxu0 %v5865_v31  ;;  %v4736_v40 = vadd.f32 %v4672_v63, %v4517_v60  ;;  %v4886_v35 = vsel %vm4811_vm4, %v8377_v38, 0.0  ;;  %v4888_v16 = vsel %vm4813_vm5, %v8377_v38, 0.0  ;;  %v9457_v20 = vadd.s32 168, %v7727_v22 }
 0x690   : > { %v4950_v21 = vadd.f32 %v4886_v35, %v4734_v11  ;;  %vm4226_vm8 = vcmp.eq.s32.totalorder %v9452_v55, %v8387_v54  ;;  %vm4381_vm9 = vcmp.eq.s32.totalorder %v9452_v55, %v8396_v37  ;;  %vm4600_vm7 = vcmp.eq.s32.totalorder %v9452_v55, %v8408_v1 }
 0x691   : > { %v4952_v45 = vadd.f32 %v4888_v16, %v4736_v40  ;;  %vm4228_vm2 = vcmp.eq.s32.totalorder %v9457_v20, %v8387_v54  ;;  %v4301_v57 = vsel %vm4226_vm8, %v8355_v5, 0.0  ;;  %vm4383_vm10 = vcmp.eq.s32.totalorder %v9457_v20, %v8396_v37 }
 0x692   : > { %v4303_v56 = vsel %vm4228_vm2, %v8355_v5, 0.0  ;;  %v4456_v41 = vsel %vm4381_vm9, %v8365_v17, 0.0  ;;  %v4458_v2 = vsel %vm4383_vm10, %v8365_v17, 0.0  ;;  %vm4602_vm3 = vcmp.eq.s32.totalorder %v9457_v20, %v8408_v1 }
 0x693   : > { %v4996_v6 = vpack.c.bf16 %v4952_v45, %v4950_v21  ;;  %v4520_v0 = vadd.f32 %v4456_v41, %v4301_v57  ;;  %v4522_v25 = vadd.f32 %v4458_v2, %v4303_v56  ;;  %v4675_v26 = vsel %vm4600_vm7, %v8374_v36, 0.0 }
 0x694   : > { %v4677_v61 = vsel %vm4602_vm3, %v8374_v36, 0.0  ;;  %vm4816_vm1 = vcmp.eq.s32.totalorder %v9452_v55, %v8415_v15  ;;  %vm4818_vm6 = vcmp.eq.s32.totalorder %v9457_v20, %v8415_v15  ;;  %vm5089_vm4 = vcmp.eq.s32.totalorder %v9352_v50, %v8453_v23 }
 0x695   : > { %5897 = vmatpush1.bf16.msra.mxu1 %v4996_v6  ;;  %v4739_v7 = vadd.f32 %v4675_v26, %v4520_v0  ;;  %v4741_v3 = vadd.f32 %v4677_v61, %v4522_v25  ;;  %v4891_v31 = vsel %vm4816_vm1, %v8381_v32, 0.0  ;;  %v4893_v60 = vsel %vm4818_vm6, %v8381_v32, 0.0 }
 0x696   : > { %vm5091_vm5 = vcmp.eq.s32.totalorder %v9355_v39, %v8453_v23  ;;  %v5164_v9 = vsel %vm5089_vm4, %v8425_v58, 0.0  ;;  %vm5244_vm8 = vcmp.eq.s32.totalorder %v9352_v50, %v8469_v42  ;;  %vm5246_vm9 = vcmp.eq.s32.totalorder %v9355_v39, %v8469_v42 }
 0x697   : > { %v4955_v63 = vadd.f32 %v4891_v31, %v4739_v7  ;;  %v4957_v11 = vadd.f32 %v4893_v60, %v4741_v3  ;;  %v5166_v40 = vsel %vm5091_vm5, %v8425_v58, 0.0  ;;  %v5319_v35 = vsel %vm5244_vm8, %v8438_v53, 0.0 }
 0x698   : > { %v5321_v16 = vsel %vm5246_vm9, %v8438_v53, 0.0  ;;  %v5383_v21 = vadd.f32 %v5319_v35, %v5164_v9  ;;  %vm5463_vm7 = vcmp.eq.s32.totalorder %v9352_v50, %v8489_v44  ;;  %vm5465_vm2 = vcmp.eq.s32.totalorder %v9355_v39, %v8489_v44 }
 0x699   : > { %v4999_v45 = vpack.c.bf16 %v4957_v11, %v4955_v63  ;;  %v5385_v57 = vadd.f32 %v5321_v16, %v5166_v40  ;;  %v5538_v56 = vsel %vm5463_vm7, %v8447_v18, 0.0  ;;  %v5540_v41 = vsel %vm5465_vm2, %v8447_v18, 0.0 }
 0x69a   : > { %v5602_v2 = vadd.f32 %v5538_v56, %v5383_v21  ;;  %vm5679_vm10 = vcmp.eq.s32.totalorder %v9352_v50, %v8502_v62  ;;  %vm5681_vm3 = vcmp.eq.s32.totalorder %v9355_v39, %v8502_v62  ;;  %vm5094_vm1 = vcmp.eq.s32.totalorder %v9452_v55, %v8456_v10 }
 0x69b   : > { %5898 = vmatprep.subr.bf16.mxu1 %v4999_v45  ;;  %v5604_v6 = vadd.f32 %v5540_v41, %v5385_v57  ;;  %v5754_v0 = vsel %vm5679_vm10, %v8476_v4, 0.0  ;;  %v5756_v25 = vsel %vm5681_vm3, %v8476_v4, 0.0  ;;  %vm5096_vm6 = vcmp.eq.s32.totalorder %v9457_v20, %v8456_v10 }
 0x69c   : > { %v5818_v26 = vadd.f32 %v5754_v0, %v5602_v2  ;;  %v5169_v61 = vsel %vm5094_vm1, %v8428_v52, 0.0  ;;  %v5171_v50 = vsel %vm5096_vm6, %v8428_v52, 0.0  ;;  %vm5249_vm4 = vcmp.eq.s32.totalorder %v9452_v55, %v8472_v59 }
 0x69d   : > { %v5820_v39 = vadd.f32 %v5756_v25, %v5604_v6  ;;  %vm5251_vm5 = vcmp.eq.s32.totalorder %v9457_v20, %v8472_v59  ;;  %v5324_v7 = vsel %vm5249_vm4, %v8441_v27, 0.0  ;;  %vm5468_vm8 = vcmp.eq.s32.totalorder %v9452_v55, %v8492_v19 }
 0x69e   : > { %v5326_v3 = vsel %vm5251_vm5, %v8441_v27, 0.0  ;;  %v5388_v31 = vadd.f32 %v5324_v7, %v5169_v61  ;;  %vm5470_vm9 = vcmp.eq.s32.totalorder %v9457_v20, %v8492_v19  ;;  %v5543_v60 = vsel %vm5468_vm8, %v8450_v29, 0.0 }
 0x69f   : > { %v5864_v9 = vpack.c.bf16 %v5820_v39, %v5818_v26  ;;  %v5390_v63 = vadd.f32 %v5326_v3, %v5171_v50  ;;  %v5545_v11 = vsel %vm5470_vm9, %v8450_v29, 0.0  ;;  %vm5684_vm7 = vcmp.eq.s32.totalorder %v9452_v55, %v8505_v49 }
 0x6a0   : > { %v5607_v40 = vadd.f32 %v5543_v60, %v5388_v31  ;;  %vm5686_vm2 = vcmp.eq.s32.totalorder %v9457_v20, %v8505_v49  ;;  %v5759_v35 = vsel %vm5684_vm7, %v8479_v12, 0.0  ;;  %vm4225_vm10 = vcmp.eq.s32.totalorder %v9452_v55, %v8384_v34 }
 0x6a1   : > { %5938 = vmatpush1.bf16.msra.mxu0 %v5864_v9  ;;  %v5609_v16 = vadd.f32 %v5545_v11, %v5390_v63  ;;  %v5761_v21 = vsel %vm5686_vm2, %v8479_v12, 0.0  ;;  %vm4227_vm3 = vcmp.eq.s32.totalorder %v9457_v20, %v8384_v34  ;;  %v4300_v45 = vsel %vm4225_vm10, %v8352_v51, 0.0 }
 0x6a2   : > { %v5823_v57 = vadd.f32 %v5759_v35, %v5607_v40  ;;  %v4302_v56 = vsel %vm4227_vm3, %v8352_v51, 0.0  ;;  %vm4380_vm1 = vcmp.eq.s32.totalorder %v9452_v55, %v8393_v47  ;;  %vm4382_vm6 = vcmp.eq.s32.totalorder %v9457_v20, %v8393_v47 }
 0x6a3   : > { %v5825_v41 = vadd.f32 %v5761_v21, %v5609_v16  ;;  %v4455_v2 = vsel %vm4380_vm1, %v8362_v30, 0.0  ;;  %v4457_v6 = vsel %vm4382_vm6, %v8362_v30, 0.0  ;;  %vm4599_vm4 = vcmp.eq.s32.totalorder %v9452_v55, %v8405_v14 }
 0x6a4   : > { %v4519_v0 = vadd.f32 %v4455_v2, %v4300_v45  ;;  %v4521_v25 = vadd.f32 %v4457_v6, %v4302_v56  ;;  %vm4601_vm5 = vcmp.eq.s32.totalorder %v9457_v20, %v8405_v14  ;;  %v4674_v26 = vsel %vm4599_vm4, %v8371_v13, 0.0 }
 0x6a5   : > { %v5867_v61 = vpack.c.bf16 %v5825_v41, %v5823_v57  ;;  %v4676_v50 = vsel %vm4601_vm5, %v8371_v13, 0.0  ;;  %vm4815_vm8 = vcmp.eq.s32.totalorder %v9452_v55, %v8412_v8  ;;  %vm4817_vm9 = vcmp.eq.s32.totalorder %v9457_v20, %v8412_v8 }
 0x6a6   : > { %v4738_v39 = vadd.f32 %v4674_v26, %v4519_v0  ;;  %v4740_v7 = vadd.f32 %v4676_v50, %v4521_v25  ;;  %v4890_v3 = vsel %vm4815_vm8, %v8377_v38, 0.0  ;;  %v4892_v31 = vsel %vm4817_vm9, %v8377_v38, 0.0 }
 0x6a7   : > { %5939 = vmatprep.subr.bf16.mxu0 %v5867_v61  ;;  %v9556_v60 = vadd.s32 176, %v7727_v22  ;;  %v9559_v9 = vadd.s32 184, %v7727_v22  ;;  %vm5093_vm7 = vcmp.eq.s32.totalorder %v9452_v55, %v8453_v23  ;;  %vm5095_vm2 = vcmp.eq.s32.totalorder %v9457_v20, %v8453_v23 }
 0x6a8   : > { %v4954_v63 = vadd.f32 %v4890_v3, %v4738_v39  ;;  %v4956_v11 = vadd.f32 %v4892_v31, %v4740_v7  ;;  %v5168_v40 = vsel %vm5093_vm7, %v8425_v58, 0.0  ;;  %v5170_v35 = vsel %vm5095_vm2, %v8425_v58, 0.0 }
 0x6a9   : > { %vm4230_vm10 = vcmp.eq.s32.totalorder %v9556_v60, %v8387_v54  ;;  %vm4232_vm3 = vcmp.eq.s32.totalorder %v9559_v9, %v8387_v54  ;;  %vm4385_vm1 = vcmp.eq.s32.totalorder %v9556_v60, %v8396_v37  ;;  %vm4387_vm6 = vcmp.eq.s32.totalorder %v9559_v9, %v8396_v37 }
 0x6aa   : > { %v4998_v16 = vpack.c.bf16 %v4956_v11, %v4954_v63  ;;  %v4305_v21 = vsel %vm4230_vm10, %v8355_v5, 0.0  ;;  %v4307_v45 = vsel %vm4232_vm3, %v8355_v5, 0.0  ;;  %v4460_v57 = vsel %vm4385_vm1, %v8365_v17, 0.0 }
 0x6ab   : > { %v4462_v56 = vsel %vm4387_vm6, %v8365_v17, 0.0  ;;  %v4524_v41 = vadd.f32 %v4460_v57, %v4305_v21  ;;  %vm4604_vm4 = vcmp.eq.s32.totalorder %v9556_v60, %v8408_v1  ;;  %vm4606_vm5 = vcmp.eq.s32.totalorder %v9559_v9, %v8408_v1 }
 0x6ac   : > { %5899 = vmatpush1.bf16.msra.mxu1 %v4998_v16  ;;  %v4526_v2 = vadd.f32 %v4462_v56, %v4307_v45  ;;  %v4679_v6 = vsel %vm4604_vm4, %v8374_v36, 0.0  ;;  %v4681_v0 = vsel %vm4606_vm5, %v8374_v36, 0.0  ;;  %vm4820_vm8 = vcmp.eq.s32.totalorder %v9556_v60, %v8415_v15 }
 0x6ad   : > { %v4743_v25 = vadd.f32 %v4679_v6, %v4524_v41  ;;  %vm4822_vm9 = vcmp.eq.s32.totalorder %v9559_v9, %v8415_v15  ;;  %v4895_v26 = vsel %vm4820_vm8, %v8381_v32, 0.0  ;;  %vm5248_vm7 = vcmp.eq.s32.totalorder %v9452_v55, %v8469_v42 }
 0x6ae   : > { %v4745_v61 = vadd.f32 %v4681_v0, %v4526_v2  ;;  %v4897_v50 = vsel %vm4822_vm9, %v8381_v32, 0.0  ;;  %vm5250_vm2 = vcmp.eq.s32.totalorder %v9457_v20, %v8469_v42  ;;  %v5323_v39 = vsel %vm5248_vm7, %v8438_v53, 0.0 }
 0x6af   : > { %v4959_v7 = vadd.f32 %v4895_v26, %v4743_v25  ;;  %v5325_v3 = vsel %vm5250_vm2, %v8438_v53, 0.0  ;;  %v5387_v31 = vadd.f32 %v5323_v39, %v5168_v40  ;;  %vm5467_vm10 = vcmp.eq.s32.totalorder %v9452_v55, %v8489_v44 }
 0x6b0   : > { %v4961_v63 = vadd.f32 %v4897_v50, %v4745_v61  ;;  %v5389_v11 = vadd.f32 %v5325_v3, %v5170_v35  ;;  %vm5469_vm3 = vcmp.eq.s32.totalorder %v9457_v20, %v8489_v44  ;;  %v5542_v16 = vsel %vm5467_vm10, %v8447_v18, 0.0 }
 0x6b1   : > { %v5544_v21 = vsel %vm5469_vm3, %v8447_v18, 0.0  ;;  %v5606_v45 = vadd.f32 %v5542_v16, %v5387_v31  ;;  %vm5683_vm1 = vcmp.eq.s32.totalorder %v9452_v55, %v8502_v62  ;;  %vm5685_vm6 = vcmp.eq.s32.totalorder %v9457_v20, %v8502_v62 }
 0x6b2   : > { %v5001_v40 = vpack.c.bf16 %v4961_v63, %v4959_v7  ;;  %v5608_v57 = vadd.f32 %v5544_v21, %v5389_v11  ;;  %v5758_v56 = vsel %vm5683_vm1, %v8476_v4, 0.0  ;;  %v5760_v35 = vsel %vm5685_vm6, %v8476_v4, 0.0 }
 0x6b3   : > { %v5822_v41 = vadd.f32 %v5758_v56, %v5606_v45  ;;  %vm5098_vm4 = vcmp.eq.s32.totalorder %v9556_v60, %v8456_v10  ;;  %vm5100_vm5 = vcmp.eq.s32.totalorder %v9559_v9, %v8456_v10  ;;  %vm5253_vm8 = vcmp.eq.s32.totalorder %v9556_v60, %v8472_v59 }
 0x6b4   : > { %5900 = vmatprep.subr.bf16.mxu1 %v5001_v40  ;;  %v5824_v55 = vadd.f32 %v5760_v35, %v5608_v57  ;;  %v5173_v20 = vsel %vm5098_vm4, %v8428_v52, 0.0  ;;  %v5175_v2 = vsel %vm5100_vm5, %v8428_v52, 0.0  ;;  %vm5255_vm9 = vcmp.eq.s32.totalorder %v9559_v9, %v8472_v59 }
 0x6b5   : > { %v5328_v6 = vsel %vm5253_vm8, %v8441_v27, 0.0  ;;  %v5330_v0 = vsel %vm5255_vm9, %v8441_v27, 0.0  ;;  %vm5472_vm7 = vcmp.eq.s32.totalorder %v9556_v60, %v8492_v19  ;;  %vm5474_vm2 = vcmp.eq.s32.totalorder %v9559_v9, %v8492_v19 }
 0x6b6   : > { %v5866_v25 = vpack.c.bf16 %v5824_v55, %v5822_v41  ;;  %v5392_v26 = vadd.f32 %v5328_v6, %v5173_v20  ;;  %v5394_v61 = vadd.f32 %v5330_v0, %v5175_v2  ;;  %v5547_v50 = vsel %vm5472_vm7, %v8450_v29, 0.0 }
 0x6b7   : > { %v5549_v39 = vsel %vm5474_vm2, %v8450_v29, 0.0  ;;  %vm5688_vm10 = vcmp.eq.s32.totalorder %v9556_v60, %v8505_v49  ;;  %vm5690_vm3 = vcmp.eq.s32.totalorder %v9559_v9, %v8505_v49  ;;  %vm4229_vm1 = vcmp.eq.s32.totalorder %v9556_v60, %v8384_v34 }
 0x6b8   : > { %5940 = vmatpush1.bf16.msra.mxu0 %v5866_v25  ;;  %v5611_v7 = vadd.f32 %v5547_v50, %v5392_v26  ;;  %v5613_v3 = vadd.f32 %v5549_v39, %v5394_v61  ;;  %v5763_v31 = vsel %vm5688_vm10, %v8479_v12, 0.0  ;;  %v5765_v63 = vsel %vm5690_vm3, %v8479_v12, 0.0 }
 0x6b9   : > { %vm4231_vm6 = vcmp.eq.s32.totalorder %v9559_v9, %v8384_v34  ;;  %v4304_v11 = vsel %vm4229_vm1, %v8352_v51, 0.0  ;;  %vm4384_vm4 = vcmp.eq.s32.totalorder %v9556_v60, %v8393_v47  ;;  %vm4386_vm5 = vcmp.eq.s32.totalorder %v9559_v9, %v8393_v47 }
 0x6ba   : > { %v5827_v16 = vadd.f32 %v5763_v31, %v5611_v7  ;;  %v5829_v21 = vadd.f32 %v5765_v63, %v5613_v3  ;;  %v4306_v45 = vsel %vm4231_vm6, %v8352_v51, 0.0  ;;  %v4459_v40 = vsel %vm4384_vm4, %v8362_v30, 0.0 }
 0x6bb   : > { %v4461_v57 = vsel %vm4386_vm5, %v8362_v30, 0.0  ;;  %v4523_v56 = vadd.f32 %v4459_v40, %v4304_v11  ;;  %vm4603_vm8 = vcmp.eq.s32.totalorder %v9556_v60, %v8405_v14  ;;  %vm4605_vm9 = vcmp.eq.s32.totalorder %v9559_v9, %v8405_v14 }
 0x6bc   : > { %v5869_v35 = vpack.c.bf16 %v5829_v21, %v5827_v16  ;;  %v4525_v41 = vadd.f32 %v4461_v57, %v4306_v45  ;;  %v4678_v55 = vsel %vm4603_vm8, %v8371_v13, 0.0  ;;  %v4680_v20 = vsel %vm4605_vm9, %v8371_v13, 0.0 }
 0x6bd   : > { %v4742_v2 = vadd.f32 %v4678_v55, %v4523_v56  ;;  %vm4819_vm7 = vcmp.eq.s32.totalorder %v9556_v60, %v8412_v8  ;;  %vm4821_vm2 = vcmp.eq.s32.totalorder %v9559_v9, %v8412_v8  ;;  %v9656_v6 = vadd.s32 192, %v7727_v22 }
 0x6be   : > { %5941 = vmatprep.subr.bf16.mxu0 %v5869_v35  ;;  %v4744_v0 = vadd.f32 %v4680_v20, %v4525_v41  ;;  %v4894_v25 = vsel %vm4819_vm7, %v8377_v38, 0.0  ;;  %v4896_v26 = vsel %vm4821_vm2, %v8377_v38, 0.0  ;;  %v9661_v61 = vadd.s32 200, %v7727_v22 }
 0x6bf   : > { %v4958_v50 = vadd.f32 %v4894_v25, %v4742_v2  ;;  %vm4234_vm10 = vcmp.eq.s32.totalorder %v9656_v6, %v8387_v54  ;;  %vm4389_vm3 = vcmp.eq.s32.totalorder %v9656_v6, %v8396_v37  ;;  %vm4608_vm1 = vcmp.eq.s32.totalorder %v9656_v6, %v8408_v1 }
 0x6c0   : > { %v4960_v39 = vadd.f32 %v4896_v26, %v4744_v0  ;;  %vm4236_vm6 = vcmp.eq.s32.totalorder %v9661_v61, %v8387_v54  ;;  %v4309_v7 = vsel %vm4234_vm10, %v8355_v5, 0.0  ;;  %vm4391_vm4 = vcmp.eq.s32.totalorder %v9661_v61, %v8396_v37 }
 0x6c1   : > { %v4311_v3 = vsel %vm4236_vm6, %v8355_v5, 0.0  ;;  %v4464_v31 = vsel %vm4389_vm3, %v8365_v17, 0.0  ;;  %v4466_v63 = vsel %vm4391_vm4, %v8365_v17, 0.0  ;;  %vm4610_vm5 = vcmp.eq.s32.totalorder %v9661_v61, %v8408_v1 }
 0x6c2   : > { %v5000_v11 = vpack.c.bf16 %v4960_v39, %v4958_v50  ;;  %v4528_v16 = vadd.f32 %v4464_v31, %v4309_v7  ;;  %v4530_v21 = vadd.f32 %v4466_v63, %v4311_v3  ;;  %v4683_v45 = vsel %vm4608_vm1, %v8374_v36, 0.0 }
 0x6c3   : > { %v4685_v40 = vsel %vm4610_vm5, %v8374_v36, 0.0  ;;  %vm4824_vm8 = vcmp.eq.s32.totalorder %v9656_v6, %v8415_v15  ;;  %vm4826_vm9 = vcmp.eq.s32.totalorder %v9661_v61, %v8415_v15  ;;  %vm5097_vm7 = vcmp.eq.s32.totalorder %v9556_v60, %v8453_v23 }
 0x6c4   : > { %5901 = vmatpush1.bf16.msra.mxu1 %v5000_v11  ;;  %v4747_v57 = vadd.f32 %v4683_v45, %v4528_v16  ;;  %v4749_v56 = vadd.f32 %v4685_v40, %v4530_v21  ;;  %v4899_v35 = vsel %vm4824_vm8, %v8381_v32, 0.0  ;;  %v4901_v41 = vsel %vm4826_vm9, %v8381_v32, 0.0 }
 0x6c5   : > { %vm5099_vm2 = vcmp.eq.s32.totalorder %v9559_v9, %v8453_v23  ;;  %v5172_v55 = vsel %vm5097_vm7, %v8425_v58, 0.0  ;;  %vm5252_vm10 = vcmp.eq.s32.totalorder %v9556_v60, %v8469_v42  ;;  %vm5254_vm3 = vcmp.eq.s32.totalorder %v9559_v9, %v8469_v42 }
 0x6c6   : > { %v4963_v20 = vadd.f32 %v4899_v35, %v4747_v57  ;;  %v4965_v2 = vadd.f32 %v4901_v41, %v4749_v56  ;;  %v5174_v0 = vsel %vm5099_vm2, %v8425_v58, 0.0  ;;  %v5327_v25 = vsel %vm5252_vm10, %v8438_v53, 0.0 }
 0x6c7   : > { %v5329_v26 = vsel %vm5254_vm3, %v8438_v53, 0.0  ;;  %v5391_v50 = vadd.f32 %v5327_v25, %v5172_v55  ;;  %vm5471_vm1 = vcmp.eq.s32.totalorder %v9556_v60, %v8489_v44  ;;  %vm5473_vm6 = vcmp.eq.s32.totalorder %v9559_v9, %v8489_v44 }
 0x6c8   : > { %v5003_v39 = vpack.c.bf16 %v4965_v2, %v4963_v20  ;;  %v5393_v7 = vadd.f32 %v5329_v26, %v5174_v0  ;;  %v5546_v3 = vsel %vm5471_vm1, %v8447_v18, 0.0  ;;  %v5548_v31 = vsel %vm5473_vm6, %v8447_v18, 0.0 }
 0x6c9   : > { %v5610_v63 = vadd.f32 %v5546_v3, %v5391_v50  ;;  %vm5687_vm4 = vcmp.eq.s32.totalorder %v9556_v60, %v8502_v62  ;;  %vm5689_vm5 = vcmp.eq.s32.totalorder %v9559_v9, %v8502_v62  ;;  %vm5102_vm8 = vcmp.eq.s32.totalorder %v9656_v6, %v8456_v10 }
 0x6ca   : > { %5902 = vmatprep.subr.bf16.mxu1 %v5003_v39  ;;  %v5612_v11 = vadd.f32 %v5548_v31, %v5393_v7  ;;  %v5762_v16 = vsel %vm5687_vm4, %v8476_v4, 0.0  ;;  %v5764_v21 = vsel %vm5689_vm5, %v8476_v4, 0.0  ;;  %vm5104_vm9 = vcmp.eq.s32.totalorder %v9661_v61, %v8456_v10 }
 0x6cb   : > { %v5826_v45 = vadd.f32 %v5762_v16, %v5610_v63  ;;  %v5177_v40 = vsel %vm5102_vm8, %v8428_v52, 0.0  ;;  %v5179_v60 = vsel %vm5104_vm9, %v8428_v52, 0.0  ;;  %vm5257_vm7 = vcmp.eq.s32.totalorder %v9656_v6, %v8472_v59 }
 0x6cc   : > { %v5828_v9 = vadd.f32 %v5764_v21, %v5612_v11  ;;  %vm5259_vm2 = vcmp.eq.s32.totalorder %v9661_v61, %v8472_v59  ;;  %v5332_v57 = vsel %vm5257_vm7, %v8441_v27, 0.0  ;;  %vm5476_vm10 = vcmp.eq.s32.totalorder %v9656_v6, %v8492_v19 }
 0x6cd   : > { %v5334_v56 = vsel %vm5259_vm2, %v8441_v27, 0.0  ;;  %v5396_v35 = vadd.f32 %v5332_v57, %v5177_v40  ;;  %vm5478_vm3 = vcmp.eq.s32.totalorder %v9661_v61, %v8492_v19  ;;  %v5551_v41 = vsel %vm5476_vm10, %v8450_v29, 0.0 }
 0x6ce   : > { %v5868_v55 = vpack.c.bf16 %v5828_v9, %v5826_v45  ;;  %v5398_v20 = vadd.f32 %v5334_v56, %v5179_v60  ;;  %v5553_v2 = vsel %vm5478_vm3, %v8450_v29, 0.0  ;;  %vm5692_vm1 = vcmp.eq.s32.totalorder %v9656_v6, %v8505_v49 }
 0x6cf   : > { %v5615_v0 = vadd.f32 %v5551_v41, %v5396_v35  ;;  %vm5694_vm6 = vcmp.eq.s32.totalorder %v9661_v61, %v8505_v49  ;;  %v5767_v25 = vsel %vm5692_vm1, %v8479_v12, 0.0  ;;  %vm4233_vm4 = vcmp.eq.s32.totalorder %v9656_v6, %v8384_v34 }
 0x6d0   : > { %5942 = vmatpush1.bf16.msra.mxu0 %v5868_v55  ;;  %v5617_v26 = vadd.f32 %v5553_v2, %v5398_v20  ;;  %v5769_v50 = vsel %vm5694_vm6, %v8479_v12, 0.0  ;;  %vm4235_vm5 = vcmp.eq.s32.totalorder %v9661_v61, %v8384_v34  ;;  %v4308_v39 = vsel %vm4233_vm4, %v8352_v51, 0.0 }
 0x6d1   : > { %v5831_v7 = vadd.f32 %v5767_v25, %v5615_v0  ;;  %v4310_v3 = vsel %vm4235_vm5, %v8352_v51, 0.0  ;;  %vm4388_vm8 = vcmp.eq.s32.totalorder %v9656_v6, %v8393_v47  ;;  %vm4390_vm9 = vcmp.eq.s32.totalorder %v9661_v61, %v8393_v47 }
 0x6d2   : > { %v5833_v31 = vadd.f32 %v5769_v50, %v5617_v26  ;;  %v4463_v63 = vsel %vm4388_vm8, %v8362_v30, 0.0  ;;  %v4465_v11 = vsel %vm4390_vm9, %v8362_v30, 0.0  ;;  %vm4607_vm7 = vcmp.eq.s32.totalorder %v9656_v6, %v8405_v14 }
 0x6d3   : > { %v4527_v16 = vadd.f32 %v4463_v63, %v4308_v39  ;;  %v4529_v21 = vadd.f32 %v4465_v11, %v4310_v3  ;;  %vm4609_vm2 = vcmp.eq.s32.totalorder %v9661_v61, %v8405_v14  ;;  %v4682_v45 = vsel %vm4607_vm7, %v8371_v13, 0.0 }
 0x6d4   : > { %v5871_v40 = vpack.c.bf16 %v5833_v31, %v5831_v7  ;;  %v4684_v60 = vsel %vm4609_vm2, %v8371_v13, 0.0  ;;  %vm4823_vm10 = vcmp.eq.s32.totalorder %v9656_v6, %v8412_v8  ;;  %vm4825_vm3 = vcmp.eq.s32.totalorder %v9661_v61, %v8412_v8 }
 0x6d5   : > { %v4746_v9 = vadd.f32 %v4682_v45, %v4527_v16  ;;  %v4748_v57 = vadd.f32 %v4684_v60, %v4529_v21  ;;  %v4898_v56 = vsel %vm4823_vm10, %v8377_v38, 0.0  ;;  %v4900_v35 = vsel %vm4825_vm3, %v8377_v38, 0.0 }
 0x6d6   : > { %5943 = vmatprep.subr.bf16.mxu0 %v5871_v40  ;;  %v9760_v41 = vadd.s32 208, %v7727_v22  ;;  %v9763_v55 = vadd.s32 216, %v7727_v22  ;;  %vm5101_vm1 = vcmp.eq.s32.totalorder %v9656_v6, %v8453_v23  ;;  %vm5103_vm6 = vcmp.eq.s32.totalorder %v9661_v61, %v8453_v23 }
 0x6d7   : > { %v4962_v20 = vadd.f32 %v4898_v56, %v4746_v9  ;;  %v4964_v2 = vadd.f32 %v4900_v35, %v4748_v57  ;;  %v5176_v0 = vsel %vm5101_vm1, %v8425_v58, 0.0  ;;  %v5178_v25 = vsel %vm5103_vm6, %v8425_v58, 0.0 }
 0x6d8   : > { %vm4238_vm4 = vcmp.eq.s32.totalorder %v9760_v41, %v8387_v54  ;;  %vm4240_vm5 = vcmp.eq.s32.totalorder %v9763_v55, %v8387_v54  ;;  %vm4393_vm8 = vcmp.eq.s32.totalorder %v9760_v41, %v8396_v37  ;;  %vm4395_vm9 = vcmp.eq.s32.totalorder %v9763_v55, %v8396_v37 }
 0x6d9   : > { %v5002_v26 = vpack.c.bf16 %v4964_v2, %v4962_v20  ;;  %v4313_v50 = vsel %vm4238_vm4, %v8355_v5, 0.0  ;;  %v4315_v39 = vsel %vm4240_vm5, %v8355_v5, 0.0  ;;  %v4468_v7 = vsel %vm4393_vm8, %v8365_v17, 0.0 }
 0x6da   : > { %v4470_v3 = vsel %vm4395_vm9, %v8365_v17, 0.0  ;;  %v4532_v31 = vadd.f32 %v4468_v7, %v4313_v50  ;;  %vm4612_vm7 = vcmp.eq.s32.totalorder %v9760_v41, %v8408_v1  ;;  %vm4614_vm2 = vcmp.eq.s32.totalorder %v9763_v55, %v8408_v1 }
 0x6db   : > { %5903 = vmatpush1.bf16.msra.mxu1 %v5002_v26  ;;  %v4534_v63 = vadd.f32 %v4470_v3, %v4315_v39  ;;  %v4687_v11 = vsel %vm4612_vm7, %v8374_v36, 0.0  ;;  %v4689_v16 = vsel %vm4614_vm2, %v8374_v36, 0.0  ;;  %vm4828_vm10 = vcmp.eq.s32.totalorder %v9760_v41, %v8415_v15 }
 0x6dc   : > { %v4751_v21 = vadd.f32 %v4687_v11, %v4532_v31  ;;  %vm4830_vm3 = vcmp.eq.s32.totalorder %v9763_v55, %v8415_v15  ;;  %v4903_v45 = vsel %vm4828_vm10, %v8381_v32, 0.0  ;;  %vm5256_vm1 = vcmp.eq.s32.totalorder %v9656_v6, %v8469_v42 }
 0x6dd   : > { %v4753_v40 = vadd.f32 %v4689_v16, %v4534_v63  ;;  %v4905_v60 = vsel %vm4830_vm3, %v8381_v32, 0.0  ;;  %vm5258_vm6 = vcmp.eq.s32.totalorder %v9661_v61, %v8469_v42  ;;  %v5331_v9 = vsel %vm5256_vm1, %v8438_v53, 0.0 }
 0x6de   : > { %v4967_v57 = vadd.f32 %v4903_v45, %v4751_v21  ;;  %v5333_v56 = vsel %vm5258_vm6, %v8438_v53, 0.0  ;;  %v5395_v35 = vadd.f32 %v5331_v9, %v5176_v0  ;;  %vm5475_vm4 = vcmp.eq.s32.totalorder %v9656_v6, %v8489_v44 }
 0x6df   : > { %v4969_v20 = vadd.f32 %v4905_v60, %v4753_v40  ;;  %v5397_v2 = vadd.f32 %v5333_v56, %v5178_v25  ;;  %vm5477_vm5 = vcmp.eq.s32.totalorder %v9661_v61, %v8489_v44  ;;  %v5550_v26 = vsel %vm5475_vm4, %v8447_v18, 0.0 }
 0x6e0   : > { %v5552_v50 = vsel %vm5477_vm5, %v8447_v18, 0.0  ;;  %v5614_v39 = vadd.f32 %v5550_v26, %v5395_v35  ;;  %vm5691_vm8 = vcmp.eq.s32.totalorder %v9656_v6, %v8502_v62  ;;  %vm5693_vm9 = vcmp.eq.s32.totalorder %v9661_v61, %v8502_v62 }
 0x6e1   : > { %v5005_v0 = vpack.c.bf16 %v4969_v20, %v4967_v57  ;;  %v5616_v7 = vadd.f32 %v5552_v50, %v5397_v2  ;;  %v5766_v3 = vsel %vm5691_vm8, %v8476_v4, 0.0  ;;  %v5768_v25 = vsel %vm5693_vm9, %v8476_v4, 0.0 }
 0x6e2   : > { %v5830_v31 = vadd.f32 %v5766_v3, %v5614_v39  ;;  %vm5106_vm7 = vcmp.eq.s32.totalorder %v9760_v41, %v8456_v10  ;;  %vm5108_vm2 = vcmp.eq.s32.totalorder %v9763_v55, %v8456_v10  ;;  %vm5261_vm10 = vcmp.eq.s32.totalorder %v9760_v41, %v8472_v59 }
 0x6e3   : > { %5904 = vmatprep.subr.bf16.mxu1 %v5005_v0  ;;  %v5832_v6 = vadd.f32 %v5768_v25, %v5616_v7  ;;  %v5181_v61 = vsel %vm5106_vm7, %v8428_v52, 0.0  ;;  %v5183_v63 = vsel %vm5108_vm2, %v8428_v52, 0.0  ;;  %vm5263_vm3 = vcmp.eq.s32.totalorder %v9763_v55, %v8472_v59 }
 0x6e4   : > { %v5336_v11 = vsel %vm5261_vm10, %v8441_v27, 0.0  ;;  %v5338_v16 = vsel %vm5263_vm3, %v8441_v27, 0.0  ;;  %vm5480_vm1 = vcmp.eq.s32.totalorder %v9760_v41, %v8492_v19  ;;  %vm5482_vm6 = vcmp.eq.s32.totalorder %v9763_v55, %v8492_v19 }
 0x6e5   : > { %v5870_v21 = vpack.c.bf16 %v5832_v6, %v5830_v31  ;;  %v5400_v45 = vadd.f32 %v5336_v11, %v5181_v61  ;;  %v5402_v40 = vadd.f32 %v5338_v16, %v5183_v63  ;;  %v5555_v60 = vsel %vm5480_vm1, %v8450_v29, 0.0 }
 0x6e6   : > { %v5557_v9 = vsel %vm5482_vm6, %v8450_v29, 0.0  ;;  %vm5696_vm4 = vcmp.eq.s32.totalorder %v9760_v41, %v8505_v49  ;;  %vm5698_vm5 = vcmp.eq.s32.totalorder %v9763_v55, %v8505_v49  ;;  %vm4237_vm8 = vcmp.eq.s32.totalorder %v9760_v41, %v8384_v34 }
 0x6e7   : > { %5944 = vmatpush1.bf16.msra.mxu0 %v5870_v21  ;;  %v5619_v57 = vadd.f32 %v5555_v60, %v5400_v45  ;;  %v5621_v56 = vadd.f32 %v5557_v9, %v5402_v40  ;;  %v5771_v35 = vsel %vm5696_vm4, %v8479_v12, 0.0  ;;  %v5773_v20 = vsel %vm5698_vm5, %v8479_v12, 0.0 }
 0x6e8   : > { %vm4239_vm9 = vcmp.eq.s32.totalorder %v9763_v55, %v8384_v34  ;;  %v4312_v2 = vsel %vm4237_vm8, %v8352_v51, 0.0  ;;  %vm4392_vm7 = vcmp.eq.s32.totalorder %v9760_v41, %v8393_v47  ;;  %vm4394_vm2 = vcmp.eq.s32.totalorder %v9763_v55, %v8393_v47 }
 0x6e9   : > { %v5835_v26 = vadd.f32 %v5771_v35, %v5619_v57  ;;  %v5837_v50 = vadd.f32 %v5773_v20, %v5621_v56  ;;  %v4314_v39 = vsel %vm4239_vm9, %v8352_v51, 0.0  ;;  %v4467_v0 = vsel %vm4392_vm7, %v8362_v30, 0.0 }
 0x6ea   : > { %v4469_v7 = vsel %vm4394_vm2, %v8362_v30, 0.0  ;;  %v4531_v3 = vadd.f32 %v4467_v0, %v4312_v2  ;;  %vm4611_vm10 = vcmp.eq.s32.totalorder %v9760_v41, %v8405_v14  ;;  %vm4613_vm3 = vcmp.eq.s32.totalorder %v9763_v55, %v8405_v14 }
 0x6eb   : > { %v5873_v25 = vpack.c.bf16 %v5837_v50, %v5835_v26  ;;  %v4533_v31 = vadd.f32 %v4469_v7, %v4314_v39  ;;  %v4686_v6 = vsel %vm4611_vm10, %v8371_v13, 0.0  ;;  %v4688_v61 = vsel %vm4613_vm3, %v8371_v13, 0.0 }
 0x6ec   : > { %v4750_v63 = vadd.f32 %v4686_v6, %v4531_v3  ;;  %vm4827_vm1 = vcmp.eq.s32.totalorder %v9760_v41, %v8412_v8  ;;  %vm4829_vm6 = vcmp.eq.s32.totalorder %v9763_v55, %v8412_v8  ;;  %v9860_v11 = vadd.s32 224, %v7727_v22 }
 0x6ed   : > { %5945 = vmatprep.subr.bf16.mxu0 %v5873_v25  ;;  %v4752_v16 = vadd.f32 %v4688_v61, %v4533_v31  ;;  %v4902_v21 = vsel %vm4827_vm1, %v8377_v38, 0.0  ;;  %v4904_v45 = vsel %vm4829_vm6, %v8377_v38, 0.0  ;;  %v9865_v40 = vadd.s32 232, %v7727_v22 }
 0x6ee   : > { %v4966_v60 = vadd.f32 %v4902_v21, %v4750_v63  ;;  %vm4242_vm4 = vcmp.eq.s32.totalorder %v9860_v11, %v8387_v54  ;;  %vm4397_vm5 = vcmp.eq.s32.totalorder %v9860_v11, %v8396_v37  ;;  %vm4616_vm8 = vcmp.eq.s32.totalorder %v9860_v11, %v8408_v1 }
 0x6ef   : > { %v4968_v9 = vadd.f32 %v4904_v45, %v4752_v16  ;;  %vm4244_vm9 = vcmp.eq.s32.totalorder %v9865_v40, %v8387_v54  ;;  %v4317_v57 = vsel %vm4242_vm4, %v8355_v5, 0.0  ;;  %vm4399_vm7 = vcmp.eq.s32.totalorder %v9865_v40, %v8396_v37 }
 0x6f0   : > { %v4319_v56 = vsel %vm4244_vm9, %v8355_v5, 0.0  ;;  %v4472_v35 = vsel %vm4397_vm5, %v8365_v17, 0.0  ;;  %v4474_v20 = vsel %vm4399_vm7, %v8365_v17, 0.0  ;;  %vm4618_vm2 = vcmp.eq.s32.totalorder %v9865_v40, %v8408_v1 }
 0x6f1   : > { %v5004_v2 = vpack.c.bf16 %v4968_v9, %v4966_v60  ;;  %v4536_v26 = vadd.f32 %v4472_v35, %v4317_v57  ;;  %v4538_v50 = vadd.f32 %v4474_v20, %v4319_v56  ;;  %v4691_v39 = vsel %vm4616_vm8, %v8374_v36, 0.0 }
 0x6f2   : > { %v4693_v0 = vsel %vm4618_vm2, %v8374_v36, 0.0  ;;  %vm4832_vm10 = vcmp.eq.s32.totalorder %v9860_v11, %v8415_v15  ;;  %vm4834_vm3 = vcmp.eq.s32.totalorder %v9865_v40, %v8415_v15  ;;  %vm5105_vm1 = vcmp.eq.s32.totalorder %v9760_v41, %v8453_v23 }
 0x6f3   : > { %5905 = vmatpush1.bf16.msra.mxu1 %v5004_v2  ;;  %v4755_v7 = vadd.f32 %v4691_v39, %v4536_v26  ;;  %v4757_v3 = vadd.f32 %v4693_v0, %v4538_v50  ;;  %v4907_v25 = vsel %vm4832_vm10, %v8381_v32, 0.0  ;;  %v4909_v31 = vsel %vm4834_vm3, %v8381_v32, 0.0 }
 0x6f4   : > { %vm5107_vm6 = vcmp.eq.s32.totalorder %v9763_v55, %v8453_v23  ;;  %v5180_v6 = vsel %vm5105_vm1, %v8425_v58, 0.0  ;;  %vm5260_vm4 = vcmp.eq.s32.totalorder %v9760_v41, %v8469_v42  ;;  %vm5262_vm5 = vcmp.eq.s32.totalorder %v9763_v55, %v8469_v42 }
 0x6f5   : > { %v4971_v61 = vadd.f32 %v4907_v25, %v4755_v7  ;;  %v4973_v63 = vadd.f32 %v4909_v31, %v4757_v3  ;;  %v5182_v16 = vsel %vm5107_vm6, %v8425_v58, 0.0  ;;  %v5335_v21 = vsel %vm5260_vm4, %v8438_v53, 0.0 }
 0x6f6   : > { %v5337_v45 = vsel %vm5262_vm5, %v8438_v53, 0.0  ;;  %v5399_v60 = vadd.f32 %v5335_v21, %v5180_v6  ;;  %vm5479_vm8 = vcmp.eq.s32.totalorder %v9760_v41, %v8489_v44  ;;  %vm5481_vm9 = vcmp.eq.s32.totalorder %v9763_v55, %v8489_v44 }
 0x6f7   : > { %v5007_v9 = vpack.c.bf16 %v4973_v63, %v4971_v61  ;;  %v5401_v57 = vadd.f32 %v5337_v45, %v5182_v16  ;;  %v5554_v56 = vsel %vm5479_vm8, %v8447_v18, 0.0  ;;  %v5556_v35 = vsel %vm5481_vm9, %v8447_v18, 0.0 }
 0x6f8   : > { %v5618_v20 = vadd.f32 %v5554_v56, %v5399_v60  ;;  %vm5695_vm7 = vcmp.eq.s32.totalorder %v9760_v41, %v8502_v62  ;;  %vm5697_vm2 = vcmp.eq.s32.totalorder %v9763_v55, %v8502_v62  ;;  %vm5110_vm10 = vcmp.eq.s32.totalorder %v9860_v11, %v8456_v10 }
 0x6f9   : > { %5906 = vmatprep.subr.bf16.mxu1 %v5007_v9  ;;  %v5620_v2 = vadd.f32 %v5556_v35, %v5401_v57  ;;  %v5770_v26 = vsel %vm5695_vm7, %v8476_v4, 0.0  ;;  %v5772_v50 = vsel %vm5697_vm2, %v8476_v4, 0.0  ;;  %vm5112_vm3 = vcmp.eq.s32.totalorder %v9865_v40, %v8456_v10 }
 0x6fa   : > { %v5834_v39 = vadd.f32 %v5770_v26, %v5618_v20  ;;  %v5185_v0 = vsel %vm5110_vm10, %v8428_v52, 0.0  ;;  %v5187_v41 = vsel %vm5112_vm3, %v8428_v52, 0.0  ;;  %vm5265_vm1 = vcmp.eq.s32.totalorder %v9860_v11, %v8472_v59 }
 0x6fb   : > { %v5836_v55 = vadd.f32 %v5772_v50, %v5620_v2  ;;  %vm5267_vm6 = vcmp.eq.s32.totalorder %v9865_v40, %v8472_v59  ;;  %v5340_v7 = vsel %vm5265_vm1, %v8441_v27, 0.0  ;;  %vm5484_vm4 = vcmp.eq.s32.totalorder %v9860_v11, %v8492_v19 }
 0x6fc   : > { %v5342_v3 = vsel %vm5267_vm6, %v8441_v27, 0.0  ;;  %v5404_v25 = vadd.f32 %v5340_v7, %v5185_v0  ;;  %vm5486_vm5 = vcmp.eq.s32.totalorder %v9865_v40, %v8492_v19  ;;  %v5559_v31 = vsel %vm5484_vm4, %v8450_v29, 0.0 }
 0x6fd   : > { %v5872_v6 = vpack.c.bf16 %v5836_v55, %v5834_v39  ;;  %v5406_v61 = vadd.f32 %v5342_v3, %v5187_v41  ;;  %v5561_v63 = vsel %vm5486_vm5, %v8450_v29, 0.0  ;;  %vm5700_vm8 = vcmp.eq.s32.totalorder %v9860_v11, %v8505_v49 }
 0x6fe   : > { %v5623_v16 = vadd.f32 %v5559_v31, %v5404_v25  ;;  %vm5702_vm9 = vcmp.eq.s32.totalorder %v9865_v40, %v8505_v49  ;;  %v5775_v21 = vsel %vm5700_vm8, %v8479_v12, 0.0  ;;  %vm4241_vm7 = vcmp.eq.s32.totalorder %v9860_v11, %v8384_v34 }
 0x6ff   : > { %5946 = vmatpush1.bf16.msra.mxu0 %v5872_v6  ;;  %v5625_v45 = vadd.f32 %v5561_v63, %v5406_v61  ;;  %v5777_v60 = vsel %vm5702_vm9, %v8479_v12, 0.0  ;;  %vm4243_vm2 = vcmp.eq.s32.totalorder %v9865_v40, %v8384_v34  ;;  %v4316_v9 = vsel %vm4241_vm7, %v8352_v51, 0.0 }
 0x700   : > { %v5839_v57 = vadd.f32 %v5775_v21, %v5623_v16  ;;  %v4318_v56 = vsel %vm4243_vm2, %v8352_v51, 0.0  ;;  %vm4396_vm10 = vcmp.eq.s32.totalorder %v9860_v11, %v8393_v47  ;;  %vm4398_vm3 = vcmp.eq.s32.totalorder %v9865_v40, %v8393_v47 }
 0x701   : > { %v5841_v35 = vadd.f32 %v5777_v60, %v5625_v45  ;;  %v4471_v20 = vsel %vm4396_vm10, %v8362_v30, 0.0  ;;  %v4473_v2 = vsel %vm4398_vm3, %v8362_v30, 0.0  ;;  %vm4615_vm1 = vcmp.eq.s32.totalorder %v9860_v11, %v8405_v14 }
 0x702   : > { %v4535_v26 = vadd.f32 %v4471_v20, %v4316_v9  ;;  %v4537_v50 = vadd.f32 %v4473_v2, %v4318_v56  ;;  %vm4617_vm6 = vcmp.eq.s32.totalorder %v9865_v40, %v8405_v14  ;;  %v4690_v39 = vsel %vm4615_vm1, %v8371_v13, 0.0 }
 0x703   : > { %v5875_v0 = vpack.c.bf16 %v5841_v35, %v5839_v57  ;;  %v4692_v41 = vsel %vm4617_vm6, %v8371_v13, 0.0  ;;  %vm4831_vm4 = vcmp.eq.s32.totalorder %v9860_v11, %v8412_v8  ;;  %vm4833_vm5 = vcmp.eq.s32.totalorder %v9865_v40, %v8412_v8 }
 0x704   : > { %v4754_v55 = vadd.f32 %v4690_v39, %v4535_v26  ;;  %v4756_v7 = vadd.f32 %v4692_v41, %v4537_v50  ;;  %v4906_v3 = vsel %vm4831_vm4, %v8377_v38, 0.0  ;;  %v4908_v25 = vsel %vm4833_vm5, %v8377_v38, 0.0 }
 0x705   : > { %5947 = vmatprep.subr.bf16.mxu0 %v5875_v0  ;;  %v9964_v31 = vadd.s32 240, %v7727_v22  ;;  %v9967_v6 = vadd.s32 248, %v7727_v22  ;;  %vm5109_vm8 = vcmp.eq.s32.totalorder %v9860_v11, %v8453_v23  ;;  %vm5111_vm9 = vcmp.eq.s32.totalorder %v9865_v40, %v8453_v23 }
 0x706   : > { %v4970_v61 = vadd.f32 %v4906_v3, %v4754_v55  ;;  %v4972_v63 = vadd.f32 %v4908_v25, %v4756_v7  ;;  %v5184_v16 = vsel %vm5109_vm8, %v8425_v58, 0.0  ;;  %v5186_v21 = vsel %vm5111_vm9, %v8425_v58, 0.0 }
 0x707   : > { %vm4246_vm7 = vcmp.eq.s32.totalorder %v9964_v31, %v8387_v54  ;;  %vm4248_vm2 = vcmp.eq.s32.totalorder %v9967_v6, %v8387_v54  ;;  %vm4401_vm10 = vcmp.eq.s32.totalorder %v9964_v31, %v8396_v37  ;;  %vm4403_vm3 = vcmp.eq.s32.totalorder %v9967_v6, %v8396_v37 }
 0x708   : > { %v5006_v22 = vpack.c.bf16 %v4972_v63, %v4970_v61  ;;  %v4321_v45 = vsel %vm4246_vm7, %v8355_v5, 0.0  ;;  %v4323_v60 = vsel %vm4248_vm2, %v8355_v5, 0.0  ;;  %v4476_v9 = vsel %vm4401_vm10, %v8365_v17, 0.0 }
 0x709   : > { %v4478_v57 = vsel %vm4403_vm3, %v8365_v17, 0.0  ;;  %v4540_v56 = vadd.f32 %v4476_v9, %v4321_v45  ;;  %vm4620_vm1 = vcmp.eq.s32.totalorder %v9964_v31, %v8408_v1  ;;  %vm4622_vm6 = vcmp.eq.s32.totalorder %v9967_v6, %v8408_v1 }
 0x70a   : > { %5907 = vmatpush1.bf16.msra.mxu1 %v5006_v22  ;;  %v4542_v54 = vadd.f32 %v4478_v57, %v4323_v60  ;;  %v4695_v37 = vsel %vm4620_vm1, %v8374_v36, 0.0  ;;  %v4697_v35 = vsel %vm4622_vm6, %v8374_v36, 0.0  ;;  %vm4836_vm4 = vcmp.eq.s32.totalorder %v9964_v31, %v8415_v15 }
 0x70b   : > { %v4759_v5 = vadd.f32 %v4695_v37, %v4540_v56  ;;  %vm4838_vm5 = vcmp.eq.s32.totalorder %v9967_v6, %v8415_v15  ;;  %v4911_v17 = vsel %vm4836_vm4, %v8381_v32, 0.0  ;;  %vm5264_vm8 = vcmp.eq.s32.totalorder %v9860_v11, %v8469_v42 }
 0x70c   : > { %v4761_v20 = vadd.f32 %v4697_v35, %v4542_v54  ;;  %v4913_v1 = vsel %vm4838_vm5, %v8381_v32, 0.0  ;;  %vm5266_vm9 = vcmp.eq.s32.totalorder %v9865_v40, %v8469_v42  ;;  %v5339_v36 = vsel %vm5264_vm8, %v8438_v53, 0.0 }
 0x70d   : > { %v4975_v2 = vadd.f32 %v4911_v17, %v4759_v5  ;;  %v5341_v26 = vsel %vm5266_vm9, %v8438_v53, 0.0  ;;  %v5403_v50 = vadd.f32 %v5339_v36, %v5184_v16  ;;  %vm5483_vm7 = vcmp.eq.s32.totalorder %v9860_v11, %v8489_v44 }
 0x70e   : > { %v4977_v15 = vadd.f32 %v4913_v1, %v4761_v20  ;;  %v5405_v39 = vadd.f32 %v5341_v26, %v5186_v21  ;;  %vm5485_vm2 = vcmp.eq.s32.totalorder %v9865_v40, %v8489_v44  ;;  %v5558_v0 = vsel %vm5483_vm7, %v8447_v18, 0.0 }
 0x70f   : > { %v5560_v32 = vsel %vm5485_vm2, %v8447_v18, 0.0  ;;  %v5622_v41 = vadd.f32 %v5558_v0, %v5403_v50  ;;  %vm5699_vm10 = vcmp.eq.s32.totalorder %v9860_v11, %v8502_v62  ;;  %vm5701_vm3 = vcmp.eq.s32.totalorder %v9865_v40, %v8502_v62 }
 0x710   : > { %v5009_v55 = vpack.c.bf16 %v4977_v15, %v4975_v2  ;;  %v5624_v7 = vadd.f32 %v5560_v32, %v5405_v39  ;;  %v5774_v3 = vsel %vm5699_vm10, %v8476_v4, 0.0  ;;  %v5776_v25 = vsel %vm5701_vm3, %v8476_v4, 0.0  ;;  %v6874_v15 = vld [vmem:[%s7411_s25 + $0x8] sm:$0xff] }
 0x711   : > { %v5838_v61 = vadd.f32 %v5774_v3, %v5622_v41  ;;  %vm5114_vm1 = vcmp.eq.s32.totalorder %v9964_v31, %v8456_v10  ;;  %vm5116_vm6 = vcmp.eq.s32.totalorder %v9967_v6, %v8456_v10  ;;  %vm5269_vm4 = vcmp.eq.s32.totalorder %v9964_v31, %v8472_v59  ;;  %v6875_v41 = vld [vmem:[#allocation2] sm:$0xff] }
 0x712   : > { %5908 = vmatprep.subr.bf16.mxu1 %v5009_v55  ;;  %v5840_v11 = vadd.f32 %v5776_v25, %v5624_v7  ;;  %v5189_v40 = vsel %vm5114_vm1, %v8428_v52, 0.0  ;;  %v5191_v63 = vsel %vm5116_vm6, %v8428_v52, 0.0  ;;  %vm5271_vm5 = vcmp.eq.s32.totalorder %v9967_v6, %v8472_v59  ;;  %v6876_v7 = vld [vmem:[%s7411_s25] sm:$0xff]  ;;  %s10363_s25 = sshll.u32 %s7405_s14, 4 }
 0x713   : > { %v5344_v16 = vsel %vm5269_vm4, %v8441_v27, 0.0  ;;  %v5346_v21 = vsel %vm5271_vm5, %v8441_v27, 0.0  ;;  %vm5488_vm8 = vcmp.eq.s32.totalorder %v9964_v31, %v8492_v19  ;;  %vm5490_vm9 = vcmp.eq.s32.totalorder %v9967_v6, %v8492_v19  ;;  %s10098_s17 = scalar_lea.vmem [#allocation14], %s10363_s25  ;;  %s7132_s25 = smov [#allocation14]  }
 0x714   : > { %v5874_v10 = vpack.c.bf16 %v5840_v11, %v5838_v61  ;;  %v5408_v22 = vadd.f32 %v5344_v16, %v5189_v40  ;;  %v5410_v45 = vadd.f32 %v5346_v21, %v5191_v63  ;;  %v5563_v60 = vsel %vm5488_vm8, %v8450_v29, 0.0  ;;  %v5960_v40 = vld [vmem:[#allocation3] sm:$0x3]  ;;  %s6161_s26 = sshll.u32 %s10098_s17, 4  ;;  %s6162_s26 = int_to_ptr.vmem [resolvable:$true] %s6161_s26 }
 0x715   : > { %v5565_v52 = vsel %vm5490_vm9, %v8450_v29, 0.0  ;;  %vm5704_vm7 = vcmp.eq.s32.totalorder %v9964_v31, %v8505_v49  ;;  %vm5706_vm2 = vcmp.eq.s32.totalorder %v9967_v6, %v8505_v49  ;;  %vm4245_vm10 = vcmp.eq.s32.totalorder %v9964_v31, %v8384_v34  ;;  %s6993_s15 = scalar_lea.vmem %s6162_s26, 256 }
 0x716   : > { %5948 = vmatpush1.bf16.msra.mxu0 %v5874_v10  ;;  %v5627_v27 = vadd.f32 %v5563_v60, %v5408_v22  ;;  %v5629_v59 = vadd.f32 %v5565_v52, %v5410_v45  ;;  %v5779_v19 = vsel %vm5704_vm7, %v8479_v12, 0.0  ;;  %v5781_v9 = vsel %vm5706_vm2, %v8479_v12, 0.0  ;;  %p6994_p7 = scmp.ne.s32.totalorder %s6162_s26, %s6993_s15 }
 0x717   : > { %vm4247_vm3 = vcmp.eq.s32.totalorder %v9967_v6, %v8384_v34  ;;  %v4320_v29 = vsel %vm4245_vm10, %v8352_v51, 0.0  ;;  %vm4400_vm1 = vcmp.eq.s32.totalorder %v9964_v31, %v8393_v47  ;;  %vm4402_vm6 = vcmp.eq.s32.totalorder %v9967_v6, %v8393_v47 }
 0x718   : > { %v5843_v49 = vadd.f32 %v5779_v19, %v5627_v27  ;;  %v5845_v57 = vadd.f32 %v5781_v9, %v5629_v59  ;;  %v4322_v56 = vsel %vm4247_vm3, %v8352_v51, 0.0  ;;  %v4475_v54 = vsel %vm4400_vm1, %v8362_v30, 0.0  ;;  %p6995_p13 = pnand %p6994_p7, %p10385_p10 }
 0x719   : > { %v4477_v37 = vsel %vm4402_vm6, %v8362_v30, 0.0  ;;  %v4539_v12 = vadd.f32 %v4475_v54, %v4320_v29  ;;  %vm4619_vm4 = vcmp.eq.s32.totalorder %v9964_v31, %v8405_v14  ;;  %vm4621_vm5 = vcmp.eq.s32.totalorder %v9967_v6, %v8405_v14 }
 0x71a   : > { %v5877_v34 = vpack.c.bf16 %v5845_v57, %v5843_v49  ;;  %v4541_v35 = vadd.f32 %v4477_v37, %v4322_v56  ;;  %v4694_v5 = vsel %vm4619_vm4, %v8371_v13, 0.0  ;;  %v4696_v47 = vsel %vm4621_vm5, %v8371_v13, 0.0  ;;  %p6996_p5 = pneg %p6995_p13 }
 0x71b   : > { %v4758_v17 = vadd.f32 %v4694_v5, %v4539_v12  ;;  %vm4835_vm8 = vcmp.eq.s32.totalorder %v9964_v31, %v8412_v8  ;;  %vm4837_vm9 = vcmp.eq.s32.totalorder %v9967_v6, %v8412_v8  ;;  %vm5113_vm7 = vcmp.eq.s32.totalorder %v9964_v31, %v8453_v23  ;;  %v10368_v12 = vld [vmem:[#allocation27_spill] sm:$0xff] }
 0x71c   : > { %5949 = vmatprep.subr.bf16.mxu0 %v5877_v34  ;;  %v4760_v51 = vadd.f32 %v4696_v47, %v4541_v35  ;;  %v4910_v30 = vsel %vm4835_vm8, %v8377_v38, 0.0  ;;  %v4912_v14 = vsel %vm4837_vm9, %v8377_v38, 0.0  ;;  %vm5115_vm2 = vcmp.eq.s32.totalorder %v9967_v6, %v8453_v23 }
 0x71d   : > { %v4974_v13 = vadd.f32 %v4910_v30, %v4758_v17  ;;  %v5188_v20 = vsel %vm5113_vm7, %v8425_v58, 0.0  ;;  %v5190_v1 = vsel %vm5115_vm2, %v8425_v58, 0.0  ;;  %vm5268_vm10 = vcmp.eq.s32.totalorder %v9964_v31, %v8469_v42 }
 0x71e   : > { %v4976_v8 = vadd.f32 %v4912_v14, %v4760_v51  ;;  %vm5270_vm3 = vcmp.eq.s32.totalorder %v9967_v6, %v8469_v42  ;;  %v5343_v36 = vsel %vm5268_vm10, %v8438_v53, 0.0  ;;  %vm5487_vm1 = vcmp.eq.s32.totalorder %v9964_v31, %v8489_v44 }
 0x71f   : > { %v5345_v23 = vsel %vm5270_vm3, %v8438_v53, 0.0  ;;  %v5407_v38 = vadd.f32 %v5343_v36, %v5188_v20  ;;  %vm5489_vm6 = vcmp.eq.s32.totalorder %v9967_v6, %v8489_v44  ;;  %v5562_v58 = vsel %vm5487_vm1, %v8447_v18, 0.0  ;;  %v10371_v36 = vld [vmem:[#allocation30_spill] sm:$0xff] }
 0x720   : > { %v5008_v2 = vpack.c.bf16 %v4976_v8, %v4974_v13  ;;  %v5409_v26 = vadd.f32 %v5345_v23, %v5190_v1  ;;  %v5564_v50 = vsel %vm5489_vm6, %v8447_v18, 0.0  ;;  %vm5703_vm4 = vcmp.eq.s32.totalorder %v9964_v31, %v8502_v62  ;;  %v10369_v13 = vld [vmem:[#allocation28_spill] sm:$0xff]  ;;  %v10370_v1 = vld [vmem:[#allocation29_spill] sm:$0xff] }
 0x721   : > { %v5626_v42 = vadd.f32 %v5562_v58, %v5407_v38  ;;  %vm5705_vm5 = vcmp.eq.s32.totalorder %v9967_v6, %v8502_v62  ;;  %v4080_v53 = vpack.c.bf16 %v6874_v15, %v6874_v15  ;;  %v5778_v44 = vsel %vm5703_vm4, %v8476_v4, 0.0  ;;  %v10372_v38 = vld [vmem:[#allocation31_spill] sm:$0xff] }
 0x722   : > { %5909 = vmatpush1.bf16.msra.mxu1 %v5008_v2  ;;  %v5628_v39 = vadd.f32 %v5564_v50, %v5409_v26  ;;  %v5780_v0 = vsel %vm5705_vm5, %v8476_v4, 0.0  ;;  %v4077_v55 = vpack.c.bf16 %v6875_v41, %v6875_v41  ;;  %v4079_v3 = vpack.c.bf16 %v6876_v7, %v6876_v7 }
 0x723   : > { %v5842_v32 = vadd.f32 %v5778_v44, %v5626_v42  ;;  %5951 = vmatprep.mubr.bf16.mxu0 %v4080_v53  ;;  %v10362_v62 = vmov 0.0   ;;  %v5965_v16 = vrot.slane %v5960_v40, %v7731_v24  ;;  %v5969_v22 = vrot.slane %v5960_v40, %v7972_v33 }
 0x724   : > { %v5844_v18 = vadd.f32 %v5780_v0, %v5628_v39  ;;  %v10373_v39 = vld [vmem:[#allocation32_spill] sm:$0xff]  ;;  %v10374_v0 = vld [vmem:[#allocation33_spill] sm:$0xff] }
 0x725   : > { %5911 = vmatmul.mubr.bf16.vlgmr.msra.gmra.mrb[32].mxu1 %v4077_v55 }
 0x726   : > { %v5876_v31 = vpack.c.bf16 %v5844_v18, %v5842_v32 }
 0x728   : > { %5950 = vmatpush1.bf16.msra.mxu0 %v5876_v31 }
 0x72b   : > { %5952 = vmatmul.mubr.bf16.vlgmr.msra.gmra.mrb[40].mxu0 %v4079_v3 }
 0x72c   : > { %6113 = vmatprep.mubr.f32.mxu0 %v10362_v62 }
 0x7f8   : > { %v5912_v6 = vpop.f32.mrb[32].mxu1 }
 0x7f9   : > { %v5914_v25 = vpop.f32.mrb[33].mxu1 }
 0x7fa   : > { %v5916_v61 = vpop.f32.mrb[34].mxu1 }
 0x7fb   : > { %v5917_v11 = vpop.f32.mrb[35].mxu1 }
 0x7fc   : > { %v10377_v11 = vld [vmem:[#allocation34_spill] sm:$0xff] }
 0x7fe   : > { %v5953_v4 = vpop.f32.mrb[40].mxu0 }
 0x7ff   : > { %v5954_v63 = vadd.f32 %v5953_v4, %v5912_v6  ;;  %v5955_v21 = vpop.f32.mrb[41].mxu0  ;;  %v10378_v4 = vld [vmem:[#allocation35_spill] sm:$0xff] }
 0x800   : > { %v5956_v10 = vadd.f32 %v5955_v21, %v5914_v25  ;;  %v5957_v45 = vpop.f32.mrb[42].mxu0 }
 0x801   : > { %v10094_v60 = vmul.f32 %v5965_v16, %v5954_v63  ;;  %v5958_v52 = vpop.f32.mrb[43].mxu0  ;;  %v10379_v16 = vld [vmem:[#allocation36_spill] sm:$0xff] }
 0x802   : > { %v5973_v27 = vmul.f32 %v5969_v22, %v5956_v10  ;;  %v10380_v10 = vld [vmem:[#allocation37_spill] sm:$0xff] }
 0x803   : > { %5974 = vst [vmem:[%s10098_s17] sm:$0xff] %v10094_v60  ;;  %5979 = vrot.lane.b32.xlu1 %v10094_v60, %s7125_s6 }
 0x804   : > { %5975 = vst [vmem:[%s10098_s17 + $0x8] sm:$0xff] %v5973_v27  ;;  %5981 = vrot.lane.b32.xlu0 %v5973_v27, %s7125_s6  ;;  %s10366_s6 = smov 113  }
 0x807   : > { %5987 = vrot.lane.b32.xlu1 %v10094_v60, %s7120_s0 }
 0x808   : > { %5989 = vrot.lane.b32.xlu0 %v5973_v27, %s7120_s0  ;;  %s10367_s0 = smov 111  }
 0x80b   : > { %5995 = vrot.lane.b32.xlu1 %v10094_v60, %s7126_s23 }
 0x80c   : > { %5997 = vrot.lane.b32.xlu0 %v5973_v27, %s7126_s23 }
 0x80f   : > { %6003 = vrot.lane.b32.xlu1 %v10094_v60, %s10364_s22 }
 0x810   : > { %6005 = vrot.lane.b32.xlu0 %v5973_v27, %s10364_s22  ;;  %s6997_s22 = sshll.u32 %s7132_s25, 4  ;;  %s6998_s22 = int_to_ptr.vmem [resolvable:$false] %s6997_s22 }
 0x811   : > { %p7000_p9 = scmp.lt.s32.totalorder %s6162_s26, %s6998_s22 }
 0x813   : > { %6011 = vrot.lane.b32.xlu1 %v10094_v60, %s10365_s24 }
 0x814   : > { %6013 = vrot.lane.b32.xlu0 %v5973_v27, %s10365_s24  ;;  %s6999_s24 = scalar_lea.vmem %s6998_s22, 512 }
 0x815   : > { %p7001_p1 = scmp.lt.s32.totalorder %s6999_s24, %s6993_s15 }
 0x817   : > { %6019 = vrot.lane.b32.xlu1 %v10094_v60, %s10366_s6  ;;  %p7002_p6 = por %p7001_p1, %p7000_p9 }
 0x818   : > { %6021 = vrot.lane.b32.xlu0 %v5973_v27, %s10366_s6 }
 0x819   : > { %p7003_p2 = pnand %p7002_p6, %p6996_p5 }
 0x81b   : > { %6027 = vrot.lane.b32.xlu1 %v10094_v60, %s7114_s4 }
 0x81c   : > { %6029 = vrot.lane.b32.xlu0 %v5973_v27, %s7114_s4 }
 0x81f   : > { %6035 = vrot.lane.b32.xlu1 %v10094_v60, %s10367_s0 }
 0x820   : > { %6037 = vrot.lane.b32.xlu0 %v5973_v27, %s10367_s0 }
 0x875   : > { %v5980_v24 = vpop.permute.xlu1 %5979 }
 0x876   : > { %v5982_v33 = vpop.permute.xlu0 %5981 }
 0x877   : > { %v5983_v59 = vsel %vm3782_vm11, %v5980_v24, %v5982_v33  ;;  %v5984_v19 = vsel %vm3782_vm11, %v5982_v33, %v5980_v24  ;;  %vm10375_vm11 = vcmp.lt.s32.totalorder %v7968_v28, 112 }
 0x878   : > { %v5985_v56 = vmul.f32 %v5984_v19, %v7985_v46  ;;  %v5986_v54 = vmul.f32 %v5983_v59, %v7988_v48  ;;  %v10383_v59 = vld [vmem:[#allocation39_spill] sm:$0xff] }
 0x879   : > { %v5988_v9 = vpop.permute.xlu1 %5987 }
 0x87a   : > { %v5990_v29 = vpop.permute.xlu0 %5989 }
 0x87b   : > { %v5991_v49 = vsel %vm3811_vm12, %v5988_v9, %v5990_v29  ;;  %v5992_v57 = vsel %vm3811_vm12, %v5990_v29, %v5988_v9  ;;  %vm10376_vm12 = vmmov %vm10375_vm11  ;;  %v10384_v9 = vld [vmem:[#allocation38_spill] sm:$0xff] }
 0x87c   : > { %v5993_v37 = vmul.f32 %v5992_v57, %v7981_v43  ;;  %v5994_v34 = vmul.f32 %v5991_v49, %v10368_v12  ;;  %v5976_v49 = vld [vmem:[%s10265_s9] sm:$0x1] }
 0x87d   : > { %v5996_v35 = vpop.permute.xlu1 %5995 }
 0x87e   : > { %v6682_v5 = vpack.c.bf16 %v5993_v37, %v5985_v56  ;;  %v5998_v47 = vpop.permute.xlu0 %5997  ;;  %v6680_v17 = vpack.c.bf16 %v5994_v34, %v5986_v54 }
 0x87f   : > { %v5999_v51 = vsel %vm3839_vm13, %v5996_v35, %v5998_v47  ;;  %v6000_v30 = vsel %vm3839_vm13, %v5998_v47, %v5996_v35  ;;  %vm10381_vm13 = vcmp.lt.s32.totalorder %v7968_v28, 111 }
 0x880   : > { %6681 = vmatprep.subr.bf16.mxu0 %v6680_v17  ;;  %v6001_v20 = vmul.f32 %v6000_v30, %v10369_v13  ;;  %v6002_v8 = vmul.f32 %v5999_v51, %v10370_v1 }
 0x881   : > { %v6004_v14 = vpop.permute.xlu1 %6003  ;;  %6683 = vmatpush1.bf16.msra.mxu0 %v6682_v5 }
 0x882   : > { %v6006_v46 = vpop.permute.xlu0 %6005 }
 0x883   : > { %v6007_v48 = vsel %vm3868_vm14, %v6004_v14, %v6006_v46  ;;  %v6008_v43 = vsel %vm3868_vm14, %v6006_v46, %v6004_v14  ;;  %vm10382_vm14 = vmmov %vm10381_vm13 }
 0x884   : > { %v6009_v23 = vmul.f32 %v6008_v43, %v10371_v36  ;;  %v6010_v58 = vmul.f32 %v6007_v48, %v10372_v38 }
 0x885   : > { %v6012_v2 = vpop.permute.xlu1 %6011 }
 0x886   : > { %v6686_v26 = vpack.c.bf16 %v6009_v23, %v6001_v20  ;;  %v6014_v50 = vpop.permute.xlu0 %6013  ;;  %v6684_v42 = vpack.c.bf16 %v6010_v58, %v6002_v8 }
 0x887   : > { %v6015_v15 = vsel %vm3896_vm15, %v6012_v2, %v6014_v50  ;;  %v6016_v53 = vsel %vm3896_vm15, %v6014_v50, %v6012_v2  ;;  %vm6045_vm15 = vcmask 588800  }
 0x888   : > { %v6017_v44 = vmul.f32 %v6015_v15, %v10373_v39  ;;  %v6018_v32 = vmul.f32 %v6016_v53, %v10374_v0  ;;  %6685 = vmatprep.subr.bf16.mxu0 %v6684_v42 }
 0x889   : > { %v6020_v41 = vpop.permute.xlu1 %6019  ;;  %6687 = vmatpush1.bf16.msra.mxu0 %v6686_v26 }
 0x88a   : > { %v6690_v55 = vpack.c.bf16 %v6017_v44, %v10094_v60  ;;  %v6022_v18 = vpop.permute.xlu0 %6021  ;;  %v6688_v31 = vpack.c.bf16 %v6018_v32, %v5973_v27 }
 0x88b   : > { %v6023_v7 = vsel %vm3924_vm0, %v6020_v41, %v6022_v18  ;;  %v6024_v3 = vsel %vm3924_vm0, %v6022_v18, %v6020_v41 }
 0x88c   : > { %6689 = vmatprep.subr.bf16.mxu0 %v6688_v31  ;;  %v6025_v40 = vmul.f32 %v6023_v7, %v10377_v11  ;;  %v6026_v63 = vmul.f32 %v6024_v3, %v10378_v4 }
 0x88d   : > { %v6028_v62 = vpop.permute.xlu1 %6027  ;;  %6691 = vmatpush1.bf16.msra.mxu0 %v6690_v55 }
 0x88e   : > { %v6030_v6 = vpop.permute.xlu0 %6029 }
 0x88f   : > { %v6031_v25 = vsel %vm10375_vm11, %v6028_v62, %v6030_v6  ;;  %v6032_v61 = vsel %vm10376_vm12, %v6030_v6, %v6028_v62 }
 0x890   : > { %v6033_v21 = vmul.f32 %v6031_v25, %v10379_v16  ;;  %v6034_v22 = vmul.f32 %v6032_v61, %v10380_v10 }
 0x891   : > { %v6036_v45 = vpop.permute.xlu1 %6035 }
 0x892   : > { %v6694_v60 = vpack.c.bf16 %v6033_v21, %v6025_v40  ;;  %v6038_v52 = vpop.permute.xlu0 %6037  ;;  %v6692_v27 = vpack.c.bf16 %v6034_v22, %v6026_v63 }
 0x893   : > { %v6040_v24 = vsel %vm10381_vm13, %v6038_v52, %v6036_v45  ;;  %v6039_v33 = vsel %vm10382_vm14, %v6036_v45, %v6038_v52 }
 0x894   : > { %v6042_v19 = vmul.f32 %v6040_v24, %v10383_v59  ;;  %6693 = vmatprep.subr.bf16.mxu0 %v6692_v27  ;;  %v6041_v29 = vmul.f32 %v6039_v33, %v10384_v9 }
 0x895   : > { %6695 = vmatpush1.bf16.msra.mxu0 %v6694_v60 }
 0x896   : > { %6065 = vmatprep.subr.mxu0 %v6042_v19 }
 0x899   : > { %6066 = vmatpush1.msra.mxu0 %v6041_v29 }
 0x89a   : > { %6404 = vmatmul.mubr.msk.f32.vlgmr.msra.gmra.mrb[44].mxu0 %vm6045_vm15, %v5976_v49 }
 0x89b   : > { %7006 = shalt.err (!%p7003_p2)
}
 0x89c   : > { %s7007_s17 = scalar_lea.hbm %s10183_s18, 256  ;;  %s7011_s4 = scalar_lea.hbm %s10268_s12, 512 }
 0x89d   : > { %p7008_p4 = scmp.ne.s32.totalorder %s10183_s18, %s7007_s17  ;;  %p7012_p8 = scmp.lt.u32.totalorder %s10183_s18, %s10268_s12 }
 0x89e   : > { %p7013_p12 = scmp.lt.u32.totalorder %s7011_s4, %s7007_s17  ;;  %p7015_p7 = scmp.lt.u32.totalorder %s7007_s17, %s10183_s18 }
 0x89f   : > { %p7009_p11 = pnand %p7008_p4, %p10385_p10 }
 0x8a0   : > { %p7014_p3 = por %p7013_p12, %p7012_p8 }
 0x8a1   : > { %p7010_p0 = pneg %p7009_p11 }
 0x8a2   : > { %p7016_p13 = por %p7015_p7, %p7014_p3 }
 0x8a4   : > { %p7017_p5 = pnand %p7016_p13, %p7010_p0 }
 0x8a6   : > { %7020 = shalt.err (!%p7017_p5)
}
 0x8a7   : > { %6718 = dma.vmem_to_hbm [thread:$0]  (%p10385_p10), %s6162_s26, 256, %s10183_s18, %s6142_s16   ;;  %v10386_v34 = vld [vmem:[#allocation26_spill] sm:$0xff]  ;;  %v10387_v5 = vlaneseq }
 0x8a8   : > { %s6043_s28 = sld [smem:[#allocation5]]  ;;  %s6342_s20 = sshll.u32 %s7405_s14, 1 }
 0x8a9   : > { %s6415_s15 = sshll.u32 %s7231_s11, 5  ;;  %s543_s25 = scalar_lea.vmem [#allocation15], %s6342_s20  ;;  %vm6138_vm0 = vcmp.lt.s32.totalorder %v10387_v5, 256 }
 0x8aa   : > { %s6175_s22 = sshll.u32 %s543_s25, 4  ;;  %s10212_s16 = scalar_lea.hbm %s10269_s13, %s6415_s15  ;;  %s10214_s22 = int_to_ptr.vmem [resolvable:$true] %s6175_s22 }
 0x8ab   : > { %s6147_s11 = scalar_lea.sflag [#allocation16], %s7405_s14  ;;  %s7021_s24 = scalar_lea.vmem %s10214_s22, 32 }
 0x8ac   : > { %p7022_p9 = scmp.ne.s32.totalorder %s10214_s22, %s7021_s24  ;;  %s7133_s17 = smov [#allocation15]  }
 0x8ad   : > { %s7025_s6 = sshll.u32 %s7133_s17, 4  ;;  %s7026_s6 = int_to_ptr.vmem [resolvable:$false] %s7025_s6 }
 0x8ae   : > { %v6044_v28 = vstv %s6043_s28  ;;  %p7023_p1 = pnand %p7022_p9, %p10385_p10  ;;  %s7027_s0 = scalar_lea.vmem %s7026_s6, 64 }
 0x8af   : > { %p7028_p2 = scmp.lt.s32.totalorder %s10214_s22, %s7026_s6  ;;  %p7029_p4 = scmp.lt.s32.totalorder %s7027_s0, %s7021_s24 }
 0x8b0   : > { %p7024_p6 = pneg %p7023_p1 }
 0x8b1   : > { %p7030_p11 = por %p7029_p4, %p7028_p2 }
 0x8b3   : > { %p7031_p0 = pnand %p7030_p11, %p7024_p6 }
 0x96d   : > { %v6115_v57 = vpop.f32.mrb[44].mxu0 }
 0x96e   : > { %v6116_v56 = vadd.f32 %v6115_v57, %v6044_v28  ;;  %v6117_v54 = vpop.f32.mrb[45].mxu0 }
 0x96f   : > { %v6118_v37 = vadd.f32 %v6117_v54, %v6044_v28 }
 0x971   : > { %v6122_v12 = vcombine.low %v6116_v56, %v6118_v37 }
 0x973   : > { %v6129_v35 = vrot.slane %v6122_v12, %v10386_v34 }
 0x975   : > { %v6136_v47 = vrot.slane %v6129_v35, %v10386_v34 }
 0x977   : > { %6140 = vst.msk [vmem:[%s543_s25] sm:$0x3] %vm6138_vm0, %v6136_v47 }
 0x978   : > { %7034 = shalt.err (!%p7031_p0)
}
 0x979   : > { %s7035_s14 = scalar_lea.hbm %s10212_s16, 32  ;;  %s7039_s21 = scalar_lea.hbm %s10269_s13, 64 }
 0x97a   : > { %p7036_p8 = scmp.ne.s32.totalorder %s10212_s16, %s7035_s14  ;;  %p7040_p7 = scmp.lt.u32.totalorder %s10212_s16, %s10269_s13 }
 0x97b   : > { %p7041_p13 = scmp.lt.u32.totalorder %s7039_s21, %s7035_s14  ;;  %p7043_p9 = scmp.lt.u32.totalorder %s7035_s14, %s10212_s16 }
 0x97c   : > { %p7037_p12 = pnand %p7036_p8, %p10385_p10 }
 0x97d   : > { %p7042_p5 = por %p7041_p13, %p7040_p7 }
 0x97e   : > { %p7038_p3 = pneg %p7037_p12 }
 0x97f   : > { %p7044_p1 = por %p7043_p9, %p7042_p5 }
 0x981   : > { %p7045_p6 = pnand %p7044_p1, %p7038_p3 }
 0x983   : > { %7048 = shalt.err (!%p7045_p6)
}
 0x984   : > { %6719 = dma.vmem_to_hbm [thread:$0]  (%p10385_p10), %s10214_s22, 32, %s10212_s16, %s6147_s11  }
 0x985 PF: > { %s10388_s15 = sld [smem:[#allocation24_spill]]  ;;  %s6187_s25 = sand.u32 1, %s7091_s29  }
 0x986   : > { %p10390_p4 = scmp.ge.s32.totalorder %s7103_s10, 2  ;;  %s6188_s18 = scalar_lea.sflag [#allocation8], %s6187_s25 }
 0x98b   : > { %p10389_p2 = scmp.ne.s32.totalorder %s10388_s15, 0 }
 0x98d   : > { %p6737_p11 = pnand %p10390_p4, %p10389_p2 }
 0x98f   : > { %7082 = dma.done.wait (!%p6737_p11), %s6188_s18, 256  }
 0x990   : > { %7084 = vsyncadd (!%p6737_p11), %s6188_s18, 4294967040  ;;  %s6197_s26 = scalar_lea.sflag [#allocation16], %s6187_s25 }
 0x991   : > { %7086 = dma.done.wait (!%p6737_p11), %s6197_s26, 32  }
 0x992   : > { %7088 = vsyncadd (!%p6737_p11), %s6197_s26, 4294967264  ;;  %s10391_s19 = sld [smem:[#allocation23_spill]]  ;;  %s10392_s14 = sld [smem:[#allocation25_spill]] }
 0x993   : > { %p36_p10 = scmp.ge.s32.totalorder %s7313_s27, 4   ;;  %s10393_s29 = smov %s7095_s30 }
 0x994   : > { %s10395_s10 = smov %s7313_s27 }
 0x995   :  { %38 = sbr.rel (!%p36_p10) target bundleno = 16 (0x10), region = 159 }
 0x998   : > { %s10394_s30 = smov %s10391_s19 }
 0x99c   :  { %6202 = vsyncpa [#allocation7], 1 }
 0x99d   :  { %6204 = vsyncpa [#allocation7 + $0x1], 1 }
 0x99e   :  { %6205 = vsyncpa [#allocation10], 1 }
 0x99f   :  { %6207 = vsyncpa [#allocation10 + $0x1], 1 }
 0x9a0   :  { %6208 = vsyncpa [#allocation13], 1 }
 0x9a1   :  { %6209 = vsyncpa [#allocation8], 1 }
 0x9a2   :  { %6211 = vsyncpa [#allocation8 + $0x1], 1 }
 0x9a3   :  { %6212 = vsyncpa [#allocation16], 1 }
 0x9a4   :  { %6214 = vsyncpa [#allocation16 + $0x1], 1 }

</bundles_post_ra>
